<compile_context>
chip_gen: v5e
topology: v5e:2x2
jax: 0.10.0
libtpu: 0.0.40
codegen_flags: <defaults>
</compile_context>

<pallas_src>
import jax
import jax.numpy as jnp
from jax.experimental import pallas as pl
from jax.experimental.pallas import tpu as pltpu

EPS = 1e-10
NEG_BIG = -1e30
VMEM_LIMIT = 32 * 1024 * 1024   # safe for v5e/v6e/v7x; raise on v6e if tb is scaled up.


# --------------------------------------------------------------------------
# In-kernel helpers
# --------------------------------------------------------------------------
def _mm(x, w_ref):
    """bf16 MXU matmul with f32 accumulation."""
    return jnp.dot(x.astype(jnp.bfloat16), w_ref[...],
                   preferred_element_type=jnp.float32)


def _tower(cat_ref, mask_ref, center_ref, w):
    """One attention-aggregation tower (_UserModel / _ItemModel body)."""
    (g_w1, g_b1, g_w2, g_b2, g_w3, g_b3,
     at_w1a, at_w1b, at_b1, at_w2, at_b2, at_w3r, at_b3,
     ag_w1, ag_b1, ag_w2, ag_b2) = w

    TB, D = center_ref.shape
    R = cat_ref.shape[0]            # R = TB * L, per-user rows are contiguous
    L = R // TB

    cat = cat_ref[...]              # (R, 2D) bf16: cat([neigh_emb, rate_emb])
    mask = mask_ref[...]            # (R, 1)  f32
    center = center_ref[...]        # (TB, D) f32

    # g MLP on cat([neigh, rate]): single K=2D=128 contraction.
    h = jnp.maximum(_mm(cat, g_w1) + g_b1[...], 0.0)
    h = jnp.maximum(_mm(h, g_w2) + g_b2[...], 0.0)
    x_ia = _mm(h, g_w3) + g_b3[...]                                   # (R, D) f32

    # Attention MLP on cat([x_ia, mask*center]).
    # Hoist the center half: (mask*center) @ W1b == mask * (center @ W1b).
    mask3 = mask.reshape(TB, L, 1)
    cb = _mm(center, at_w1b)                                          # (TB, D)
    att_c = (mask3 * cb[:, None, :]).reshape(R, D)                    # (R, D)
    a = jnp.maximum(_mm(x_ia, at_w1a) + att_c + at_b1[...], 0.0)
    a = jnp.maximum(_mm(a, at_w2) + at_b2[...], 0.0)                  # (R, D//2)

    # (., 1) attention head: VPU multiply + lane reduce (no 1-column MXU matmul).
    logit = jnp.sum(a * at_w3r[...], axis=-1, keepdims=True) + at_b3[...]  # (R, 1)

    # Masked softmax over each user's L rows, stabilized with the per-group max
    # over *masked* rows (padded rows can carry arbitrary logits).
    logit3 = logit.reshape(TB, L, 1)
    logit3 = jnp.where(mask3 > 0.0, logit3, jnp.float32(NEG_BIG))
    m = jnp.max(logit3, axis=1, keepdims=True)                        # (TB, 1, 1)
    alpha3 = jnp.exp(logit3 - m) * mask3
    denom = jnp.sum(alpha3, axis=1, keepdims=True) + EPS
    alpha3 = alpha3 / denom

    # Weighted sum of x_ia over each user's L rows.
    agg_in = jnp.sum(alpha3 * x_ia.reshape(TB, L, D), axis=1)         # (TB, D)

    # aggre: Linear -> ReLU -> Linear -> ReLU
    h1 = jnp.maximum(_mm(agg_in, ag_w1) + ag_b1[...], 0.0)
    return jnp.maximum(_mm(h1, ag_w2) + ag_b2[...], 0.0)              # (TB, D)


def _graphrec_fused_kernel(*refs):
    """user tower + item tower + rate-prediction MLP for one block of TB pairs."""
    u_cat, u_mask, u_center, i_cat, i_mask, i_center = refs[0:6]
    uw = refs[6:23]
    iw = refs[23:40]
    rp_w1, rp_b1, rp_w2, rp_b2, rp_w3, rp_b3, rp_w4r, rp_b4 = refs[40:48]
    out_ref = refs[48]

    h_i = _tower(u_cat, u_mask, u_center, uw)      # (TB, D) f32, stays in VMEM
    z_j = _tower(i_cat, i_mask, i_center, iw)      # (TB, D) f32, stays in VMEM

    # rate_pred on cat([h_i, z_j], -1): lane-dense (TB, 2D=128) operand, K=128.
    hz = jnp.concatenate([h_i, z_j], axis=-1)
    x = jnp.maximum(_mm(hz, rp_w1) + rp_b1[...], 0.0)
    x = jnp.maximum(_mm(x, rp_w2) + rp_b2[...], 0.0)
    x = jnp.maximum(_mm(x, rp_w3) + rp_b3[...], 0.0)
    r = jnp.sum(x * rp_w4r[...], axis=-1, keepdims=True) + rp_b4[...]
    # Only output left after fusion is the (TB, 1) rating: B*4 bytes total, the
    # masked narrow store is negligible (no more (B, D) h_i/z_j HBM round-trips).
    out_ref[...] = jnp.maximum(r, 0.0)


# --------------------------------------------------------------------------
# Wrapper
# --------------------------------------------------------------------------
def _const_spec(arr):
    # Full-array block, constant index map -> resident weights (fetched once).
    return pl.BlockSpec(arr.shape, lambda i: (0, 0))


def _tower_weights(p, g, at, ag, D):
    bf = jnp.bfloat16
    row = lambda b: b.reshape(1, -1).astype(jnp.float32)
    return (
        p[g + "_w1"].astype(bf), row(p[g + "_b1"]),          # (2D, D) single K=128
        p[g + "_w2"].astype(bf), row(p[g + "_b2"]),
        p[g + "_w3"].astype(bf), row(p[g + "_b3"]),
        p[at + "_w1"][:D].astype(bf), p[at + "_w1"][D:].astype(bf), row(p[at + "_b1"]),
        p[at + "_w2"].astype(bf), row(p[at + "_b2"]),
        p[at + "_w3"].reshape(1, -1).astype(jnp.float32),     # f32 VPU head
        p[at + "_b3"].reshape(1, 1).astype(jnp.float32),
        p[ag + "_w1"].astype(bf), row(p[ag + "_b1"]),
        p[ag + "_w2"].astype(bf), row(p[ag + "_b2"]),
    )


def _rp_weights(p):
    bf = jnp.bfloat16
    row = lambda b: b.reshape(1, -1).astype(jnp.float32)
    return (
        p["rp_w1"].astype(bf), row(p["rp_b1"]),               # (2D, D) single K=128
        p["rp_w2"].astype(bf), row(p["rp_b2"]),
        p["rp_w3"].astype(bf), row(p["rp_b3"]),
        p["rp_w4"].reshape(1, -1).astype(jnp.float32),
        p["rp_b4"].reshape(1, 1).astype(jnp.float32),
    )


def _pick_tb(B, L_min):
    """Smallest multiple-of-8 divisor of B with >= 512 rows per block; this keeps
    per-step overhead amortized while maximizing grid length for v7x's 2 cores."""
    assert B % 8 == 0, "batch size must be a multiple of 8"
    cands = [t for t in range(8, B + 1, 8) if B % t == 0]
    for t in cands:
        if t * L_min >= 512:
            return t
    return cands[-1]


def graphrec_forward(params, uids, iids, u_item_pad, i_user_pad, tb=None):
    D = params["user_emb"].shape[1]
    B = uids.shape[0]
    Lu = u_item_pad.shape[1]
    Li = i_user_pad.shape[1]
    if tb is None:
        tb = _pick_tb(B, min(Lu, Li))
    assert tb % 8 == 0 and B % tb == 0, "tb must be a multiple of 8 dividing B"

    def prep(pad, neigh_table):
        Bp, L, _ = pad.shape
        ids, rids = pad[:, :, 0], pad[:, :, 1]
        neigh = jnp.take(neigh_table, ids, axis=0)
        rate = jnp.take(params["rate_emb"], rids, axis=0)
        cat = jnp.concatenate([neigh, rate], axis=-1)           # (B, L, 2D)
        cat = cat.reshape(Bp * L, 2 * D).astype(jnp.bfloat16)   # K=128 row stream
        mask = (ids > 0).astype(jnp.float32).reshape(Bp * L, 1)
        return cat, mask

    # _UserModel: neighbors are items, center is the user embedding.
    u_cat, u_mask = prep(u_item_pad, params["item_emb"])
    u_center = jnp.take(params["user_emb"], uids, axis=0)
    # _ItemModel: neighbors are users, center is the item embedding.
    i_cat, i_mask = prep(i_user_pad, params["user_emb"])
    i_center = jnp.take(params["item_emb"], iids, axis=0)

    uw = _tower_weights(params, "gv", "uat", "uag", D)
    iw = _tower_weights(params, "gu", "iat", "iag", D)
    rw = _rp_weights(params)
    weights = uw + iw + rw

    row_u = pl.BlockSpec((tb * Lu, 2 * D), lambda i: (i, 0))
    row_i = pl.BlockSpec((tb * Li, 2 * D), lambda i: (i, 0))
    msk_u = pl.BlockSpec((tb * Lu, 1), lambda i: (i, 0))
    msk_i = pl.BlockSpec((tb * Li, 1), lambda i: (i, 0))
    ctr_d = pl.BlockSpec((tb, D), lambda i: (i, 0))
    out_s = pl.BlockSpec((tb, 1), lambda i: (i, 0))

    return pl.pallas_call(
        _graphrec_fused_kernel,
        out_shape=jax.ShapeDtypeStruct((B, 1), jnp.float32),
        grid=(B // tb,),
        in_specs=[row_u, msk_u, ctr_d, row_i, msk_i, ctr_d]
                 + [_const_spec(w) for w in weights],
        out_specs=out_s,
        compiler_params=pltpu.CompilerParams(
            dimension_semantics=("parallel",),
            vmem_limit_bytes=VMEM_LIMIT),
    )(u_cat, u_mask, u_center, i_cat, i_mask, i_center, *weights)


# --------------------------------------------------------------------------
# Parameter init (PyTorch-like) and pure-JAX reference
# --------------------------------------------------------------------------
def _linear_params(key, fan_in, fan_out):
    kw, kb = jax.random.split(key)
    bound = 1.0 / jnp.sqrt(jnp.float32(fan_in))
    w = jax.random.uniform(kw, (fan_in, fan_out), jnp.float32, -bound, bound)
    b = jax.random.uniform(kb, (fan_out,), jnp.float32, -bound, bound)
    return w, b


def init_params(key, emb_dim, n_users, n_items, n_rates):
    D = emb_dim
    ks = jax.random.split(key, 23)
    p = {}
    zero_pad = lambda t: t.at[0].set(0.0)   # nn.Embedding(padding_idx=0)
    p["user_emb"] = zero_pad(jax.random.normal(ks[0], (n_users, D), jnp.float32) * 0.1)
    p["item_emb"] = zero_pad(jax.random.normal(ks[1], (n_items, D), jnp.float32) * 0.1)
    p["rate_emb"] = zero_pad(jax.random.normal(ks[2], (n_rates, D), jnp.float32) * 0.1)

    def mlp3(k0, k1, k2, out_dim):
        w1, b1 = _linear_params(k0, 2 * D, D)
        w2, b2 = _linear_params(k1, D, D // 2)
        w3, b3 = _linear_params(k2, D // 2, out_dim)
        return w1, b1, w2, b2, w3, b3

    (p["gv_w1"], p["gv_b1"], p["gv_w2"], p["gv_b2"], p["gv_w3"], p["gv_b3"]) = mlp3(ks[3], ks[4], ks[5], D)
    (p["uat_w1"], p["uat_b1"], p["uat_w2"], p["uat_b2"], p["uat_w3"], p["uat_b3"]) = mlp3(ks[6], ks[7], ks[8], 1)
    p["uag_w1"], p["uag_b1"] = _linear_params(ks[9], D, D)
    p["uag_w2"], p["uag_b2"] = _linear_params(ks[10], D, D)

    (p["gu_w1"], p["gu_b1"], p["gu_w2"], p["gu_b2"], p["gu_w3"], p["gu_b3"]) = mlp3(ks[11], ks[12], ks[13], D)
    (p["iat_w1"], p["iat_b1"], p["iat_w2"], p["iat_b2"], p["iat_w3"], p["iat_b3"]) = mlp3(ks[14], ks[15], ks[16], 1)
    p["iag_w1"], p["iag_b1"] = _linear_params(ks[17], D, D)
    p["iag_w2"], p["iag_b2"] = _linear_params(ks[18], D, D)

    p["rp_w1"], p["rp_b1"] = _linear_params(ks[19], 2 * D, D)
    p["rp_w2"], p["rp_b2"] = _linear_params(ks[20], D, D)
    p["rp_w3"], p["rp_b3"] = _linear_params(ks[21], D, D)
    p["rp_w4"], p["rp_b4"] = _linear_params(ks[22], D, 1)
    # TODO(synk): _UserModel.combine_mlp is defined in __init__ but never used in forward; omitted.
    return p


def graphrec_reference(params, uids, iids, u_item_pad, i_user_pad):
    """Pure-JAX f32 mirror of the PyTorch forward, for verification."""
    D = params["user_emb"].shape[1]

    def mlp3(x, w1, b1, w2, b2, w3, b3):
        h = jnp.maximum(x @ w1 + b1, 0.0)
        h = jnp.maximum(h @ w2 + b2, 0.0)
        return h @ w3 + b3

    def tower(center_ids, pad, center_tab, neigh_tab, g, at, ag):
        B, L, _ = pad.shape
        neigh = jnp.take(neigh_tab, pad[:, :, 0], axis=0)
        mask = (pad[:, :, 0] > 0).astype(jnp.float32)
        er = jnp.take(params["rate_emb"], pad[:, :, 1], axis=0)
        x = mlp3(jnp.concatenate([neigh, er], axis=2).reshape(-1, 2 * D),
                 params[g + "_w1"], params[g + "_b1"], params[g + "_w2"],
                 params[g + "_b2"], params[g + "_w3"], params[g + "_b3"]).reshape(B, L, D)
        center = jnp.take(center_tab, center_ids, axis=0)
        pvec = mask[:, :, None] * center[:, None, :]
        al = mlp3(jnp.concatenate([x, pvec], axis=2).reshape(-1, 2 * D),
                  params[at + "_w1"], params[at + "_b1"], params[at + "_w2"],
                  params[at + "_b2"], params[at + "_w3"], params[at + "_b3"]).reshape(B, L)
        al = jnp.exp(al) * mask
        al = al / (jnp.sum(al, axis=1, keepdims=True) + EPS)
        agg = jnp.sum(al[:, :, None] * x, axis=1)
        h = jnp.maximum(agg @ params[ag + "_w1"] + params[ag + "_b1"], 0.0)
        return jnp.maximum(h @ params[ag + "_w2"] + params[ag + "_b2"], 0.0)

    h_i = tower(uids, u_item_pad, params["user_emb"], params["item_emb"], "gv", "uat", "uag")
    z_j = tower(iids, i_user_pad, params["item_emb"], params["user_emb"], "gu", "iat", "iag")
    x = jnp.concatenate([h_i, z_j], axis=1)
    x = jnp.maximum(x @ params["rp_w1"] + params["rp_b1"], 0.0)
    x = jnp.maximum(x @ params["rp_w2"] + params["rp_b2"], 0.0)
    x = jnp.maximum(x @ params["rp_w3"] + params["rp_b3"], 0.0)
    return jnp.maximum(x @ params["rp_w4"] + params["rp_b4"], 0.0)


if __name__ == "__main__":
    B, L_ITEMS, L_USERS, D = 16, 16, 16, 64        # small demo shapes
    N_USERS, N_ITEMS, N_RATES = 40, 50, 6

    key = jax.random.PRNGKey(0)
    kp, k1, k2, k3, k4, k5, k6 = jax.random.split(key, 7)
    params = init_params(kp, D, N_USERS, N_ITEMS, N_RATES)

    uids = jax.random.randint(k1, (B,), 1, N_USERS, dtype=jnp.int32)
    iids = jax.random.randint(k2, (B,), 1, N_ITEMS, dtype=jnp.int32)
    u_item_pad = jnp.stack(
        [jax.random.randint(k3, (B, L_ITEMS), 0, N_ITEMS, dtype=jnp.int32),   # id 0 == padding
         jax.random.randint(k4, (B, L_ITEMS), 0, N_RATES, dtype=jnp.int32)], axis=2)
    i_user_pad = jnp.stack(
        [jax.random.randint(k5, (B, L_USERS), 0, N_USERS, dtype=jnp.int32),
         jax.random.randint(k6, (B, L_USERS), 0, N_RATES, dtype=jnp.int32)], axis=2)

    fwd = jax.jit(lambda p, u, i, up, ip: graphrec_forward(p, u, i, up, ip))
    out = jax.block_until_ready(fwd(params, uids, iids, u_item_pad, i_user_pad))

    ref = graphrec_reference(params, uids, iids, u_item_pad, i_user_pad)
    assert out.shape == (B, 1)
    assert bool(jnp.all(jnp.isfinite(out)))
    max_err = float(jnp.max(jnp.abs(out - ref)))
    # bf16 MXU matmuls vs the f32 reference
    assert max_err < 5e-2, f"mismatch vs reference: max_err={max_err}"
    print("KERNEL_OK")
</pallas_src>

<mosaic_0001>
module attributes {stable_mosaic.version = 11 : i64} {
  func.func @_graphrec_fused_kernel(%arg0: i32, %arg1: memref<256x128xbf16, #tpu.memory_space<vmem>>, %arg2: memref<256x1xf32, #tpu.memory_space<vmem>>, %arg3: memref<16x64xf32, #tpu.memory_space<vmem>>, %arg4: memref<256x128xbf16, #tpu.memory_space<vmem>>, %arg5: memref<256x1xf32, #tpu.memory_space<vmem>>, %arg6: memref<16x64xf32, #tpu.memory_space<vmem>>, %arg7: memref<128x64xbf16, #tpu.memory_space<vmem>>, %arg8: memref<1x64xf32, #tpu.memory_space<vmem>>, %arg9: memref<64x32xbf16, #tpu.memory_space<vmem>>, %arg10: memref<1x32xf32, #tpu.memory_space<vmem>>, %arg11: memref<32x64xbf16, #tpu.memory_space<vmem>>, %arg12: memref<1x64xf32, #tpu.memory_space<vmem>>, %arg13: memref<64x64xbf16, #tpu.memory_space<vmem>>, %arg14: memref<64x64xbf16, #tpu.memory_space<vmem>>, %arg15: memref<1x64xf32, #tpu.memory_space<vmem>>, %arg16: memref<64x32xbf16, #tpu.memory_space<vmem>>, %arg17: memref<1x32xf32, #tpu.memory_space<vmem>>, %arg18: memref<1x32xf32, #tpu.memory_space<vmem>>, %arg19: memref<1x1xf32, #tpu.memory_space<vmem>>, %arg20: memref<64x64xbf16, #tpu.memory_space<vmem>>, %arg21: memref<1x64xf32, #tpu.memory_space<vmem>>, %arg22: memref<64x64xbf16, #tpu.memory_space<vmem>>, %arg23: memref<1x64xf32, #tpu.memory_space<vmem>>, %arg24: memref<128x64xbf16, #tpu.memory_space<vmem>>, %arg25: memref<1x64xf32, #tpu.memory_space<vmem>>, %arg26: memref<64x32xbf16, #tpu.memory_space<vmem>>, %arg27: memref<1x32xf32, #tpu.memory_space<vmem>>, %arg28: memref<32x64xbf16, #tpu.memory_space<vmem>>, %arg29: memref<1x64xf32, #tpu.memory_space<vmem>>, %arg30: memref<64x64xbf16, #tpu.memory_space<vmem>>, %arg31: memref<64x64xbf16, #tpu.memory_space<vmem>>, %arg32: memref<1x64xf32, #tpu.memory_space<vmem>>, %arg33: memref<64x32xbf16, #tpu.memory_space<vmem>>, %arg34: memref<1x32xf32, #tpu.memory_space<vmem>>, %arg35: memref<1x32xf32, #tpu.memory_space<vmem>>, %arg36: memref<1x1xf32, #tpu.memory_space<vmem>>, %arg37: memref<64x64xbf16, #tpu.memory_space<vmem>>, %arg38: memref<1x64xf32, #tpu.memory_space<vmem>>, %arg39: memref<64x64xbf16, #tpu.memory_space<vmem>>, %arg40: memref<1x64xf32, #tpu.memory_space<vmem>>, %arg41: memref<128x64xbf16, #tpu.memory_space<vmem>>, %arg42: memref<1x64xf32, #tpu.memory_space<vmem>>, %arg43: memref<64x64xbf16, #tpu.memory_space<vmem>>, %arg44: memref<1x64xf32, #tpu.memory_space<vmem>>, %arg45: memref<64x64xbf16, #tpu.memory_space<vmem>>, %arg46: memref<1x64xf32, #tpu.memory_space<vmem>>, %arg47: memref<1x64xf32, #tpu.memory_space<vmem>>, %arg48: memref<1x1xf32, #tpu.memory_space<vmem>>, %arg49: memref<16x1xf32, #tpu.memory_space<vmem>>) attributes {dimension_semantics = [#tpu.dimension_semantics<parallel>], iteration_bounds = array<i64: 1>, scalar_prefetch = 0 : i64, scratch_operands = 0 : i64, tpu.core_type = #tpu.core_type<tc>, window_params = [{transform_indices = @transform_0, window_bounds = array<i64: 256, 128>}, {transform_indices = @transform_1, window_bounds = array<i64: 256, 1>}, {transform_indices = @transform_2, window_bounds = array<i64: 16, 64>}, {transform_indices = @transform_3, window_bounds = array<i64: 256, 128>}, {transform_indices = @transform_4, window_bounds = array<i64: 256, 1>}, {transform_indices = @transform_5, window_bounds = array<i64: 16, 64>}, {pipeline_mode = #tpu.pipeline_mode<synchronous>, transform_indices = @transform_6, window_bounds = array<i64: 128, 64>}, {pipeline_mode = #tpu.pipeline_mode<synchronous>, transform_indices = @transform_7, window_bounds = array<i64: 1, 64>}, {pipeline_mode = #tpu.pipeline_mode<synchronous>, transform_indices = @transform_8, window_bounds = array<i64: 64, 32>}, {pipeline_mode = #tpu.pipeline_mode<synchronous>, transform_indices = @transform_9, window_bounds = array<i64: 1, 32>}, {pipeline_mode = #tpu.pipeline_mode<synchronous>, transform_indices = @transform_10, window_bounds = array<i64: 32, 64>}, {pipeline_mode = #tpu.pipeline_mode<synchronous>, transform_indices = @transform_11, window_bounds = array<i64: 1, 64>}, {pipeline_mode = #tpu.pipeline_mode<synchronous>, transform_indices = @transform_12, window_bounds = array<i64: 64, 64>}, {pipeline_mode = #tpu.pipeline_mode<synchronous>, transform_indices = @transform_13, window_bounds = array<i64: 64, 64>}, {pipeline_mode = #tpu.pipeline_mode<synchronous>, transform_indices = @transform_14, window_bounds = array<i64: 1, 64>}, {pipeline_mode = #tpu.pipeline_mode<synchronous>, transform_indices = @transform_15, window_bounds = array<i64: 64, 32>}, {pipeline_mode = #tpu.pipeline_mode<synchronous>, transform_indices = @transform_16, window_bounds = array<i64: 1, 32>}, {pipeline_mode = #tpu.pipeline_mode<synchronous>, transform_indices = @transform_17, window_bounds = array<i64: 1, 32>}, {pipeline_mode = #tpu.pipeline_mode<synchronous>, transform_indices = @transform_18, window_bounds = array<i64: 1, 1>}, {pipeline_mode = #tpu.pipeline_mode<synchronous>, transform_indices = @transform_19, window_bounds = array<i64: 64, 64>}, {pipeline_mode = #tpu.pipeline_mode<synchronous>, transform_indices = @transform_20, window_bounds = array<i64: 1, 64>}, {pipeline_mode = #tpu.pipeline_mode<synchronous>, transform_indices = @transform_21, window_bounds = array<i64: 64, 64>}, {pipeline_mode = #tpu.pipeline_mode<synchronous>, transform_indices = @transform_22, window_bounds = array<i64: 1, 64>}, {pipeline_mode = #tpu.pipeline_mode<synchronous>, transform_indices = @transform_23, window_bounds = array<i64: 128, 64>}, {pipeline_mode = #tpu.pipeline_mode<synchronous>, transform_indices = @transform_24, window_bounds = array<i64: 1, 64>}, {pipeline_mode = #tpu.pipeline_mode<synchronous>, transform_indices = @transform_25, window_bounds = array<i64: 64, 32>}, {pipeline_mode = #tpu.pipeline_mode<synchronous>, transform_indices = @transform_26, window_bounds = array<i64: 1, 32>}, {pipeline_mode = #tpu.pipeline_mode<synchronous>, transform_indices = @transform_27, window_bounds = array<i64: 32, 64>}, {pipeline_mode = #tpu.pipeline_mode<synchronous>, transform_indices = @transform_28, window_bounds = array<i64: 1, 64>}, {pipeline_mode = #tpu.pipeline_mode<synchronous>, transform_indices = @transform_29, window_bounds = array<i64: 64, 64>}, {pipeline_mode = #tpu.pipeline_mode<synchronous>, transform_indices = @transform_30, window_bounds = array<i64: 64, 64>}, {pipeline_mode = #tpu.pipeline_mode<synchronous>, transform_indices = @transform_31, window_bounds = array<i64: 1, 64>}, {pipeline_mode = #tpu.pipeline_mode<synchronous>, transform_indices = @transform_32, window_bounds = array<i64: 64, 32>}, {pipeline_mode = #tpu.pipeline_mode<synchronous>, transform_indices = @transform_33, window_bounds = array<i64: 1, 32>}, {pipeline_mode = #tpu.pipeline_mode<synchronous>, transform_indices = @transform_34, window_bounds = array<i64: 1, 32>}, {pipeline_mode = #tpu.pipeline_mode<synchronous>, transform_indices = @transform_35, window_bounds = array<i64: 1, 1>}, {pipeline_mode = #tpu.pipeline_mode<synchronous>, transform_indices = @transform_36, window_bounds = array<i64: 64, 64>}, {pipeline_mode = #tpu.pipeline_mode<synchronous>, transform_indices = @transform_37, window_bounds = array<i64: 1, 64>}, {pipeline_mode = #tpu.pipeline_mode<synchronous>, transform_indices = @transform_38, window_bounds = array<i64: 64, 64>}, {pipeline_mode = #tpu.pipeline_mode<synchronous>, transform_indices = @transform_39, window_bounds = array<i64: 1, 64>}, {pipeline_mode = #tpu.pipeline_mode<synchronous>, transform_indices = @transform_40, window_bounds = array<i64: 128, 64>}, {pipeline_mode = #tpu.pipeline_mode<synchronous>, transform_indices = @transform_41, window_bounds = array<i64: 1, 64>}, {pipeline_mode = #tpu.pipeline_mode<synchronous>, transform_indices = @transform_42, window_bounds = array<i64: 64, 64>}, {pipeline_mode = #tpu.pipeline_mode<synchronous>, transform_indices = @transform_43, window_bounds = array<i64: 1, 64>}, {pipeline_mode = #tpu.pipeline_mode<synchronous>, transform_indices = @transform_44, window_bounds = array<i64: 64, 64>}, {pipeline_mode = #tpu.pipeline_mode<synchronous>, transform_indices = @transform_45, window_bounds = array<i64: 1, 64>}, {pipeline_mode = #tpu.pipeline_mode<synchronous>, transform_indices = @transform_46, window_bounds = array<i64: 1, 64>}, {pipeline_mode = #tpu.pipeline_mode<synchronous>, transform_indices = @transform_47, window_bounds = array<i64: 1, 1>}, {transform_indices = @transform_48, window_bounds = array<i64: 16, 1>}]} {
    %c0 = arith.constant 0 : index
    %c0_0 = arith.constant 0 : index
    %0 = vector.load %arg1[%c0, %c0_0] : memref<256x128xbf16, #tpu.memory_space<vmem>>, vector<256x128xbf16>
    %c0_1 = arith.constant 0 : index
    %c0_2 = arith.constant 0 : index
    %1 = vector.load %arg2[%c0_1, %c0_2] : memref<256x1xf32, #tpu.memory_space<vmem>>, vector<256x1xf32>
    %c0_3 = arith.constant 0 : index
    %c0_4 = arith.constant 0 : index
    %2 = vector.load %arg3[%c0_3, %c0_4] : memref<16x64xf32, #tpu.memory_space<vmem>>, vector<16x64xf32>
    %c0_5 = arith.constant 0 : index
    %c0_6 = arith.constant 0 : index
    %3 = vector.load %arg7[%c0_5, %c0_6] : memref<128x64xbf16, #tpu.memory_space<vmem>>, vector<128x64xbf16>
    %cst = arith.constant dense<0.000000e+00> : vector<256x64xf32>
    %4 = tpu.matmul %0, %3, %cst {dimension_numbers = #tpu.dot_dimension_numbers<[1], [0], [0], [1], [0, 0, 1, 1], [], []>} : vector<256x128xbf16>, vector<128x64xbf16>, vector<256x64xf32> -> vector<256x64xf32>
    %c0_7 = arith.constant 0 : index
    %c0_8 = arith.constant 0 : index
    %5 = vector.load %arg8[%c0_7, %c0_8] : memref<1x64xf32, #tpu.memory_space<vmem>>, vector<1x64xf32>
    %6 = vector.broadcast %5 : vector<1x64xf32> to vector<256x64xf32>
    %7 = arith.addf %4, %6 : vector<256x64xf32>
    %cst_9 = arith.constant 0.000000e+00 : f32
    %8 = vector.broadcast %cst_9 : f32 to vector<256x64xf32>
    %9 = arith.maximumf %7, %8 : vector<256x64xf32>
    %10 = arith.truncf %9 : vector<256x64xf32> to vector<256x64xbf16>
    %c0_10 = arith.constant 0 : index
    %c0_11 = arith.constant 0 : index
    %11 = vector.load %arg9[%c0_10, %c0_11] : memref<64x32xbf16, #tpu.memory_space<vmem>>, vector<64x32xbf16>
    %cst_12 = arith.constant dense<0.000000e+00> : vector<256x32xf32>
    %12 = tpu.matmul %10, %11, %cst_12 {dimension_numbers = #tpu.dot_dimension_numbers<[1], [0], [0], [1], [0, 0, 1, 1], [], []>} : vector<256x64xbf16>, vector<64x32xbf16>, vector<256x32xf32> -> vector<256x32xf32>
    %c0_13 = arith.constant 0 : index
    %c0_14 = arith.constant 0 : index
    %13 = vector.load %arg10[%c0_13, %c0_14] : memref<1x32xf32, #tpu.memory_space<vmem>>, vector<1x32xf32>
    %14 = vector.broadcast %13 : vector<1x32xf32> to vector<256x32xf32>
    %15 = arith.addf %12, %14 : vector<256x32xf32>
    %cst_15 = arith.constant 0.000000e+00 : f32
    %16 = vector.broadcast %cst_15 : f32 to vector<256x32xf32>
    %17 = arith.maximumf %15, %16 : vector<256x32xf32>
    %18 = arith.truncf %17 : vector<256x32xf32> to vector<256x32xbf16>
    %c0_16 = arith.constant 0 : index
    %c0_17 = arith.constant 0 : index
    %19 = vector.load %arg11[%c0_16, %c0_17] : memref<32x64xbf16, #tpu.memory_space<vmem>>, vector<32x64xbf16>
    %cst_18 = arith.constant dense<0.000000e+00> : vector<256x64xf32>
    %20 = tpu.matmul %18, %19, %cst_18 {dimension_numbers = #tpu.dot_dimension_numbers<[1], [0], [0], [1], [0, 0, 1, 1], [], []>} : vector<256x32xbf16>, vector<32x64xbf16>, vector<256x64xf32> -> vector<256x64xf32>
    %c0_19 = arith.constant 0 : index
    %c0_20 = arith.constant 0 : index
    %21 = vector.load %arg12[%c0_19, %c0_20] : memref<1x64xf32, #tpu.memory_space<vmem>>, vector<1x64xf32>
    %22 = vector.broadcast %21 : vector<1x64xf32> to vector<256x64xf32>
    %23 = arith.addf %20, %22 : vector<256x64xf32>
    %24 = vector.shape_cast %1 : vector<256x1xf32> to vector<16x16x1xf32>
    %25 = arith.truncf %2 : vector<16x64xf32> to vector<16x64xbf16>
    %c0_21 = arith.constant 0 : index
    %c0_22 = arith.constant 0 : index
    %26 = vector.load %arg14[%c0_21, %c0_22] : memref<64x64xbf16, #tpu.memory_space<vmem>>, vector<64x64xbf16>
    %cst_23 = arith.constant dense<0.000000e+00> : vector<16x64xf32>
    %27 = tpu.matmul %25, %26, %cst_23 {dimension_numbers = #tpu.dot_dimension_numbers<[1], [0], [0], [1], [0, 0, 1, 1], [], []>} : vector<16x64xbf16>, vector<64x64xbf16>, vector<16x64xf32> -> vector<16x64xf32>
    %28 = vector.shape_cast %27 : vector<16x64xf32> to vector<16x1x64xf32>
    %29 = vector.broadcast %24 : vector<16x16x1xf32> to vector<16x16x64xf32>
    %30 = vector.broadcast %28 : vector<16x1x64xf32> to vector<16x16x64xf32>
    %31 = arith.mulf %29, %30 : vector<16x16x64xf32>
    %32 = vector.shape_cast %31 : vector<16x16x64xf32> to vector<256x64xf32>
    %33 = arith.truncf %23 : vector<256x64xf32> to vector<256x64xbf16>
    %c0_24 = arith.constant 0 : index
    %c0_25 = arith.constant 0 : index
    %34 = vector.load %arg13[%c0_24, %c0_25] : memref<64x64xbf16, #tpu.memory_space<vmem>>, vector<64x64xbf16>
    %cst_26 = arith.constant dense<0.000000e+00> : vector<256x64xf32>
    %35 = tpu.matmul %33, %34, %cst_26 {dimension_numbers = #tpu.dot_dimension_numbers<[1], [0], [0], [1], [0, 0, 1, 1], [], []>} : vector<256x64xbf16>, vector<64x64xbf16>, vector<256x64xf32> -> vector<256x64xf32>
    %36 = arith.addf %35, %32 : vector<256x64xf32>
    %c0_27 = arith.constant 0 : index
    %c0_28 = arith.constant 0 : index
    %37 = vector.load %arg15[%c0_27, %c0_28] : memref<1x64xf32, #tpu.memory_space<vmem>>, vector<1x64xf32>
    %38 = vector.broadcast %37 : vector<1x64xf32> to vector<256x64xf32>
    %39 = arith.addf %36, %38 : vector<256x64xf32>
    %cst_29 = arith.constant 0.000000e+00 : f32
    %40 = vector.broadcast %cst_29 : f32 to vector<256x64xf32>
    %41 = arith.maximumf %39, %40 : vector<256x64xf32>
    %42 = arith.truncf %41 : vector<256x64xf32> to vector<256x64xbf16>
    %c0_30 = arith.constant 0 : index
    %c0_31 = arith.constant 0 : index
    %43 = vector.load %arg16[%c0_30, %c0_31] : memref<64x32xbf16, #tpu.memory_space<vmem>>, vector<64x32xbf16>
    %cst_32 = arith.constant dense<0.000000e+00> : vector<256x32xf32>
    %44 = tpu.matmul %42, %43, %cst_32 {dimension_numbers = #tpu.dot_dimension_numbers<[1], [0], [0], [1], [0, 0, 1, 1], [], []>} : vector<256x64xbf16>, vector<64x32xbf16>, vector<256x32xf32> -> vector<256x32xf32>
    %c0_33 = arith.constant 0 : index
    %c0_34 = arith.constant 0 : index
    %45 = vector.load %arg17[%c0_33, %c0_34] : memref<1x32xf32, #tpu.memory_space<vmem>>, vector<1x32xf32>
    %46 = vector.broadcast %45 : vector<1x32xf32> to vector<256x32xf32>
    %47 = arith.addf %44, %46 : vector<256x32xf32>
    %cst_35 = arith.constant 0.000000e+00 : f32
    %48 = vector.broadcast %cst_35 : f32 to vector<256x32xf32>
    %49 = arith.maximumf %47, %48 : vector<256x32xf32>
    %c0_36 = arith.constant 0 : index
    %c0_37 = arith.constant 0 : index
    %50 = vector.load %arg18[%c0_36, %c0_37] : memref<1x32xf32, #tpu.memory_space<vmem>>, vector<1x32xf32>
    %51 = vector.broadcast %50 : vector<1x32xf32> to vector<256x32xf32>
    %52 = arith.mulf %49, %51 : vector<256x32xf32>
    %cst_38 = arith.constant dense<0.000000e+00> : vector<256xf32>
    %53 = vector.multi_reduction <add>, %52, %cst_38 [1] : vector<256x32xf32> to vector<256xf32>
    %54 = vector.shape_cast %53 : vector<256xf32> to vector<256x1xf32>
    %c0_39 = arith.constant 0 : index
    %c0_40 = arith.constant 0 : index
    %55 = vector.load %arg19[%c0_39, %c0_40] : memref<1x1xf32, #tpu.memory_space<vmem>>, vector<1x1xf32>
    %56 = vector.broadcast %55 : vector<1x1xf32> to vector<256x1xf32>
    %57 = arith.addf %54, %56 : vector<256x1xf32>
    %58 = vector.shape_cast %57 : vector<256x1xf32> to vector<16x16x1xf32>
    %cst_41 = arith.constant 0.000000e+00 : f32
    %59 = vector.broadcast %cst_41 : f32 to vector<16x16x1xf32>
    %60 = arith.cmpf ogt, %24, %59 : vector<16x16x1xf32>
    %cst_42 = arith.constant -1.000000e+30 : f32
    %61 = vector.broadcast %cst_42 : f32 to vector<16x16x1xf32>
    %62 = arith.select %60, %58, %61 : vector<16x16x1xi1>, vector<16x16x1xf32>
    %cst_43 = arith.constant dense<0xFF800000> : vector<16x1xf32>
    %63 = vector.multi_reduction <maximumf>, %62, %cst_43 [1] : vector<16x16x1xf32> to vector<16x1xf32>
    %64 = vector.shape_cast %63 : vector<16x1xf32> to vector<16x1x1xf32>
    %65 = vector.broadcast %64 : vector<16x1x1xf32> to vector<16x16x1xf32>
    %66 = arith.subf %62, %65 : vector<16x16x1xf32>
    %67 = math.exp %66 : vector<16x16x1xf32>
    %68 = arith.mulf %67, %24 : vector<16x16x1xf32>
    %cst_44 = arith.constant dense<0.000000e+00> : vector<16x1xf32>
    %69 = vector.multi_reduction <add>, %68, %cst_44 [1] : vector<16x16x1xf32> to vector<16x1xf32>
    %70 = vector.shape_cast %69 : vector<16x1xf32> to vector<16x1x1xf32>
    %cst_45 = arith.constant 1.000000e-10 : f32
    %71 = vector.broadcast %cst_45 : f32 to vector<16x1x1xf32>
    %72 = arith.addf %70, %71 : vector<16x1x1xf32>
    %73 = vector.broadcast %72 : vector<16x1x1xf32> to vector<16x16x1xf32>
    %74 = arith.divf %68, %73 : vector<16x16x1xf32>
    %75 = vector.shape_cast %23 : vector<256x64xf32> to vector<16x16x64xf32>
    %76 = vector.broadcast %74 : vector<16x16x1xf32> to vector<16x16x64xf32>
    %77 = arith.mulf %76, %75 : vector<16x16x64xf32>
    %cst_46 = arith.constant dense<0.000000e+00> : vector<16x64xf32>
    %78 = vector.multi_reduction <add>, %77, %cst_46 [1] : vector<16x16x64xf32> to vector<16x64xf32>
    %79 = arith.truncf %78 : vector<16x64xf32> to vector<16x64xbf16>
    %c0_47 = arith.constant 0 : index
    %c0_48 = arith.constant 0 : index
    %80 = vector.load %arg20[%c0_47, %c0_48] : memref<64x64xbf16, #tpu.memory_space<vmem>>, vector<64x64xbf16>
    %cst_49 = arith.constant dense<0.000000e+00> : vector<16x64xf32>
    %81 = tpu.matmul %79, %80, %cst_49 {dimension_numbers = #tpu.dot_dimension_numbers<[1], [0], [0], [1], [0, 0, 1, 1], [], []>} : vector<16x64xbf16>, vector<64x64xbf16>, vector<16x64xf32> -> vector<16x64xf32>
    %c0_50 = arith.constant 0 : index
    %c0_51 = arith.constant 0 : index
    %82 = vector.load %arg21[%c0_50, %c0_51] : memref<1x64xf32, #tpu.memory_space<vmem>>, vector<1x64xf32>
    %83 = vector.broadcast %82 : vector<1x64xf32> to vector<16x64xf32>
    %84 = arith.addf %81, %83 : vector<16x64xf32>
    %cst_52 = arith.constant 0.000000e+00 : f32
    %85 = vector.broadcast %cst_52 : f32 to vector<16x64xf32>
    %86 = arith.maximumf %84, %85 : vector<16x64xf32>
    %87 = arith.truncf %86 : vector<16x64xf32> to vector<16x64xbf16>
    %c0_53 = arith.constant 0 : index
    %c0_54 = arith.constant 0 : index
    %88 = vector.load %arg22[%c0_53, %c0_54] : memref<64x64xbf16, #tpu.memory_space<vmem>>, vector<64x64xbf16>
    %cst_55 = arith.constant dense<0.000000e+00> : vector<16x64xf32>
    %89 = tpu.matmul %87, %88, %cst_55 {dimension_numbers = #tpu.dot_dimension_numbers<[1], [0], [0], [1], [0, 0, 1, 1], [], []>} : vector<16x64xbf16>, vector<64x64xbf16>, vector<16x64xf32> -> vector<16x64xf32>
    %c0_56 = arith.constant 0 : index
    %c0_57 = arith.constant 0 : index
    %90 = vector.load %arg23[%c0_56, %c0_57] : memref<1x64xf32, #tpu.memory_space<vmem>>, vector<1x64xf32>
    %91 = vector.broadcast %90 : vector<1x64xf32> to vector<16x64xf32>
    %92 = arith.addf %89, %91 : vector<16x64xf32>
    %cst_58 = arith.constant 0.000000e+00 : f32
    %93 = vector.broadcast %cst_58 : f32 to vector<16x64xf32>
    %94 = arith.maximumf %92, %93 : vector<16x64xf32>
    %c0_59 = arith.constant 0 : index
    %c0_60 = arith.constant 0 : index
    %95 = vector.load %arg4[%c0_59, %c0_60] : memref<256x128xbf16, #tpu.memory_space<vmem>>, vector<256x128xbf16>
    %c0_61 = arith.constant 0 : index
    %c0_62 = arith.constant 0 : index
    %96 = vector.load %arg5[%c0_61, %c0_62] : memref<256x1xf32, #tpu.memory_space<vmem>>, vector<256x1xf32>
    %c0_63 = arith.constant 0 : index
    %c0_64 = arith.constant 0 : index
    %97 = vector.load %arg6[%c0_63, %c0_64] : memref<16x64xf32, #tpu.memory_space<vmem>>, vector<16x64xf32>
    %c0_65 = arith.constant 0 : index
    %c0_66 = arith.constant 0 : index
    %98 = vector.load %arg24[%c0_65, %c0_66] : memref<128x64xbf16, #tpu.memory_space<vmem>>, vector<128x64xbf16>
    %cst_67 = arith.constant dense<0.000000e+00> : vector<256x64xf32>
    %99 = tpu.matmul %95, %98, %cst_67 {dimension_numbers = #tpu.dot_dimension_numbers<[1], [0], [0], [1], [0, 0, 1, 1], [], []>} : vector<256x128xbf16>, vector<128x64xbf16>, vector<256x64xf32> -> vector<256x64xf32>
    %c0_68 = arith.constant 0 : index
    %c0_69 = arith.constant 0 : index
    %100 = vector.load %arg25[%c0_68, %c0_69] : memref<1x64xf32, #tpu.memory_space<vmem>>, vector<1x64xf32>
    %101 = vector.broadcast %100 : vector<1x64xf32> to vector<256x64xf32>
    %102 = arith.addf %99, %101 : vector<256x64xf32>
    %cst_70 = arith.constant 0.000000e+00 : f32
    %103 = vector.broadcast %cst_70 : f32 to vector<256x64xf32>
    %104 = arith.maximumf %102, %103 : vector<256x64xf32>
    %105 = arith.truncf %104 : vector<256x64xf32> to vector<256x64xbf16>
    %c0_71 = arith.constant 0 : index
    %c0_72 = arith.constant 0 : index
    %106 = vector.load %arg26[%c0_71, %c0_72] : memref<64x32xbf16, #tpu.memory_space<vmem>>, vector<64x32xbf16>
    %cst_73 = arith.constant dense<0.000000e+00> : vector<256x32xf32>
    %107 = tpu.matmul %105, %106, %cst_73 {dimension_numbers = #tpu.dot_dimension_numbers<[1], [0], [0], [1], [0, 0, 1, 1], [], []>} : vector<256x64xbf16>, vector<64x32xbf16>, vector<256x32xf32> -> vector<256x32xf32>
    %c0_74 = arith.constant 0 : index
    %c0_75 = arith.constant 0 : index
    %108 = vector.load %arg27[%c0_74, %c0_75] : memref<1x32xf32, #tpu.memory_space<vmem>>, vector<1x32xf32>
    %109 = vector.broadcast %108 : vector<1x32xf32> to vector<256x32xf32>
    %110 = arith.addf %107, %109 : vector<256x32xf32>
    %cst_76 = arith.constant 0.000000e+00 : f32
    %111 = vector.broadcast %cst_76 : f32 to vector<256x32xf32>
    %112 = arith.maximumf %110, %111 : vector<256x32xf32>
    %113 = arith.truncf %112 : vector<256x32xf32> to vector<256x32xbf16>
    %c0_77 = arith.constant 0 : index
    %c0_78 = arith.constant 0 : index
    %114 = vector.load %arg28[%c0_77, %c0_78] : memref<32x64xbf16, #tpu.memory_space<vmem>>, vector<32x64xbf16>
    %cst_79 = arith.constant dense<0.000000e+00> : vector<256x64xf32>
    %115 = tpu.matmul %113, %114, %cst_79 {dimension_numbers = #tpu.dot_dimension_numbers<[1], [0], [0], [1], [0, 0, 1, 1], [], []>} : vector<256x32xbf16>, vector<32x64xbf16>, vector<256x64xf32> -> vector<256x64xf32>
    %c0_80 = arith.constant 0 : index
    %c0_81 = arith.constant 0 : index
    %116 = vector.load %arg29[%c0_80, %c0_81] : memref<1x64xf32, #tpu.memory_space<vmem>>, vector<1x64xf32>
    %117 = vector.broadcast %116 : vector<1x64xf32> to vector<256x64xf32>
    %118 = arith.addf %115, %117 : vector<256x64xf32>
    %119 = vector.shape_cast %96 : vector<256x1xf32> to vector<16x16x1xf32>
    %120 = arith.truncf %97 : vector<16x64xf32> to vector<16x64xbf16>
    %c0_82 = arith.constant 0 : index
    %c0_83 = arith.constant 0 : index
    %121 = vector.load %arg31[%c0_82, %c0_83] : memref<64x64xbf16, #tpu.memory_space<vmem>>, vector<64x64xbf16>
    %cst_84 = arith.constant dense<0.000000e+00> : vector<16x64xf32>
    %122 = tpu.matmul %120, %121, %cst_84 {dimension_numbers = #tpu.dot_dimension_numbers<[1], [0], [0], [1], [0, 0, 1, 1], [], []>} : vector<16x64xbf16>, vector<64x64xbf16>, vector<16x64xf32> -> vector<16x64xf32>
    %123 = vector.shape_cast %122 : vector<16x64xf32> to vector<16x1x64xf32>
    %124 = vector.broadcast %119 : vector<16x16x1xf32> to vector<16x16x64xf32>
    %125 = vector.broadcast %123 : vector<16x1x64xf32> to vector<16x16x64xf32>
    %126 = arith.mulf %124, %125 : vector<16x16x64xf32>
    %127 = vector.shape_cast %126 : vector<16x16x64xf32> to vector<256x64xf32>
    %128 = arith.truncf %118 : vector<256x64xf32> to vector<256x64xbf16>
    %c0_85 = arith.constant 0 : index
    %c0_86 = arith.constant 0 : index
    %129 = vector.load %arg30[%c0_85, %c0_86] : memref<64x64xbf16, #tpu.memory_space<vmem>>, vector<64x64xbf16>
    %cst_87 = arith.constant dense<0.000000e+00> : vector<256x64xf32>
    %130 = tpu.matmul %128, %129, %cst_87 {dimension_numbers = #tpu.dot_dimension_numbers<[1], [0], [0], [1], [0, 0, 1, 1], [], []>} : vector<256x64xbf16>, vector<64x64xbf16>, vector<256x64xf32> -> vector<256x64xf32>
    %131 = arith.addf %130, %127 : vector<256x64xf32>
    %c0_88 = arith.constant 0 : index
    %c0_89 = arith.constant 0 : index
    %132 = vector.load %arg32[%c0_88, %c0_89] : memref<1x64xf32, #tpu.memory_space<vmem>>, vector<1x64xf32>
    %133 = vector.broadcast %132 : vector<1x64xf32> to vector<256x64xf32>
    %134 = arith.addf %131, %133 : vector<256x64xf32>
    %cst_90 = arith.constant 0.000000e+00 : f32
    %135 = vector.broadcast %cst_90 : f32 to vector<256x64xf32>
    %136 = arith.maximumf %134, %135 : vector<256x64xf32>
    %137 = arith.truncf %136 : vector<256x64xf32> to vector<256x64xbf16>
    %c0_91 = arith.constant 0 : index
    %c0_92 = arith.constant 0 : index
    %138 = vector.load %arg33[%c0_91, %c0_92] : memref<64x32xbf16, #tpu.memory_space<vmem>>, vector<64x32xbf16>
    %cst_93 = arith.constant dense<0.000000e+00> : vector<256x32xf32>
    %139 = tpu.matmul %137, %138, %cst_93 {dimension_numbers = #tpu.dot_dimension_numbers<[1], [0], [0], [1], [0, 0, 1, 1], [], []>} : vector<256x64xbf16>, vector<64x32xbf16>, vector<256x32xf32> -> vector<256x32xf32>
    %c0_94 = arith.constant 0 : index
    %c0_95 = arith.constant 0 : index
    %140 = vector.load %arg34[%c0_94, %c0_95] : memref<1x32xf32, #tpu.memory_space<vmem>>, vector<1x32xf32>
    %141 = vector.broadcast %140 : vector<1x32xf32> to vector<256x32xf32>
    %142 = arith.addf %139, %141 : vector<256x32xf32>
    %cst_96 = arith.constant 0.000000e+00 : f32
    %143 = vector.broadcast %cst_96 : f32 to vector<256x32xf32>
    %144 = arith.maximumf %142, %143 : vector<256x32xf32>
    %c0_97 = arith.constant 0 : index
    %c0_98 = arith.constant 0 : index
    %145 = vector.load %arg35[%c0_97, %c0_98] : memref<1x32xf32, #tpu.memory_space<vmem>>, vector<1x32xf32>
    %146 = vector.broadcast %145 : vector<1x32xf32> to vector<256x32xf32>
    %147 = arith.mulf %144, %146 : vector<256x32xf32>
    %cst_99 = arith.constant dense<0.000000e+00> : vector<256xf32>
    %148 = vector.multi_reduction <add>, %147, %cst_99 [1] : vector<256x32xf32> to vector<256xf32>
    %149 = vector.shape_cast %148 : vector<256xf32> to vector<256x1xf32>
    %c0_100 = arith.constant 0 : index
    %c0_101 = arith.constant 0 : index
    %150 = vector.load %arg36[%c0_100, %c0_101] : memref<1x1xf32, #tpu.memory_space<vmem>>, vector<1x1xf32>
    %151 = vector.broadcast %150 : vector<1x1xf32> to vector<256x1xf32>
    %152 = arith.addf %149, %151 : vector<256x1xf32>
    %153 = vector.shape_cast %152 : vector<256x1xf32> to vector<16x16x1xf32>
    %cst_102 = arith.constant 0.000000e+00 : f32
    %154 = vector.broadcast %cst_102 : f32 to vector<16x16x1xf32>
    %155 = arith.cmpf ogt, %119, %154 : vector<16x16x1xf32>
    %cst_103 = arith.constant -1.000000e+30 : f32
    %156 = vector.broadcast %cst_103 : f32 to vector<16x16x1xf32>
    %157 = arith.select %155, %153, %156 : vector<16x16x1xi1>, vector<16x16x1xf32>
    %cst_104 = arith.constant dense<0xFF800000> : vector<16x1xf32>
    %158 = vector.multi_reduction <maximumf>, %157, %cst_104 [1] : vector<16x16x1xf32> to vector<16x1xf32>
    %159 = vector.shape_cast %158 : vector<16x1xf32> to vector<16x1x1xf32>
    %160 = vector.broadcast %159 : vector<16x1x1xf32> to vector<16x16x1xf32>
    %161 = arith.subf %157, %160 : vector<16x16x1xf32>
    %162 = math.exp %161 : vector<16x16x1xf32>
    %163 = arith.mulf %162, %119 : vector<16x16x1xf32>
    %cst_105 = arith.constant dense<0.000000e+00> : vector<16x1xf32>
    %164 = vector.multi_reduction <add>, %163, %cst_105 [1] : vector<16x16x1xf32> to vector<16x1xf32>
    %165 = vector.shape_cast %164 : vector<16x1xf32> to vector<16x1x1xf32>
    %cst_106 = arith.constant 1.000000e-10 : f32
    %166 = vector.broadcast %cst_106 : f32 to vector<16x1x1xf32>
    %167 = arith.addf %165, %166 : vector<16x1x1xf32>
    %168 = vector.broadcast %167 : vector<16x1x1xf32> to vector<16x16x1xf32>
    %169 = arith.divf %163, %168 : vector<16x16x1xf32>
    %170 = vector.shape_cast %118 : vector<256x64xf32> to vector<16x16x64xf32>
    %171 = vector.broadcast %169 : vector<16x16x1xf32> to vector<16x16x64xf32>
    %172 = arith.mulf %171, %170 : vector<16x16x64xf32>
    %cst_107 = arith.constant dense<0.000000e+00> : vector<16x64xf32>
    %173 = vector.multi_reduction <add>, %172, %cst_107 [1] : vector<16x16x64xf32> to vector<16x64xf32>
    %174 = arith.truncf %173 : vector<16x64xf32> to vector<16x64xbf16>
    %c0_108 = arith.constant 0 : index
    %c0_109 = arith.constant 0 : index
    %175 = vector.load %arg37[%c0_108, %c0_109] : memref<64x64xbf16, #tpu.memory_space<vmem>>, vector<64x64xbf16>
    %cst_110 = arith.constant dense<0.000000e+00> : vector<16x64xf32>
    %176 = tpu.matmul %174, %175, %cst_110 {dimension_numbers = #tpu.dot_dimension_numbers<[1], [0], [0], [1], [0, 0, 1, 1], [], []>} : vector<16x64xbf16>, vector<64x64xbf16>, vector<16x64xf32> -> vector<16x64xf32>
    %c0_111 = arith.constant 0 : index
    %c0_112 = arith.constant 0 : index
    %177 = vector.load %arg38[%c0_111, %c0_112] : memref<1x64xf32, #tpu.memory_space<vmem>>, vector<1x64xf32>
    %178 = vector.broadcast %177 : vector<1x64xf32> to vector<16x64xf32>
    %179 = arith.addf %176, %178 : vector<16x64xf32>
    %cst_113 = arith.constant 0.000000e+00 : f32
    %180 = vector.broadcast %cst_113 : f32 to vector<16x64xf32>
    %181 = arith.maximumf %179, %180 : vector<16x64xf32>
    %182 = arith.truncf %181 : vector<16x64xf32> to vector<16x64xbf16>
    %c0_114 = arith.constant 0 : index
    %c0_115 = arith.constant 0 : index
    %183 = vector.load %arg39[%c0_114, %c0_115] : memref<64x64xbf16, #tpu.memory_space<vmem>>, vector<64x64xbf16>
    %cst_116 = arith.constant dense<0.000000e+00> : vector<16x64xf32>
    %184 = tpu.matmul %182, %183, %cst_116 {dimension_numbers = #tpu.dot_dimension_numbers<[1], [0], [0], [1], [0, 0, 1, 1], [], []>} : vector<16x64xbf16>, vector<64x64xbf16>, vector<16x64xf32> -> vector<16x64xf32>
    %c0_117 = arith.constant 0 : index
    %c0_118 = arith.constant 0 : index
    %185 = vector.load %arg40[%c0_117, %c0_118] : memref<1x64xf32, #tpu.memory_space<vmem>>, vector<1x64xf32>
    %186 = vector.broadcast %185 : vector<1x64xf32> to vector<16x64xf32>
    %187 = arith.addf %184, %186 : vector<16x64xf32>
    %cst_119 = arith.constant 0.000000e+00 : f32
    %188 = vector.broadcast %cst_119 : f32 to vector<16x64xf32>
    %189 = arith.maximumf %187, %188 : vector<16x64xf32>
    %190 = tpu.concatenate %94, %189 in 1 : vector<16x64xf32>, vector<16x64xf32> -> vector<16x128xf32>
    %191 = arith.truncf %190 : vector<16x128xf32> to vector<16x128xbf16>
    %c0_120 = arith.constant 0 : index
    %c0_121 = arith.constant 0 : index
    %192 = vector.load %arg41[%c0_120, %c0_121] : memref<128x64xbf16, #tpu.memory_space<vmem>>, vector<128x64xbf16>
    %cst_122 = arith.constant dense<0.000000e+00> : vector<16x64xf32>
    %193 = tpu.matmul %191, %192, %cst_122 {dimension_numbers = #tpu.dot_dimension_numbers<[1], [0], [0], [1], [0, 0, 1, 1], [], []>} : vector<16x128xbf16>, vector<128x64xbf16>, vector<16x64xf32> -> vector<16x64xf32>
    %c0_123 = arith.constant 0 : index
    %c0_124 = arith.constant 0 : index
    %194 = vector.load %arg42[%c0_123, %c0_124] : memref<1x64xf32, #tpu.memory_space<vmem>>, vector<1x64xf32>
    %195 = vector.broadcast %194 : vector<1x64xf32> to vector<16x64xf32>
    %196 = arith.addf %193, %195 : vector<16x64xf32>
    %cst_125 = arith.constant 0.000000e+00 : f32
    %197 = vector.broadcast %cst_125 : f32 to vector<16x64xf32>
    %198 = arith.maximumf %196, %197 : vector<16x64xf32>
    %199 = arith.truncf %198 : vector<16x64xf32> to vector<16x64xbf16>
    %c0_126 = arith.constant 0 : index
    %c0_127 = arith.constant 0 : index
    %200 = vector.load %arg43[%c0_126, %c0_127] : memref<64x64xbf16, #tpu.memory_space<vmem>>, vector<64x64xbf16>
    %cst_128 = arith.constant dense<0.000000e+00> : vector<16x64xf32>
    %201 = tpu.matmul %199, %200, %cst_128 {dimension_numbers = #tpu.dot_dimension_numbers<[1], [0], [0], [1], [0, 0, 1, 1], [], []>} : vector<16x64xbf16>, vector<64x64xbf16>, vector<16x64xf32> -> vector<16x64xf32>
    %c0_129 = arith.constant 0 : index
    %c0_130 = arith.constant 0 : index
    %202 = vector.load %arg44[%c0_129, %c0_130] : memref<1x64xf32, #tpu.memory_space<vmem>>, vector<1x64xf32>
    %203 = vector.broadcast %202 : vector<1x64xf32> to vector<16x64xf32>
    %204 = arith.addf %201, %203 : vector<16x64xf32>
    %cst_131 = arith.constant 0.000000e+00 : f32
    %205 = vector.broadcast %cst_131 : f32 to vector<16x64xf32>
    %206 = arith.maximumf %204, %205 : vector<16x64xf32>
    %207 = arith.truncf %206 : vector<16x64xf32> to vector<16x64xbf16>
    %c0_132 = arith.constant 0 : index
    %c0_133 = arith.constant 0 : index
    %208 = vector.load %arg45[%c0_132, %c0_133] : memref<64x64xbf16, #tpu.memory_space<vmem>>, vector<64x64xbf16>
    %cst_134 = arith.constant dense<0.000000e+00> : vector<16x64xf32>
    %209 = tpu.matmul %207, %208, %cst_134 {dimension_numbers = #tpu.dot_dimension_numbers<[1], [0], [0], [1], [0, 0, 1, 1], [], []>} : vector<16x64xbf16>, vector<64x64xbf16>, vector<16x64xf32> -> vector<16x64xf32>
    %c0_135 = arith.constant 0 : index
    %c0_136 = arith.constant 0 : index
    %210 = vector.load %arg46[%c0_135, %c0_136] : memref<1x64xf32, #tpu.memory_space<vmem>>, vector<1x64xf32>
    %211 = vector.broadcast %210 : vector<1x64xf32> to vector<16x64xf32>
    %212 = arith.addf %209, %211 : vector<16x64xf32>
    %cst_137 = arith.constant 0.000000e+00 : f32
    %213 = vector.broadcast %cst_137 : f32 to vector<16x64xf32>
    %214 = arith.maximumf %212, %213 : vector<16x64xf32>
    %c0_138 = arith.constant 0 : index
    %c0_139 = arith.constant 0 : index
    %215 = vector.load %arg47[%c0_138, %c0_139] : memref<1x64xf32, #tpu.memory_space<vmem>>, vector<1x64xf32>
    %216 = vector.broadcast %215 : vector<1x64xf32> to vector<16x64xf32>
    %217 = arith.mulf %214, %216 : vector<16x64xf32>
    %cst_140 = arith.constant dense<0.000000e+00> : vector<16xf32>
    %218 = vector.multi_reduction <add>, %217, %cst_140 [1] : vector<16x64xf32> to vector<16xf32>
    %219 = vector.shape_cast %218 : vector<16xf32> to vector<16x1xf32>
    %c0_141 = arith.constant 0 : index
    %c0_142 = arith.constant 0 : index
    %220 = vector.load %arg48[%c0_141, %c0_142] : memref<1x1xf32, #tpu.memory_space<vmem>>, vector<1x1xf32>
    %221 = vector.broadcast %220 : vector<1x1xf32> to vector<16x1xf32>
    %222 = arith.addf %219, %221 : vector<16x1xf32>
    %cst_143 = arith.constant 0.000000e+00 : f32
    %223 = vector.broadcast %cst_143 : f32 to vector<16x1xf32>
    %224 = arith.maximumf %222, %223 : vector<16x1xf32>
    %c0_144 = arith.constant 0 : index
    %c0_145 = arith.constant 0 : index
    %225 = vector.load %arg49[%c0_144, %c0_145] : memref<16x1xf32, #tpu.memory_space<vmem>>, vector<16x1xf32>
    tpu.vector_store %arg49[%c0_144, %c0_145], %224 {strides = array<i32>} : memref<16x1xf32, #tpu.memory_space<vmem>>, vector<16x1xf32>,
    return
  }
  func.func @transform_0(%arg0: i32) -> (i32, i32) {
    %c0_i32 = arith.constant 0 : i32
    %c0_i32_0 = arith.constant 0 : i32
    return %arg0, %c0_i32 : i32, i32
  }
  func.func @transform_1(%arg0: i32) -> (i32, i32) {
    %c0_i32 = arith.constant 0 : i32
    %c0_i32_0 = arith.constant 0 : i32
    return %arg0, %c0_i32 : i32, i32
  }
  func.func @transform_2(%arg0: i32) -> (i32, i32) {
    %c0_i32 = arith.constant 0 : i32
    %c0_i32_0 = arith.constant 0 : i32
    return %arg0, %c0_i32 : i32, i32
  }
  func.func @transform_3(%arg0: i32) -> (i32, i32) {
    %c0_i32 = arith.constant 0 : i32
    %c0_i32_0 = arith.constant 0 : i32
    return %arg0, %c0_i32 : i32, i32
  }
  func.func @transform_4(%arg0: i32) -> (i32, i32) {
    %c0_i32 = arith.constant 0 : i32
    %c0_i32_0 = arith.constant 0 : i32
    return %arg0, %c0_i32 : i32, i32
  }
  func.func @transform_5(%arg0: i32) -> (i32, i32) {
    %c0_i32 = arith.constant 0 : i32
    %c0_i32_0 = arith.constant 0 : i32
    return %arg0, %c0_i32 : i32, i32
  }
  func.func @transform_6(%arg0: i32) -> (i32, i32) {
    %c0_i32 = arith.constant 0 : i32
    %c0_i32_0 = arith.constant 0 : i32
    %c0_i32_1 = arith.constant 0 : i32
    return %c0_i32, %c0_i32_0 : i32, i32
  }
  func.func @transform_7(%arg0: i32) -> (i32, i32) {
    %c0_i32 = arith.constant 0 : i32
    %c0_i32_0 = arith.constant 0 : i32
    %c0_i32_1 = arith.constant 0 : i32
    return %c0_i32, %c0_i32_0 : i32, i32
  }
  func.func @transform_8(%arg0: i32) -> (i32, i32) {
    %c0_i32 = arith.constant 0 : i32
    %c0_i32_0 = arith.constant 0 : i32
    %c0_i32_1 = arith.constant 0 : i32
    return %c0_i32, %c0_i32_0 : i32, i32
  }
  func.func @transform_9(%arg0: i32) -> (i32, i32) {
    %c0_i32 = arith.constant 0 : i32
    %c0_i32_0 = arith.constant 0 : i32
    %c0_i32_1 = arith.constant 0 : i32
    return %c0_i32, %c0_i32_0 : i32, i32
  }
  func.func @transform_10(%arg0: i32) -> (i32, i32) {
    %c0_i32 = arith.constant 0 : i32
    %c0_i32_0 = arith.constant 0 : i32
    %c0_i32_1 = arith.constant 0 : i32
    return %c0_i32, %c0_i32_0 : i32, i32
  }
  func.func @transform_11(%arg0: i32) -> (i32, i32) {
    %c0_i32 = arith.constant 0 : i32
    %c0_i32_0 = arith.constant 0 : i32
    %c0_i32_1 = arith.constant 0 : i32
    return %c0_i32, %c0_i32_0 : i32, i32
  }
  func.func @transform_12(%arg0: i32) -> (i32, i32) {
    %c0_i32 = arith.constant 0 : i32
    %c0_i32_0 = arith.constant 0 : i32
    %c0_i32_1 = arith.constant 0 : i32
    return %c0_i32, %c0_i32_0 : i32, i32
  }
  func.func @transform_13(%arg0: i32) -> (i32, i32) {
    %c0_i32 = arith.constant 0 : i32
    %c0_i32_0 = arith.constant 0 : i32
    %c0_i32_1 = arith.constant 0 : i32
    return %c0_i32, %c0_i32_0 : i32, i32
  }
  func.func @transform_14(%arg0: i32) -> (i32, i32) {
    %c0_i32 = arith.constant 0 : i32
    %c0_i32_0 = arith.constant 0 : i32
    %c0_i32_1 = arith.constant 0 : i32
    return %c0_i32, %c0_i32_0 : i32, i32
  }
  func.func @transform_15(%arg0: i32) -> (i32, i32) {
    %c0_i32 = arith.constant 0 : i32
    %c0_i32_0 = arith.constant 0 : i32
    %c0_i32_1 = arith.constant 0 : i32
    return %c0_i32, %c0_i32_0 : i32, i32
  }
  func.func @transform_16(%arg0: i32) -> (i32, i32) {
    %c0_i32 = arith.constant 0 : i32
    %c0_i32_0 = arith.constant 0 : i32
    %c0_i32_1 = arith.constant 0 : i32
    return %c0_i32, %c0_i32_0 : i32, i32
  }
  func.func @transform_17(%arg0: i32) -> (i32, i32) {
    %c0_i32 = arith.constant 0 : i32
    %c0_i32_0 = arith.constant 0 : i32
    %c0_i32_1 = arith.constant 0 : i32
    return %c0_i32, %c0_i32_0 : i32, i32
  }
  func.func @transform_18(%arg0: i32) -> (i32, i32) {
    %c0_i32 = arith.constant 0 : i32
    %c0_i32_0 = arith.constant 0 : i32
    %c0_i32_1 = arith.constant 0 : i32
    return %c0_i32, %c0_i32_0 : i32, i32
  }
  func.func @transform_19(%arg0: i32) -> (i32, i32) {
    %c0_i32 = arith.constant 0 : i32
    %c0_i32_0 = arith.constant 0 : i32
    %c0_i32_1 = arith.constant 0 : i32
    return %c0_i32, %c0_i32_0 : i32, i32
  }
  func.func @transform_20(%arg0: i32) -> (i32, i32) {
    %c0_i32 = arith.constant 0 : i32
    %c0_i32_0 = arith.constant 0 : i32
    %c0_i32_1 = arith.constant 0 : i32
    return %c0_i32, %c0_i32_0 : i32, i32
  }
  func.func @transform_21(%arg0: i32) -> (i32, i32) {
    %c0_i32 = arith.constant 0 : i32
    %c0_i32_0 = arith.constant 0 : i32
    %c0_i32_1 = arith.constant 0 : i32
    return %c0_i32, %c0_i32_0 : i32, i32
  }
  func.func @transform_22(%arg0: i32) -> (i32, i32) {
    %c0_i32 = arith.constant 0 : i32
    %c0_i32_0 = arith.constant 0 : i32
    %c0_i32_1 = arith.constant 0 : i32
    return %c0_i32, %c0_i32_0 : i32, i32
  }
  func.func @transform_23(%arg0: i32) -> (i32, i32) {
    %c0_i32 = arith.constant 0 : i32
    %c0_i32_0 = arith.constant 0 : i32
    %c0_i32_1 = arith.constant 0 : i32
    return %c0_i32, %c0_i32_0 : i32, i32
  }
  func.func @transform_24(%arg0: i32) -> (i32, i32) {
    %c0_i32 = arith.constant 0 : i32
    %c0_i32_0 = arith.constant 0 : i32
    %c0_i32_1 = arith.constant 0 : i32
    return %c0_i32, %c0_i32_0 : i32, i32
  }
  func.func @transform_25(%arg0: i32) -> (i32, i32) {
    %c0_i32 = arith.constant 0 : i32
    %c0_i32_0 = arith.constant 0 : i32
    %c0_i32_1 = arith.constant 0 : i32
    return %c0_i32, %c0_i32_0 : i32, i32
  }
  func.func @transform_26(%arg0: i32) -> (i32, i32) {
    %c0_i32 = arith.constant 0 : i32
    %c0_i32_0 = arith.constant 0 : i32
    %c0_i32_1 = arith.constant 0 : i32
    return %c0_i32, %c0_i32_0 : i32, i32
  }
  func.func @transform_27(%arg0: i32) -> (i32, i32) {
    %c0_i32 = arith.constant 0 : i32
    %c0_i32_0 = arith.constant 0 : i32
    %c0_i32_1 = arith.constant 0 : i32
    return %c0_i32, %c0_i32_0 : i32, i32
  }
  func.func @transform_28(%arg0: i32) -> (i32, i32) {
    %c0_i32 = arith.constant 0 : i32
    %c0_i32_0 = arith.constant 0 : i32
    %c0_i32_1 = arith.constant 0 : i32
    return %c0_i32, %c0_i32_0 : i32, i32
  }
  func.func @transform_29(%arg0: i32) -> (i32, i32) {
    %c0_i32 = arith.constant 0 : i32
    %c0_i32_0 = arith.constant 0 : i32
    %c0_i32_1 = arith.constant 0 : i32
    return %c0_i32, %c0_i32_0 : i32, i32
  }
  func.func @transform_30(%arg0: i32) -> (i32, i32) {
    %c0_i32 = arith.constant 0 : i32
    %c0_i32_0 = arith.constant 0 : i32
    %c0_i32_1 = arith.constant 0 : i32
    return %c0_i32, %c0_i32_0 : i32, i32
  }
  func.func @transform_31(%arg0: i32) -> (i32, i32) {
    %c0_i32 = arith.constant 0 : i32
    %c0_i32_0 = arith.constant 0 : i32
    %c0_i32_1 = arith.constant 0 : i32
    return %c0_i32, %c0_i32_0 : i32, i32
  }
  func.func @transform_32(%arg0: i32) -> (i32, i32) {
    %c0_i32 = arith.constant 0 : i32
    %c0_i32_0 = arith.constant 0 : i32
    %c0_i32_1 = arith.constant 0 : i32
    return %c0_i32, %c0_i32_0 : i32, i32
  }
  func.func @transform_33(%arg0: i32) -> (i32, i32) {
    %c0_i32 = arith.constant 0 : i32
    %c0_i32_0 = arith.constant 0 : i32
    %c0_i32_1 = arith.constant 0 : i32
    return %c0_i32, %c0_i32_0 : i32, i32
  }
  func.func @transform_34(%arg0: i32) -> (i32, i32) {
    %c0_i32 = arith.constant 0 : i32
    %c0_i32_0 = arith.constant 0 : i32
    %c0_i32_1 = arith.constant 0 : i32
    return %c0_i32, %c0_i32_0 : i32, i32
  }
  func.func @transform_35(%arg0: i32) -> (i32, i32) {
    %c0_i32 = arith.constant 0 : i32
    %c0_i32_0 = arith.constant 0 : i32
    %c0_i32_1 = arith.constant 0 : i32
    return %c0_i32, %c0_i32_0 : i32, i32
  }
  func.func @transform_36(%arg0: i32) -> (i32, i32) {
    %c0_i32 = arith.constant 0 : i32
    %c0_i32_0 = arith.constant 0 : i32
    %c0_i32_1 = arith.constant 0 : i32
    return %c0_i32, %c0_i32_0 : i32, i32
  }
  func.func @transform_37(%arg0: i32) -> (i32, i32) {
    %c0_i32 = arith.constant 0 : i32
    %c0_i32_0 = arith.constant 0 : i32
    %c0_i32_1 = arith.constant 0 : i32
    return %c0_i32, %c0_i32_0 : i32, i32
  }
  func.func @transform_38(%arg0: i32) -> (i32, i32) {
    %c0_i32 = arith.constant 0 : i32
    %c0_i32_0 = arith.constant 0 : i32
    %c0_i32_1 = arith.constant 0 : i32
    return %c0_i32, %c0_i32_0 : i32, i32
  }
  func.func @transform_39(%arg0: i32) -> (i32, i32) {
    %c0_i32 = arith.constant 0 : i32
    %c0_i32_0 = arith.constant 0 : i32
    %c0_i32_1 = arith.constant 0 : i32
    return %c0_i32, %c0_i32_0 : i32, i32
  }
  func.func @transform_40(%arg0: i32) -> (i32, i32) {
    %c0_i32 = arith.constant 0 : i32
    %c0_i32_0 = arith.constant 0 : i32
    %c0_i32_1 = arith.constant 0 : i32
    return %c0_i32, %c0_i32_0 : i32, i32
  }
  func.func @transform_41(%arg0: i32) -> (i32, i32) {
    %c0_i32 = arith.constant 0 : i32
    %c0_i32_0 = arith.constant 0 : i32
    %c0_i32_1 = arith.constant 0 : i32
    return %c0_i32, %c0_i32_0 : i32, i32
  }
  func.func @transform_42(%arg0: i32) -> (i32, i32) {
    %c0_i32 = arith.constant 0 : i32
    %c0_i32_0 = arith.constant 0 : i32
    %c0_i32_1 = arith.constant 0 : i32
    return %c0_i32, %c0_i32_0 : i32, i32
  }
  func.func @transform_43(%arg0: i32) -> (i32, i32) {
    %c0_i32 = arith.constant 0 : i32
    %c0_i32_0 = arith.constant 0 : i32
    %c0_i32_1 = arith.constant 0 : i32
    return %c0_i32, %c0_i32_0 : i32, i32
  }
  func.func @transform_44(%arg0: i32) -> (i32, i32) {
    %c0_i32 = arith.constant 0 : i32
    %c0_i32_0 = arith.constant 0 : i32
    %c0_i32_1 = arith.constant 0 : i32
    return %c0_i32, %c0_i32_0 : i32, i32
  }
  func.func @transform_45(%arg0: i32) -> (i32, i32) {
    %c0_i32 = arith.constant 0 : i32
    %c0_i32_0 = arith.constant 0 : i32
    %c0_i32_1 = arith.constant 0 : i32
    return %c0_i32, %c0_i32_0 : i32, i32
  }
  func.func @transform_46(%arg0: i32) -> (i32, i32) {
    %c0_i32 = arith.constant 0 : i32
    %c0_i32_0 = arith.constant 0 : i32
    %c0_i32_1 = arith.constant 0 : i32
    return %c0_i32, %c0_i32_0 : i32, i32
  }
  func.func @transform_47(%arg0: i32) -> (i32, i32) {
    %c0_i32 = arith.constant 0 : i32
    %c0_i32_0 = arith.constant 0 : i32
    %c0_i32_1 = arith.constant 0 : i32
    return %c0_i32, %c0_i32_0 : i32, i32
  }
  func.func @transform_48(%arg0: i32) -> (i32, i32) {
    %c0_i32 = arith.constant 0 : i32
    %c0_i32_0 = arith.constant 0 : i32
    return %arg0, %c0_i32 : i32, i32
  }
}

</mosaic_0001>

<bundles_post_ra>
// kernel: _lambda_.1
= control target key start
LH: loop header
LB: loop body
LE: loop exit
PB: predicated region body
PF: predicated region fallthrough
CT: control target
= control target key end

     0   :  { %s7439_s3 = smov 6   ;;  %s7440_s7 = smov 7   ;;  %vm608_vm0 = vcmask 523264   ;;  %vm814_vm1 = vcmask 261120   ;;  %vm1948_vm4 = vcmask 7168   ;;  %s10316_s0 = inlined_call_operand.smem [shape: u32[49], index: -1, kind: input, shape index: {}] }
   0x1   :  { %s6331_s6 = sld [smem:[%s10316_s0 + %s7439_s3]]   ;;  %s7441_s14 = smov 10  }
   0x2   :  { %s7500_s10 = sld [smem:[%s10316_s0 + %s7440_s7]]   ;;  %s7442_s18 = smov 8  }
   0x3   :  { %s7505_s13 = sld [smem:[%s10316_s0]]   ;;  %s7443_s22 = smov 9  }
   0x4   :  { %s7510_s17 = sld [smem:[%s10316_s0 + %s7441_s14]]   ;;  %s7444_s26 = smov 11  }
   0x5   :  { %s6333_s21 = sld [smem:[%s10316_s0 + %s7442_s18]]   ;;  %s7445_s30 = smov 13  }
   0x6   :  { %s7532_s25 = sld [smem:[%s10316_s0 + %s7443_s22]]   ;;  %s7446_s4 = smov 1  }
   0x7   :  { %v6997_v0 = vld [vmem:[%s6331_s6 + $0x38] sm:$0xff]  ;;  %v6996_v1 = vld [vmem:[%s6331_s6 + $0x30] sm:$0xff]  ;;  %v6995_v2 = vld [vmem:[%s6331_s6 + $0x28] sm:$0xff]  ;;  %s7574_s29 = sld [smem:[%s10316_s0 + %s7444_s26]]   ;;  %s7448_s8 = smov 15  }
   0x8   :  { %435 = vmatpush.bf16.msra.mxu0 %v6997_v0  ;;  %v6994_v3 = vld [vmem:[%s6331_s6 + $0x20] sm:$0xff]  ;;  %v6993_v4 = vld [vmem:[%s6331_s6 + $0x18] sm:$0xff]  ;;  %v6992_v5 = vld [vmem:[%s6331_s6 + $0x10] sm:$0xff]  ;;  %s7582_s3 = sld [smem:[%s10316_s0 + %s7445_s30]]   ;;  %s7449_s12 = smov 12  }
   0x9   :  { %v6991_v6 = vld [vmem:[%s6331_s6 + $0x8] sm:$0xff]  ;;  %v6990_v7 = vld [vmem:[%s6331_s6] sm:$0xff]  ;;  %v6976_v11 = vld [vmem:[%s7505_s13 + $0x10] sm:$0xff]  ;;  %s7602_s7 = sld [smem:[%s10316_s0 + %s7446_s4]]   ;;  %s7450_s16 = smov 2  }
   0xa   :  { %v6974_v8 = vld [vmem:[%s7505_s13] sm:$0xff]  ;;  %v7003_v9 = vld [vmem:[%s7510_s17 + $0x8] sm:$0xff]  ;;  %v6977_v12 = vld [vmem:[%s7505_s13 + $0x18] sm:$0xff]  ;;  %s7638_s11 = sld [smem:[%s10316_s0 + %s7448_s8]]   ;;  %s7451_s20 = smov 14  }
   0xb   :  { %7094 = vmatpush.bf16.msra.mxu2 %v7003_v9  ;;  %v6975_v10 = vld [vmem:[%s7505_s13 + $0x8] sm:$0xff]  ;;  %v6978_v13 = vld [vmem:[%s7505_s13 + $0x20] sm:$0xff]  ;;  %v7001_v15 = vld [vmem:[%s6333_s21 + $0x18] sm:$0xff]  ;;  %s7647_s15 = sld [smem:[%s10316_s0 + %s7449_s12]]   ;;  %s7452_s24 = smov 16  }
   0xc   :  { %436 = vmatpush.bf16.msra.mxu0 %v6996_v1  ;;  %v6979_v14 = vld [vmem:[%s7505_s13 + $0x28] sm:$0xff]  ;;  %v6980_v16 = vld [vmem:[%s7505_s13 + $0x30] sm:$0xff]  ;;  %661 = vmatpush.bf16.msra.mxu1 %v7001_v15  ;;  %v6998_v19 = vld [vmem:[%s6333_s21] sm:$0xff]  ;;  %s6327_s19 = sld [smem:[%s10316_s0 + %s7450_s16]]   ;;  %s7453_s28 = smov 17  }
   0xd   :  { %7090 = vmatpush.bf16.msra.mxu3 %v7001_v15  ;;  %v7000_v17 = vld [vmem:[%s6333_s21 + $0x10] sm:$0xff]  ;;  %v6999_v18 = vld [vmem:[%s6333_s21 + $0x8] sm:$0xff]  ;;  %v6981_v20 = vld [vmem:[%s7505_s13 + $0x38] sm:$0xff]  ;;  %s7704_s23 = sld [smem:[%s10316_s0 + %s7451_s20]]   ;;  %s7454_s2 = smov 18  }
   0xe   :  { %v6982_v21 = vld [vmem:[%s7505_s13 + $0x40] sm:$0xff]  ;;  %v6983_v31 = vld [vmem:[%s7505_s13 + $0x48] sm:$0xff]  ;;  %v6984_v39 = vld [vmem:[%s7505_s13 + $0x50] sm:$0xff]  ;;  %s7816_s27 = sld [smem:[%s10316_s0 + %s7452_s24]]   ;;  %s7455_s6 = smov 23  }
   0xf   :  { %v7526_v23 = vld [vmem:[%s7500_s10] ss:$0 sm:$0xff]  ;;  %v6985_v47 = vld [vmem:[%s7505_s13 + $0x58] sm:$0xff]  ;;  %v6987_v63 = vld [vmem:[%s7505_s13 + $0x68] sm:$0xff]  ;;  %s7830_s1 = sld [smem:[%s10316_s0 + %s7453_s28]]   ;;  %s7457_s14 = smov 3  }
  0x10   :  { %437 = vmatpush.bf16.msra.mxu0 %v6995_v2  ;;  %662 = vmatpush.bf16.msra.mxu1 %v7000_v17  ;;  %v7002_v24 = vld [vmem:[%s7510_s17] sm:$0xff]  ;;  %v6989_v15 = vld [vmem:[%s7505_s13 + $0x78] sm:$0xff]  ;;  %s6343_s5 = sld [smem:[%s10316_s0 + %s7454_s2]]   ;;  %s7458_s18 = smov 4  }
  0x11   :  { %7091 = vmatpush.bf16.msra.mxu3 %v7000_v17  ;;  %7095 = vmatpush.bf16.msra.mxu2 %v7002_v24  ;;  %v6986_v55 = vld [vmem:[%s7505_s13 + $0x60] sm:$0xff]  ;;  %s8088_s10 = sld [smem:[%s10316_s0 + %s7455_s6]]   ;;  %s7459_s22 = smov 24  }
  0x12   :  { %s8771_s17 = sld [smem:[%s10316_s0 + %s7457_s14]]   ;;  %s7460_s26 = smov 25  }
  0x13   :  { %s8785_s21 = sld [smem:[%s10316_s0 + %s7458_s18]]   ;;  %s7461_s30 = smov 20  }
  0x14   :  { %438 = vmatpush.bf16.msra.mxu0 %v6994_v3  ;;  %663 = vmatpush.bf16.msra.mxu1 %v6999_v18  ;;  %s7462_s4 = smov 26   ;;  %s7463_s9 = smov 21  }
  0x15   :  { %7092 = vmatpush.bf16.msra.mxu3 %v6999_v18  ;;  %s8942_s8 = sld [smem:[%s10316_s0 + %s7462_s4]]   ;;  %s7464_s12 = smov 27  }
  0x16   :  { %s7465_s16 = smov 29   ;;  %s7466_s20 = smov 30  }
  0x17   :  { %s8993_s24 = sld [smem:[%s10316_s0 + %s7466_s20]]  }
  0x18   :  { %439 = vmatpush.bf16.msra.mxu0 %v6993_v4  ;;  %664 = vmatpush.bf16.msra.mxu1 %v6998_v19 }
  0x19   :  { %7093 = vmatpush.bf16.msra.mxu3 %v6998_v19 }
  0x1c   :  { %440 = vmatpush.bf16.msra.mxu0 %v6992_v5 }
  0x20   :  { %441 = vmatpush.bf16.msra.mxu0 %v6991_v6 }
  0x24   :  { %442 = vmatpush.bf16.msra.mxu0 %v6990_v7  ;;  %v6988_v7 = vld [vmem:[%s7505_s13 + $0x70] sm:$0xff] }
  0x27   :  { %443 = vmatmul.bf16.vlgmr.msra.gmra.mxu0 %v6974_v8 }
  0x28   :  { %869 = vmatpush.bf16.msrb.mxu0 %v7003_v9 }
  0x2c   :  { %870 = vmatpush.bf16.msrb.mxu0 %v7002_v24 }
  0x37   :  { %448 = vmatmul.bf16.gmra.mxu0 %v6975_v10 }
  0x47   :  { %453 = vmatmul.bf16.gmra.mxu0 %v6976_v11 }
  0x57   :  { %458 = vmatmul.bf16.gmra.mxu0 %v6977_v12 }
  0x67   :  { %463 = vmatmul.bf16.gmra.mxu0 %v6978_v13 }
  0x77   :  { %468 = vmatmul.bf16.gmra.mxu0 %v6979_v14 }
  0x87   :  { %473 = vmatmul.bf16.gmra.mxu0 %v6980_v16 }
  0x97   :  { %478 = vmatmul.bf16.gmra.mxu0 %v6981_v20 }
  0xa4   :  { %v444_v22 = vpop.f32.mrf.mxu0 }
  0xa5   :  { %v445_v25 = vadd.f32 %v7526_v23, %v444_v22 }
  0xa7   :  { %483 = vmatmul.bf16.gmra.mxu0 %v6982_v21  ;;  %v524_v28 = vmax.f32 %v445_v25, 0.0 }
  0xac   :  { %v446_v26 = vpop.f32.mrf.mxu0 }
  0xad   :  { %v447_v27 = vadd.f32 %v7526_v23, %v446_v26 }
  0xaf   :  { %v525_v29 = vmax.f32 %v447_v27, 0.0 }
  0xb1   :  { %v556_v30 = vpack.c.bf16 %v525_v29, %v524_v28 }
  0xb3   :  { %6486 = vmatmul.msk.bf16.vlgmr.msra.gmra.mxu1 %vm608_vm0, %v556_v30 }
  0xb4   :  { %v449_v32 = vpop.f32.mrf.mxu0 }
  0xb5   :  { %v450_v33 = vadd.f32 %v7526_v23, %v449_v32  ;;  %v7568_v32 = vld [vmem:[%s7532_s25] ss:$0 sm:$0xff]  ;;  %s8797_s25 = sld [smem:[%s10316_s0 + %s7459_s22]]  }
  0xb7   :  { %488 = vmatmul.bf16.gmra.mxu0 %v6983_v31  ;;  %v526_v36 = vmax.f32 %v450_v33, 0.0 }
  0xbc   :  { %v451_v34 = vpop.f32.mrf.mxu0 }
  0xbd   :  { %v452_v35 = vadd.f32 %v7526_v23, %v451_v34 }
  0xbf   :  { %v527_v37 = vmax.f32 %v452_v35, 0.0 }
  0xc1   :  { %v557_v38 = vpack.c.bf16 %v527_v37, %v526_v36 }
  0xc3   :  { %6487 = vmatmul.msk.bf16.gmra.mxu1 %vm608_vm0, %v557_v38 }
  0xc4   :  { %v454_v40 = vpop.f32.mrf.mxu0 }
  0xc5   :  { %v455_v41 = vadd.f32 %v7526_v23, %v454_v40 }
  0xc7   :  { %493 = vmatmul.bf16.gmra.mxu0 %v6984_v39  ;;  %v528_v44 = vmax.f32 %v455_v41, 0.0 }
  0xcc   :  { %v456_v42 = vpop.f32.mrf.mxu0 }
  0xcd   :  { %v457_v43 = vadd.f32 %v7526_v23, %v456_v42 }
  0xcf   :  { %v529_v45 = vmax.f32 %v457_v43, 0.0 }
  0xd1   :  { %v558_v46 = vpack.c.bf16 %v529_v45, %v528_v44 }
  0xd3   :  { %6488 = vmatmul.msk.bf16.gmra.mxu1 %vm608_vm0, %v558_v46 }
  0xd4   :  { %v459_v48 = vpop.f32.mrf.mxu0 }
  0xd5   :  { %v460_v49 = vadd.f32 %v7526_v23, %v459_v48 }
  0xd7   :  { %498 = vmatmul.bf16.gmra.mxu0 %v6985_v47  ;;  %v530_v52 = vmax.f32 %v460_v49, 0.0  ;;  %v7007_v47 = vld [vmem:[%s7582_s3 + $0x18] sm:$0xff] }
  0xd8   :  { %992 = vmatpush.bf16.msrb.mxu3 %v7007_v47  ;;  %v247_v47 = vld [vmem:[%s7602_s7 + $0x50] sm:$0xff] }
  0xdc   :  { %v461_v50 = vpop.f32.mrf.mxu0 }
  0xdd   :  { %v462_v51 = vadd.f32 %v7526_v23, %v461_v50 }
  0xdf   :  { %v531_v53 = vmax.f32 %v462_v51, 0.0 }
  0xe1   :  { %v559_v54 = vpack.c.bf16 %v531_v53, %v530_v52 }
  0xe3   :  { %6489 = vmatmul.msk.bf16.gmra.mxu1 %vm608_vm0, %v559_v54 }
  0xe4   :  { %v464_v56 = vpop.f32.mrf.mxu0 }
  0xe5   :  { %v465_v57 = vadd.f32 %v7526_v23, %v464_v56 }
  0xe7   :  { %503 = vmatmul.bf16.gmra.mxu0 %v6986_v55  ;;  %v532_v60 = vmax.f32 %v465_v57, 0.0 }
  0xec   :  { %v466_v58 = vpop.f32.mrf.mxu0 }
  0xed   :  { %v467_v59 = vadd.f32 %v7526_v23, %v466_v58 }
  0xef   :  { %v533_v61 = vmax.f32 %v467_v59, 0.0 }
  0xf1   :  { %v560_v62 = vpack.c.bf16 %v533_v61, %v532_v60 }
  0xf3   :  { %6490 = vmatmul.msk.bf16.gmra.mxu1 %vm608_vm0, %v560_v62 }
  0xf4   :  { %v469_v0 = vpop.f32.mrf.mxu0 }
  0xf5   :  { %v470_v1 = vadd.f32 %v7526_v23, %v469_v0 }
  0xf7   :  { %508 = vmatmul.bf16.gmra.mxu0 %v6987_v63  ;;  %v534_v4 = vmax.f32 %v470_v1, 0.0 }
  0xfc   :  { %v471_v2 = vpop.f32.mrf.mxu0 }
  0xfd   :  { %v472_v3 = vadd.f32 %v7526_v23, %v471_v2 }
  0xff   :  { %v535_v5 = vmax.f32 %v472_v3, 0.0 }
 0x101   :  { %v561_v6 = vpack.c.bf16 %v535_v5, %v534_v4 }
 0x103   :  { %6491 = vmatmul.msk.bf16.gmra.mxu1 %vm608_vm0, %v561_v6 }
 0x104   :  { %v474_v8 = vpop.f32.mrf.mxu0 }
 0x105   :  { %v475_v9 = vadd.f32 %v7526_v23, %v474_v8  ;;  %v7006_v8 = vld [vmem:[%s7582_s3 + $0x10] sm:$0xff] }
 0x106   :  { %993 = vmatpush.bf16.msrb.mxu3 %v7006_v8 }
 0x107   :  { %513 = vmatmul.bf16.gmra.mxu0 %v6988_v7  ;;  %v536_v12 = vmax.f32 %v475_v9, 0.0 }
 0x10c   :  { %v476_v10 = vpop.f32.mrf.mxu0 }
 0x10d   :  { %v477_v11 = vadd.f32 %v7526_v23, %v476_v10 }
 0x10f   :  { %v537_v13 = vmax.f32 %v477_v11, 0.0 }
 0x111   :  { %v562_v14 = vpack.c.bf16 %v537_v13, %v536_v12 }
 0x113   :  { %6492 = vmatmul.msk.bf16.gmra.mxu1 %vm608_vm0, %v562_v14  ;;  %v7447_v14 = vmov 0  }
 0x114   :  { %v479_v16 = vpop.f32.mrf.mxu0  ;;  %7147 = vset.pattern.permute.xlu1 %v7447_v14  ;;  %7146 = vset.pattern.permute.xlu0 %v7447_v14 }
 0x115   :  { %v480_v17 = vadd.f32 %v7526_v23, %v479_v16  ;;  %v237_v16 = vld [vmem:[%s7602_s7] sm:$0xff]  ;;  %7148 = vset.pattern.permute.xlu2 %v7447_v14  ;;  %v255_v14 = vld [vmem:[%s7602_s7 + $0x90] sm:$0xff] }
 0x116   :  { %1020 = vperm.xlu0 %7146, %v237_v16  }
 0x117   :  { %518 = vmatmul.bf16.gmra.mxu0 %v6989_v15  ;;  %v538_v20 = vmax.f32 %v480_v17, 0.0  ;;  %v239_v15 = vld [vmem:[%s7602_s7 + $0x10] sm:$0xff] }
 0x118   :  { %1030 = vperm.xlu1 %7147, %v239_v15  }
 0x11c   :  { %v481_v18 = vpop.f32.mrf.mxu0 }
 0x11d   :  { %v482_v19 = vadd.f32 %v7526_v23, %v481_v18 }
 0x11f   :  { %v539_v21 = vmax.f32 %v482_v19, 0.0 }
 0x121   :  { %v563_v22 = vpack.c.bf16 %v539_v21, %v538_v20 }
 0x123   :  { %6493 = vmatmul.msk.bf16.gmra.mxu1 %vm608_vm0, %v563_v22 }
 0x124   :  { %v484_v24 = vpop.f32.mrf.mxu0 }
 0x125   :  { %v485_v25 = vadd.f32 %v7526_v23, %v484_v24 }
 0x127   :  { %v540_v28 = vmax.f32 %v485_v25, 0.0 }
 0x12c   :  { %v486_v26 = vpop.f32.mrf.mxu0 }
 0x12d   :  { %v487_v27 = vadd.f32 %v7526_v23, %v486_v26 }
 0x12f   :  { %v541_v29 = vmax.f32 %v487_v27, 0.0  ;;  %v240_v27 = vld [vmem:[%s7602_s7 + $0x18] sm:$0xff] }
 0x130   :  { %v666_v30 = vpop.f32.mrf.mxu1  ;;  %1035 = vperm.xlu1 %7147, %v240_v27   ;;  %v248_v27 = vld [vmem:[%s7602_s7 + $0x58] sm:$0xff] }
 0x131   :  { %v564_v31 = vpack.c.bf16 %v541_v29, %v540_v28  ;;  %v667_v34 = vadd.f32 %v7568_v32, %v666_v30  ;;  %v238_v28 = vld [vmem:[%s7602_s7 + $0x8] sm:$0xff] }
 0x132   :  { %1025 = vperm.xlu0 %7146, %v238_v28   ;;  %v259_v28 = vld [vmem:[%s7602_s7 + $0xb0] sm:$0xff] }
 0x133   :  { %6494 = vmatmul.msk.bf16.gmra.mxu1 %vm608_vm0, %v564_v31  ;;  %v746_v37 = vmax.f32 %v667_v34, 0.0  ;;  %v7005_v34 = vld [vmem:[%s7582_s3 + $0x8] sm:$0xff] }
 0x134   :  { %v489_v33 = vpop.f32.mrf.mxu0  ;;  %994 = vmatpush.bf16.msrb.mxu3 %v7005_v34  ;;  %v7009_v34 = vld [vmem:[%s7647_s15 + $0x8] sm:$0xff] }
 0x135   :  { %v490_v38 = vadd.f32 %v7526_v23, %v489_v33 }
 0x137   :  { %v542_v43 = vmax.f32 %v490_v38, 0.0 }
 0x138   :  { %v668_v35 = vpop.f32.mrf.mxu1 }
 0x139   :  { %v669_v36 = vadd.f32 %v7568_v32, %v668_v35 }
 0x13b   :  { %v747_v39 = vmax.f32 %v669_v36, 0.0  ;;  %v244_v36 = vld [vmem:[%s7602_s7 + $0x38] sm:$0xff] }
 0x13c   :  { %v491_v40 = vpop.f32.mrf.mxu0  ;;  %1055 = vperm.xlu1 %7147, %v244_v36   ;;  %v251_v36 = vld [vmem:[%s7602_s7 + $0x70] sm:$0xff] }
 0x13d   :  { %v778_v41 = vpack.c.bf16 %v747_v39, %v746_v37  ;;  %v492_v42 = vadd.f32 %v7526_v23, %v491_v40  ;;  %v243_v37 = vld [vmem:[%s7602_s7 + $0x30] sm:$0xff] }
 0x13e   :  { %1050 = vperm.xlu0 %7146, %v243_v37   ;;  %v262_v37 = vld [vmem:[%s7602_s7 + $0xc8] sm:$0xff] }
 0x13f   :  { %v543_v44 = vmax.f32 %v492_v42, 0.0  ;;  %6510 = vmatmul.msk.bf16.vlgmr.msrb.gmra.mxu0 %vm814_vm1, %v778_v41 }
 0x140   :  { %v671_v45 = vpop.f32.mrf.mxu1 }
 0x141   :  { %v565_v46 = vpack.c.bf16 %v543_v44, %v542_v43  ;;  %v672_v49 = vadd.f32 %v7568_v32, %v671_v45 }
 0x143   :  { %6495 = vmatmul.msk.bf16.gmra.mxu1 %vm608_vm0, %v565_v46  ;;  %v748_v52 = vmax.f32 %v672_v49, 0.0 }
 0x144   :  { %v494_v48 = vpop.f32.mrf.mxu0  ;;  %1070 = vperm.xlu1 %7147, %v247_v47   ;;  %v254_v47 = vld [vmem:[%s7602_s7 + $0x88] sm:$0xff] }
 0x145   :  { %v495_v53 = vadd.f32 %v7526_v23, %v494_v48  ;;  %v246_v48 = vld [vmem:[%s7602_s7 + $0x48] sm:$0xff] }
 0x146   :  { %1065 = vperm.xlu0 %7146, %v246_v48   ;;  %v265_v48 = vld [vmem:[%s7602_s7 + $0xe0] sm:$0xff] }
 0x147   :  { %v544_v58 = vmax.f32 %v495_v53, 0.0  ;;  %v241_v53 = vld [vmem:[%s7602_s7 + $0x20] sm:$0xff] }
 0x148   :  { %v673_v50 = vpop.f32.mrf.mxu1  ;;  %1040 = vperm.xlu2 %7148, %v241_v53   ;;  %v268_v53 = vld [vmem:[%s7602_s7 + $0xf8] sm:$0xff] }
 0x149   :  { %v674_v51 = vadd.f32 %v7568_v32, %v673_v50 }
 0x14b   :  { %v749_v54 = vmax.f32 %v674_v51, 0.0 }
 0x14c   :  { %v496_v55 = vpop.f32.mrf.mxu0 }
 0x14d   :  { %v779_v56 = vpack.c.bf16 %v749_v54, %v748_v52  ;;  %v497_v57 = vadd.f32 %v7526_v23, %v496_v55  ;;  %v250_v55 = vld [vmem:[%s7602_s7 + $0x68] sm:$0xff] }
 0x14e   :  { %1085 = vperm.xlu1 %7147, %v250_v55  }
 0x14f   :  { %v545_v59 = vmax.f32 %v497_v57, 0.0  ;;  %6511 = vmatmul.msk.bf16.gmra.mxu0 %vm814_vm1, %v779_v56  ;;  %v249_v56 = vld [vmem:[%s7602_s7 + $0x60] sm:$0xff] }
 0x150   :  { %v676_v60 = vpop.f32.mrf.mxu1  ;;  %1080 = vperm.xlu0 %7146, %v249_v56  }
 0x151   :  { %v566_v61 = vpack.c.bf16 %v545_v59, %v544_v58  ;;  %v677_v63 = vadd.f32 %v7568_v32, %v676_v60 }
 0x153   :  { %6496 = vmatmul.msk.bf16.vlgmr.msra.gmra.mxu3 %vm608_vm0, %v566_v61  ;;  %v750_v2 = vmax.f32 %v677_v63, 0.0  ;;  %v7004_v63 = vld [vmem:[%s7582_s3] sm:$0xff]  ;;  %s8915_s3 = sld [smem:[%s10316_s0 + %s7461_s30]]  }
 0x154   :  { %v499_v62 = vpop.f32.mrf.mxu0  ;;  %995 = vmatpush.bf16.msrb.mxu3 %v7004_v63 }
 0x155   :  { %v500_v3 = vadd.f32 %v7526_v23, %v499_v62 }
 0x157   :  { %v546_v9 = vmax.f32 %v500_v3, 0.0 }
 0x158   :  { %v678_v0 = vpop.f32.mrf.mxu1 }
 0x159   :  { %v679_v1 = vadd.f32 %v7568_v32, %v678_v0  ;;  %v242_v0 = vld [vmem:[%s7602_s7 + $0x28] sm:$0xff] }
 0x15a   :  { %1045 = vperm.xlu2 %7148, %v242_v0   ;;  %v7688_v0 = vld [vmem:[%s7574_s29] ss:$0 sm:$0xff]  ;;  %s8883_s29 = sld [smem:[%s10316_s0 + %s7460_s26]]  }
 0x15b   :  { %v751_v4 = vmax.f32 %v679_v1, 0.0 }
 0x15c   :  { %v501_v5 = vpop.f32.mrf.mxu0 }
 0x15d   :  { %v780_v6 = vpack.c.bf16 %v751_v4, %v750_v2  ;;  %v502_v7 = vadd.f32 %v7526_v23, %v501_v5  ;;  %v253_v2 = vld [vmem:[%s7602_s7 + $0x80] sm:$0xff]  ;;  %v252_v5 = vld [vmem:[%s7602_s7 + $0x78] sm:$0xff] }
 0x15e   :  { %1100 = vperm.xlu1 %7147, %v253_v2   ;;  %1095 = vperm.xlu0 %7146, %v252_v5   ;;  %v263_v5 = vld [vmem:[%s7602_s7 + $0xd0] sm:$0xff] }
 0x15f   :  { %v547_v10 = vmax.f32 %v502_v7, 0.0  ;;  %6512 = vmatmul.msk.bf16.gmra.mxu0 %vm814_vm1, %v780_v6 }
 0x160   :  { %v681_v11 = vpop.f32.mrf.mxu1 }
 0x161   :  { %v567_v12 = vpack.c.bf16 %v547_v10, %v546_v9  ;;  %v682_v17 = vadd.f32 %v7568_v32, %v681_v11  ;;  %v7015_v10 = vld [vmem:[%s7638_s11 + $0x18] sm:$0xff]  ;;  %v245_v11 = vld [vmem:[%s7602_s7 + $0x40] sm:$0xff] }
 0x162   :  { %1060 = vperm.xlu2 %7148, %v245_v11   ;;  %1599 = vmatpush.bf16.msrb.mxu2 %v7015_v10 }
 0x163   :  { %6497 = vmatmul.msk.bf16.gmra.mxu3 %vm608_vm0, %v567_v12  ;;  %v752_v20 = vmax.f32 %v682_v17, 0.0  ;;  %v7011_v17 = vld [vmem:[%s7647_s15 + $0x18] sm:$0xff] }
 0x164   :  { %v504_v13 = vpop.f32.mrf.mxu0  ;;  %1342 = vmatpush.bf16.msra.mxu3 %v7011_v17 }
 0x165   :  { %v505_v21 = vadd.f32 %v7526_v23, %v504_v13  ;;  %v256_v13 = vld [vmem:[%s7602_s7 + $0x98] sm:$0xff] }
 0x166   :  { %1115 = vperm.xlu1 %7147, %v256_v13   ;;  %1110 = vperm.xlu0 %7146, %v255_v14   ;;  %v266_v14 = vld [vmem:[%s7602_s7 + $0xe8] sm:$0xff] }
 0x167   :  { %v548_v29 = vmax.f32 %v505_v21, 0.0 }
 0x168   :  { %v683_v18 = vpop.f32.mrf.mxu1 }
 0x169   :  { %v684_v19 = vadd.f32 %v7568_v32, %v683_v18 }
 0x16a   :  { %1075 = vperm.xlu2 %7148, %v248_v27  }
 0x16b   :  { %v753_v22 = vmax.f32 %v684_v19, 0.0 }
 0x16c   :  { %v506_v24 = vpop.f32.mrf.mxu0 }
 0x16d   :  { %v781_v25 = vpack.c.bf16 %v753_v22, %v752_v20  ;;  %v507_v26 = vadd.f32 %v7526_v23, %v506_v24  ;;  %v7010_v24 = vld [vmem:[%s7647_s15 + $0x10] sm:$0xff] }
 0x16e   :  { %1343 = vmatpush.bf16.msra.mxu3 %v7010_v24  ;;  %1130 = vperm.xlu1 %7147, %v259_v28  }
 0x16f   :  { %v549_v30 = vmax.f32 %v507_v26, 0.0  ;;  %6513 = vmatmul.msk.bf16.gmra.mxu0 %vm814_vm1, %v781_v25 }
 0x170   :  { %v686_v31 = vpop.f32.mrf.mxu1 }
 0x171   :  { %v568_v33 = vpack.c.bf16 %v549_v30, %v548_v29  ;;  %v687_v38 = vadd.f32 %v7568_v32, %v686_v31  ;;  %v258_v29 = vld [vmem:[%s7602_s7 + $0xa8] sm:$0xff] }
 0x172   :  { %1125 = vperm.xlu0 %7146, %v258_v29   ;;  %1344 = vmatpush.bf16.msra.mxu3 %v7009_v34 }
 0x173   :  { %6498 = vmatmul.msk.bf16.gmra.mxu3 %vm608_vm0, %v568_v33  ;;  %v754_v41 = vmax.f32 %v687_v38, 0.0  ;;  %v261_v38 = vld [vmem:[%s7602_s7 + $0xc0] sm:$0xff]  ;;  %1090 = vperm.xlu2 %7148, %v251_v36  }
 0x174   :  { %v509_v35 = vpop.f32.mrf.mxu0 }
 0x175   :  { %v510_v42 = vadd.f32 %v7526_v23, %v509_v35 }
 0x176   :  { %1145 = vperm.xlu1 %7147, %v262_v37  }
 0x177   :  { %v550_v49 = vmax.f32 %v510_v42, 0.0 }
 0x178   :  { %v688_v39 = vpop.f32.mrf.mxu1 }
 0x179   :  { %v689_v40 = vadd.f32 %v7568_v32, %v688_v39 }
 0x17a   :  { %1140 = vperm.xlu0 %7146, %v261_v38  }
 0x17b   :  { %v755_v43 = vmax.f32 %v689_v40, 0.0  ;;  %1105 = vperm.xlu2 %7148, %v254_v47  }
 0x17c   :  { %v511_v44 = vpop.f32.mrf.mxu0 }
 0x17d   :  { %v782_v45 = vpack.c.bf16 %v755_v43, %v754_v41  ;;  %v512_v46 = vadd.f32 %v7526_v23, %v511_v44  ;;  %v269_v44 = vld [vmem:[%s6327_s19] sm:$0xff] }
 0x17e   :  { %1160 = vperm.xlu1 %7147, %v265_v48  }
 0x17f   :  { %v551_v50 = vmax.f32 %v512_v46, 0.0  ;;  %6514 = vmatmul.msk.bf16.gmra.mxu0 %vm814_vm1, %v782_v45  ;;  %v270_v45 = vld [vmem:[%s6327_s19 + $0x8] sm:$0xff]  ;;  %s8982_s19 = sld [smem:[%s10316_s0 + %s7465_s16]]  }
 0x180   :  { %v691_v51 = vpop.f32.mrf.mxu1 }
 0x181   :  { %v569_v52 = vpack.c.bf16 %v551_v50, %v550_v49  ;;  %v692_v57 = vadd.f32 %v7568_v32, %v691_v51  ;;  %v264_v49 = vld [vmem:[%s7602_s7 + $0xd8] sm:$0xff]  ;;  %v952_v50 = vpack.c.bf16 %v270_v45, %v269_v44 }
 0x182   :  { %1155 = vperm.xlu0 %7146, %v264_v49  }
 0x183   :  { %6499 = vmatmul.msk.bf16.gmra.mxu3 %vm608_vm0, %v569_v52  ;;  %v756_v60 = vmax.f32 %v692_v57, 0.0  ;;  %v257_v52 = vld [vmem:[%s7602_s7 + $0xa0] sm:$0xff] }
 0x184   :  { %v514_v54 = vpop.f32.mrf.mxu0  ;;  %1120 = vperm.xlu2 %7148, %v257_v52  }
 0x185   :  { %v515_v61 = vadd.f32 %v7526_v23, %v514_v54  ;;  %v267_v54 = vld [vmem:[%s7602_s7 + $0xf0] sm:$0xff] }
 0x186   :  { %1175 = vperm.xlu1 %7147, %v268_v53  }
 0x187   :  { %v552_v6 = vmax.f32 %v515_v61, 0.0 }
 0x188   :  { %v693_v58 = vpop.f32.mrf.mxu1 }
 0x189   :  { %v694_v59 = vadd.f32 %v7568_v32, %v693_v58 }
 0x18a   :  { %1170 = vperm.xlu0 %7146, %v267_v54  }
 0x18b   :  { %v757_v62 = vmax.f32 %v694_v59, 0.0 }
 0x18c   :  { %v516_v1 = vpop.f32.mrf.mxu0 }
 0x18d   :  { %v517_v3 = vadd.f32 %v7526_v23, %v516_v1  ;;  %v783_v4 = vpack.c.bf16 %v757_v62, %v756_v60  ;;  %v260_v62 = vld [vmem:[%s7602_s7 + $0xb8] sm:$0xff]  ;;  %v7014_v1 = vld [vmem:[%s7638_s11 + $0x10] sm:$0xff] }
 0x18e   :  { %1135 = vperm.xlu2 %7148, %v260_v62   ;;  %1600 = vmatpush.bf16.msrb.mxu2 %v7014_v1 }
 0x18f   :  { %v553_v7 = vmax.f32 %v517_v3, 0.0  ;;  %6515 = vmatmul.msk.bf16.vlgmr.msra.gmra.mxu2 %vm814_vm1, %v783_v4 }
 0x190   :  { %v696_v8 = vpop.f32.mrf.mxu1 }
 0x191   :  { %v570_v9 = vpack.c.bf16 %v553_v7, %v552_v6  ;;  %v697_v15 = vadd.f32 %v7568_v32, %v696_v8 }
 0x193   :  { %6500 = vmatmul.msk.bf16.gmra.mxu3 %vm608_vm0, %v570_v9  ;;  %v758_v19 = vmax.f32 %v697_v15, 0.0 }
 0x194   :  { %v519_v12 = vpop.f32.mrf.mxu0 }
 0x195   :  { %v520_v20 = vadd.f32 %v7526_v23, %v519_v12 }
 0x196   :  { %1150 = vperm.xlu2 %7148, %v263_v5  }
 0x197   :  { %v554_v30 = vmax.f32 %v520_v20, 0.0 }
 0x198   :  { %v698_v16 = vpop.f32.mrf.mxu1 }
 0x199   :  { %v699_v18 = vadd.f32 %v7568_v32, %v698_v16 }
 0x19b   :  { %v759_v21 = vmax.f32 %v699_v18, 0.0 }
 0x19c   :  { %v521_v22 = vpop.f32.mrf.mxu0 }
 0x19d   :  { %v522_v25 = vadd.f32 %v7526_v23, %v521_v22  ;;  %v784_v26 = vpack.c.bf16 %v759_v21, %v758_v19  ;;  %v7008_v23 = vld [vmem:[%s7647_s15] sm:$0xff]  ;;  %s6352_s15 = sld [smem:[%s10316_s0 + %s7464_s12]]  }
 0x19e   :  { %1345 = vmatpush.bf16.msra.mxu3 %v7008_v23  ;;  %1165 = vperm.xlu2 %7148, %v266_v14  }
 0x19f   :  { %v555_v31 = vmax.f32 %v522_v25, 0.0  ;;  %6516 = vmatmul.msk.bf16.gmra.mxu2 %vm814_vm1, %v784_v26 }
 0x1a0   :  { %v701_v33 = vpop.f32.mrf.mxu1 }
 0x1a1   :  { %v571_v35 = vpack.c.bf16 %v555_v31, %v554_v30  ;;  %v702_v39 = vadd.f32 %v7568_v32, %v701_v33 }
 0x1a3   :  { %6501 = vmatmul.msk.bf16.gmra.mxu3 %vm608_vm0, %v571_v35  ;;  %v760_v42 = vmax.f32 %v702_v39, 0.0  ;;  %v7013_v39 = vld [vmem:[%s7638_s11 + $0x8] sm:$0xff] }
 0x1a4   :  { %1601 = vmatpush.bf16.msrb.mxu2 %v7013_v39 }
 0x1a8   :  { %v703_v40 = vpop.f32.mrf.mxu1 }
 0x1a9   :  { %v704_v41 = vadd.f32 %v7568_v32, %v703_v40 }
 0x1ab   :  { %v761_v43 = vmax.f32 %v704_v41, 0.0 }
 0x1ad   :  { %v785_v46 = vpack.c.bf16 %v761_v43, %v760_v42 }
 0x1af   :  { %6517 = vmatmul.msk.bf16.gmra.mxu2 %vm814_vm1, %v785_v46 }
 0x1b0   :  { %v706_v51 = vpop.f32.mrf.mxu1 }
 0x1b1   :  { %v707_v55 = vadd.f32 %v7568_v32, %v706_v51 }
 0x1b3   :  { %6542 = vmatmul.msk.bf16.vlgmr.msrb.gmra.mxu3 %vm608_vm0, %v952_v50  ;;  %v762_v58 = vmax.f32 %v707_v55, 0.0 }
 0x1b8   :  { %v708_v56 = vpop.f32.mrf.mxu1 }
 0x1b9   :  { %v709_v57 = vadd.f32 %v7568_v32, %v708_v56 }
 0x1bb   :  { %v763_v59 = vmax.f32 %v709_v57, 0.0 }
 0x1bc   :  { %v872_v60 = vpop.f32.mrf.mxu0 }
 0x1bd   :  { %v786_v61 = vpack.c.bf16 %v763_v59, %v762_v58  ;;  %v7692_v3 = vadd.f32 %v7688_v0, %v872_v60 }
 0x1bf   :  { %6518 = vmatmul.msk.bf16.gmra.mxu2 %vm814_vm1, %v786_v61 }
 0x1c0   :  { %v711_v63 = vpop.f32.mrf.mxu1 }
 0x1c1   :  { %v712_v6 = vadd.f32 %v7568_v32, %v711_v63 }
 0x1c3   :  { %v764_v10 = vmax.f32 %v712_v6, 0.0 }
 0x1c4   :  { %v874_v2 = vpop.f32.mrf.mxu0 }
 0x1c5   :  { %v7695_v4 = vadd.f32 %v7688_v0, %v874_v2 }
 0x1c7   :  { %v1242_v7 = vpack.c.bf16 %v7695_v4, %v7692_v3 }
 0x1c8   :  { %v713_v8 = vpop.f32.mrf.mxu1 }
 0x1c9   :  { %v714_v9 = vadd.f32 %v7568_v32, %v713_v8  ;;  %6559 = vmatmul.msk.bf16.vlgmr.msra.gmra.mxu3 %vm608_vm0, %v1242_v7 }
 0x1cb   :  { %v765_v11 = vmax.f32 %v714_v9, 0.0 }
 0x1cc   :  { %v877_v12 = vpop.f32.mrf.mxu0 }
 0x1cd   :  { %v787_v13 = vpack.c.bf16 %v765_v11, %v764_v10  ;;  %v7711_v16 = vadd.f32 %v7688_v0, %v877_v12  ;;  %v7012_v10 = vld [vmem:[%s7638_s11] sm:$0xff]  ;;  %s8947_s11 = sld [smem:[%s10316_s0 + %s7463_s9]]  }
 0x1ce   :  { %1602 = vmatpush.bf16.msrb.mxu2 %v7012_v10 }
 0x1cf   :  { %6519 = vmatmul.msk.bf16.gmra.mxu2 %vm814_vm1, %v787_v13 }
 0x1d4   :  { %v879_v15 = vpop.f32.mrf.mxu0 }
 0x1d5   :  { %v7714_v17 = vadd.f32 %v7688_v0, %v879_v15 }
 0x1d6   :  { %v716_v18 = vpop.f32.mrf.mxu3 }
 0x1d7   :  { %v1243_v19 = vpack.c.bf16 %v7714_v17, %v7711_v16  ;;  %v717_v21 = vadd.f32 %v7568_v32, %v716_v18 }
 0x1d9   :  { %6560 = vmatmul.msk.bf16.gmra.mxu3 %vm608_vm0, %v1243_v19  ;;  %v766_v25 = vmax.f32 %v717_v21, 0.0 }
 0x1dc   :  { %v882_v20 = vpop.f32.mrf.mxu0 }
 0x1dd   :  { %v7722_v29 = vadd.f32 %v7688_v0, %v882_v20 }
 0x1de   :  { %v718_v22 = vpop.f32.mrf.mxu3 }
 0x1df   :  { %v719_v24 = vadd.f32 %v7568_v32, %v718_v22 }
 0x1e1   :  { %v767_v26 = vmax.f32 %v719_v24, 0.0 }
 0x1e3   :  { %v788_v27 = vpack.c.bf16 %v767_v26, %v766_v25 }
 0x1e4   :  { %v884_v28 = vpop.f32.mrf.mxu0 }
 0x1e5   :  { %v7725_v30 = vadd.f32 %v7688_v0, %v884_v28  ;;  %6520 = vmatmul.msk.bf16.gmra.mxu2 %vm814_vm1, %v788_v27 }
 0x1e6   :  { %v721_v31 = vpop.f32.mrf.mxu3 }
 0x1e7   :  { %v1244_v33 = vpack.c.bf16 %v7725_v30, %v7722_v29  ;;  %v722_v35 = vadd.f32 %v7568_v32, %v721_v31 }
 0x1e9   :  { %6561 = vmatmul.msk.bf16.gmra.mxu3 %vm608_vm0, %v1244_v33  ;;  %v768_v37 = vmax.f32 %v722_v35, 0.0 }
 0x1ec   :  { %v887_v34 = vpop.f32.mrf.mxu0 }
 0x1ed   :  { %v7735_v42 = vadd.f32 %v7688_v0, %v887_v34 }
 0x1ee   :  { %v723_v23 = vpop.f32.mrf.mxu3 }
 0x1ef   :  { %v724_v36 = vadd.f32 %v7568_v32, %v723_v23 }
 0x1f1   :  { %v769_v38 = vmax.f32 %v724_v36, 0.0 }
 0x1f3   :  { %v789_v40 = vpack.c.bf16 %v769_v38, %v768_v37 }
 0x1f4   :  { %v889_v41 = vpop.f32.mrf.mxu0 }
 0x1f5   :  { %v7738_v43 = vadd.f32 %v7688_v0, %v889_v41  ;;  %6521 = vmatmul.msk.bf16.gmra.mxu2 %vm814_vm1, %v789_v40  ;;  %v1021_v40 = vpop.permute.xlu0 %1020 }
 0x1f6   :  { %v726_v44 = vpop.f32.mrf.mxu3 }
 0x1f7   :  { %v1245_v45 = vpack.c.bf16 %v7738_v43, %v7735_v42  ;;  %v727_v47 = vadd.f32 %v7568_v32, %v726_v44 }
 0x1f9   :  { %6562 = vmatmul.msk.bf16.gmra.mxu3 %vm608_vm0, %v1245_v45  ;;  %v770_v50 = vmax.f32 %v727_v47, 0.0 }
 0x1fc   :  { %v892_v46 = vpop.f32.mrf.mxu0 }
 0x1fd   :  { %v7747_v54 = vadd.f32 %v7688_v0, %v892_v46 }
 0x1fe   :  { %v728_v48 = vpop.f32.mrf.mxu3 }
 0x1ff   :  { %v729_v49 = vadd.f32 %v7568_v32, %v728_v48  ;;  %10353 = vst [vmem:[#allocation5_spill] sm:$0xff] %v7747_v54 }
 0x201   :  { %v771_v51 = vmax.f32 %v729_v49, 0.0 }
 0x203   :  { %v790_v52 = vpack.c.bf16 %v771_v51, %v770_v50  ;;  %v7808_v51 = vld [vmem:[%s7704_s23] ss:$0 sm:$0xff] }
 0x204   :  { %v894_v53 = vpop.f32.mrf.mxu0 }
 0x205   :  { %v7750_v55 = vadd.f32 %v7688_v0, %v894_v53  ;;  %6522 = vmatmul.msk.bf16.gmra.mxu2 %vm814_vm1, %v790_v52  ;;  %v1026_v52 = vpop.permute.xlu0 %1025 }
 0x206   :  { %v731_v56 = vpop.f32.mrf.mxu3 }
 0x207   :  { %v1246_v57 = vpack.c.bf16 %v7750_v55, %v7747_v54  ;;  %v732_v58 = vadd.f32 %v7568_v32, %v731_v56  ;;  %v8316_v54 = vld [vmem:[%s7602_s7 + $0x80] sm:$0xff] }
 0x209   :  { %6563 = vmatmul.msk.bf16.gmra.mxu3 %vm608_vm0, %v1246_v57  ;;  %v772_v61 = vmax.f32 %v732_v58, 0.0 }
 0x20e   :  { %v733_v59 = vpop.f32.mrf.mxu3 }
 0x20f   :  { %v734_v60 = vadd.f32 %v7568_v32, %v733_v59 }
 0x211   :  { %v773_v62 = vmax.f32 %v734_v60, 0.0 }
 0x212   :  { %v897_v63 = vpop.f32.mrf.mxu2 }
 0x213   :  { %v791_v1 = vpack.c.bf16 %v773_v62, %v772_v61  ;;  %v7760_v6 = vadd.f32 %v7688_v0, %v897_v63  ;;  %v1031_v62 = vpop.permute.xlu1 %1030 }
 0x215   :  { %6523 = vmatmul.msk.bf16.gmra.mxu2 %vm814_vm1, %v791_v1  ;;  %10354 = vst [vmem:[#allocation6_spill] sm:$0xff] %v7760_v6 }
 0x216   :  { %v736_v2 = vpop.f32.mrf.mxu3 }
 0x217   :  { %v737_v8 = vadd.f32 %v7568_v32, %v736_v2 }
 0x219   :  { %v774_v13 = vmax.f32 %v737_v8, 0.0 }
 0x21a   :  { %v899_v5 = vpop.f32.mrf.mxu2 }
 0x21b   :  { %v7763_v7 = vadd.f32 %v7688_v0, %v899_v5 }
 0x21d   :  { %10355 = vst [vmem:[#allocation7_spill] sm:$0xff] %v7763_v7  ;;  %v1247_v9 = vpack.c.bf16 %v7763_v7, %v7760_v6 }
 0x21e   :  { %v738_v11 = vpop.f32.mrf.mxu3 }
 0x21f   :  { %v739_v12 = vadd.f32 %v7568_v32, %v738_v11  ;;  %6564 = vmatmul.msk.bf16.gmra.mxu3 %vm608_vm0, %v1247_v9 }
 0x221   :  { %v775_v14 = vmax.f32 %v739_v12, 0.0 }
 0x222   :  { %v902_v15 = vpop.f32.mrf.mxu2 }
 0x223   :  { %v792_v18 = vpack.c.bf16 %v775_v14, %v774_v13  ;;  %v7773_v21 = vadd.f32 %v7688_v0, %v902_v15  ;;  %v1036_v15 = vpop.permute.xlu1 %1035 }
 0x225   :  { %6524 = vmatmul.msk.bf16.gmra.mxu2 %vm814_vm1, %v792_v18  ;;  %10356 = vst [vmem:[#allocation8_spill] sm:$0xff] %v7773_v21 }
 0x226   :  { %v741_v19 = vpop.f32.mrf.mxu3 }
 0x227   :  { %v742_v24 = vadd.f32 %v7568_v32, %v741_v19 }
 0x229   :  { %v776_v28 = vmax.f32 %v742_v24, 0.0 }
 0x22a   :  { %v904_v20 = vpop.f32.mrf.mxu2 }
 0x22b   :  { %v7776_v22 = vadd.f32 %v7688_v0, %v904_v20 }
 0x22d   :  { %10357 = vst [vmem:[#allocation9_spill] sm:$0xff] %v7776_v22  ;;  %v1248_v25 = vpack.c.bf16 %v7776_v22, %v7773_v21 }
 0x22e   :  { %v743_v26 = vpop.f32.mrf.mxu3 }
 0x22f   :  { %v744_v27 = vadd.f32 %v7568_v32, %v743_v26  ;;  %6565 = vmatmul.msk.bf16.gmra.mxu3 %vm608_vm0, %v1248_v25 }
 0x231   :  { %v777_v31 = vmax.f32 %v744_v27, 0.0  ;;  %v1041_v27 = vpop.permute.xlu2 %1040 }
 0x232   :  { %v907_v33 = vpop.f32.mrf.mxu2 }
 0x233   :  { %v793_v34 = vpack.c.bf16 %v777_v31, %v776_v28  ;;  %v7787_v36 = vadd.f32 %v7688_v0, %v907_v33 }
 0x235   :  { %6525 = vmatmul.msk.bf16.gmra.mxu2 %vm814_vm1, %v793_v34  ;;  %10358 = vst [vmem:[#allocation10_spill] sm:$0xff] %v7787_v36 }
 0x236   :  { %v7784_v35 = vpop.f32.mrf.mxu3 }
 0x237   :  { %v1178_v46 = vperm.slane %v7784_v35, 0  ;;  %v1004_v61 = vrot.slane %v7784_v35, 1  ;;  %v1005_v26 = vrot.slane %v7784_v35, 2 }
 0x239   :  { %v1210_v49 = vmul.f32 %v1178_v46, %v1021_v40  ;;  %v1211_v56 = vmul.f32 %v1178_v46, %v1026_v52  ;;  %v1179_v10 = vperm.slane %v1004_v61, 0 }
 0x23a   :  { %v909_v23 = vpop.f32.mrf.mxu2 }
 0x23b   :  { %v7790_v37 = vadd.f32 %v7688_v0, %v909_v23  ;;  %v1212_v13 = vmul.f32 %v1179_v10, %v1031_v62  ;;  %v1213_v18 = vmul.f32 %v1179_v10, %v1036_v15  ;;  %v1180_v23 = vperm.slane %v1005_v26, 0 }
 0x23c   :  { %v1007_v26 = vrot.slane %v7784_v35, 4 }
 0x23d   :  { %10359 = vst [vmem:[#allocation11_spill] sm:$0xff] %v7790_v37  ;;  %v1249_v32 = vpack.c.bf16 %v7790_v37, %v7787_v36 }
 0x23e   :  { %v7795_v39 = vpop.f32.mrf.mxu3 }
 0x23f   :  { %6566 = vmatmul.msk.bf16.gmra.mxu3 %vm608_vm0, %v1249_v32 }
 0x242   :  { %v912_v38 = vpop.f32.mrf.mxu2 }
 0x243   :  { %v7798_v44 = vadd.f32 %v7688_v0, %v912_v38  ;;  %v1214_v38 = vmul.f32 %v1180_v23, %v1041_v27 }
 0x24a   :  { %v914_v41 = vpop.f32.mrf.mxu2 }
 0x24b   :  { %v7801_v45 = vadd.f32 %v7688_v0, %v914_v41 }
 0x24c   :  { %v1347_v47 = vpop.f32.mrf.mxu3 }
 0x24d   :  { %v1250_v48 = vpack.c.bf16 %v7801_v45, %v7798_v44  ;;  %v1348_v50 = vadd.f32 %v1347_v47, %v1210_v49 }
 0x24f   :  { %6567 = vmatmul.msk.bf16.gmra.mxu3 %vm608_vm0, %v1250_v48  ;;  %v1431_v58 = vadd.f32 %v7808_v51, %v1348_v50  ;;  %v1046_v48 = vpop.permute.xlu2 %1045 }
 0x250   :  { %v1215_v50 = vmul.f32 %v1180_v23, %v1046_v48 }
 0x251   :  { %v1463_v63 = vmax.f32 %v1431_v58, 0.0  ;;  %v1006_v58 = vrot.slane %v7784_v35, 3 }
 0x252   :  { %v917_v53 = vpop.f32.mrf.mxu2 }
 0x253   :  { %v7819_v5 = vadd.f32 %v7688_v0, %v917_v53 }
 0x254   :  { %v1349_v57 = vpop.f32.mrf.mxu3 }
 0x255   :  { %v1350_v59 = vadd.f32 %v1349_v57, %v1211_v56 }
 0x257   :  { %v1432_v60 = vadd.f32 %v7808_v51, %v1350_v59 }
 0x259   :  { %v1464_v1 = vmax.f32 %v1432_v60, 0.0 }
 0x25a   :  { %v919_v2 = vpop.f32.mrf.mxu2 }
 0x25b   :  { %v1495_v8 = vpack.c.bf16 %v1464_v1, %v1463_v63  ;;  %v7822_v9 = vadd.f32 %v7688_v0, %v919_v2  ;;  %v1181_v63 = vperm.slane %v1006_v58, 0  ;;  %v1051_v2 = vpop.permute.xlu0 %1050 }
 0x25c   :  { %v1352_v11 = vpop.f32.mrf.mxu3 }
 0x25d   :  { %v1251_v12 = vpack.c.bf16 %v7822_v9, %v7819_v5  ;;  %6591 = vmatmul.msk.bf16.vlgmr.msrb.gmra.mxu2 %vm608_vm0, %v1495_v8  ;;  %v1353_v14 = vadd.f32 %v1352_v11, %v1212_v13  ;;  %v1216_v8 = vmul.f32 %v1181_v63, %v1051_v2 }
 0x25f   :  { %6568 = vmatmul.msk.bf16.gmra.mxu3 %vm608_vm0, %v1251_v12  ;;  %v1433_v20 = vadd.f32 %v7808_v51, %v1353_v14  ;;  %v1056_v14 = vpop.permute.xlu1 %1055 }
 0x261   :  { %v1465_v31 = vmax.f32 %v1433_v20, 0.0 }
 0x264   :  { %v1354_v19 = vpop.f32.mrf.mxu3 }
 0x265   :  { %v1355_v24 = vadd.f32 %v1354_v19, %v1213_v18  ;;  %v1217_v18 = vmul.f32 %v1181_v63, %v1056_v14 }
 0x267   :  { %v1434_v25 = vadd.f32 %v7808_v51, %v1355_v24 }
 0x268   :  { %v922_v28 = vpop.f32.mrf.mxu2 }
 0x269   :  { %v1466_v33 = vmax.f32 %v1434_v25, 0.0  ;;  %v7838_v41 = vadd.f32 %v7688_v0, %v922_v28 }
 0x26b   :  { %v1496_v34 = vpack.c.bf16 %v1466_v33, %v1465_v31  ;;  %10360 = vst [vmem:[#allocation12_spill] sm:$0xff] %v7838_v41 }
 0x26c   :  { %v1357_v32 = vpop.f32.mrf.mxu3 }
 0x26d   :  { %6592 = vmatmul.msk.bf16.gmra.mxu2 %vm608_vm0, %v1496_v34  ;;  %v1358_v46 = vadd.f32 %v1357_v32, %v1214_v38  ;;  %v1182_v34 = vperm.slane %v1007_v26, 0  ;;  %v1061_v32 = vpop.permute.xlu2 %1060 }
 0x26f   :  { %v1435_v53 = vadd.f32 %v7808_v51, %v1358_v46  ;;  %v1218_v38 = vmul.f32 %v1182_v34, %v1061_v32 }
 0x270   :  { %v924_v40 = vpop.f32.mrf.mxu2 }
 0x271   :  { %v7841_v47 = vadd.f32 %v7688_v0, %v924_v40  ;;  %v1467_v60 = vmax.f32 %v1435_v53, 0.0 }
 0x273   :  { %v1252_v49 = vpack.c.bf16 %v7841_v47, %v7838_v41 }
 0x274   :  { %v1359_v52 = vpop.f32.mrf.mxu3 }
 0x275   :  { %v1360_v56 = vadd.f32 %v1359_v52, %v1215_v50  ;;  %6569 = vmatmul.msk.bf16.gmra.mxu3 %vm608_vm0, %v1252_v49  ;;  %v1066_v50 = vpop.permute.xlu0 %1065 }
 0x276   :  { %v1219_v53 = vmul.f32 %v1182_v34, %v1066_v50  ;;  %v1009_v34 = vrot.slane %v7784_v35, 6 }
 0x277   :  { %v1436_v57 = vadd.f32 %v7808_v51, %v1360_v56 }
 0x278   :  { %v927_v59 = vpop.f32.mrf.mxu2 }
 0x279   :  { %v1468_v61 = vmax.f32 %v1436_v57, 0.0  ;;  %v7851_v11 = vadd.f32 %v7688_v0, %v927_v59 }
 0x27b   :  { %v1497_v62 = vpack.c.bf16 %v1468_v61, %v1467_v60  ;;  %10361 = vst [vmem:[#allocation13_spill] sm:$0xff] %v7851_v11 }
 0x27c   :  { %v1362_v1 = vpop.f32.mrf.mxu3 }
 0x27d   :  { %6593 = vmatmul.msk.bf16.gmra.mxu2 %vm608_vm0, %v1497_v62  ;;  %v1363_v12 = vadd.f32 %v1362_v1, %v1216_v8  ;;  %v1008_v1 = vrot.slane %v7784_v35, 5 }
 0x27f   :  { %v1437_v20 = vadd.f32 %v7808_v51, %v1363_v12  ;;  %v1183_v12 = vperm.slane %v1008_v1, 0 }
 0x280   :  { %v929_v10 = vpop.f32.mrf.mxu2 }
 0x281   :  { %v7854_v13 = vadd.f32 %v7688_v0, %v929_v10  ;;  %v1469_v28 = vmax.f32 %v1437_v20, 0.0 }
 0x283   :  { %10362 = vst [vmem:[#allocation14_spill] sm:$0xff] %v7854_v13  ;;  %v1253_v15 = vpack.c.bf16 %v7854_v13, %v7851_v11 }
 0x284   :  { %v1364_v19 = vpop.f32.mrf.mxu3 }
 0x285   :  { %v1365_v24 = vadd.f32 %v1364_v19, %v1217_v18  ;;  %6570 = vmatmul.msk.bf16.gmra.mxu3 %vm608_vm0, %v1253_v15  ;;  %v1071_v18 = vpop.permute.xlu1 %1070 }
 0x286   :  { %v1220_v19 = vmul.f32 %v1183_v12, %v1071_v18 }
 0x287   :  { %v1438_v25 = vadd.f32 %v7808_v51, %v1365_v24  ;;  %v1076_v24 = vpop.permute.xlu2 %1075 }
 0x288   :  { %v932_v27 = vpop.f32.mrf.mxu2  ;;  %v1221_v26 = vmul.f32 %v1183_v12, %v1076_v24 }
 0x289   :  { %v1470_v31 = vmax.f32 %v1438_v25, 0.0  ;;  %v7864_v46 = vadd.f32 %v7688_v0, %v932_v27 }
 0x28b   :  { %v1498_v33 = vpack.c.bf16 %v1470_v31, %v1469_v28  ;;  %10363 = vst [vmem:[#allocation15_spill] sm:$0xff] %v7864_v46 }
 0x28c   :  { %v1367_v23 = vpop.f32.mrf.mxu3 }
 0x28d   :  { %6594 = vmatmul.msk.bf16.gmra.mxu2 %vm608_vm0, %v1498_v33  ;;  %v1368_v48 = vadd.f32 %v1367_v23, %v1218_v38 }
 0x28f   :  { %v1439_v57 = vadd.f32 %v7808_v51, %v1368_v48 }
 0x290   :  { %v934_v40 = vpop.f32.mrf.mxu2 }
 0x291   :  { %v7867_v49 = vadd.f32 %v7688_v0, %v934_v40  ;;  %v1471_v61 = vmax.f32 %v1439_v57, 0.0  ;;  %v1081_v57 = vpop.permute.xlu0 %1080 }
 0x293   :  { %10364 = vst [vmem:[#allocation16_spill] sm:$0xff] %v7867_v49  ;;  %v1254_v52 = vpack.c.bf16 %v7867_v49, %v7864_v46  ;;  %v8225_v46 = vld [vmem:[%s7816_s27] ss:$0 sm:$0xff] }
 0x294   :  { %v1369_v56 = vpop.f32.mrf.mxu3 }
 0x295   :  { %v1370_v58 = vadd.f32 %v1369_v56, %v1219_v53  ;;  %6571 = vmatmul.msk.bf16.gmra.mxu3 %vm608_vm0, %v1254_v52  ;;  %v1184_v52 = vperm.slane %v1009_v34, 0 }
 0x297   :  { %v1440_v59 = vadd.f32 %v7808_v51, %v1370_v58  ;;  %v1222_v58 = vmul.f32 %v1184_v52, %v1081_v57  ;;  %v1186_v57 = vperm.slane %v7795_v39, 0 }
 0x298   :  { %v937_v60 = vpop.f32.mrf.mxu2 }
 0x299   :  { %v1472_v62 = vmax.f32 %v1440_v59, 0.0  ;;  %v7877_v8 = vadd.f32 %v7688_v0, %v937_v60  ;;  %v1086_v60 = vpop.permute.xlu1 %1085  ;;  %v1096_v34 = vpop.permute.xlu0 %1095 }
 0x29b   :  { %v1499_v63 = vpack.c.bf16 %v1472_v62, %v1471_v61  ;;  %10365 = vst [vmem:[#allocation17_spill] sm:$0xff] %v7877_v8  ;;  %v1223_v62 = vmul.f32 %v1184_v52, %v1086_v60 }
 0x29d   :  { %6595 = vmatmul.msk.bf16.gmra.mxu2 %vm608_vm0, %v1499_v63 }
 0x2a0   :  { %v939_v2 = vpop.f32.mrf.mxu2 }
 0x2a1   :  { %v7880_v10 = vadd.f32 %v7688_v0, %v939_v2 }
 0x2a2   :  { %v1372_v14 = vpop.f32.mrf.mxu3 }
 0x2a3   :  { %10366 = vst [vmem:[#allocation18_spill] sm:$0xff] %v7880_v10  ;;  %v1255_v15 = vpack.c.bf16 %v7880_v10, %v7877_v8  ;;  %v1373_v20 = vadd.f32 %v1372_v14, %v1220_v19  ;;  %v1010_v14 = vrot.slane %v7784_v35, 7 }
 0x2a5   :  { %6572 = vmatmul.msk.bf16.gmra.mxu3 %vm608_vm0, %v1255_v15  ;;  %v1441_v28 = vadd.f32 %v7808_v51, %v1373_v20 }
 0x2a7   :  { %v1473_v23 = vmax.f32 %v1441_v28, 0.0 }
 0x2a8   :  { %v942_v25 = vpop.f32.mrf.mxu2 }
 0x2a9   :  { %v7889_v40 = vadd.f32 %v7688_v0, %v942_v25 }
 0x2aa   :  { %v1374_v27 = vpop.f32.mrf.mxu3 }
 0x2ab   :  { %v1375_v31 = vadd.f32 %v1374_v27, %v1221_v26  ;;  %10367 = vst [vmem:[#allocation19_spill] sm:$0xff] %v7889_v40  ;;  %v1185_v26 = vperm.slane %v1010_v14, 0 }
 0x2ad   :  { %v1442_v33 = vadd.f32 %v7808_v51, %v1375_v31  ;;  %v1091_v31 = vpop.permute.xlu2 %1090 }
 0x2af   :  { %v1474_v32 = vmax.f32 %v1442_v33, 0.0  ;;  %v1224_v33 = vmul.f32 %v1185_v26, %v1091_v31 }
 0x2b0   :  { %v944_v38 = vpop.f32.mrf.mxu2 }
 0x2b1   :  { %v1500_v48 = vpack.c.bf16 %v1474_v32, %v1473_v23  ;;  %v7892_v50 = vadd.f32 %v7688_v0, %v944_v38  ;;  %v1225_v23 = vmul.f32 %v1185_v26, %v1096_v34 }
 0x2b2   :  { %v1377_v53 = vpop.f32.mrf.mxu3 }
 0x2b3   :  { %10368 = vst [vmem:[#allocation20_spill] sm:$0xff] %v7892_v50  ;;  %v1256_v56 = vpack.c.bf16 %v7892_v50, %v7889_v40  ;;  %6596 = vmatmul.msk.bf16.gmra.mxu2 %vm608_vm0, %v1500_v48  ;;  %v1378_v59 = vadd.f32 %v1377_v53, %v1222_v58 }
 0x2b5   :  { %6573 = vmatmul.msk.bf16.gmra.mxu3 %vm608_vm0, %v1256_v56  ;;  %v1443_v1 = vadd.f32 %v7808_v51, %v1378_v59  ;;  %v1101_v59 = vpop.permute.xlu1 %1100 }
 0x2b6   :  { %v1226_v60 = vmul.f32 %v1186_v57, %v1101_v59 }
 0x2b7   :  { %v1475_v15 = vmax.f32 %v1443_v1, 0.0 }
 0x2b8   :  { %v947_v61 = vpop.f32.mrf.mxu2 }
 0x2b9   :  { %v7902_v20 = vadd.f32 %v7688_v0, %v947_v61 }
 0x2ba   :  { %v1379_v63 = vpop.f32.mrf.mxu3 }
 0x2bb   :  { %v1380_v2 = vadd.f32 %v1379_v63, %v1223_v62  ;;  %10369 = vst [vmem:[#allocation21_spill] sm:$0xff] %v7902_v20  ;;  %v1106_v62 = vpop.permute.xlu2 %1105 }
 0x2bc   :  { %v1227_v63 = vmul.f32 %v1186_v57, %v1106_v62 }
 0x2bd   :  { %v1444_v12 = vadd.f32 %v7808_v51, %v1380_v2 }
 0x2bf   :  { %v1476_v18 = vmax.f32 %v1444_v12, 0.0 }
 0x2c0   :  { %v949_v19 = vpop.f32.mrf.mxu2 }
 0x2c1   :  { %v1501_v24 = vpack.c.bf16 %v1476_v18, %v1475_v15  ;;  %v7905_v25 = vadd.f32 %v7688_v0, %v949_v19  ;;  %v7918_v15 = vld [vmem:[%s7816_s27] ss:$0 sm:$0xff]  ;;  %v1011_v18 = vrot.slane %v7795_v39, 1 }
 0x2c2   :  { %v1382_v27 = vpop.f32.mrf.mxu3 }
 0x2c3   :  { %10370 = vst [vmem:[#allocation22_spill] sm:$0xff] %v7905_v25  ;;  %v1257_v28 = vpack.c.bf16 %v7905_v25, %v7902_v20  ;;  %6597 = vmatmul.msk.bf16.gmra.mxu2 %vm608_vm0, %v1501_v24  ;;  %v1383_v35 = vadd.f32 %v1382_v27, %v1224_v33  ;;  %v1187_v31 = vperm.slane %v1011_v18, 0  ;;  %v7923_v33 = vld [vmem:[%s7830_s1] ss:$0 sm:$0xff] }
 0x2c5   :  { %6574 = vmatmul.msk.bf16.gmra.mxu3 %vm608_vm0, %v1257_v28  ;;  %v1445_v38 = vadd.f32 %v7808_v51, %v1383_v35 }
 0x2c7   :  { %v1477_v52 = vmax.f32 %v1445_v38, 0.0 }
 0x2ca   :  { %v1384_v32 = vpop.f32.mrf.mxu3 }
 0x2cb   :  { %v1385_v48 = vadd.f32 %v1384_v32, %v1225_v23  ;;  %v1111_v23 = vpop.permute.xlu0 %1110 }
 0x2cc   :  { %v1228_v32 = vmul.f32 %v1187_v31, %v1111_v23 }
 0x2cd   :  { %v1446_v0 = vadd.f32 %v7808_v51, %v1385_v48 }
 0x2cf   :  { %v1478_v53 = vmax.f32 %v1446_v0, 0.0 }
 0x2d1   :  { %v1502_v56 = vpack.c.bf16 %v1478_v53, %v1477_v52  ;;  %v1116_v52 = vpop.permute.xlu1 %1115 }
 0x2d2   :  { %v1387_v58 = vpop.f32.mrf.mxu3  ;;  %v1229_v57 = vmul.f32 %v1187_v31, %v1116_v52 }
 0x2d3   :  { %6598 = vmatmul.msk.bf16.gmra.mxu2 %vm608_vm0, %v1502_v56  ;;  %v1388_v61 = vadd.f32 %v1387_v58, %v1226_v60 }
 0x2d5   :  { %v1447_v2 = vadd.f32 %v7808_v51, %v1388_v61 }
 0x2d7   :  { %v1479_v19 = vmax.f32 %v1447_v2, 0.0 }
 0x2da   :  { %v1389_v1 = vpop.f32.mrf.mxu3 }
 0x2db   :  { %v1390_v12 = vadd.f32 %v1389_v1, %v1227_v63 }
 0x2dd   :  { %v1448_v14 = vadd.f32 %v7808_v51, %v1390_v12 }
 0x2df   :  { %v1480_v24 = vmax.f32 %v1448_v14, 0.0 }
 0x2e0   :  { %v1604_v26 = vpop.f32.mrf.mxu2 }
 0x2e1   :  { %v1503_v27 = vpack.c.bf16 %v1480_v24, %v1479_v19  ;;  %v1605_v28 = vadd.f32 %v7918_v15, %v1604_v26  ;;  %v1012_v26 = vrot.slane %v7795_v39, 2 }
 0x2e2   :  { %v1392_v35 = vpop.f32.mrf.mxu3 }
 0x2e3   :  { %v1684_v34 = vmax.f32 %v1605_v28, 0.0  ;;  %6599 = vmatmul.msk.bf16.gmra.mxu2 %vm608_vm0, %v1503_v27  ;;  %v1393_v48 = vadd.f32 %v1392_v35, %v1228_v32  ;;  %v1188_v28 = vperm.slane %v1012_v26, 0  ;;  %v1121_v32 = vpop.permute.xlu2 %1120 }
 0x2e5   :  { %v1720_v38 = vmul.f32 %v7923_v33, %v1684_v34  ;;  %v1449_v59 = vadd.f32 %v7808_v51, %v1393_v48 }
 0x2e7   :  { %v1752_v0 = vsel %vm814_vm1, %v1720_v38, 0.0  ;;  %v1481_v1 = vmax.f32 %v1449_v59, 0.0  ;;  %v1230_v38 = vmul.f32 %v1188_v28, %v1121_v32 }
 0x2e8   :  { %v1606_v53 = vpop.f32.mrf.mxu2  ;;  %1753 = vadd.xlane.f32.xlu2 %v1752_v0 }
 0x2e9   :  { %v1607_v56 = vadd.f32 %v7918_v15, %v1606_v53  ;;  %v1126_v53 = vpop.permute.xlu0 %1125 }
 0x2ea   :  { %v1394_v58 = vpop.f32.mrf.mxu3 }
 0x2eb   :  { %v1685_v60 = vmax.f32 %v1607_v56, 0.0  ;;  %v1395_v61 = vadd.f32 %v1394_v58, %v1229_v57  ;;  %v1231_v56 = vmul.f32 %v1188_v28, %v1126_v53 }
 0x2ed   :  { %v1450_v62 = vadd.f32 %v7808_v51, %v1395_v61  ;;  %v1721_v63 = vmul.f32 %v7923_v33, %v1685_v60 }
 0x2ef   :  { %v1482_v2 = vmax.f32 %v1450_v62, 0.0  ;;  %v1755_v12 = vsel %vm814_vm1, %v1721_v63, 0.0 }
 0x2f0   :  { %v1609_v14 = vpop.f32.mrf.mxu2  ;;  %1756 = vadd.xlane.f32.xlu0 %v1755_v12 }
 0x2f1   :  { %v1504_v18 = vpack.c.bf16 %v1482_v2, %v1481_v1  ;;  %v1610_v19 = vadd.f32 %v7918_v15, %v1609_v14  ;;  %v1013_v2 = vrot.slane %v7795_v39, 3 }
 0x2f3   :  { %v1686_v24 = vmax.f32 %v1610_v19, 0.0  ;;  %6600 = vmatmul.msk.bf16.gmra.mxu2 %vm608_vm0, %v1504_v18 }
 0x2f5   :  { %v1722_v27 = vmul.f32 %v7923_v33, %v1686_v24  ;;  %v1189_v24 = vperm.slane %v1013_v2, 0 }
 0x2f7   :  { %v1758_v31 = vsel %vm814_vm1, %v1722_v27, 0.0 }
 0x2f8   :  { %v1397_v35 = vpop.f32.mrf.mxu3  ;;  %v1611_v34 = vpop.f32.mrf.mxu2  ;;  %1759 = vadd.xlane.f32.xlu1 %v1758_v31 }
 0x2f9   :  { %v1612_v23 = vadd.f32 %v7918_v15, %v1611_v34  ;;  %v1398_v0 = vadd.f32 %v1397_v35, %v1230_v38  ;;  %v1131_v35 = vpop.permute.xlu1 %1130 }
 0x2fa   :  { %v1232_v34 = vmul.f32 %v1189_v24, %v1131_v35 }
 0x2fb   :  { %v1687_v48 = vmax.f32 %v1612_v23, 0.0  ;;  %v1451_v60 = vadd.f32 %v7808_v51, %v1398_v0 }
 0x2fd   :  { %v1723_v52 = vmul.f32 %v7923_v33, %v1687_v48  ;;  %v1483_v12 = vmax.f32 %v1451_v60, 0.0  ;;  %v1136_v48 = vpop.permute.xlu2 %1135 }
 0x2fe   :  { %v1233_v0 = vmul.f32 %v1189_v24, %v1136_v48 }
 0x2ff   :  { %v1761_v57 = vsel %vm814_vm1, %v1723_v52, 0.0 }
 0x300   :  { %v1399_v58 = vpop.f32.mrf.mxu3  ;;  %v1614_v59 = vpop.f32.mrf.mxu2  ;;  %1762 = vadd.xlane.f32.xlu2 %v1761_v57 }
 0x301   :  { %v1400_v61 = vadd.f32 %v1399_v58, %v1231_v56  ;;  %v1615_v62 = vadd.f32 %v7918_v15, %v1614_v59 }
 0x303   :  { %v1452_v63 = vadd.f32 %v7808_v51, %v1400_v61  ;;  %v1688_v1 = vmax.f32 %v1615_v62, 0.0  ;;  %v1014_v62 = vrot.slane %v7795_v39, 4 }
 0x305   :  { %v1484_v14 = vmax.f32 %v1452_v63, 0.0  ;;  %v1724_v18 = vmul.f32 %v7923_v33, %v1688_v1 }
 0x307   :  { %v1505_v19 = vpack.c.bf16 %v1484_v14, %v1483_v12  ;;  %v1764_v26 = vsel %vm814_vm1, %v1724_v18, 0.0  ;;  %v1190_v14 = vperm.slane %v1014_v62, 0 }
 0x308   :  { %v1402_v27 = vpop.f32.mrf.mxu3  ;;  %v1616_v28 = vpop.f32.mrf.mxu2  ;;  %1765 = vadd.xlane.f32.xlu0 %v1764_v26 }
 0x309   :  { %v1617_v31 = vadd.f32 %v7918_v15, %v1616_v28  ;;  %6601 = vmatmul.msk.bf16.gmra.mxu2 %vm608_vm0, %v1505_v19  ;;  %v1403_v32 = vadd.f32 %v1402_v27, %v1232_v34  ;;  %v1141_v27 = vpop.permute.xlu0 %1140 }
 0x30a   :  { %v1234_v28 = vmul.f32 %v1190_v14, %v1141_v27 }
 0x30b   :  { %v1689_v23 = vmax.f32 %v1617_v31, 0.0  ;;  %v1453_v57 = vadd.f32 %v7808_v51, %v1403_v32 }
 0x30d   :  { %v1725_v38 = vmul.f32 %v7923_v33, %v1689_v23  ;;  %v1485_v63 = vmax.f32 %v1453_v57, 0.0  ;;  %v1146_v23 = vpop.permute.xlu1 %1145 }
 0x30e   :  { %v1235_v32 = vmul.f32 %v1190_v14, %v1146_v23 }
 0x30f   :  { %v1767_v52 = vsel %vm814_vm1, %v1725_v38, 0.0 }
 0x310   :  { %v1404_v53 = vpop.f32.mrf.mxu3  ;;  %v1619_v56 = vpop.f32.mrf.mxu2  ;;  %1768 = vadd.xlane.f32.xlu1 %v1767_v52 }
 0x311   :  { %v1405_v58 = vadd.f32 %v1404_v53, %v1233_v0  ;;  %v1620_v59 = vadd.f32 %v7918_v15, %v1619_v56 }
 0x313   :  { %v1454_v60 = vadd.f32 %v7808_v51, %v1405_v58  ;;  %v1690_v61 = vmax.f32 %v1620_v59, 0.0  ;;  %v1015_v59 = vrot.slane %v7795_v39, 5 }
 0x315   :  { %v1486_v1 = vmax.f32 %v1454_v60, 0.0  ;;  %v1726_v2 = vmul.f32 %v7923_v33, %v1690_v61 }
 0x317   :  { %v1506_v12 = vpack.c.bf16 %v1486_v1, %v1485_v63  ;;  %v1770_v18 = vsel %vm814_vm1, %v1726_v2, 0.0  ;;  %v1191_v1 = vperm.slane %v1015_v59, 0 }
 0x318   :  { %v1407_v19 = vpop.f32.mrf.mxu3  ;;  %v1621_v24 = vpop.f32.mrf.mxu2  ;;  %1771 = vadd.xlane.f32.xlu1 %v1770_v18 }
 0x319   :  { %v1622_v26 = vadd.f32 %v7918_v15, %v1621_v24  ;;  %6602 = vmatmul.msk.bf16.gmra.mxu2 %vm608_vm0, %v1506_v12  ;;  %v1408_v35 = vadd.f32 %v1407_v19, %v1234_v28  ;;  %v1151_v19 = vpop.permute.xlu2 %1150 }
 0x31a   :  { %v1236_v24 = vmul.f32 %v1191_v1, %v1151_v19 }
 0x31b   :  { %v1691_v31 = vmax.f32 %v1622_v26, 0.0  ;;  %v1455_v52 = vadd.f32 %v7808_v51, %v1408_v35 }
 0x31d   :  { %v1727_v34 = vmul.f32 %v7923_v33, %v1691_v31  ;;  %v1487_v60 = vmax.f32 %v1455_v52, 0.0  ;;  %v1156_v31 = vpop.permute.xlu0 %1155 }
 0x31e   :  { %v1237_v35 = vmul.f32 %v1191_v1, %v1156_v31 }
 0x31f   :  { %v1773_v38 = vsel %vm814_vm1, %v1727_v34, 0.0 }
 0x320   :  { %v1409_v48 = vpop.f32.mrf.mxu3  ;;  %v1624_v0 = vpop.f32.mrf.mxu2  ;;  %1774 = vadd.xlane.f32.xlu2 %v1773_v38 }
 0x321   :  { %v1410_v53 = vadd.f32 %v1409_v48, %v1235_v32  ;;  %v1625_v56 = vadd.f32 %v7918_v15, %v1624_v0  ;;  %v102_v48 = vstv %s6343_s5  ;;  %v1016_v0 = vrot.slane %v7795_v39, 6 }
 0x322   :  { %103 = vst [vmem:[#allocation2] sm:$0x1] %v102_v48 }
 0x323   :  { %v1456_v57 = vadd.f32 %v7808_v51, %v1410_v53  ;;  %v1692_v58 = vmax.f32 %v1625_v56, 0.0 }
 0x325   :  { %v1488_v61 = vmax.f32 %v1456_v57, 0.0  ;;  %v1728_v62 = vmul.f32 %v7923_v33, %v1692_v58  ;;  %v1192_v58 = vperm.slane %v1016_v0, 0 }
 0x327   :  { %v1507_v63 = vpack.c.bf16 %v1488_v61, %v1487_v60  ;;  %v1776_v2 = vsel %vm814_vm1, %v1728_v62, 0.0 }
 0x328   :  { %v1412_v12 = vpop.f32.mrf.mxu3  ;;  %v1626_v14 = vpop.f32.mrf.mxu2  ;;  %1777 = vadd.xlane.f32.xlu2 %v1776_v2 }
 0x329   :  { %v1627_v18 = vadd.f32 %v7918_v15, %v1626_v14  ;;  %6603 = vmatmul.msk.bf16.gmra.mxu2 %vm608_vm0, %v1507_v63  ;;  %v1413_v27 = vadd.f32 %v1412_v12, %v1236_v24  ;;  %v1161_v63 = vpop.permute.xlu1 %1160  ;;  %v1166_v12 = vpop.permute.xlu2 %1165 }
 0x32a   :  { %v1238_v1 = vmul.f32 %v1192_v58, %v1161_v63  ;;  %v1239_v24 = vmul.f32 %v1192_v58, %v1166_v12  ;;  %v1171_v58 = vpop.permute.xlu0 %1170 }
 0x32b   :  { %v1693_v26 = vmax.f32 %v1627_v18, 0.0  ;;  %v1457_v32 = vadd.f32 %v7808_v51, %v1413_v27 }
 0x32d   :  { %v1729_v28 = vmul.f32 %v7923_v33, %v1693_v26  ;;  %v1489_v53 = vmax.f32 %v1457_v32, 0.0 }
 0x32f   :  { %v1779_v34 = vsel %vm814_vm1, %v1729_v28, 0.0 }
 0x330   :  { %v1414_v23 = vpop.f32.mrf.mxu3  ;;  %1780 = vadd.xlane.f32.xlu0 %v1779_v34  ;;  %v1017_v34 = vrot.slane %v7795_v39, 7 }
 0x331   :  { %v1415_v38 = vadd.f32 %v1414_v23, %v1237_v35 }
 0x333   :  { %v1458_v52 = vadd.f32 %v7808_v51, %v1415_v38 }
 0x335   :  { %v1490_v56 = vmax.f32 %v1458_v52, 0.0 }
 0x336   :  { %v1629_v57 = vpop.f32.mrf.mxu2 }
 0x337   :  { %v1508_v59 = vpack.c.bf16 %v1490_v56, %v1489_v53  ;;  %v1630_v60 = vadd.f32 %v7918_v15, %v1629_v57  ;;  %v1193_v53 = vperm.slane %v1017_v34, 0 }
 0x338   :  { %v1417_v61 = vpop.f32.mrf.mxu3 }
 0x339   :  { %v1694_v62 = vmax.f32 %v1630_v60, 0.0  ;;  %6604 = vmatmul.msk.bf16.gmra.mxu2 %vm608_vm0, %v1508_v59  ;;  %v1418_v14 = vadd.f32 %v1417_v61, %v1238_v1  ;;  %v1240_v39 = vmul.f32 %v1193_v53, %v1171_v58 }
 0x33b   :  { %v1730_v2 = vmul.f32 %v7923_v33, %v1694_v62  ;;  %v1459_v28 = vadd.f32 %v7808_v51, %v1418_v14  ;;  %v1176_v62 = vpop.permute.xlu1 %1175 }
 0x33c   :  { %v1241_v12 = vmul.f32 %v1193_v53, %v1176_v62 }
 0x33d   :  { %v1782_v18 = vsel %vm814_vm1, %v1730_v2, 0.0  ;;  %v1491_v38 = vmax.f32 %v1459_v28, 0.0 }
 0x33e   :  { %v1631_v19 = vpop.f32.mrf.mxu2  ;;  %1783 = vadd.xlane.f32.xlu0 %v1782_v18 }
 0x33f   :  { %v1632_v26 = vadd.f32 %v7918_v15, %v1631_v19 }
 0x340   :  { %v1419_v27 = vpop.f32.mrf.mxu3 }
 0x341   :  { %v1695_v31 = vmax.f32 %v1632_v26, 0.0  ;;  %v1420_v35 = vadd.f32 %v1419_v27, %v1239_v24 }
 0x343   :  { %v1460_v23 = vadd.f32 %v7808_v51, %v1420_v35  ;;  %v1731_v32 = vmul.f32 %v7923_v33, %v1695_v31 }
 0x345   :  { %v1492_v48 = vmax.f32 %v1460_v23, 0.0  ;;  %v1785_v0 = vsel %vm814_vm1, %v1731_v32, 0.0 }
 0x346   :  { %v1634_v52 = vpop.f32.mrf.mxu2  ;;  %1786 = vadd.xlane.f32.xlu1 %v1785_v0 }
 0x347   :  { %v1509_v56 = vpack.c.bf16 %v1492_v48, %v1491_v38  ;;  %v1635_v57 = vadd.f32 %v7918_v15, %v1634_v52  ;;  %v7999_v52 = vld [vmem:[#allocation2] ss:$0 sm:$0xff] }
 0x348   :  { %v1422_v59 = vpop.f32.mrf.mxu3 }
 0x349   :  { %v1696_v60 = vmax.f32 %v1635_v57, 0.0  ;;  %6605 = vmatmul.msk.bf16.gmra.mxu2 %vm608_vm0, %v1509_v56  ;;  %v1423_v63 = vadd.f32 %v1422_v59, %v1240_v39  ;;  %v8005_v59 = vld [vmem:[%s7602_s7] sm:$0xff]  ;;  %v8009_v39 = vld [vmem:[%s7602_s7 + $0x8] sm:$0xff] }
 0x34a   :  { %vm1884_vm2 = vcmp.gt.f32.partialorder %v8005_v59, 0.0  ;;  %vm1885_vm3 = vcmp.gt.f32.partialorder %v8009_v39, 0.0 }
 0x34b   :  { %v1732_v61 = vmul.f32 %v7923_v33, %v1696_v60  ;;  %v1461_v19 = vadd.f32 %v7808_v51, %v1423_v63 }
 0x34d   :  { %v1788_v1 = vsel %vm814_vm1, %v1732_v61, 0.0  ;;  %v1493_v31 = vmax.f32 %v1461_v19, 0.0 }
 0x34e   :  { %v1636_v2 = vpop.f32.mrf.mxu2  ;;  %1789 = vadd.xlane.f32.xlu1 %v1788_v1 }
 0x34f   :  { %v1637_v14 = vadd.f32 %v7918_v15, %v1636_v2 }
 0x350   :  { %v1424_v18 = vpop.f32.mrf.mxu3 }
 0x351   :  { %v1697_v24 = vmax.f32 %v1637_v14, 0.0  ;;  %v1425_v26 = vadd.f32 %v1424_v18, %v1241_v12 }
 0x353   :  { %v1462_v27 = vadd.f32 %v7808_v51, %v1425_v26  ;;  %v1733_v28 = vmul.f32 %v7923_v33, %v1697_v24 }
 0x355   :  { %v1494_v35 = vmax.f32 %v1462_v27, 0.0  ;;  %v1791_v34 = vsel %vm814_vm1, %v1733_v28, 0.0 }
 0x356   :  { %v1639_v23 = vpop.f32.mrf.mxu2  ;;  %1792 = vadd.xlane.f32.xlu2 %v1791_v34 }
 0x357   :  { %v1510_v32 = vpack.c.bf16 %v1494_v35, %v1493_v31  ;;  %v1640_v38 = vadd.f32 %v7918_v15, %v1639_v23 }
 0x359   :  { %v1698_v48 = vmax.f32 %v1640_v38, 0.0  ;;  %6606 = vmatmul.msk.bf16.gmra.mxu2 %vm608_vm0, %v1510_v32 }
 0x35b   :  { %v1734_v0 = vmul.f32 %v7923_v33, %v1698_v48  ;;  %v1754_v51 = vpop.xlane.xlu2 %1753 }
 0x35c   :  { %v1852_v58 = vadd.f32 %v7999_v52, %v1754_v51 }
 0x35d   :  { %v1794_v53 = vsel %vm814_vm1, %v1734_v0, 0.0 }
 0x35e   :  { %v1641_v56 = vpop.f32.mrf.mxu2  ;;  %1795 = vadd.xlane.f32.xlu2 %v1794_v53  ;;  %v1916_v63 = vsel %vm1884_vm2, %v1852_v58, -1e+30  ;;  %v8023_v53 = vld [vmem:[%s7602_s7 + $0x10] sm:$0xff]  ;;  %v8027_v58 = vld [vmem:[%s7602_s7 + $0x18] sm:$0xff] }
 0x35f   :  { %v1642_v57 = vadd.f32 %v7918_v15, %v1641_v56  ;;  %v1949_v18 = vsel %vm1948_vm4, %v1916_v63, -inf  ;;  %vm1886_vm5 = vcmp.gt.f32.partialorder %v8023_v53, 0.0  ;;  %vm1887_vm6 = vcmp.gt.f32.partialorder %v8027_v58, 0.0 }
 0x361   :  { %v1699_v60 = vmax.f32 %v1642_v57, 0.0 }
 0x363   :  { %v1757_v61 = vpop.xlane.xlu0 %1756  ;;  %v1735_v62 = vmul.f32 %v7923_v33, %v1699_v60 }
 0x364   :  { %v1853_v1 = vadd.f32 %v7999_v52, %v1757_v61 }
 0x365   :  { %v1797_v2 = vsel %vm814_vm1, %v1735_v62, 0.0 }
 0x366   :  { %v1917_v12 = vsel %vm1885_vm3, %v1853_v1, -1e+30  ;;  %v1644_v14 = vpop.f32.mrf.mxu2  ;;  %1798 = vadd.xlane.f32.xlu0 %v1797_v2 }
 0x367   :  { %v1950_v19 = vsel %vm1948_vm4, %v1917_v12, -inf  ;;  %v1645_v24 = vadd.f32 %v7918_v15, %v1644_v14 }
 0x368   :  { %v1951_v26 = vmax.f32 %v1949_v18, %v1950_v19 }
 0x369   :  { %v1700_v27 = vmax.f32 %v1645_v24, 0.0 }
 0x36a   :  { %v1952_v28 = vrot.slane %v1951_v26, 4 }
 0x36b   :  { %v1736_v31 = vmul.f32 %v7923_v33, %v1700_v27  ;;  %v1760_v34 = vpop.xlane.xlu1 %1759 }
 0x36c   :  { %v1953_v35 = vmax.f32 %v1951_v26, %v1952_v28  ;;  %v1854_v51 = vadd.f32 %v7999_v52, %v1760_v34 }
 0x36d   :  { %v1800_v23 = vsel %vm814_vm1, %v1736_v31, 0.0 }
 0x36e   :  { %v1954_v32 = vrot.slane %v1953_v35, 2  ;;  %v1646_v38 = vpop.f32.mrf.mxu2  ;;  %1801 = vadd.xlane.f32.xlu2 %v1800_v23  ;;  %v8031_v1 = vsel %vm1886_vm5, %v1854_v51, -1e+30 }
 0x36f   :  { %v1647_v48 = vadd.f32 %v7918_v15, %v1646_v38  ;;  %v1958_v27 = vsel %vm1948_vm4, %v8031_v1, -inf }
 0x370   :  { %v1955_v0 = vmax.f32 %v1953_v35, %v1954_v32 }
 0x371   :  { %v1701_v56 = vmax.f32 %v1647_v48, 0.0 }
 0x372   :  { %v1956_v57 = vrot.slane %v1955_v0, 1 }
 0x373   :  { %v1763_v60 = vpop.xlane.xlu2 %1762  ;;  %v1737_v61 = vmul.f32 %v7923_v33, %v1701_v56 }
 0x374   :  { %v1957_v62 = vmax.f32 %v1955_v0, %v1956_v57  ;;  %v1855_v2 = vadd.f32 %v7999_v52, %v1763_v60 }
 0x375   :  { %v1803_v14 = vsel %vm814_vm1, %v1737_v61, 0.0 }
 0x376   :  { %v2093_v18 = vsub.f32 %v1916_v63, %v1957_v62  ;;  %v2094_v19 = vsub.f32 %v1917_v12, %v1957_v62  ;;  %v1919_v24 = vsel %vm1887_vm6, %v1855_v2, -1e+30  ;;  %v1649_v26 = vpop.f32.mrf.mxu2  ;;  %1804 = vadd.xlane.f32.xlu0 %v1803_v14  ;;  %v8044_v14 = vld [vmem:[%s7602_s7 + $0x20] sm:$0xff] }
 0x377   :  { %v1959_v28 = vsel %vm1948_vm4, %v1919_v24, -inf  ;;  %v1650_v31 = vadd.f32 %v7918_v15, %v1649_v26  ;;  %vm1888_vm7 = vcmp.gt.f32.partialorder %v8044_v14, 0.0 }
 0x378   :  { %v2125_v35 = vmul.f32 1.442695, %v2093_v18  ;;  %v2127_v34 = vmul.f32 1.442695, %v2094_v19  ;;  %v1960_v23 = vmax.f32 %v1958_v27, %v1959_v28  ;;  %v8054_v27 = vld [vmem:[%s7602_s7 + $0x28] sm:$0xff] }
 0x379   :  { %v1702_v32 = vmax.f32 %v1650_v31, 0.0  ;;  %vm1889_vm8 = vcmp.gt.f32.partialorder %v8054_v27, 0.0 }
 0x37a   :  { %7177 = vpow2.f32 %v2125_v35  ;;  %v1961_v38 = vrot.slane %v1960_v23, 4 }
 0x37b   :  { %7179 = vpow2.f32 %v2127_v34  ;;  %v1738_v63 = vmul.f32 %v7923_v33, %v1702_v32  ;;  %v1766_v48 = vpop.xlane.xlu0 %1765 }
 0x37c   :  { %v1962_v12 = vmax.f32 %v1960_v23, %v1961_v38  ;;  %v1856_v62 = vadd.f32 %v7999_v52, %v1766_v48 }
 0x37d   :  { %v1806_v0 = vsel %vm814_vm1, %v1738_v63, 0.0 }
 0x37e   :  { %v1963_v51 = vrot.slane %v1962_v12, 2  ;;  %v1651_v56 = vpop.f32.mrf.mxu2  ;;  %1807 = vadd.xlane.f32.xlu1 %v1806_v0  ;;  %v8060_v23 = vsel %vm1888_vm7, %v1856_v62, -1e+30 }
 0x37f   :  { %v1652_v57 = vadd.f32 %v7918_v15, %v1651_v56  ;;  %v1967_v48 = vsel %vm1948_vm4, %v8060_v23, -inf }
 0x380   :  { %v7178_v60 = vpop.eup %7177  ;;  %v1964_v61 = vmax.f32 %v1962_v12, %v1963_v51 }
 0x381   :  { %v7180_v2 = vpop.eup %7179  ;;  %v1703_v18 = vmax.f32 %v1652_v57, 0.0  ;;  %v8048_v19 = vmul.f32 %v8005_v59, %v7178_v60 }
 0x382   :  { %v8051_v26 = vmul.f32 %v8009_v39, %v7180_v2  ;;  %v1965_v28 = vrot.slane %v1964_v61, 1 }
 0x383   :  { %v1769_v31 = vpop.xlane.xlu1 %1768  ;;  %v1739_v35 = vmul.f32 %v7923_v33, %v1703_v18  ;;  %v2221_v34 = vsel %vm1948_vm4, %v8048_v19, 0.0 }
 0x384   :  { %v1857_v32 = vadd.f32 %v7999_v52, %v1769_v31  ;;  %v2222_v59 = vsel %vm1948_vm4, %v8051_v26, 0.0  ;;  %v1966_v12 = vmax.f32 %v1964_v61, %v1965_v28 }
 0x385   :  { %v1809_v39 = vsel %vm814_vm1, %v1739_v35, 0.0  ;;  %v2223_v38 = vadd.f32 %v2222_v59, %v2221_v34 }
 0x386   :  { %v8066_v63 = vsel %vm1889_vm8, %v1857_v32, -1e+30  ;;  %1810 = vadd.xlane.f32.xlu2 %v1809_v39  ;;  %v2095_v62 = vsub.f32 %v8031_v1, %v1966_v12  ;;  %v2096_v18 = vsub.f32 %v1919_v24, %v1966_v12  ;;  %v8081_v12 = vld [vmem:[%s7602_s7 + $0x38] sm:$0xff] }
 0x387   :  { %v1968_v0 = vsel %vm1948_vm4, %v8066_v63, -inf  ;;  %v2224_v51 = vrot.slane %v2223_v38, 4  ;;  %vm1891_vm10 = vcmp.gt.f32.partialorder %v8081_v12, 0.0 }
 0x388   :  { %v1969_v56 = vmax.f32 %v1967_v48, %v1968_v0  ;;  %v2129_v32 = vmul.f32 1.442695, %v2095_v62  ;;  %v2131_v25 = vmul.f32 1.442695, %v2096_v18  ;;  %v8076_v48 = vld [vmem:[%s7602_s7 + $0x30] sm:$0xff] }
 0x389   :  { %v2225_v57 = vadd.f32 %v2224_v51, %v2223_v38  ;;  %vm1890_vm9 = vcmp.gt.f32.partialorder %v8076_v48, 0.0 }
 0x38a   :  { %v1970_v60 = vrot.slane %v1969_v56, 4  ;;  %7181 = vpow2.f32 %v2129_v32 }
 0x38b   :  { %v2226_v2 = vrot.slane %v2225_v57, 2  ;;  %v1772_v34 = vpop.xlane.xlu1 %1771  ;;  %7183 = vpow2.f32 %v2131_v25 }
 0x38c   :  { %v1971_v31 = vmax.f32 %v1969_v56, %v1970_v60  ;;  %v1654_v35 = vpop.f32.mrf.mxu2  ;;  %v1858_v38 = vadd.f32 %v7999_v52, %v1772_v34 }
 0x38d   :  { %v1655_v61 = vadd.f32 %v7918_v15, %v1654_v35  ;;  %v2227_v28 = vadd.f32 %v2226_v2, %v2225_v57 }
 0x38e   :  { %v1972_v59 = vrot.slane %v1971_v31, 2  ;;  %v8090_v60 = vsel %vm1890_vm9, %v1858_v38, -1e+30 }
 0x38f   :  { %v1704_v39 = vmax.f32 %v1655_v61, 0.0  ;;  %v2228_v37 = vrot.slane %v2227_v28, 1  ;;  %v1976_v35 = vsel %vm1948_vm4, %v8090_v60, -inf }
 0x390   :  { %v1973_v0 = vmax.f32 %v1971_v31, %v1972_v59 }
 0x391   :  { %v1740_v1 = vmul.f32 %v7923_v33, %v1704_v39  ;;  %v2229_v24 = vadd.f32 %v2228_v37, %v2227_v28  ;;  %v7182_v28 = vpop.eup %7181 }
 0x392   :  { %v1974_v31 = vrot.slane %v1973_v0, 1  ;;  %v7184_v59 = vpop.eup %7183 }
 0x393   :  { %v1775_v51 = vpop.xlane.xlu2 %1774  ;;  %v1812_v56 = vsel %vm814_vm1, %v1740_v1, 0.0  ;;  %v2365_v57 = vadd.f32 1e-10, %v2229_v24 }
 0x394   :  { %v1859_v37 = vadd.f32 %v7999_v52, %v1775_v51  ;;  %v1656_v62 = vpop.f32.mrf.mxu2  ;;  %1813 = vadd.xlane.f32.xlu2 %v1812_v56  ;;  %v1975_v1 = vmax.f32 %v1973_v0, %v1974_v31  ;;  %v7047_v51 = vld [vmem:[%s8088_s10 + $0x38] sm:$0xff] }
 0x395   :  { %v1657_v2 = vadd.f32 %v7918_v15, %v1656_v62  ;;  %7185 = vrcp.f32 %v2365_v57  ;;  %3384 = vmatpush.bf16.msrb.mxu3 %v7047_v51  ;;  %vm2386_vm14 = vweird.f32 %v2365_v57 }
 0x396   :  { %v8094_v18 = vsel %vm1891_vm10, %v1859_v37, -1e+30 }
 0x397   :  { %v1977_v34 = vsel %vm1948_vm4, %v8094_v18, -inf  ;;  %v1705_v25 = vmax.f32 %v1657_v2, 0.0  ;;  %v8105_v2 = vmul.f32 %v8023_v53, %v7182_v28 }
 0x398   :  { %v1978_v61 = vmax.f32 %v1976_v35, %v1977_v34  ;;  %v8108_v35 = vmul.f32 %v8027_v58, %v7184_v59  ;;  %v8111_v34 = vld [vmem:[%s7602_s7 + $0x48] sm:$0xff]  ;;  %v8118_v58 = vld [vmem:[%s7602_s7 + $0x40] sm:$0xff] }
 0x399   :  { %v1741_v32 = vmul.f32 %v7923_v33, %v1705_v25  ;;  %vm1893_vm11 = vcmp.gt.f32.partialorder %v8111_v34, 0.0  ;;  %v2390_v25 = vand.u32 2147483647, %v2365_v57  ;;  %vm1892_vm13 = vcmp.gt.f32.partialorder %v8118_v58, 0.0 }
 0x39a   :  { %v1979_v39 = vrot.slane %v1978_v61, 4 }
 0x39b   :  { %v7186_v38 = vpop.eup %7185  ;;  %v1815_v24 = vsel %vm814_vm1, %v1741_v32, 0.0  ;;  %v1778_v36 = vpop.xlane.xlu2 %1777  ;;  %v2098_v32 = vsub.f32 %v8066_v63, %v1975_v1  ;;  %vm2391_vm15 = vcmp.eq.f32.partialorder %v2390_v25, 8.507059e+37 }
 0x39c   :  { %v1980_v56 = vmax.f32 %v1978_v61, %v1979_v39  ;;  %v1659_v37 = vpop.f32.mrf.mxu2  ;;  %1816 = vadd.xlane.f32.xlu0 %v1815_v24  ;;  %v2382_v62 = vmul.f32 %v7186_v38, %v2365_v57  ;;  %v2097_v61 = vsub.f32 %v8060_v23, %v1975_v1  ;;  %v2392_v24 = vand.u32 2147483648, %v2365_v57 }
 0x39d   :  { %v1660_v20 = vadd.f32 %v7918_v15, %v1659_v37  ;;  %v1860_v53 = vadd.f32 %v7999_v52, %v1778_v36  ;;  %vm2387_vm12 = vweird.f32 %v7186_v38  ;;  %v2230_v37 = vsel %vm1948_vm4, %v8105_v2, 0.0 }
 0x39e   :  { %v1981_v0 = vrot.slane %v1980_v56, 2  ;;  %v2383_v31 = vsub.f32 1.0, %v2382_v62  ;;  %v2231_v23 = vsel %vm1948_vm4, %v8108_v35, 0.0  ;;  %v2133_v1 = vmul.f32 1.442695, %v2097_v61  ;;  %vm2388_vm2 = vmor %vm2386_vm14, %vm2387_vm12 }
 0x39f   :  { %v1706_v39 = vmax.f32 %v1660_v20, 0.0  ;;  %v2135_v36 = vmul.f32 1.442695, %v2098_v32  ;;  %v1924_v40 = vsel %vm1892_vm13, %v1860_v53, -1e+30 }
 0x3a0   :  { %v1982_v51 = vmax.f32 %v1980_v56, %v1981_v0  ;;  %v2384_v28 = vmul.f32 %v7186_v38, %v2383_v31  ;;  %v2393_v0 = vor.u32 1.1754944e-38, %v2392_v24  ;;  %7187 = vpow2.f32 %v2133_v1 }
 0x3a1   :  { %v1742_v59 = vmul.f32 %v7923_v33, %v1706_v39  ;;  %v1985_v32 = vsel %vm1948_vm4, %v1924_v40, -inf  ;;  %7189 = vpow2.f32 %v2135_v36 }
 0x3a2   :  { %v1983_v63 = vrot.slane %v1982_v51, 1  ;;  %v2385_v20 = vadd.f32 %v7186_v38, %v2384_v28 }
 0x3a3   :  { %v1781_v56 = vpop.xlane.xlu0 %1780  ;;  %v1818_v62 = vsel %vm814_vm1, %v1742_v59, 0.0 }
 0x3a4   :  { %v1984_v31 = vmax.f32 %v1982_v51, %v1983_v63  ;;  %v1861_v39 = vadd.f32 %v7999_v52, %v1781_v56  ;;  %v8128_v50 = vpop.f32.mrf.mxu2  ;;  %1819 = vadd.xlane.f32.xlu0 %v1818_v62  ;;  %v2389_v8 = vsel %vm2388_vm2, %v7186_v38, %v2385_v20  ;;  %v2232_v51 = vadd.f32 %v2231_v23, %v2230_v37 }
 0x3a5   :  { %v2394_v10 = vsel %vm2391_vm15, %v2393_v0, %v2389_v8  ;;  %vm1900_vm15 = vcmp.gt.f32.partialorder %v8316_v54, 0.0 }
 0x3a6   :  { %v2099_v28 = vsub.f32 %v8090_v60, %v1984_v31  ;;  %v2100_v57 = vsub.f32 %v8094_v18, %v1984_v31  ;;  %v1925_v25 = vsel %vm1893_vm11, %v1861_v39, -1e+30  ;;  %v2396_v61 = vmul.f32 %v2394_v10, %v8051_v26  ;;  %v7188_v20 = vpop.eup %7187 }
 0x3a7   :  { %v1986_v24 = vsel %vm1948_vm4, %v1925_v25, -inf  ;;  %v2233_v60 = vrot.slane %v2232_v51, 4  ;;  %v7190_v26 = vpop.eup %7189  ;;  %v8140_v37 = vmul.f32 %v8044_v14, %v7188_v20 }
 0x3a8   :  { %v2137_v53 = vmul.f32 1.442695, %v2099_v28  ;;  %v2139_v59 = vmul.f32 1.442695, %v2100_v57  ;;  %v1987_v38 = vmax.f32 %v1985_v32, %v1986_v24  ;;  %2644 = vperm.xlu1 %7147, %v2396_v61   ;;  %v8143_v23 = vmul.f32 %v8054_v27, %v7190_v26 }
 0x3a9   :  { %v2234_v56 = vadd.f32 %v2233_v60, %v2232_v51  ;;  %v2239_v14 = vsel %vm1948_vm4, %v8140_v37, 0.0 }
 0x3aa   :  { %7191 = vpow2.f32 %v2137_v53  ;;  %v1988_v8 = vrot.slane %v1987_v38, 4  ;;  %v2240_v27 = vsel %vm1948_vm4, %v8143_v23, 0.0 }
 0x3ab   :  { %7193 = vpow2.f32 %v2139_v59  ;;  %v2235_v28 = vrot.slane %v2234_v56, 2 }
 0x3ac   :  { %v1989_v18 = vmax.f32 %v1987_v38, %v1988_v8  ;;  %v8137_v63 = vpop.f32.mrf.mxu2  ;;  %v2395_v8 = vmul.f32 %v2394_v10, %v8048_v19 }
 0x3ad   :  { %v2236_v60 = vadd.f32 %v2235_v28, %v2234_v56 }
 0x3ae   :  { %v1990_v1 = vrot.slane %v1989_v18, 2 }
 0x3b0   :  { %v7192_v62 = vpop.eup %7191  ;;  %v1991_v0 = vmax.f32 %v1989_v18, %v1990_v1  ;;  %v2241_v1 = vadd.f32 %v2240_v27, %v2239_v14 }
 0x3b1   :  { %v7194_v31 = vpop.eup %7193  ;;  %v1784_v39 = vpop.xlane.xlu0 %1783  ;;  %v8146_v32 = vmul.f32 %v8076_v48, %v7192_v62  ;;  %v8159_v48 = vld [vmem:[%s7602_s7 + $0x50] sm:$0xff] }
 0x3b2   :  { %v1992_v36 = vrot.slane %v1991_v0, 1  ;;  %v8149_v24 = vmul.f32 %v8081_v12, %v7194_v31  ;;  %v1862_v38 = vadd.f32 %v7999_v52, %v1784_v39  ;;  %vm1894_vm3 = vcmp.gt.f32.partialorder %v8159_v48, 0.0 }
 0x3b3   :  { %v2248_v26 = vsel %vm1948_vm4, %v8146_v32, 0.0  ;;  %v2237_v31 = vrot.slane %v2236_v60, 1  ;;  %v2242_v14 = vrot.slane %v2241_v1, 4 }
 0x3b4   :  { %v1993_v57 = vmax.f32 %v1991_v0, %v1992_v36  ;;  %v1666_v61 = vpop.f32.mrf.mxu2  ;;  %v8171_v62 = vsel %vm1894_vm3, %v1862_v38, -1e+30 }
 0x3b5   :  { %v1667_v51 = vadd.f32 %v7918_v15, %v1666_v61 }
 0x3b6   :  { %v2101_v53 = vsub.f32 %v1924_v40, %v1993_v57  ;;  %v2102_v59 = vsub.f32 %v1925_v25, %v1993_v57  ;;  %v2249_v40 = vsel %vm1948_vm4, %v8149_v24, 0.0  ;;  %v8167_v25 = vld [vmem:[%s7602_s7 + $0x58] sm:$0xff]  ;;  %v1994_v57 = vsel %vm1948_vm4, %v8171_v62, -inf }
 0x3b7   :  { %v1709_v12 = vmax.f32 %v1667_v51, 0.0  ;;  %vm1895_vm5 = vcmp.gt.f32.partialorder %v8167_v25, 0.0  ;;  %v2250_v36 = vadd.f32 %v2249_v40, %v2248_v26  ;;  %v7046_v26 = vld [vmem:[%s8088_s10 + $0x30] sm:$0xff]  ;;  %v2243_v40 = vadd.f32 %v2242_v14, %v2241_v1 }
 0x3b8   :  { %v2141_v18 = vmul.f32 1.442695, %v2101_v53  ;;  %v2143_v20 = vmul.f32 1.442695, %v2102_v59  ;;  %2639 = vperm.xlu0 %7146, %v2395_v8   ;;  %v2238_v59 = vadd.f32 %v2237_v31, %v2236_v60  ;;  %3385 = vmatpush.bf16.msrb.mxu3 %v7046_v26 }
 0x3b9   :  { %v1787_v10 = vpop.xlane.xlu1 %1786  ;;  %v1745_v19 = vmul.f32 %v7923_v33, %v1709_v12  ;;  %v2251_v38 = vrot.slane %v2250_v36, 4 }
 0x3ba   :  { %7195 = vpow2.f32 %v2141_v18  ;;  %v1863_v56 = vadd.f32 %v7999_v52, %v1787_v10  ;;  %v8188_v60 = vadd.f32 1e-10, %v2238_v59 }
 0x3bb   :  { %7197 = vpow2.f32 %v2143_v20  ;;  %v1827_v0 = vsel %vm814_vm1, %v1745_v19, 0.0  ;;  %v2252_v31 = vadd.f32 %v2251_v38, %v2250_v36 }
 0x3bc   :  { %v1927_v39 = vsel %vm1895_vm5, %v1863_v56, -1e+30  ;;  %v1669_v28 = vpop.f32.mrf.mxu2  ;;  %1828 = vadd.xlane.f32.xlu2 %v1827_v0  ;;  %7199 = vrcp.f32 %v8188_v60  ;;  %vm2402_vm12 = vweird.f32 %v8188_v60 }
 0x3bd   :  { %v1995_v61 = vsel %vm1948_vm4, %v1927_v39, -inf  ;;  %v1670_v51 = vadd.f32 %v7918_v15, %v1669_v28 }
 0x3be   :  { %v1996_v27 = vmax.f32 %v1994_v57, %v1995_v61  ;;  %v1662_v57 = vadd.f32 %v7918_v15, %v8128_v50  ;;  %v2253_v50 = vrot.slane %v2252_v31, 2 }
 0x3bf   :  { %v1710_v53 = vmax.f32 %v1670_v51, 0.0  ;;  %v2244_v51 = vrot.slane %v2243_v40, 2 }
 0x3c0   :  { %v7196_v8 = vpop.eup %7195  ;;  %v1997_v12 = vrot.slane %v1996_v27, 4  ;;  %v1707_v59 = vmax.f32 %v1662_v57, 0.0 }
 0x3c1   :  { %v7198_v18 = vpop.eup %7197  ;;  %v1746_v20 = vmul.f32 %v7923_v33, %v1710_v53  ;;  %v8182_v10 = vmul.f32 %v8118_v58, %v7196_v8  ;;  %v1790_v0 = vpop.xlane.xlu1 %1789  ;;  %v8198_v53 = vld [vmem:[%s7602_s7 + $0x60] sm:$0xff]  ;;  %v8203_v8 = vld [vmem:[%s7602_s7 + $0x68] sm:$0xff] }
 0x3c2   :  { %v1998_v19 = vmax.f32 %v1996_v27, %v1997_v12  ;;  %v8185_v56 = vmul.f32 %v8111_v34, %v7198_v18  ;;  %v1864_v27 = vadd.f32 %v7999_v52, %v1790_v0  ;;  %vm1896_vm6 = vcmp.gt.f32.partialorder %v8198_v53, 0.0 }
 0x3c3   :  { %v1830_v28 = vsel %vm814_vm1, %v1746_v20, 0.0  ;;  %v2257_v58 = vsel %vm1948_vm4, %v8182_v10, 0.0  ;;  %vm1897_vm7 = vcmp.gt.f32.partialorder %v8203_v8, 0.0  ;;  %v2245_v18 = vadd.f32 %v2244_v51, %v2243_v40 }
 0x3c4   :  { %v1999_v1 = vrot.slane %v1998_v19, 2  ;;  %v1671_v61 = vpop.f32.mrf.mxu2  ;;  %1831 = vadd.xlane.f32.xlu2 %v1830_v28  ;;  %v2258_v34 = vsel %vm1948_vm4, %v8185_v56, 0.0  ;;  %v8206_v26 = vsel %vm1896_vm6, %v1864_v27, -1e+30  ;;  %v2254_v28 = vadd.f32 %v2253_v50, %v2252_v31 }
 0x3c5   :  { %v2259_v36 = vadd.f32 %v2258_v34, %v2257_v58  ;;  %v1743_v58 = vmul.f32 %v7923_v33, %v1707_v59  ;;  %v8213_v34 = vpop.eup %7199  ;;  %v1665_v40 = vadd.f32 %v7918_v15, %v8137_v63  ;;  %v2003_v51 = vsel %vm1948_vm4, %v8206_v26, -inf }
 0x3c6   :  { %v2000_v14 = vmax.f32 %v1998_v19, %v1999_v1  ;;  %v2246_v31 = vrot.slane %v2245_v18, 1  ;;  %v2398_v59 = vmul.f32 %v8213_v34, %v8188_v60  ;;  %vm2403_vm10 = vweird.f32 %v8213_v34 }
 0x3c7   :  { %v2260_v0 = vrot.slane %v2259_v36, 4  ;;  %v1708_v15 = vmax.f32 %v1665_v40, 0.0  ;;  %v1821_v63 = vsel %vm814_vm1, %v1743_v58, 0.0  ;;  %vm8301_vm14 = vmor %vm2402_vm12, %vm2403_vm10 }
 0x3c8   :  { %v2001_v38 = vrot.slane %v2000_v14, 1 }
 0x3c9   :  { %v1793_v12 = vpop.xlane.xlu2 %1792  ;;  %v2261_v50 = vadd.f32 %v2260_v0, %v2259_v36 }
 0x3ca   :  { %v2002_v20 = vmax.f32 %v2000_v14, %v2001_v38  ;;  %v1865_v19 = vadd.f32 %v7999_v52, %v1793_v12  ;;  %v2255_v38 = vrot.slane %v2254_v28, 1  ;;  %v2247_v12 = vadd.f32 %v2246_v31, %v2245_v18 }
 0x3cc   :  { %v2103_v1 = vsub.f32 %v8171_v62, %v2002_v20  ;;  %v2104_v22 = vsub.f32 %v1927_v39, %v2002_v20  ;;  %v8210_v21 = vsel %vm1897_vm7, %v1865_v19, -1e+30  ;;  %v1674_v57 = vpop.f32.mrf.mxu2  ;;  %v2262_v19 = vrot.slane %v2261_v50, 2 }
 0x3cd   :  { %v2004_v14 = vsel %vm1948_vm4, %v8210_v21, -inf  ;;  %v2256_v0 = vadd.f32 %v2255_v38, %v2254_v28  ;;  %v8233_v58 = vadd.f32 1e-10, %v2247_v12 }
 0x3ce   :  { %v2145_v62 = vmul.f32 1.442695, %v2103_v1  ;;  %v2147_v39 = vmul.f32 1.442695, %v2104_v22  ;;  %v2005_v27 = vmax.f32 %v2003_v51, %v2004_v14  ;;  %v1672_v22 = vadd.f32 %v8225_v46, %v1671_v61 }
 0x3cf   :  { %v2399_v14 = vsub.f32 1.0, %v2398_v59  ;;  %v8240_v38 = vadd.f32 1e-10, %v2256_v0  ;;  %vm2418_vm3 = vweird.f32 %v8233_v58 }
 0x3d0   :  { %7201 = vpow2.f32 %v2145_v62  ;;  %v2006_v33 = vrot.slane %v2005_v27, 4  ;;  %v8230_v62 = vld [vmem:[%s7830_s1] ss:$0 sm:$0xff]  ;;  %v1711_v28 = vmax.f32 %v1672_v22, 0.0 }
 0x3d1   :  { %7203 = vpow2.f32 %v2147_v39  ;;  %v1796_v36 = vpop.xlane.xlu2 %1795  ;;  %v1744_v18 = vmul.f32 %v8230_v62, %v1708_v15  ;;  %v2400_v12 = vmul.f32 %v8213_v34, %v2399_v14  ;;  %v1675_v14 = vadd.f32 %v8225_v46, %v1674_v57 }
 0x3d2   :  { %v2007_v20 = vmax.f32 %v2005_v27, %v2006_v33  ;;  %1822 = vadd.xlane.f32.xlu1 %v1821_v63  ;;  %v1866_v27 = vadd.f32 %v7999_v52, %v1796_v36  ;;  %v2263_v33 = vadd.f32 %v2262_v19, %v2261_v50  ;;  %v8237_v63 = vld [vmem:[%s7602_s7 + $0x70] sm:$0xff]  ;;  %7205 = vrcp.f32 %v8233_v58 }
 0x3d3   :  { %vm1898_vm8 = vcmp.gt.f32.partialorder %v8237_v63, 0.0  ;;  %v1824_v36 = vsel %vm814_vm1, %v1744_v18, 0.0  ;;  %7207 = vrcp.f32 %v8240_v38  ;;  %vm2434_vm5 = vweird.f32 %v8240_v38 }
 0x3d4   :  { %v2008_v1 = vrot.slane %v2007_v20, 2  ;;  %v1676_v51 = vpop.f32.mrf.mxu2  ;;  %v8257_v0 = vsel %vm1898_vm8, %v1866_v27, -1e+30 }
 0x3d5   :  { %v1677_v40 = vadd.f32 %v8225_v46, %v1676_v51  ;;  %v8246_v51 = vld [vmem:[%s7602_s7 + $0x78] sm:$0xff]  ;;  %v2012_v57 = vsel %vm1948_vm4, %v8257_v0, -inf }
 0x3d6   :  { %v7202_v31 = vpop.eup %7201  ;;  %v2009_v39 = vmax.f32 %v2007_v20, %v2008_v1  ;;  %vm1899_vm9 = vcmp.gt.f32.partialorder %v8246_v51, 0.0 }
 0x3d7   :  { %v7204_v61 = vpop.eup %7203  ;;  %v8243_v59 = vmul.f32 %v8159_v48, %v7202_v31  ;;  %v1713_v20 = vmax.f32 %v1677_v40, 0.0  ;;  %v2264_v31 = vrot.slane %v2263_v33, 1 }
 0x3d8   :  { %v2010_v15 = vrot.slane %v2009_v39, 1  ;;  %v8251_v50 = vmul.f32 %v8167_v25, %v7204_v61  ;;  %v1747_v25 = vmul.f32 %v8230_v62, %v1711_v28 }
 0x3d9   :  { %v1799_v19 = vpop.xlane.xlu0 %1798  ;;  %v2266_v48 = vsel %vm1948_vm4, %v8243_v59, 0.0 }
 0x3da   :  { %v2011_v22 = vmax.f32 %v2009_v39, %v2010_v15  ;;  %v1867_v1 = vadd.f32 %v7999_v52, %v1799_v19  ;;  %1825 = vadd.xlane.f32.xlu1 %v1824_v36  ;;  %v2267_v40 = vsel %vm1948_vm4, %v8251_v50, 0.0  ;;  %v1749_v36 = vmul.f32 %v8230_v62, %v1713_v20 }
 0x3db   :  { %v2268_v15 = vadd.f32 %v2267_v40, %v2266_v48  ;;  %v2406_v48 = vand.u32 2147483647, %v8188_v60  ;;  %v2401_v20 = vadd.f32 %v8213_v34, %v2400_v12 }
 0x3dc   :  { %v2105_v18 = vsub.f32 %v8206_v26, %v2011_v22  ;;  %v2106_v61 = vsub.f32 %v8210_v21, %v2011_v22  ;;  %v8269_v39 = vsel %vm1899_vm9, %v1867_v1, -1e+30  ;;  %v1679_v27 = vpop.f32.mrf.mxu2  ;;  %v2265_v21 = vadd.f32 %v2264_v31, %v2263_v33  ;;  %v8277_v22 = vpop.eup %7205 }
 0x3dd   :  { %v2013_v28 = vsel %vm1948_vm4, %v8269_v39, -inf  ;;  %v1680_v19 = vadd.f32 %v8225_v46, %v1679_v27  ;;  %v2408_v1 = vand.u32 2147483648, %v8188_v60  ;;  %v2269_v40 = vrot.slane %v2268_v15, 4 }
 0x3de   :  { %v2149_v13 = vmul.f32 1.442695, %v2105_v18  ;;  %v2151_v26 = vmul.f32 1.442695, %v2106_v61  ;;  %v2014_v49 = vmax.f32 %v2012_v57, %v2013_v28  ;;  %v1833_v27 = vsel %vm814_vm1, %v1747_v25, 0.0  ;;  %v8284_v18 = vpop.eup %7207  ;;  %v7045_v57 = vld [vmem:[%s8088_s10 + $0x28] sm:$0xff] }
 0x3df   :  { %v1712_v33 = vmax.f32 %v1675_v14, 0.0  ;;  %v1714_v31 = vmax.f32 %v1680_v19, 0.0  ;;  %v1839_v61 = vsel %vm814_vm1, %v1749_v36, 0.0  ;;  %v8288_v11 = vadd.f32 1e-10, %v2265_v21  ;;  %3386 = vmatpush.bf16.msrb.mxu3 %v7045_v57 }
 0x3e0   :  { %7209 = vpow2.f32 %v2149_v13  ;;  %v2015_v7 = vrot.slane %v2014_v49, 4  ;;  %v2270_v6 = vadd.f32 %v2269_v40, %v2268_v15  ;;  %v8291_v13 = vld [vmem:[%s7602_s7 + $0x88] sm:$0xff]  ;;  %vm8295_vm13 = vcmp.eq.f32.partialorder %v2406_v48, 8.507059e+37 }
 0x3e1   :  { %7211 = vpow2.f32 %v2151_v26  ;;  %vm1901_vm11 = vcmp.gt.f32.partialorder %v8291_v13, 0.0  ;;  %v1802_v25 = vpop.xlane.xlu2 %1801  ;;  %v2409_v15 = vor.u32 1.1754944e-38, %v2408_v1  ;;  %v2430_v19 = vmul.f32 %v8284_v18, %v8240_v38 }
 0x3e2   :  { %v2016_v28 = vmax.f32 %v2014_v49, %v2015_v7  ;;  %1840 = vadd.xlane.f32.xlu1 %v1839_v61  ;;  %1834 = vadd.xlane.f32.xlu0 %v1833_v27  ;;  %v2271_v36 = vrot.slane %v2270_v6, 2  ;;  %v1750_v26 = vmul.f32 %v8230_v62, %v1714_v31  ;;  %v1748_v21 = vmul.f32 %v8230_v62, %v1712_v33 }
 0x3e3   :  { %v2405_v48 = vsel %vm8301_vm14, %v8213_v34, %v2401_v20  ;;  %v1868_v61 = vadd.f32 %v7999_v52, %v1802_v25  ;;  %7213 = vrcp.f32 %v8288_v11  ;;  %v2414_v33 = vmul.f32 %v8277_v22, %v8233_v58 }
 0x3e4   :  { %v2017_v14 = vrot.slane %v2016_v28, 2  ;;  %v1681_v7 = vpop.f32.mrf.mxu2  ;;  %v2272_v1 = vadd.f32 %v2271_v36, %v2270_v6  ;;  %v2431_v20 = vsub.f32 1.0, %v2430_v19  ;;  %v1842_v6 = vsel %vm814_vm1, %v1750_v26, 0.0 }
 0x3e5   :  { %v1682_v60 = vadd.f32 %v8225_v46, %v1681_v7  ;;  %v1836_v7 = vsel %vm814_vm1, %v1748_v21, 0.0  ;;  %v8332_v41 = vsel %vm1900_vm15, %v1868_v61, -1e+30  ;;  %v8340_v26 = vsel %vm8295_vm13, %v2409_v15, %v2405_v48 }
 0x3e6   :  { %v7210_v40 = vpop.eup %7209  ;;  %v2018_v27 = vmax.f32 %v2016_v28, %v2017_v14  ;;  %v2273_v25 = vrot.slane %v2272_v1, 1  ;;  %v2432_v15 = vmul.f32 %v8284_v18, %v2431_v20  ;;  %vm2435_vm2 = vweird.f32 %v8284_v18 }
 0x3e7   :  { %v7212_v57 = vpop.eup %7211  ;;  %v1715_v46 = vmax.f32 %v1682_v60, 0.0  ;;  %v8322_v31 = vmul.f32 %v8198_v53, %v7210_v40  ;;  %vm8371_vm6 = vmor %vm2434_vm5, %vm2435_vm2  ;;  %vm2419_vm7 = vweird.f32 %v8277_v22  ;;  %vm2450_vm12 = vweird.f32 %v8288_v11 }
 0x3e8   :  { %v2019_v34 = vrot.slane %v2018_v27, 1  ;;  %v8325_v28 = vmul.f32 %v8203_v8, %v7212_v57  ;;  %v2433_v20 = vadd.f32 %v8284_v18, %v2432_v15  ;;  %vm8389_vm10 = vmor %vm2418_vm3, %vm2419_vm7 }
 0x3e9   :  { %v1805_v14 = vpop.xlane.xlu0 %1804  ;;  %v1751_v49 = vmul.f32 %v8230_v62, %v1715_v46  ;;  %v2275_v36 = vsel %vm1948_vm4, %v8322_v31, 0.0  ;;  %v2415_v62 = vsub.f32 1.0, %v2414_v33  ;;  %v8342_v40 = vpop.eup %7213  ;;  %v2274_v46 = vadd.f32 %v2273_v25, %v2272_v1 }
 0x3ea   :  { %v2020_v60 = vmax.f32 %v2018_v27, %v2019_v34  ;;  %v1869_v53 = vadd.f32 %v7999_v52, %v1805_v14  ;;  %1843 = vadd.xlane.f32.xlu1 %v1842_v6  ;;  %1837 = vadd.xlane.f32.xlu0 %v1836_v7  ;;  %v2276_v8 = vsel %vm1948_vm4, %v8325_v28, 0.0  ;;  %v2021_v34 = vsel %vm1948_vm4, %v8332_v41, -inf }
 0x3eb   :  { %v1845_v19 = vsel %vm814_vm1, %v1751_v49, 0.0  ;;  %v2277_v21 = vadd.f32 %v2276_v8, %v2275_v36  ;;  %v2446_v6 = vmul.f32 %v8342_v40, %v8288_v11  ;;  %v2416_v7 = vmul.f32 %v8277_v22, %v2415_v62 }
 0x3ec   :  { %v2107_v27 = vsub.f32 %v8257_v0, %v2020_v60  ;;  %v2108_v61 = vsub.f32 %v8269_v39, %v2020_v60  ;;  %v8348_v57 = vsel %vm1901_vm11, %v1869_v53, -1e+30  ;;  %1846 = vadd.xlane.f32.xlu2 %v1845_v19  ;;  %v8357_v39 = vmul.f32 %v8340_v26, %v8108_v35 }
 0x3ed   :  { %v2022_v12 = vsel %vm1948_vm4, %v8348_v57, -inf  ;;  %v2278_v48 = vrot.slane %v2277_v21, 4  ;;  %v8362_v49 = vadd.f32 1e-10, %v2274_v46  ;;  %v2440_v35 = vand.u32 2147483648, %v8240_v38 }
 0x3ee   :  { %v2153_v33 = vmul.f32 1.442695, %v2107_v27  ;;  %v2155_v14 = vmul.f32 1.442695, %v2108_v61  ;;  %v2023_v0 = vmax.f32 %v2021_v34, %v2022_v12  ;;  %v2424_v8 = vand.u32 2147483648, %v8233_v58 }
 0x3ef   :  { %v2279_v1 = vadd.f32 %v2278_v48, %v2277_v21  ;;  %v2438_v19 = vand.u32 2147483647, %v8240_v38  ;;  %v2447_v62 = vsub.f32 1.0, %v2446_v6  ;;  %v2417_v46 = vadd.f32 %v8277_v22, %v2416_v7 }
 0x3f0   :  { %7215 = vpow2.f32 %v2153_v33  ;;  %v2024_v25 = vrot.slane %v2023_v0, 4  ;;  %v2437_v12 = vsel %vm8371_vm6, %v8284_v18, %v2433_v20  ;;  %v2422_v38 = vand.u32 2147483647, %v8233_v58 }
 0x3f1   :  { %7217 = vpow2.f32 %v2155_v14  ;;  %v2280_v36 = vrot.slane %v2279_v1, 2  ;;  %v1808_v53 = vpop.xlane.xlu1 %1807  ;;  %v8384_v14 = vld [vmem:[%s7602_s7 + $0x90] sm:$0xff]  ;;  %v2425_v6 = vor.u32 1.1754944e-38, %v2424_v8  ;;  %vm2439_vm9 = vcmp.eq.f32.partialorder %v2438_v19, 8.507059e+37  ;;  %v8408_v8 = vld [vmem:[%s7602_s7 + $0x98] sm:$0xff] }
 0x3f2   :  { %v2025_v60 = vmax.f32 %v2023_v0, %v2024_v25  ;;  %7219 = vrcp.f32 %v8362_v49  ;;  %v1870_v34 = vadd.f32 %v7999_v52, %v1808_v53  ;;  %vm1902_vm8 = vcmp.gt.f32.partialorder %v8384_v14, 0.0 }
 0x3f3   :  { %v2281_v21 = vadd.f32 %v2280_v36, %v2279_v1  ;;  %v2441_v0 = vor.u32 1.1754944e-38, %v2440_v35  ;;  %v2448_v18 = vmul.f32 %v8342_v40, %v2447_v62  ;;  %v2421_v53 = vsel %vm8389_vm10, %v8277_v22, %v2417_v46 }
 0x3f4   :  { %v2026_v27 = vrot.slane %v2025_v60, 2  ;;  %v8405_v58 = vsel %vm1902_vm8, %v1870_v34, -1e+30  ;;  %vm1903_vm11 = vcmp.gt.f32.partialorder %v8408_v8, 0.0  ;;  %vm2451_vm13 = vweird.f32 %v8342_v40 }
 0x3f5   :  { %v2282_v15 = vrot.slane %v2281_v21, 1  ;;  %v2449_v61 = vadd.f32 %v8342_v40, %v2448_v18  ;;  %v2454_v46 = vand.u32 2147483647, %v8288_v11  ;;  %vm2423_vm14 = vcmp.eq.f32.partialorder %v2422_v38, 8.507059e+37  ;;  %vm8441_vm15 = vmor %vm2450_vm12, %vm2451_vm13 }
 0x3f6   :  { %v7216_v48 = vpop.eup %7215  ;;  %v2027_v33 = vmax.f32 %v2025_v60, %v2026_v27  ;;  %v8397_v60 = vsel %vm2439_vm9, %v2441_v0, %v2437_v12  ;;  %vm2466_vm8 = vweird.f32 %v8362_v49 }
 0x3f7   :  { %v7218_v1 = vpop.eup %7217  ;;  %v2283_v7 = vadd.f32 %v2282_v15, %v2281_v21  ;;  %v8395_v20 = vmul.f32 %v8237_v63, %v7216_v48  ;;  %v2030_v48 = vsel %vm1948_vm4, %v8405_v58, -inf  ;;  %vm2455_vm2 = vcmp.eq.f32.partialorder %v2454_v46, 8.507059e+37 }
 0x3f8   :  { %v2028_v36 = vrot.slane %v2027_v33, 1  ;;  %v8403_v35 = vmul.f32 %v8246_v51, %v7218_v1  ;;  %v8414_v62 = vpop.eup %7219 }
 0x3f9   :  { %v1811_v19 = vpop.xlane.xlu2 %1810  ;;  %v8412_v63 = vadd.f32 1e-10, %v2283_v7  ;;  %v2284_v51 = vsel %vm1948_vm4, %v8395_v20, 0.0  ;;  %v2462_v0 = vmul.f32 %v8414_v62, %v8362_v49  ;;  %vm2467_vm3 = vweird.f32 %v8414_v62 }
 0x3fa   :  { %v2029_v21 = vmax.f32 %v2027_v33, %v2028_v36  ;;  %v1871_v27 = vadd.f32 %v7999_v52, %v1811_v19  ;;  %v2285_v22 = vsel %vm1948_vm4, %v8403_v35, 0.0  ;;  %v2456_v52 = vand.u32 2147483648, %v8288_v11  ;;  %vm8501_vm9 = vmor %vm2466_vm8, %vm2467_vm3 }
 0x3fb   :  { %7221 = vrcp.f32 %v8412_v63  ;;  %v2286_v1 = vadd.f32 %v2285_v22, %v2284_v51  ;;  %v2453_v36 = vsel %vm8441_vm15, %v8342_v40, %v2449_v61  ;;  %v2463_v11 = vsub.f32 1.0, %v2462_v0 }
 0x3fc   :  { %v2109_v34 = vsub.f32 %v8332_v41, %v2029_v21  ;;  %v2110_v12 = vsub.f32 %v8348_v57, %v2029_v21  ;;  %v8427_v15 = vsel %vm1903_vm11, %v1871_v27, -1e+30  ;;  %v2426_v57 = vsel %vm2423_vm14, %v2425_v6, %v2421_v53 }
 0x3fd   :  { %v2031_v33 = vsel %vm1948_vm4, %v8427_v15, -inf  ;;  %v2287_v19 = vrot.slane %v2286_v1, 4  ;;  %v2457_v38 = vor.u32 1.1754944e-38, %v2456_v52  ;;  %v2411_v6 = vmul.f32 %v8340_v26, %v8105_v2 }
 0x3fe   :  { %v2157_v25 = vmul.f32 1.442695, %v2109_v34  ;;  %v2159_v18 = vmul.f32 1.442695, %v2110_v12  ;;  %v2032_v7 = vmax.f32 %v2030_v48, %v2031_v33  ;;  %2654 = vperm.xlu0 %7146, %v8357_v39   ;;  %v2444_v39 = vmul.f32 %v8397_v60, %v8149_v24 }
 0x3ff   :  { %v2288_v51 = vadd.f32 %v2287_v19, %v2286_v1  ;;  %v2458_v53 = vsel %vm2455_vm2, %v2457_v38, %v2453_v36  ;;  %v2427_v24 = vmul.f32 %v2426_v57, %v8140_v37  ;;  %v2428_v52 = vmul.f32 %v2426_v57, %v8143_v23 }
 0x400   :  { %7223 = vpow2.f32 %v2157_v25  ;;  %v2033_v21 = vrot.slane %v2032_v7, 4  ;;  %v2459_v46 = vmul.f32 %v2458_v53, %v8182_v10  ;;  %v2464_v48 = vmul.f32 %v8414_v62, %v2463_v11 }
 0x401   :  { %v8450_v27 = vpop.eup %7221  ;;  %7225 = vpow2.f32 %v2159_v18  ;;  %v2289_v61 = vrot.slane %v2288_v51, 2  ;;  %v2460_v0 = vmul.f32 %v2458_v53, %v8185_v56  ;;  %v7044_v18 = vld [vmem:[%s8088_s10 + $0x20] sm:$0xff]  ;;  %vm2482_vm5 = vweird.f32 %v8412_v63 }
 0x402   :  { %v2034_v22 = vmax.f32 %v2032_v7, %v2033_v21  ;;  %v2478_v40 = vmul.f32 %v8450_v27, %v8412_v63  ;;  %vm2483_vm6 = vweird.f32 %v8450_v27  ;;  %v2488_v41 = vand.u32 2147483648, %v8412_v63  ;;  %3387 = vmatpush.bf16.msrb.mxu3 %v7044_v18 }
 0x403   :  { %2674 = vperm.xlu1 %7147, %v2444_v39   ;;  %v2290_v33 = vadd.f32 %v2289_v61, %v2288_v51  ;;  %v2486_v36 = vand.u32 2147483647, %v8412_v63  ;;  %v2465_v19 = vadd.f32 %v8414_v62, %v2464_v48  ;;  %vm8480_vm7 = vmor %vm2482_vm5, %vm2483_vm6  ;;  %v8496_v61 = vld [vmem:[#allocation2] ss:$0 sm:$0xff]  ;;  %v8516_v48 = vld [vmem:[%s7602_s7 + $0xa8] sm:$0xff] }
 0x404   :  { %v2035_v34 = vrot.slane %v2034_v22, 2  ;;  %2649 = vperm.xlu2 %7148, %v2411_v6   ;;  %v2479_v12 = vsub.f32 1.0, %v2478_v40  ;;  %vm1905_vm12 = vcmp.gt.f32.partialorder %v8516_v48, 0.0 }
 0x405   :  { %v2291_v37 = vrot.slane %v2290_v33, 1  ;;  %vm2487_vm11 = vcmp.eq.f32.partialorder %v2486_v36, 8.507059e+37 }
 0x406   :  { %v7224_v2 = vpop.eup %7223  ;;  %v2036_v26 = vmax.f32 %v2034_v22, %v2035_v34  ;;  %2659 = vperm.xlu0 %7146, %v2427_v24   ;;  %v2480_v1 = vmul.f32 %v8450_v27, %v2479_v12  ;;  %v2472_v22 = vand.u32 2147483648, %v8362_v49  ;;  %v2489_v24 = vor.u32 1.1754944e-38, %v2488_v41 }
 0x407   :  { %v7226_v25 = vpop.eup %7225  ;;  %v8467_v23 = vmul.f32 %v8316_v54, %v7224_v2  ;;  %v1814_v57 = vpop.xlane.xlu2 %1813  ;;  %v2292_v21 = vadd.f32 %v2291_v37, %v2290_v33  ;;  %v2443_v37 = vmul.f32 %v8397_v60, %v8146_v32 }
 0x408   :  { %v2037_v10 = vrot.slane %v2036_v26, 1  ;;  %v2481_v7 = vadd.f32 %v8450_v27, %v2480_v1  ;;  %v8472_v56 = vmul.f32 %v8291_v13, %v7226_v25  ;;  %v2470_v13 = vand.u32 2147483647, %v8362_v49  ;;  %v8506_v49 = vld [vmem:[%s7602_s7 + $0xa0] sm:$0xff] }
 0x409   :  { %v2293_v39 = vsel %vm1948_vm4, %v8467_v23, 0.0  ;;  %v8492_v63 = vadd.f32 1e-10, %v2292_v21  ;;  %v1872_v34 = vadd.f32 %v8496_v61, %v1814_v57  ;;  %vm1904_vm10 = vcmp.gt.f32.partialorder %v8506_v49, 0.0 }
 0x40a   :  { %v2038_v54 = vmax.f32 %v2036_v26, %v2037_v10  ;;  %v2294_v11 = vsel %vm1948_vm4, %v8472_v56, 0.0  ;;  %v2485_v51 = vsel %vm8480_vm7, %v8450_v27, %v2481_v7  ;;  %vm2471_vm13 = vcmp.eq.f32.partialorder %v2470_v13, 8.507059e+37 }
 0x40b   :  { %2679 = vperm.xlu1 %7147, %v2459_v46   ;;  %v2295_v6 = vadd.f32 %v2294_v11, %v2293_v39  ;;  %7227 = vrcp.f32 %v8492_v63  ;;  %v8513_v46 = vsel %vm2487_vm11, %v2489_v24, %v2485_v51  ;;  %v2473_v2 = vor.u32 1.1754944e-38, %v2472_v22 }
 0x40c   :  { %v2111_v53 = vsub.f32 %v8405_v58, %v2038_v54  ;;  %v2112_v40 = vsub.f32 %v8427_v15, %v2038_v54  ;;  %2664 = vperm.xlu2 %7148, %v2428_v52   ;;  %v2469_v58 = vsel %vm8501_vm9, %v8414_v62, %v2465_v19  ;;  %v8519_v26 = vsel %vm1904_vm10, %v1872_v34, -1e+30 }
 0x40d   :  { %v2296_v52 = vrot.slane %v2295_v6, 4  ;;  %v2474_v25 = vsel %vm2471_vm13, %v2473_v2, %v2469_v58  ;;  %v2039_v41 = vsel %vm1948_vm4, %v8519_v26, -inf  ;;  %v2502_v13 = vand.u32 2147483647, %v8492_v63  ;;  %v7043_v2 = vld [vmem:[%s8088_s10 + $0x18] sm:$0xff] }
 0x40e   :  { %v2161_v15 = vmul.f32 1.442695, %v2111_v53  ;;  %v2163_v12 = vmul.f32 1.442695, %v2112_v40  ;;  %2684 = vperm.xlu0 %7146, %v2460_v0   ;;  %v2492_v0 = vmul.f32 %v8513_v46, %v8325_v28  ;;  %v2475_v19 = vmul.f32 %v2474_v25, %v8243_v59  ;;  %3388 = vmatpush.bf16.msrb.mxu3 %v7043_v2 }
 0x40f   :  { %v1817_v33 = vpop.xlane.xlu0 %1816  ;;  %v2297_v1 = vadd.f32 %v2296_v52, %v2295_v6  ;;  %v2504_v11 = vand.u32 2147483648, %v8492_v63  ;;  %v2476_v53 = vmul.f32 %v2474_v25, %v8251_v50  ;;  %vm2498_vm15 = vweird.f32 %v8492_v63 }
 0x410   :  { %7229 = vpow2.f32 %v2161_v15  ;;  %v1873_v62 = vadd.f32 %v8496_v61, %v1817_v33  ;;  %vm2503_vm3 = vcmp.eq.f32.partialorder %v2502_v13, 8.507059e+37 }
 0x411   :  { %7231 = vpow2.f32 %v2163_v12  ;;  %v2298_v10 = vrot.slane %v2297_v1, 2  ;;  %v7228_v7 = vpop.eup %7227  ;;  %v2505_v58 = vor.u32 1.1754944e-38, %v2504_v11 }
 0x412   :  { %v1937_v18 = vsel %vm1905_vm12, %v1873_v62, -1e+30  ;;  %v2494_v21 = vmul.f32 %v7228_v7, %v8492_v63  ;;  %vm2499_vm14 = vweird.f32 %v7228_v7 }
 0x413   :  { %v2040_v57 = vsel %vm1948_vm4, %v1937_v18, -inf  ;;  %2704 = vperm.xlu1 %7147, %v2492_v0   ;;  %v2299_v28 = vadd.f32 %v2298_v10, %v2297_v1  ;;  %vm2500_vm2 = vmor %vm2498_vm15, %vm2499_vm14 }
 0x414   :  { %v2041_v36 = vmax.f32 %v2039_v41, %v2040_v57  ;;  %2669 = vperm.xlu2 %7148, %v2443_v37   ;;  %v2495_v38 = vsub.f32 1.0, %v2494_v21  ;;  %v2491_v41 = vmul.f32 %v8513_v46, %v8322_v31 }
 0x415   :  { %v2300_v32 = vrot.slane %v2299_v28, 1 }
 0x416   :  { %v7230_v39 = vpop.eup %7229  ;;  %v2042_v54 = vrot.slane %v2041_v36, 4  ;;  %2689 = vperm.xlu0 %7146, %v2475_v19   ;;  %v2496_v6 = vmul.f32 %v7228_v7, %v2495_v38 }
 0x417   :  { %v7232_v60 = vpop.eup %7231  ;;  %v8534_v51 = vmul.f32 %v8384_v14, %v7230_v39  ;;  %v2301_v59 = vadd.f32 %v2300_v32, %v2299_v28 }
 0x418   :  { %v2043_v22 = vmax.f32 %v2041_v36, %v2042_v54  ;;  %v8538_v40 = vmul.f32 %v8408_v8, %v7232_v60  ;;  %v2497_v24 = vadd.f32 %v7228_v7, %v2496_v6 }
 0x419   :  { %v2373_v27 = vadd.f32 1e-10, %v2301_v59  ;;  %v2302_v14 = vsel %vm1948_vm4, %v8534_v51, 0.0 }
 0x41a   :  { %v2044_v34 = vrot.slane %v2043_v22, 2  ;;  %v2501_v12 = vsel %vm2500_vm2, %v7228_v7, %v2497_v24  ;;  %v2303_v50 = vsel %vm1948_vm4, %v8538_v40, 0.0  ;;  %v8551_v7 = vpop.xlane.xlu0 %1819 }
 0x41b   :  { %7233 = vrcp.f32 %v2373_v27  ;;  %v2506_v8 = vsel %vm2503_vm3, %v2505_v58, %v2501_v12  ;;  %v2304_v63 = vadd.f32 %v2303_v50, %v2302_v14  ;;  %v2518_v39 = vand.u32 2147483647, %v2373_v27 }
 0x41c   :  { %v2045_v15 = vmax.f32 %v2043_v22, %v2044_v34  ;;  %2694 = vperm.xlu2 %7148, %v2476_v53   ;;  %v2507_v33 = vmul.f32 %v2506_v8, %v8395_v20  ;;  %v8548_v62 = vmul.f32 %v2506_v8, %v8403_v35  ;;  %v2645_v35 = vpop.permute.xlu1 %2644  ;;  %v2520_v54 = vand.u32 2147483648, %v2373_v27 }
 0x41d   :  { %v2305_v0 = vrot.slane %v2304_v63, 4  ;;  %vm2514_vm6 = vweird.f32 %v2373_v27  ;;  %vm2519_vm8 = vcmp.eq.f32.partialorder %v2518_v39, 8.507059e+37 }
 0x41e   :  { %v2046_v52 = vrot.slane %v2045_v15, 1  ;;  %2709 = vperm.xlu1 %7147, %v2507_v33   ;;  %v2521_v60 = vor.u32 1.1754944e-38, %v2520_v54  ;;  %v8582_v54 = vld [vmem:[%s7602_s7 + $0xb8] sm:$0xff] }
 0x41f   :  { %v2306_v20 = vadd.f32 %v2305_v0, %v2304_v63  ;;  %vm1907_vm14 = vcmp.gt.f32.partialorder %v8582_v54, 0.0 }
 0x420   :  { %v2047_v1 = vmax.f32 %v2045_v15, %v2046_v52 }
 0x421   :  { %v7234_v25 = vpop.eup %7233  ;;  %v2307_v28 = vrot.slane %v2306_v20, 2 }
 0x422   :  { %v2113_v37 = vsub.f32 %v8519_v26, %v2047_v1  ;;  %v2114_v10 = vsub.f32 %v1937_v18, %v2047_v1  ;;  %v2510_v57 = vmul.f32 %v7234_v25, %v2373_v27  ;;  %vm2515_vm5 = vweird.f32 %v7234_v25 }
 0x423   :  { %v2308_v26 = vadd.f32 %v2307_v28, %v2306_v20  ;;  %v2798_v18 = vmul.f32 %v2645_v35, %v7695_v4  ;;  %vm2516_vm7 = vmor %vm2514_vm6, %vm2515_vm5  ;;  %v8578_v28 = vld [vmem:[%s7602_s7 + $0xb0] sm:$0xff] }
 0x424   :  { %v2165_v36 = vmul.f32 1.442695, %v2113_v37  ;;  %v2167_v19 = vmul.f32 1.442695, %v2114_v10  ;;  %2699 = vperm.xlu2 %7148, %v2491_v41   ;;  %v2511_v21 = vsub.f32 1.0, %v2510_v57  ;;  %vm1906_vm13 = vcmp.gt.f32.partialorder %v8578_v28, 0.0 }
 0x425   :  { %v2309_v31 = vrot.slane %v2308_v26, 1  ;;  %v2830_v59 = vsel %vm608_vm0, %v2798_v18, 0.0 }
 0x426   :  { %7235 = vpow2.f32 %v2165_v36  ;;  %v2512_v38 = vmul.f32 %v7234_v25, %v2511_v21  ;;  %v1874_v21 = vadd.f32 %v8496_v61, %v8551_v7 }
 0x427   :  { %7237 = vpow2.f32 %v2167_v19  ;;  %v2310_v22 = vadd.f32 %v2309_v31, %v2308_v26 }
 0x428   :  { %v2513_v32 = vadd.f32 %v7234_v25, %v2512_v38  ;;  %v1938_v38 = vsel %vm1906_vm13, %v1874_v21, -1e+30 }
 0x429   :  { %v2374_v58 = vadd.f32 1e-10, %v2310_v22  ;;  %v7042_v22 = vld [vmem:[%s8088_s10 + $0x10] sm:$0xff] }
 0x42a   :  { %v2640_v46 = vpop.permute.xlu0 %2639  ;;  %v2517_v11 = vsel %vm2516_vm7, %v7234_v25, %v2513_v32  ;;  %v2048_v32 = vsel %vm1948_vm4, %v1938_v38, -inf  ;;  %3389 = vmatpush.bf16.msrb.mxu3 %v7042_v22  ;;  %v8631_v22 = vld [vmem:[%s7602_s7 + $0xe8] sm:$0xff] }
 0x42b   :  { %v2797_v13 = vmul.f32 %v2640_v46, %v7692_v3  ;;  %v2522_v53 = vsel %vm2519_vm8, %v2521_v60, %v2517_v11  ;;  %7239 = vrcp.f32 %v2374_v58  ;;  %v2536_v63 = vand.u32 2147483648, %v2374_v58  ;;  %v8590_v60 = vld [vmem:[%s7602_s7 + $0xc8] sm:$0xff] }
 0x42c   :  { %v7236_v6 = vpop.eup %7235  ;;  %v2524_v4 = vmul.f32 %v2522_v53, %v8472_v56  ;;  %v2523_v27 = vmul.f32 %v2522_v53, %v8467_v23  ;;  %v2534_v0 = vand.u32 2147483647, %v2374_v58  ;;  %vm2530_vm10 = vweird.f32 %v2374_v58 }
 0x42d   :  { %v7238_v34 = vpop.eup %7237  ;;  %v2829_v24 = vsel %vm608_vm0, %v2797_v13, 0.0  ;;  %v8564_v15 = vmul.f32 %v8506_v49, %v7236_v6  ;;  %v2537_v10 = vor.u32 1.1754944e-38, %v2536_v63  ;;  %vm1909_vm15 = vcmp.gt.f32.partialorder %v8590_v60, 0.0 }
 0x42e   :  { %v8561_v14 = vadd.f32 %v2830_v59, %v2829_v24  ;;  %v8567_v3 = vmul.f32 %v8516_v48, %v7238_v34  ;;  %2724 = vperm.xlu0 %7146, %v2524_v4   ;;  %2719 = vperm.xlu1 %7147, %v2523_v27   ;;  %vm2535_vm12 = vcmp.eq.f32.partialorder %v2534_v0, 8.507059e+37  ;;  %v8597_v4 = vld [vmem:[%s7602_s7 + $0xc0] sm:$0xff] }
 0x42f   :  { %v2311_v12 = vsel %vm1948_vm4, %v8564_v15, 0.0  ;;  %v1829_v39 = vpop.xlane.xlu2 %1828  ;;  %vm1908_vm3 = vcmp.gt.f32.partialorder %v8597_v4, 0.0 }
 0x430   :  { %v2312_v56 = vsel %vm1948_vm4, %v8567_v3, 0.0  ;;  %v1877_v31 = vadd.f32 %v8496_v61, %v1829_v39  ;;  %v8619_v39 = vld [vmem:[%s7602_s7 + $0xd8] sm:$0xff] }
 0x431   :  { %v2313_v50 = vadd.f32 %v2312_v56, %v2311_v12  ;;  %v7240_v8 = vpop.eup %7239 }
 0x432   :  { %v2526_v33 = vmul.f32 %v7240_v8, %v2374_v58  ;;  %vm2531_vm9 = vweird.f32 %v7240_v8  ;;  %v8594_v24 = vsel %vm1909_vm15, %v1877_v31, -1e+30 }
 0x433   :  { %v2314_v23 = vrot.slane %v2313_v50, 4  ;;  %vm2532_vm11 = vmor %vm2530_vm10, %vm2531_vm9  ;;  %vm1911_vm9 = vcmp.gt.f32.partialorder %v8619_v39, 0.0  ;;  %vm1913_vm10 = vcmp.gt.f32.partialorder %v8631_v22, 0.0 }
 0x434   :  { %v2527_v49 = vsub.f32 1.0, %v2526_v33 }
 0x435   :  { %v2315_v52 = vadd.f32 %v2314_v23, %v2313_v50  ;;  %v8602_v23 = vld [vmem:[%s7602_s7 + $0xd0] sm:$0xff] }
 0x436   :  { %v2528_v48 = vmul.f32 %v7240_v8, %v2527_v49  ;;  %vm1910_vm6 = vcmp.gt.f32.partialorder %v8602_v23, 0.0  ;;  %v2058_v49 = vsel %vm1948_vm4, %v8594_v24, -inf }
 0x437   :  { %v2316_v2 = vrot.slane %v2315_v52, 2  ;;  %v1832_v58 = vpop.xlane.xlu2 %1831 }
 0x438   :  { %v2529_v37 = vadd.f32 %v7240_v8, %v2528_v48  ;;  %v1878_v63 = vadd.f32 %v8496_v61, %v1832_v58 }
 0x439   :  { %v2317_v1 = vadd.f32 %v2316_v2, %v2315_v52 }
 0x43a   :  { %v2533_v57 = vsel %vm2532_vm11, %v7240_v8, %v2529_v37 }
 0x43b   :  { %v2318_v25 = vrot.slane %v2317_v1, 1  ;;  %v2538_v20 = vsel %vm2535_vm12, %v2537_v10, %v2533_v57 }
 0x43c   :  { %v2540_v19 = vmul.f32 %v2538_v20, %v8538_v40  ;;  %v2539_v35 = vmul.f32 %v2538_v20, %v8534_v51  ;;  %v8616_v20 = vsel %vm1910_vm6, %v1878_v63, -1e+30  ;;  %vm3035_vm6 = vcmask 1042434  }
 0x43d   :  { %v2319_v41 = vadd.f32 %v2318_v25, %v2317_v1 }
 0x43e   :  { %2734 = vperm.xlu1 %7147, %v2540_v19   ;;  %2729 = vperm.xlu2 %7148, %v2539_v35  }
 0x43f   :  { %v2375_v36 = vadd.f32 1e-10, %v2319_v41 }
 0x441   :  { %7241 = vrcp.f32 %v2375_v36  ;;  %v2552_v6 = vand.u32 2147483648, %v2375_v36  ;;  %v2550_v34 = vand.u32 2147483647, %v2375_v36  ;;  %vm2546_vm5 = vweird.f32 %v2375_v36 }
 0x443   :  { %v2553_v8 = vor.u32 1.1754944e-38, %v2552_v6  ;;  %vm2551_vm8 = vcmp.eq.f32.partialorder %v2550_v34, 8.507059e+37 }
 0x445   :  { %v1823_v40 = vpop.xlane.xlu1 %1822 }
 0x446   :  { %v1875_v51 = vadd.f32 %v8496_v61, %v1823_v40 }
 0x447   :  { %v7242_v26 = vpop.eup %7241 }
 0x448   :  { %v1939_v18 = vsel %vm1907_vm14, %v1875_v51, -1e+30  ;;  %v2542_v7 = vmul.f32 %v7242_v26, %v2375_v36  ;;  %vm2547_vm2 = vweird.f32 %v7242_v26  ;;  %vm3033_vm14 = vcmask 1041409  }
 0x449   :  { %v2049_v46 = vsel %vm1948_vm4, %v1939_v18, -inf  ;;  %vm2548_vm7 = vmor %vm2546_vm5, %vm2547_vm2 }
 0x44a   :  { %v2050_v13 = vmax.f32 %v2048_v32, %v2049_v46  ;;  %v2543_v11 = vsub.f32 1.0, %v2542_v7 }
 0x44c   :  { %v2051_v59 = vrot.slane %v2050_v13, 4  ;;  %v2544_v53 = vmul.f32 %v7242_v26, %v2543_v11 }
 0x44d   :  { %v1826_v27 = vpop.xlane.xlu1 %1825 }
 0x44e   :  { %v2052_v12 = vmax.f32 %v2050_v13, %v2051_v59  ;;  %v1876_v56 = vadd.f32 %v8496_v61, %v1826_v27  ;;  %v2545_v50 = vadd.f32 %v7242_v26, %v2544_v53  ;;  %v8636_v53 = vld [vmem:[%s7602_s7 + $0xf0] sm:$0xff]  ;;  %v8640_v27 = vld [vmem:[%s7602_s7 + $0xe0] sm:$0xff] }
 0x44f   :  { %vm1914_vm11 = vcmp.gt.f32.partialorder %v8636_v53, 0.0  ;;  %vm1912_vm12 = vcmp.gt.f32.partialorder %v8640_v27, 0.0 }
 0x450   :  { %v2053_v52 = vrot.slane %v2052_v12, 2  ;;  %v8605_v33 = vsel %vm1908_vm3, %v1876_v56, -1e+30  ;;  %v2549_v2 = vsel %vm2548_vm7, %v7242_v26, %v2545_v50  ;;  %v2066_v26 = vsel %vm1948_vm4, %v8616_v20, -inf }
 0x451   :  { %v2057_v1 = vsel %vm1948_vm4, %v8605_v33, -inf  ;;  %v2554_v48 = vsel %vm2551_vm8, %v2553_v8, %v2549_v2  ;;  %v8648_v2 = vld [vmem:[%s7602_s7 + $0xf8] sm:$0xff]  ;;  %s7456_s7 = smov 19   ;;  %vm3037_vm7 = vcmask 1043459  }
 0x452   :  { %v2054_v0 = vmax.f32 %v2052_v12, %v2053_v52  ;;  %v2059_v25 = vmax.f32 %v2057_v1, %v2058_v49  ;;  %v2556_v37 = vmul.f32 %v2554_v48, %v8567_v3  ;;  %v2555_v10 = vmul.f32 %v2554_v48, %v8564_v15  ;;  %s8702_s13 = sld [smem:[%s10316_s0 + %s7456_s7]]  }
 0x453   :  { %vm1915_vm13 = vcmp.gt.f32.partialorder %v8648_v2, 0.0 }
 0x454   :  { %v2055_v41 = vrot.slane %v2054_v0, 1  ;;  %v2060_v57 = vrot.slane %v2059_v25, 4  ;;  %2744 = vperm.xlu0 %7146, %v2556_v37   ;;  %2739 = vperm.xlu1 %7147, %v2555_v10  }
 0x455   :  { %v1841_v36 = vpop.xlane.xlu1 %1840  ;;  %v1835_v19 = vpop.xlane.xlu0 %1834 }
 0x456   :  { %v2056_v35 = vmax.f32 %v2054_v0, %v2055_v41  ;;  %v2061_v21 = vmax.f32 %v2059_v25, %v2060_v57  ;;  %v1879_v3 = vadd.f32 %v8496_v61, %v1835_v19  ;;  %v1881_v7 = vadd.f32 %v8496_v61, %v1841_v36 }
 0x458   :  { %v2115_v15 = vsub.f32 %v1938_v38, %v2056_v35  ;;  %v2116_v40 = vsub.f32 %v1939_v18, %v2056_v35  ;;  %v2062_v51 = vrot.slane %v2061_v21, 2  ;;  %v8626_v32 = vsel %vm1911_vm9, %v1879_v3, -1e+30 }
 0x459   :  { %v2067_v11 = vsel %vm1948_vm4, %v8626_v32, -inf  ;;  %v2832_v18 = vrot.slane %v8561_v14, 4  ;;  %v8643_v56 = vsel %vm1913_vm10, %v1881_v7, -1e+30 }
 0x45a   :  { %v2169_v31 = vmul.f32 1.442695, %v2115_v15  ;;  %v2171_v46 = vmul.f32 1.442695, %v2116_v40  ;;  %v2063_v13 = vmax.f32 %v2061_v21, %v2062_v51  ;;  %v2068_v38 = vmax.f32 %v2066_v26, %v2067_v11 }
 0x45b   :  { %v2076_v25 = vsel %vm1948_vm4, %v8643_v56, -inf  ;;  %v2833_v36 = vadd.f32 %v2832_v18, %v8561_v14 }
 0x45c   :  { %7243 = vpow2.f32 %v2169_v31  ;;  %v2064_v6 = vrot.slane %v2063_v13, 1  ;;  %v2069_v59 = vrot.slane %v2068_v38, 4 }
 0x45d   :  { %7245 = vpow2.f32 %v2171_v46  ;;  %v1844_v34 = vpop.xlane.xlu1 %1843  ;;  %v1838_v58 = vpop.xlane.xlu0 %1837 }
 0x45e   :  { %v2065_v12 = vmax.f32 %v2063_v13, %v2064_v6  ;;  %v1882_v50 = vadd.f32 %v8496_v61, %v1844_v34  ;;  %v1880_v8 = vadd.f32 %v8496_v61, %v1838_v58  ;;  %v2070_v52 = vmax.f32 %v2068_v38, %v2069_v59  ;;  %v7041_v13 = vld [vmem:[%s8088_s10 + $0x8] sm:$0xff] }
 0x45f   :  { %v1847_v49 = vpop.xlane.xlu2 %1846  ;;  %3390 = vmatpush.bf16.msrb.mxu3 %v7041_v13  ;;  %v2834_v34 = vrot.slane %v2833_v36, 2 }
 0x460   :  { %v2117_v63 = vsub.f32 %v8605_v33, %v2065_v12  ;;  %v2118_v1 = vsub.f32 %v8594_v24, %v2065_v12  ;;  %v8653_v48 = vsel %vm1914_vm11, %v1882_v50, -1e+30  ;;  %v8655_v0 = vsel %vm1912_vm12, %v1880_v8, -1e+30 }
 0x461   :  { %v2071_v37 = vrot.slane %v2070_v52, 2  ;;  %v2075_v10 = vsel %vm1948_vm4, %v8655_v0, -inf  ;;  %v1883_v41 = vadd.f32 %v8496_v61, %v1847_v49  ;;  %v2084_v3 = vsel %vm1948_vm4, %v8653_v48, -inf }
 0x462   :  { %v7244_v57 = vpop.eup %7243  ;;  %v2173_v19 = vmul.f32 1.442695, %v2117_v63  ;;  %v2175_v33 = vmul.f32 1.442695, %v2118_v1  ;;  %v2077_v24 = vmax.f32 %v2075_v10, %v2076_v25  ;;  %v2835_v10 = vadd.f32 %v2834_v34, %v2833_v36 }
 0x463   :  { %v7246_v35 = vpop.eup %7245  ;;  %v2072_v21 = vmax.f32 %v2070_v52, %v2071_v37  ;;  %v8667_v15 = vsel %vm1915_vm13, %v1883_v41, -1e+30  ;;  %v8670_v40 = vmul.f32 %v8578_v28, %v7244_v57 }
 0x464   :  { %7247 = vpow2.f32 %v2173_v19  ;;  %v2078_v61 = vrot.slane %v2077_v24, 4  ;;  %v2085_v14 = vsel %vm1948_vm4, %v8667_v15, -inf  ;;  %v8675_v51 = vmul.f32 %v8582_v54, %v7246_v35 }
 0x465   :  { %7249 = vpow2.f32 %v2175_v33  ;;  %v2073_v26 = vrot.slane %v2072_v21, 1  ;;  %v2086_v7 = vmax.f32 %v2084_v3, %v2085_v14  ;;  %v2320_v31 = vsel %vm1948_vm4, %v8670_v40, 0.0 }
 0x466   :  { %v2079_v46 = vmax.f32 %v2077_v24, %v2078_v61  ;;  %v2321_v28 = vsel %vm1948_vm4, %v8675_v51, 0.0 }
 0x467   :  { %v2087_v11 = vrot.slane %v2086_v7, 4  ;;  %v2650_v38 = vpop.permute.xlu2 %2649  ;;  %v2322_v18 = vadd.f32 %v2321_v28, %v2320_v31  ;;  %v2074_v6 = vmax.f32 %v2072_v21, %v2073_v26 }
 0x468   :  { %v2080_v59 = vrot.slane %v2079_v46, 2  ;;  %v2799_v33 = vmul.f32 %v2650_v38, %v7711_v16 }
 0x469   :  { %v2088_v54 = vmax.f32 %v2086_v7, %v2087_v11  ;;  %v2323_v58 = vrot.slane %v2322_v18, 4  ;;  %v2119_v63 = vsub.f32 %v8616_v20, %v2074_v6  ;;  %v2120_v41 = vsub.f32 %v8626_v32, %v2074_v6 }
 0x46a   :  { %v7248_v12 = vpop.eup %7247  ;;  %v2081_v50 = vmax.f32 %v2079_v46, %v2080_v59  ;;  %v2838_v31 = vsel %vm608_vm0, %v2799_v33, 0.0 }
 0x46b   :  { %v7250_v8 = vpop.eup %7249  ;;  %v8683_v52 = vmul.f32 %v8597_v4, %v7248_v12  ;;  %v2089_v49 = vrot.slane %v2088_v54, 2  ;;  %v2324_v25 = vadd.f32 %v2323_v58, %v2322_v18  ;;  %v2177_v20 = vmul.f32 1.442695, %v2119_v63 }
 0x46c   :  { %v2082_v1 = vrot.slane %v2081_v50, 1  ;;  %v8687_v37 = vmul.f32 %v8590_v60, %v7250_v8  ;;  %v2836_v60 = vrot.slane %v2835_v10, 1  ;;  %v2179_v14 = vmul.f32 1.442695, %v2120_v41 }
 0x46d   :  { %v2329_v57 = vsel %vm1948_vm4, %v8683_v52, 0.0  ;;  %v2090_v19 = vmax.f32 %v2088_v54, %v2089_v49  ;;  %v2325_v4 = vrot.slane %v2324_v25, 2  ;;  %7251 = vpow2.f32 %v2177_v20 }
 0x46e   :  { %v2330_v35 = vsel %vm1948_vm4, %v8687_v37, 0.0  ;;  %v2083_v21 = vmax.f32 %v2081_v50, %v2082_v1  ;;  %7253 = vpow2.f32 %v2179_v14 }
 0x46f   :  { %v2665_v24 = vpop.permute.xlu2 %2664  ;;  %v2331_v61 = vadd.f32 %v2330_v35, %v2329_v57  ;;  %v2326_v32 = vadd.f32 %v2325_v4, %v2324_v25  ;;  %v2091_v7 = vrot.slane %v2090_v19, 1 }
 0x470   :  { %v2655_v3 = vpop.permute.xlu0 %2654  ;;  %v2121_v13 = vsub.f32 %v8655_v0, %v2083_v21  ;;  %v2122_v38 = vsub.f32 %v8643_v56, %v2083_v21  ;;  %v2802_v0 = vmul.f32 %v2665_v24, %v7725_v30 }
 0x471   :  { %v2800_v36 = vmul.f32 %v2655_v3, %v7714_v17  ;;  %v2332_v26 = vrot.slane %v2331_v61, 4  ;;  %v2327_v46 = vrot.slane %v2326_v32, 1  ;;  %v2837_v17 = vadd.f32 %v2836_v60, %v2835_v10  ;;  %v7040_v3 = vld [vmem:[%s8088_s10] sm:$0xff] }
 0x472   :  { %v2092_v58 = vmax.f32 %v2090_v19, %v2091_v7  ;;  %v2181_v8 = vmul.f32 1.442695, %v2121_v13  ;;  %v2183_v10 = vmul.f32 1.442695, %v2122_v38  ;;  %3391 = vmatpush.bf16.msrb.mxu3 %v7040_v3 }
 0x473   :  { %v2839_v16 = vsel %vm608_vm0, %v2800_v36, 0.0  ;;  %v2333_v11 = vadd.f32 %v2332_v26, %v2331_v61  ;;  %v2328_v6 = vadd.f32 %v2327_v46, %v2326_v32  ;;  %v2973_v25 = vpack.c.bf16 %v2837_v17, %v2837_v17  ;;  %v7019_v61 = vld [vmem:[%s8702_s13 + $0x18] sm:$0xff] }
 0x474   :  { %v2840_v28 = vadd.f32 %v2839_v16, %v2838_v31  ;;  %v2123_v24 = vsub.f32 %v8653_v48, %v2092_v58  ;;  %v2124_v60 = vsub.f32 %v8667_v15, %v2092_v58  ;;  %3086 = vmatpush.bf16.msrb.mxu1 %v7019_v61 }
 0x475   :  { %v2675_v18 = vpop.permute.xlu1 %2674  ;;  %v2334_v54 = vrot.slane %v2333_v11, 2  ;;  %v8707_v50 = vadd.f32 1e-10, %v2328_v6  ;;  %v3017_v13 = vunpack.c.l.b16 %v2973_v25 }
 0x476   :  { %v2841_v59 = vrot.slane %v2840_v28, 4  ;;  %v2804_v34 = vmul.f32 %v2675_v18, %v7738_v43  ;;  %v7252_v43 = vpop.eup %7251  ;;  %v2185_v16 = vmul.f32 1.442695, %v2123_v24  ;;  %v2187_v15 = vmul.f32 1.442695, %v2124_v60 }
 0x477   :  { %v2670_v12 = vpop.permute.xlu2 %2669  ;;  %7255 = vrcp.f32 %v8707_v50  ;;  %v2335_v19 = vadd.f32 %v2334_v54, %v2333_v11  ;;  %v7254_v33 = vpop.eup %7253  ;;  %v8721_v36 = vmul.f32 %v8602_v23, %v7252_v43  ;;  %vm2562_vm2 = vweird.f32 %v8707_v50 }
 0x478   :  { %v2842_v49 = vadd.f32 %v2841_v59, %v2840_v28  ;;  %v2803_v63 = vmul.f32 %v2670_v12, %v7735_v42  ;;  %v2660_v1 = vpop.permute.xlu0 %2659  ;;  %v2857_v30 = vsel %vm608_vm0, %v2804_v34, 0.0  ;;  %v2848_v42 = vsel %vm608_vm0, %v2802_v0, 0.0 }
 0x479   :  { %v2801_v56 = vmul.f32 %v2660_v1, %v7722_v29  ;;  %7257 = vpow2.f32 %v2181_v8  ;;  %v2336_v21 = vrot.slane %v2335_v19, 1  ;;  %v8724_v7 = vmul.f32 %v8619_v39, %v7254_v33 }
 0x47a   :  { %v2843_v41 = vrot.slane %v2842_v49, 2  ;;  %v2856_v57 = vsel %vm608_vm0, %v2803_v63, 0.0  ;;  %7259 = vpow2.f32 %v2183_v10  ;;  %v2338_v38 = vsel %vm1948_vm4, %v8721_v36, 0.0 }
 0x47b   :  { %v2858_v4 = vadd.f32 %v2857_v30, %v2856_v57  ;;  %v2847_v35 = vsel %vm608_vm0, %v2801_v56, 0.0  ;;  %v2337_v26 = vadd.f32 %v2336_v21, %v2335_v19  ;;  %v2339_v39 = vsel %vm1948_vm4, %v8724_v7, 0.0 }
 0x47c   :  { %v2844_v29 = vadd.f32 %v2843_v41, %v2842_v49  ;;  %v2849_v20 = vadd.f32 %v2848_v42, %v2847_v35  ;;  %7261 = vpow2.f32 %v2185_v16  ;;  %v2566_v12 = vand.u32 2147483647, %v8707_v50 }
 0x47d   :  { %v2859_v14 = vrot.slane %v2858_v4, 4  ;;  %v7256_v31 = vpop.eup %7255  ;;  %v8729_v34 = vadd.f32 1e-10, %v2337_v26  ;;  %v2568_v63 = vand.u32 2147483648, %v8707_v50  ;;  %v2340_v10 = vadd.f32 %v2339_v39, %v2338_v38 }
 0x47e   :  { %v2845_v32 = vrot.slane %v2844_v29, 1  ;;  %v2850_v48 = vrot.slane %v2849_v20, 4  ;;  %v2558_v23 = vmul.f32 %v7256_v31, %v8707_v50  ;;  %vm2563_vm15 = vweird.f32 %v7256_v31 }
 0x47f   :  { %v2860_v46 = vadd.f32 %v2859_v14, %v2858_v4  ;;  %v7258_v18 = vpop.eup %7257  ;;  %7263 = vrcp.f32 %v8729_v34  ;;  %vm2564_vm3 = vmor %vm2562_vm2, %vm2563_vm15  ;;  %v2569_v24 = vor.u32 1.1754944e-38, %v2568_v63  ;;  %vm2567_vm5 = vcmp.eq.f32.partialorder %v2566_v12, 8.507059e+37 }
 0x480   :  { %v2846_v28 = vadd.f32 %v2845_v32, %v2844_v29  ;;  %v2851_v11 = vadd.f32 %v2850_v48, %v2849_v20  ;;  %v7260_v54 = vpop.eup %7259  ;;  %v2559_v0 = vsub.f32 1.0, %v2558_v23  ;;  %7265 = vpow2.f32 %v2187_v15 }
 0x481   :  { %v2861_v17 = vrot.slane %v2860_v46, 2  ;;  %v8739_v41 = vmul.f32 %v8640_v27, %v7258_v18  ;;  %v8742_v19 = vmul.f32 %v8631_v22, %v7260_v54  ;;  %v2341_v29 = vrot.slane %v2340_v10, 4 }
 0x482   :  { %v2974_v6 = vpack.c.bf16 %v2846_v28, %v2846_v28  ;;  %v2852_v59 = vrot.slane %v2851_v11, 2  ;;  %v2560_v25 = vmul.f32 %v7256_v31, %v2559_v0  ;;  %v7262_v42 = vpop.eup %7261  ;;  %vm2578_vm9 = vweird.f32 %v8729_v34 }
 0x483   :  { %v2862_v58 = vadd.f32 %v2861_v17, %v2860_v46  ;;  %v2347_v50 = vsel %vm1948_vm4, %v8739_v41, 0.0  ;;  %v2348_v22 = vsel %vm1948_vm4, %v8742_v19, 0.0  ;;  %v2342_v26 = vadd.f32 %v2341_v29, %v2340_v10 }
 0x484   :  { %v3018_v8 = vunpack.c.l.b16 %v2974_v6  ;;  %v2853_v49 = vadd.f32 %v2852_v59, %v2851_v11  ;;  %v2561_v57 = vadd.f32 %v7256_v31, %v2560_v25  ;;  %v2349_v16 = vadd.f32 %v2348_v22, %v2347_v50 }
 0x485   :  { %v2863_v1 = vrot.slane %v2862_v58, 1  ;;  %v7264_v20 = vpop.eup %7263  ;;  %v2343_v28 = vrot.slane %v2342_v26, 2  ;;  %v2582_v11 = vand.u32 2147483647, %v8729_v34 }
 0x486   :  { %v3034_v56 = vsel %vm3033_vm14, %v3018_v8, %v3017_v13  ;;  %v2854_v43 = vrot.slane %v2853_v49, 1  ;;  %v2565_v35 = vsel %vm2564_vm3, %v7256_v31, %v2561_v57  ;;  %v7266_v61 = vpop.eup %7265  ;;  %v2574_v48 = vmul.f32 %v7264_v20, %v8729_v34 }
 0x487   :  { %v2864_v30 = vadd.f32 %v2863_v1, %v2862_v58  ;;  %v2570_v3 = vsel %vm2567_vm5, %v2569_v24, %v2565_v35  ;;  %v8752_v31 = vmul.f32 %v8636_v53, %v7262_v42  ;;  %v2350_v15 = vrot.slane %v2349_v16, 4 }
 0x488   :  { %v2855_v33 = vadd.f32 %v2854_v43, %v2853_v49  ;;  %v2572_v27 = vmul.f32 %v2570_v3, %v8675_v51  ;;  %v2571_v14 = vmul.f32 %v2570_v3, %v8670_v40  ;;  %v2575_v13 = vsub.f32 1.0, %v2574_v48 }
 0x489   :  { %v2976_v4 = vpack.c.bf16 %v2864_v30, %v2864_v30  ;;  %v2584_v40 = vand.u32 2147483648, %v8729_v34  ;;  %v8761_v17 = vmul.f32 %v8648_v2, %v7266_v61  ;;  %vm2579_vm8 = vweird.f32 %v7264_v20 }
 0x48a   :  { %v2975_v21 = vpack.c.bf16 %v2855_v33, %v2855_v33  ;;  %2754 = vperm.xlu2 %7148, %v2572_v27   ;;  %2749 = vperm.xlu0 %7146, %v2571_v14   ;;  %v2576_v23 = vmul.f32 %v7264_v20, %v2575_v13  ;;  %v2344_v53 = vadd.f32 %v2343_v28, %v2342_v26  ;;  %v2356_v38 = vsel %vm1948_vm4, %v8752_v31, 0.0  ;;  %vm2580_vm10 = vmor %vm2578_vm9, %vm2579_vm8  ;;  %v7024_v33 = vld [vmem:[%s8771_s17] sm:$0xff] }
 0x48b   :  { %v3020_v32 = vunpack.c.l.b16 %v2976_v4  ;;  %v2351_v18 = vadd.f32 %v2350_v15, %v2349_v16  ;;  %v2357_v6 = vsel %vm1948_vm4, %v8761_v17, 0.0  ;;  %v2585_v54 = vor.u32 1.1754944e-38, %v2584_v40  ;;  %3392 = vmatmul.bf16.vlgmr.msrb.gmra.mxu3 %v7024_v33  ;;  %v7025_v40 = vld [vmem:[%s8771_s17 + $0x8] sm:$0xff] }
 0x48c   :  { %v3019_v60 = vunpack.c.l.b16 %v2975_v21  ;;  %v2577_v59 = vadd.f32 %v7264_v20, %v2576_v23  ;;  %v2345_v39 = vrot.slane %v2344_v53, 1  ;;  %v2358_v0 = vadd.f32 %v2357_v6, %v2356_v38  ;;  %v7017_v33 = vld [vmem:[%s8702_s13 + $0x8] sm:$0xff] }
 0x48d   :  { %v2352_v58 = vrot.slane %v2351_v18, 2  ;;  %vm2583_vm11 = vcmp.eq.f32.partialorder %v2582_v11, 8.507059e+37 }
 0x48e   :  { %v3036_v51 = vsel %vm3035_vm6, %v3019_v60, %v3034_v56  ;;  %v2581_v2 = vsel %vm2580_vm10, %v7264_v20, %v2577_v59  ;;  %v2346_v12 = vadd.f32 %v2345_v39, %v2344_v53  ;;  %v2359_v10 = vrot.slane %v2358_v0, 4 }
 0x48f   :  { %v8756_v46 = vsel %vm3037_vm7, %v3020_v32, %v3036_v51  ;;  %v2586_v8 = vsel %vm2583_vm11, %v2585_v54, %v2581_v2  ;;  %v2353_v49 = vadd.f32 %v2352_v58, %v2351_v18  ;;  %v7018_v54 = vld [vmem:[%s8702_s13 + $0x10] sm:$0xff] }
 0x490   :  { %v2588_v63 = vmul.f32 %v2586_v8, %v8687_v37  ;;  %v2587_v34 = vmul.f32 %v2586_v8, %v8683_v52  ;;  %v2378_v1 = vadd.f32 1e-10, %v2346_v12  ;;  %v2360_v43 = vadd.f32 %v2359_v10, %v2358_v0  ;;  %3087 = vmatpush.bf16.msrb.mxu1 %v7018_v54  ;;  %v7026_v8 = vld [vmem:[%s8771_s17 + $0x10] sm:$0xff]  ;;  %v3193_v10 = vld [vmem:[%s8785_s21 + $0x38] sm:$0xff] }
 0x491   :  { %v2354_v25 = vrot.slane %v2353_v49, 1 }
 0x492   :  { %2764 = vperm.xlu1 %7147, %v2588_v63   ;;  %2759 = vperm.xlu2 %7148, %v2587_v34   ;;  %7267 = vrcp.f32 %v2378_v1  ;;  %v2361_v57 = vrot.slane %v2360_v43, 2  ;;  %v2600_v29 = vand.u32 2147483648, %v2378_v1  ;;  %v2598_v3 = vand.u32 2147483647, %v2378_v1  ;;  %v3187_v63 = vld [vmem:[%s8785_s21 + $0x8] sm:$0xff]  ;;  %v3186_v34 = vld [vmem:[%s8785_s21] sm:$0xff] }
 0x493   :  { %v2355_v56 = vadd.f32 %v2354_v25, %v2353_v49  ;;  %vm2594_vm13 = vweird.f32 %v2378_v1  ;;  %v3188_v49 = vld [vmem:[%s8785_s21 + $0x10] sm:$0xff]  ;;  %v3194_v25 = vld [vmem:[%s8785_s21 + $0x40] sm:$0xff] }
 0x494   :  { %v2362_v42 = vadd.f32 %v2361_v57, %v2360_v43  ;;  %v2601_v61 = vor.u32 1.1754944e-38, %v2600_v29  ;;  %vm2599_vm2 = vcmp.eq.f32.partialorder %v2598_v3, 8.507059e+37  ;;  %v3197_v43 = vld [vmem:[%s8785_s21 + $0x58] sm:$0xff]  ;;  %v3195_v57 = vld [vmem:[%s8785_s21 + $0x48] sm:$0xff]  ;;  %3088 = vmatpush.bf16.msrb.mxu1 %v7017_v33 }
 0x495   :  { %v2379_v30 = vadd.f32 1e-10, %v2355_v56  ;;  %v3192_v56 = vld [vmem:[%s8785_s21 + $0x30] sm:$0xff]  ;;  %v3203_v29 = vld [vmem:[%s8785_s21 + $0x88] sm:$0xff] }
 0x496   :  { %v2363_v35 = vrot.slane %v2362_v42, 1  ;;  %v7029_v3 = vld [vmem:[%s8771_s17 + $0x28] sm:$0xff] }
 0x497   :  { %7269 = vrcp.f32 %v2379_v30  ;;  %v2616_v32 = vand.u32 2147483648, %v2379_v30  ;;  %v2614_v51 = vand.u32 2147483647, %v2379_v30  ;;  %vm2610_vm5 = vweird.f32 %v2379_v30 }
 0x498   :  { %v7268_v24 = vpop.eup %7267  ;;  %v2364_v52 = vadd.f32 %v2363_v35, %v2362_v42  ;;  %v8811_v42 = vpop.permute.xlu1 %2679  ;;  %v3199_v35 = vld [vmem:[%s8785_s21 + $0x68] sm:$0xff] }
 0x499   :  { %v2590_v4 = vmul.f32 %v7268_v24, %v2378_v1  ;;  %vm2595_vm12 = vweird.f32 %v7268_v24  ;;  %v2617_v11 = vor.u32 1.1754944e-38, %v2616_v32  ;;  %vm2615_vm9 = vcmp.eq.f32.partialorder %v2614_v51, 8.507059e+37  ;;  %v7027_v1 = vld [vmem:[%s8771_s17 + $0x18] sm:$0xff] }
 0x49a   :  { %v2380_v50 = vadd.f32 1e-10, %v2364_v52  ;;  %vm2596_vm15 = vmor %vm2594_vm13, %vm2595_vm12  ;;  %v3202_v52 = vld [vmem:[%s8785_s21 + $0x80] sm:$0xff]  ;;  %v3209_v32 = vld [vmem:[%s8785_s21 + $0xb8] sm:$0xff] }
 0x49b   :  { %v2591_v37 = vsub.f32 1.0, %v2590_v4  ;;  %3397 = vmatmul.bf16.gmra.mxu3 %v7025_v40  ;;  %v3200_v4 = vld [vmem:[%s8785_s21 + $0x70] sm:$0xff] }
 0x49c   :  { %7271 = vrcp.f32 %v2380_v50  ;;  %v2630_v39 = vand.u32 2147483647, %v2380_v50  ;;  %vm2626_vm11 = vweird.f32 %v2380_v50 }
 0x49d   :  { %v7270_v20 = vpop.eup %7269  ;;  %v2592_v21 = vmul.f32 %v7268_v24, %v2591_v37  ;;  %v3198_v37 = vld [vmem:[%s8785_s21 + $0x60] sm:$0xff] }
 0x49e   :  { %v2606_v27 = vmul.f32 %v7270_v20, %v2379_v30  ;;  %vm2611_vm3 = vweird.f32 %v7270_v20  ;;  %vm2631_vm13 = vcmp.eq.f32.partialorder %v2630_v39, 8.507059e+37  ;;  %v3196_v30 = vld [vmem:[%s8785_s21 + $0x50] sm:$0xff]  ;;  %v3213_v39 = vld [vmem:[%s8785_s21 + $0xd8] sm:$0xff] }
 0x49f   :  { %v2593_v22 = vadd.f32 %v7268_v24, %v2592_v21  ;;  %vm2612_vm8 = vmor %vm2610_vm5, %vm2611_vm3  ;;  %v3201_v21 = vld [vmem:[%s8785_s21 + $0x78] sm:$0xff]  ;;  %vm3043_vm3 = vcmask 1046534   ;;  %vm3045_vm5 = vcmask 1047559  }
 0x4a0   :  { %v2607_v60 = vsub.f32 1.0, %v2606_v27  ;;  %v2685_v27 = vpop.permute.xlu0 %2684 }
 0x4a1   :  { %v2597_v14 = vsel %vm2596_vm15, %v7268_v24, %v2593_v22  ;;  %v7028_v24 = vld [vmem:[%s8771_s17 + $0x20] sm:$0xff]  ;;  %vm3039_vm15 = vcmask 1044484  }
 0x4a2   :  { %v2602_v48 = vsel %vm2599_vm2, %v2601_v61, %v2597_v14  ;;  %v2608_v26 = vmul.f32 %v7270_v20, %v2607_v60  ;;  %v7272_v15 = vpop.eup %7271  ;;  %v3206_v22 = vld [vmem:[%s8785_s21 + $0xa0] sm:$0xff]  ;;  %v3205_v61 = vld [vmem:[%s8785_s21 + $0x98] sm:$0xff]  ;;  %v3204_v14 = vld [vmem:[%s8785_s21 + $0x90] sm:$0xff]  ;;  %vm3041_vm2 = vcmask 1045509  }
 0x4a3   :  { %v2604_v16 = vmul.f32 %v2602_v48, %v8724_v7  ;;  %v2603_v13 = vmul.f32 %v2602_v48, %v8721_v36  ;;  %v2622_v38 = vmul.f32 %v7272_v15, %v2380_v50  ;;  %v2632_v36 = vand.u32 2147483648, %v2380_v50  ;;  %v2695_v50 = vpop.permute.xlu2 %2694  ;;  %v3208_v48 = vld [vmem:[%s8785_s21 + $0xb0] sm:$0xff] }
 0x4a4   :  { %v2609_v28 = vadd.f32 %v7270_v20, %v2608_v26  ;;  %vm2627_vm10 = vweird.f32 %v7272_v15 }
 0x4a5   :  { %2774 = vperm.xlu0 %7146, %v2604_v16   ;;  %2769 = vperm.xlu1 %7147, %v2603_v13   ;;  %v2623_v6 = vsub.f32 1.0, %v2622_v38  ;;  %vm2628_vm12 = vmor %vm2626_vm11, %vm2627_vm10  ;;  %v2633_v0 = vor.u32 1.1754944e-38, %v2632_v36  ;;  %v3207_v13 = vld [vmem:[%s8785_s21 + $0xa8] sm:$0xff]  ;;  %v3210_v38 = vld [vmem:[%s8785_s21 + $0xc0] sm:$0xff] }
 0x4a6   :  { %v2613_v23 = vsel %vm2612_vm8, %v7270_v20, %v2609_v28  ;;  %v8818_v20 = vpop.permute.xlu1 %2704  ;;  %v3212_v28 = vld [vmem:[%s8785_s21 + $0xd0] sm:$0xff] }
 0x4a7   :  { %v2618_v53 = vsel %vm2615_vm9, %v2617_v11, %v2613_v23  ;;  %v2624_v59 = vmul.f32 %v7272_v15, %v2623_v6  ;;  %v3211_v11 = vld [vmem:[%s8785_s21 + $0xc8] sm:$0xff] }
 0x4a8   :  { %v2620_v18 = vmul.f32 %v2618_v53, %v8742_v19  ;;  %v2619_v7 = vmul.f32 %v2618_v53, %v8739_v41  ;;  %v2690_v26 = vpop.permute.xlu0 %2689 }
 0x4a9   :  { %v2625_v58 = vadd.f32 %v7272_v15, %v2624_v59 }
 0x4aa   :  { %2784 = vperm.xlu2 %7148, %v2620_v18   ;;  %v3215_v18 = vld [vmem:[%s8785_s21 + $0xe8] sm:$0xff] }
 0x4ab   :  { %v2629_v2 = vsel %vm2628_vm12, %v7272_v15, %v2625_v58  ;;  %3402 = vmatmul.bf16.gmra.mxu3 %v7026_v8  ;;  %v8829_v51 = vpop.permute.xlu2 %2699  ;;  %v7030_v15 = vld [vmem:[%s8771_s17 + $0x30] sm:$0xff]  ;;  %v3217_v58 = vld [vmem:[%s8785_s21 + $0xf8] sm:$0xff] }
 0x4ac   :  { %v2634_v12 = vsel %vm2631_vm13, %v2633_v0, %v2629_v2  ;;  %v2806_v0 = vmul.f32 %v2685_v27, %v7750_v55  ;;  %v10387_v55 = vld [vmem:[#allocation6_spill] sm:$0xff] }
 0x4ad   :  { %2779 = vperm.xlu0 %7146, %v2619_v7   ;;  %v2636_v41 = vmul.f32 %v2634_v12, %v8761_v17  ;;  %v2635_v19 = vmul.f32 %v2634_v12, %v8752_v31  ;;  %v3190_v31 = vld [vmem:[%s8785_s21 + $0x20] sm:$0xff]  ;;  %v3189_v17 = vld [vmem:[%s8785_s21 + $0x18] sm:$0xff] }
 0x4ae   :  { %v8824_v60 = vpop.permute.xlu1 %2709  ;;  %v3214_v7 = vld [vmem:[%s8785_s21 + $0xe0] sm:$0xff]  ;;  %v7031_v12 = vld [vmem:[%s8771_s17 + $0x38] sm:$0xff] }
 0x4af   :  { %2794 = vperm.xlu1 %7147, %v2636_v41  }
 0x4b0   :  { %v2725_v40 = vpop.permute.xlu0 %2724 }
 0x4b2   :  { %2789 = vperm.xlu2 %7148, %v2635_v19   ;;  %v2814_v19 = vmul.f32 %v2725_v40, %v7801_v45 }
 0x4b3   :  { %v2730_v23 = vpop.permute.xlu2 %2729 }
 0x4b4   :  { %v2815_v41 = vmul.f32 %v2730_v23, %v7819_v5 }
 0x4b5   :  { %2714 = vperm.xlu0 %7146, %v8548_v62   ;;  %v3191_v62 = vld [vmem:[%s8785_s21 + $0x28] sm:$0xff] }
 0x4b6   :  { %v2720_v16 = vpop.permute.xlu1 %2719  ;;  %v2910_v33 = vsel %vm608_vm0, %v2815_v41, 0.0 }
 0x4b7   :  { %3977 = vperm.xlu1 %7147, %v3188_v49   ;;  %v2813_v8 = vmul.f32 %v2720_v16, %v7798_v44  ;;  %v3216_v49 = vld [vmem:[%s8785_s21 + $0xf0] sm:$0xff] }
 0x4b8   :  { %v10389_v44 = vld [vmem:[#allocation7_spill] sm:$0xff] }
 0x4ba   :  { %3972 = vperm.xlu2 %7148, %v3187_v63  }
 0x4bb   :  { %3407 = vmatmul.bf16.gmra.mxu3 %v7027_v1 }
 0x4bd   :  { %3967 = vperm.xlu0 %7146, %v3186_v34  }
 0x4be   :  { %v2735_v53 = vpop.permute.xlu1 %2734 }
 0x4bf   :  { %3992 = vperm.xlu1 %7147, %v3191_v62   ;;  %v2816_v54 = vmul.f32 %v2735_v53, %v7822_v9  ;;  %v10385_v62 = vld [vmem:[#allocation12_spill] sm:$0xff]  ;;  %v10386_v9 = vld [vmem:[#allocation5_spill] sm:$0xff] }
 0x4c0   :  { %v2805_v1 = vmul.f32 %v8811_v42, %v10386_v9  ;;  %v2901_v42 = vsel %vm608_vm0, %v2813_v8, 0.0  ;;  %v10394_v53 = vld [vmem:[#allocation9_spill] sm:$0xff] }
 0x4c2   :  { %3987 = vperm.xlu2 %7148, %v3190_v31   ;;  %v2865_v27 = vsel %vm608_vm0, %v2805_v1, 0.0 }
 0x4c5   :  { %3982 = vperm.xlu0 %7146, %v3189_v17   ;;  %v7016_v17 = vld [vmem:[%s8702_s13] sm:$0xff] }
 0x4c6   :  { %v2745_v6 = vpop.permute.xlu0 %2744  ;;  %v2740_v36 = vpop.permute.xlu1 %2739  ;;  %3089 = vmatpush.bf16.msrb.mxu1 %v7016_v17 }
 0x4c7   :  { %4007 = vperm.xlu1 %7147, %v3194_v25   ;;  %v2818_v34 = vmul.f32 %v2745_v6, %v7841_v47  ;;  %v2817_v31 = vmul.f32 %v2740_v36, %v10385_v62  ;;  %v2807_v25 = vmul.f32 %v2690_v26, %v10387_v55  ;;  %v10390_v47 = vld [vmem:[#allocation16_spill] sm:$0xff] }
 0x4c8   :  { %v7032_v62 = vld [vmem:[%s8771_s17 + $0x40] sm:$0xff] }
 0x4ca   :  { %4002 = vperm.xlu2 %7148, %v3193_v10   ;;  %v2911_v10 = vsel %vm608_vm0, %v2816_v54, 0.0 }
 0x4cb   :  { %3412 = vmatmul.bf16.gmra.mxu3 %v7028_v24  ;;  %v2902_v24 = vsel %vm608_vm0, %v2814_v19, 0.0  ;;  %v10395_v19 = vld [vmem:[#allocation18_spill] sm:$0xff] }
 0x4cc   :  { %v2903_v16 = vadd.f32 %v2902_v24, %v2901_v42 }
 0x4cd   :  { %3997 = vperm.xlu0 %7146, %v3192_v56   ;;  %v10388_v56 = vld [vmem:[#allocation13_spill] sm:$0xff] }
 0x4ce   :  { %v2904_v36 = vrot.slane %v2903_v16, 4 }
 0x4cf   :  { %4022 = vperm.xlu1 %7147, %v3197_v43   ;;  %v2808_v43 = vmul.f32 %v2695_v50, %v10389_v44  ;;  %v2874_v50 = vsel %vm608_vm0, %v2807_v25, 0.0 }
 0x4d2   :  { %4017 = vperm.xlu2 %7148, %v3196_v30   ;;  %v2866_v30 = vsel %vm608_vm0, %v2806_v0, 0.0 }
 0x4d5   :  { %4012 = vperm.xlu0 %7146, %v3195_v57  }
 0x4d7   :  { %4037 = vperm.xlu1 %7147, %v3200_v4   ;;  %v10391_v4 = vld [vmem:[#allocation14_spill] sm:$0xff] }
 0x4da   :  { %4032 = vperm.xlu2 %7148, %v3199_v35  }
 0x4db   :  { %3417 = vmatmul.bf16.gmra.mxu3 %v7029_v3 }
 0x4dd   :  { %4027 = vperm.xlu0 %7146, %v3198_v37   ;;  %v2912_v37 = vadd.f32 %v2911_v10, %v2910_v33  ;;  %v10397_v33 = vld [vmem:[#allocation20_spill] sm:$0xff] }
 0x4df   :  { %4052 = vperm.xlu1 %7147, %v3203_v29   ;;  %v2920_v29 = vsel %vm608_vm0, %v2818_v34, 0.0  ;;  %v2913_v40 = vrot.slane %v2912_v37, 4 }
 0x4e1   :  { %v2914_v54 = vadd.f32 %v2913_v40, %v2912_v37 }
 0x4e2   :  { %4047 = vperm.xlu2 %7148, %v3202_v52   ;;  %v2919_v52 = vsel %vm608_vm0, %v2817_v31, 0.0  ;;  %v2905_v31 = vadd.f32 %v2904_v36, %v2903_v16 }
 0x4e3   :  { %v2915_v25 = vrot.slane %v2914_v54, 2 }
 0x4e4   :  { %v2755_v59 = vpop.permute.xlu2 %2754 }
 0x4e5   :  { %4042 = vperm.xlu0 %7146, %v3201_v21   ;;  %v2820_v35 = vmul.f32 %v2755_v59, %v10391_v4  ;;  %v10392_v21 = vld [vmem:[#allocation15_spill] sm:$0xff]  ;;  %v2916_v4 = vadd.f32 %v2915_v25, %v2914_v54 }
 0x4e7   :  { %4067 = vperm.xlu1 %7147, %v3206_v22  }
 0x4ea   :  { %4062 = vperm.xlu2 %7148, %v3205_v61   ;;  %v2875_v61 = vsel %vm608_vm0, %v2808_v43, 0.0 }
 0x4eb   :  { %3422 = vmatmul.bf16.gmra.mxu3 %v7030_v15 }
 0x4ec   :  { %v2760_v5 = vpop.permute.xlu2 %2759 }
 0x4ed   :  { %4057 = vperm.xlu0 %7146, %v3204_v14   ;;  %v2821_v3 = vmul.f32 %v2760_v5, %v10392_v21  ;;  %v2867_v14 = vadd.f32 %v2866_v30, %v2865_v27  ;;  %v10398_v21 = vld [vmem:[#allocation19_spill] sm:$0xff] }
 0x4ee   :  { %v7051_v27 = vld [vmem:[%s8883_s29 + $0x18] sm:$0xff] }
 0x4ef   :  { %4082 = vperm.xlu1 %7147, %v3209_v32   ;;  %v2937_v15 = vsel %vm608_vm0, %v2821_v3, 0.0  ;;  %3609 = vmatpush.bf16.msra.mxu1 %v7051_v27  ;;  %v7048_v27 = vld [vmem:[%s8883_s29] sm:$0xff] }
 0x4f2   :  { %4077 = vperm.xlu2 %7148, %v3208_v48   ;;  %v10393_v48 = vld [vmem:[#allocation8_spill] sm:$0xff] }
 0x4f3   :  { %v2809_v26 = vmul.f32 %v8829_v51, %v10393_v48 }
 0x4f5   :  { %4072 = vperm.xlu0 %7146, %v3207_v13   ;;  %v2921_v13 = vadd.f32 %v2920_v29, %v2919_v52  ;;  %v2883_v6 = vsel %vm608_vm0, %v2809_v26, 0.0 }
 0x4f7   :  { %4097 = vperm.xlu1 %7147, %v3212_v28   ;;  %v2929_v28 = vsel %vm608_vm0, %v2820_v35, 0.0  ;;  %v2922_v59 = vrot.slane %v2921_v13, 4 }
 0x4f9   :  { %v2923_v17 = vadd.f32 %v2922_v59, %v2921_v13 }
 0x4fa   :  { %4092 = vperm.xlu2 %7148, %v3211_v11   ;;  %v2876_v11 = vadd.f32 %v2875_v61, %v2874_v50 }
 0x4fb   :  { %3427 = vmatmul.bf16.gmra.mxu3 %v7031_v12 }
 0x4fc   :  { %v2750_v2 = vpop.permute.xlu0 %2749 }
 0x4fd   :  { %4087 = vperm.xlu0 %7146, %v3210_v38   ;;  %v2819_v45 = vmul.f32 %v2750_v2, %v10388_v56  ;;  %v2810_v38 = vmul.f32 %v8818_v20, %v10394_v53  ;;  %v10399_v53 = vld [vmem:[#allocation21_spill] sm:$0xff] }
 0x4ff   :  { %4112 = vperm.xlu1 %7147, %v3215_v18   ;;  %v2928_v22 = vsel %vm608_vm0, %v2819_v45, 0.0  ;;  %v2884_v12 = vsel %vm608_vm0, %v2810_v38, 0.0 }
 0x500   :  { %v2930_v23 = vadd.f32 %v2929_v28, %v2928_v22  ;;  %v2885_v34 = vadd.f32 %v2884_v12, %v2883_v6  ;;  %v2917_v28 = vrot.slane %v2916_v4, 1 }
 0x502   :  { %4107 = vperm.xlu2 %7148, %v3214_v7   ;;  %v2868_v7 = vrot.slane %v2867_v14, 4  ;;  %v2886_v43 = vrot.slane %v2885_v34, 4 }
 0x504   :  { %v2765_v63 = vpop.permute.xlu1 %2764  ;;  %v2785_v51 = vpop.permute.xlu2 %2784  ;;  %v2887_v22 = vadd.f32 %v2886_v43, %v2885_v34 }
 0x505   :  { %4102 = vperm.xlu0 %7146, %v3213_v39   ;;  %v2822_v57 = vmul.f32 %v2765_v63, %v10390_v47  ;;  %v2877_v39 = vrot.slane %v2876_v11, 4  ;;  %v2869_v63 = vadd.f32 %v2868_v7, %v2867_v14  ;;  %v2906_v47 = vrot.slane %v2905_v31, 2 }
 0x506   :  { %v2826_v24 = vmul.f32 %v2785_v51, %v10397_v33  ;;  %v2888_v7 = vrot.slane %v2887_v22, 2  ;;  %v7050_v51 = vld [vmem:[%s8883_s29 + $0x10] sm:$0xff] }
 0x507   :  { %v2938_v32 = vsel %vm608_vm0, %v2822_v57, 0.0  ;;  %v2878_v55 = vadd.f32 %v2877_v39, %v2876_v11  ;;  %v2870_v44 = vrot.slane %v2869_v63, 2  ;;  %v2924_v57 = vrot.slane %v2923_v17, 2  ;;  %v10400_v39 = vld [vmem:[#allocation10_spill] sm:$0xff]  ;;  %3610 = vmatpush.bf16.msra.mxu1 %v7050_v51 }
 0x508   :  { %v2939_v18 = vadd.f32 %v2938_v32, %v2937_v15  ;;  %v2907_v32 = vadd.f32 %v2906_v47, %v2905_v31  ;;  %v2956_v26 = vsel %vm608_vm0, %v2826_v24, 0.0  ;;  %v2811_v54 = vmul.f32 %v8824_v60, %v10400_v39 }
 0x509   :  { %v2879_v42 = vrot.slane %v2878_v55, 2  ;;  %v2871_v50 = vadd.f32 %v2870_v44, %v2869_v63  ;;  %v2925_v48 = vadd.f32 %v2924_v57, %v2923_v17  ;;  %v7049_v63 = vld [vmem:[%s8883_s29 + $0x8] sm:$0xff]  ;;  %v10402_v17 = vld [vmem:[#allocation11_spill] sm:$0xff]  ;;  %v2889_v60 = vadd.f32 %v2888_v7, %v2887_v22  ;;  %s7468_s29 = smov 28  }
 0x50a   :  { %4122 = vperm.xlu2 %7148, %v3217_v58   ;;  %v2931_v58 = vrot.slane %v2930_v23, 4  ;;  %v2940_v41 = vrot.slane %v2939_v18, 4  ;;  %s9015_s2 = sld [smem:[%s10316_s0 + %s7468_s29]]   ;;  %s7475_s29 = smov 36  }
 0x50b   :  { %3432 = vmatmul.bf16.gmra.mxu3 %v7032_v62  ;;  %v2880_v13 = vadd.f32 %v2879_v42, %v2878_v55  ;;  %3611 = vmatpush.bf16.msra.mxu1 %v7049_v63  ;;  %v2890_v22 = vrot.slane %v2889_v60, 1 }
 0x50c   :  { %v2932_v10 = vadd.f32 %v2931_v58, %v2930_v23  ;;  %v2941_v45 = vadd.f32 %v2940_v41, %v2939_v18  ;;  %v2790_v61 = vpop.permute.xlu2 %2789  ;;  %v2872_v18 = vrot.slane %v2871_v50, 1  ;;  %v2908_v58 = vrot.slane %v2907_v32, 1 }
 0x50d   :  { %4117 = vperm.xlu0 %7146, %v3216_v49   ;;  %v10396_v49 = vld [vmem:[#allocation17_spill] sm:$0xff]  ;;  %v2827_v38 = vmul.f32 %v2790_v61, %v10399_v53  ;;  %v2881_v41 = vrot.slane %v2880_v13, 1 }
 0x50e   :  { %v8888_v56 = vpop.f32.mrf.mxu3  ;;  %v2933_v35 = vrot.slane %v2932_v10, 2  ;;  %v2942_v52 = vrot.slane %v2941_v45, 2  ;;  %v2873_v42 = vadd.f32 %v2872_v18, %v2871_v50 }
 0x50f   :  { %v2964_v62 = vsel %vm608_vm0, %v2827_v38, 0.0  ;;  %3612 = vmatpush.bf16.msra.mxu1 %v7048_v27  ;;  %v2891_v38 = vadd.f32 %v2890_v22, %v2889_v60  ;;  %v7023_v27 = vld [vmem:[%s8947_s11 + $0x18] sm:$0xff]  ;;  %v7036_v22 = vld [vmem:[%s8771_s17 + $0x60] sm:$0xff] }
 0x510   :  { %v2934_v11 = vadd.f32 %v2933_v35, %v2932_v10  ;;  %v2943_v23 = vadd.f32 %v2942_v52, %v2941_v45  ;;  %v2909_v45 = vadd.f32 %v2908_v58, %v2907_v32  ;;  %3142 = vmatpush.bf16.msra.mxu0 %v7023_v27 }
 0x512   :  { %v2944_v34 = vrot.slane %v2943_v23, 1  ;;  %v2981_v61 = vpack.c.bf16 %v2909_v45, %v2909_v45 }
 0x516   :  { %v8895_v15 = vpop.f32.mrf.mxu3 }
 0x517   :  { %v2775_v0 = vpop.permute.xlu0 %2774  ;;  %v2770_v2 = vpop.permute.xlu1 %2769 }
 0x518   :  { %v2824_v8 = vmul.f32 %v2775_v0, %v10395_v19  ;;  %v2823_v20 = vmul.f32 %v2770_v2, %v10396_v49  ;;  %v2926_v0 = vrot.slane %v2925_v48, 1  ;;  %v10401_v2 = vld [vmem:[#allocation22_spill] sm:$0xff]  ;;  %v2918_v19 = vadd.f32 %v2917_v28, %v2916_v4 }
 0x519   :  { %v2882_v4 = vadd.f32 %v2881_v41, %v2880_v13  ;;  %v2977_v28 = vpack.c.bf16 %v2873_v42, %v2873_v42 }
 0x51a   :  { %v2947_v9 = vsel %vm608_vm0, %v2824_v8, 0.0  ;;  %v2946_v1 = vsel %vm608_vm0, %v2823_v20, 0.0  ;;  %v2935_v8 = vrot.slane %v2934_v11, 1  ;;  %v2927_v44 = vadd.f32 %v2926_v0, %v2925_v48 }
 0x51b   :  { %v2948_v5 = vadd.f32 %v2947_v9, %v2946_v1  ;;  %v7033_v1 = vld [vmem:[%s8771_s17 + $0x48] sm:$0xff]  ;;  %v2982_v35 = vpack.c.bf16 %v2918_v19, %v2918_v19 }
 0x51c   :  { %3437 = vmatmul.bf16.gmra.mxu3 %v7033_v1 }
 0x51d   :  { %v2949_v30 = vrot.slane %v2948_v5, 4  ;;  %v3026_v13 = vunpack.c.l.b16 %v2982_v35  ;;  %v7035_v35 = vld [vmem:[%s8771_s17 + $0x58] sm:$0xff] }
 0x51e   :  { %v8909_v24 = vpop.f32.mrf.mxu3 }
 0x51f   :  { %v2950_v37 = vadd.f32 %v2949_v30, %v2948_v5  ;;  %v2780_v29 = vpop.permute.xlu0 %2779  ;;  %v2892_v5 = vsel %vm608_vm0, %v2811_v54, 0.0  ;;  %v2936_v30 = vadd.f32 %v2935_v8, %v2934_v11  ;;  %v2978_v11 = vpack.c.bf16 %v2882_v4, %v2882_v4 }
 0x520   :  { %v2825_v3 = vmul.f32 %v2780_v29, %v10398_v21  ;;  %v3021_v54 = vunpack.c.l.b16 %v2977_v28  ;;  %v2979_v8 = vpack.c.bf16 %v2891_v38, %v2891_v38 }
 0x521   :  { %v2951_v14 = vrot.slane %v2950_v37, 2  ;;  %v2795_v59 = vpop.permute.xlu1 %2794  ;;  %v2984_v32 = vpack.c.bf16 %v2936_v30, %v2936_v30  ;;  %v3022_v58 = vunpack.c.l.b16 %v2978_v11  ;;  %v7037_v11 = vld [vmem:[%s8771_s17 + $0x68] sm:$0xff] }
 0x522   :  { %v2955_v16 = vsel %vm608_vm0, %v2825_v3, 0.0  ;;  %v2828_v12 = vmul.f32 %v2795_v59, %v10401_v2 }
 0x523   :  { %v2957_v40 = vadd.f32 %v2956_v26, %v2955_v16  ;;  %v2952_v6 = vadd.f32 %v2951_v14, %v2950_v37  ;;  %v2945_v37 = vadd.f32 %v2944_v34, %v2943_v23  ;;  %v2983_v14 = vpack.c.bf16 %v2927_v44, %v2927_v44 }
 0x524   :  { %v2965_v31 = vsel %vm608_vm0, %v2828_v12, 0.0 }
 0x525   :  { %v2958_v36 = vrot.slane %v2957_v40, 4  ;;  %v2953_v55 = vrot.slane %v2952_v6, 1  ;;  %v2966_v10 = vadd.f32 %v2965_v31, %v2964_v62  ;;  %v2985_v50 = vpack.c.bf16 %v2945_v37, %v2945_v37 }
 0x526   :  { %v3027_v18 = vunpack.c.l.b16 %v2983_v14  ;;  %v3400_v39 = vpop.f32.mrf.mxu3  ;;  %v3040_v31 = vsel %vm3039_vm15, %v3021_v54, %v8756_v46 }
 0x527   :  { %v2959_v49 = vadd.f32 %v2958_v36, %v2957_v40  ;;  %v2715_v20 = vpop.permute.xlu0 %2714  ;;  %v2967_v57 = vrot.slane %v2966_v10, 4  ;;  %v2954_v29 = vadd.f32 %v2953_v55, %v2952_v6  ;;  %v3025_v6 = vunpack.c.l.b16 %v2981_v61 }
 0x528   :  { %v2812_v9 = vmul.f32 %v2715_v20, %v10402_v17  ;;  %v3028_v36 = vunpack.c.l.b16 %v2984_v32  ;;  %v3029_v0 = vunpack.c.l.b16 %v2985_v50  ;;  %v3042_v55 = vsel %vm3041_vm2, %v3022_v58, %v3040_v31 }
 0x529   :  { %v2960_v25 = vrot.slane %v2959_v49, 2  ;;  %v2968_v21 = vadd.f32 %v2967_v57, %v2966_v10  ;;  %v2986_v40 = vpack.c.bf16 %v2954_v29, %v2954_v29  ;;  %v3047_v2 = vsel %vm3033_vm14, %v3026_v13, %v3025_v6  ;;  %v8932_v57 = vld [vmem:[%s8797_s25] ss:$0 sm:$0xff]  ;;  %s7467_s25 = smov 22  }
 0x52a   :  { %v2893_v43 = vsel %vm608_vm0, %v2812_v9, 0.0  ;;  %v7034_v9 = vld [vmem:[%s8771_s17 + $0x50] sm:$0xff]  ;;  %v3023_v10 = vunpack.c.l.b16 %v2979_v8  ;;  %v3394_v42 = vadd.f32 %v8932_v57, %v8888_v56  ;;  %v3396_v4 = vadd.f32 %v8932_v57, %v8895_v15  ;;  %s9000_s28 = sld [smem:[%s10316_s0 + %s7467_s25]]  }
 0x52b   :  { %v2961_v47 = vadd.f32 %v2960_v25, %v2959_v49  ;;  %v2894_v33 = vadd.f32 %v2893_v43, %v2892_v5  ;;  %v2969_v26 = vrot.slane %v2968_v21, 2  ;;  %v3030_v12 = vunpack.c.l.b16 %v2986_v40 }
 0x52c   :  { %v3048_v49 = vsel %vm3035_vm6, %v3027_v18, %v3047_v2  ;;  %v3044_v46 = vsel %vm3043_vm3, %v3023_v10, %v3042_v55  ;;  %3442 = vmatmul.bf16.gmra.mxu3 %v7034_v9  ;;  %v3473_v37 = vmax.f32 %v3394_v42, 0.0  ;;  %v3474_v29 = vmax.f32 %v3396_v4, 0.0  ;;  %v7039_v2 = vld [vmem:[%s8771_s17 + $0x78] sm:$0xff] }
 0x52d   :  { %v2962_v52 = vrot.slane %v2961_v47, 1  ;;  %v2895_v3 = vrot.slane %v2894_v33, 4  ;;  %v2970_v23 = vadd.f32 %v2969_v26, %v2968_v21  ;;  %v3049_v63 = vsel %vm3037_vm7, %v3028_v36, %v3048_v49  ;;  %v7022_v26 = vld [vmem:[%s8947_s11 + $0x10] sm:$0xff]  ;;  %v7020_v49 = vld [vmem:[%s8947_s11] sm:$0xff] }
 0x52e   :  { %v3050_v17 = vsel %vm3039_vm15, %v3029_v0, %v3049_v63  ;;  %v3403_v44 = vpop.f32.mrf.mxu3  ;;  %v3505_v21 = vpack.c.bf16 %v3474_v29, %v3473_v37  ;;  %v3399_v15 = vadd.f32 %v8932_v57, %v8909_v24  ;;  %3143 = vmatpush.bf16.msra.mxu0 %v7022_v26  ;;  %v7162_v29 = vld [vmem:[%s8915_s3] ss:$0 sm:$0xff]  ;;  %s7469_s3 = smov 32  }
 0x52f   :  { %v2963_v48 = vadd.f32 %v2962_v52, %v2961_v47  ;;  %v2896_v16 = vadd.f32 %v2895_v3, %v2894_v33  ;;  %v2971_v59 = vrot.slane %v2970_v23, 1  ;;  %v3051_v25 = vsel %vm3041_vm2, %v3030_v12, %v3050_v17  ;;  %s9062_s6 = sld [smem:[%s10316_s0 + %s7469_s3]]  }
 0x530   :  { %v3401_v3 = vadd.f32 %v8932_v57, %v3400_v39  ;;  %v3475_v61 = vmax.f32 %v3399_v15, 0.0  ;;  %v3404_v28 = vadd.f32 %v8932_v57, %v3403_v44  ;;  %v7021_v39 = vld [vmem:[%s8947_s11 + $0x8] sm:$0xff]  ;;  %v7061_v44 = vld [vmem:[%s8982_s19 + $0x18] sm:$0xff]  ;;  %s7471_s11 = smov 31  }
 0x531   :  { %v2897_v53 = vrot.slane %v2896_v16, 2  ;;  %v2987_v7 = vpack.c.bf16 %v2963_v48, %v2963_v48  ;;  %v2972_v41 = vadd.f32 %v2971_v59, %v2970_v23  ;;  %4289 = vmatpush.bf16.msra.mxu2 %v7061_v44  ;;  %s9182_s14 = sld [smem:[%s10316_s0 + %s7471_s11]]  }
 0x532   :  { %v3476_v14 = vmax.f32 %v3401_v3, 0.0  ;;  %v3477_v50 = vmax.f32 %v3404_v28, 0.0  ;;  %3144 = vmatpush.bf16.msra.mxu0 %v7021_v39 }
 0x533   :  { %v2898_v51 = vadd.f32 %v2897_v53, %v2896_v16  ;;  %v3031_v20 = vunpack.c.l.b16 %v2987_v7  ;;  %v2988_v34 = vpack.c.bf16 %v2972_v41, %v2972_v41  ;;  %v7038_v7 = vld [vmem:[%s8771_s17 + $0x70] sm:$0xff] }
 0x534   :  { %v3506_v48 = vpack.c.bf16 %v3476_v14, %v3475_v61  ;;  %v7057_v14 = vld [vmem:[%s8993_s24 + $0x18] sm:$0xff] }
 0x535   :  { %v2899_v19 = vrot.slane %v2898_v51, 1  ;;  %v3032_v1 = vunpack.c.l.b16 %v2988_v34  ;;  %v3052_v5 = vsel %vm3043_vm3, %v3031_v20, %v3051_v25 }
 0x536   :  { %v3405_v33 = vpop.f32.mrf.mxu3  ;;  %3145 = vmatpush.bf16.msra.mxu0 %v7020_v49 }
 0x537   :  { %v2900_v62 = vadd.f32 %v2899_v19, %v2898_v51  ;;  %v3053_v30 = vsel %vm3045_vm5, %v3032_v1, %v3052_v5  ;;  %v3406_v24 = vadd.f32 %v8932_v57, %v3405_v33  ;;  %v7053_v5 = vld [vmem:[%s6352_s15 + $0x8] sm:$0xff] }
 0x539   :  { %v2980_v60 = vpack.c.bf16 %v2900_v62, %v2900_v62  ;;  %v3478_v13 = vmax.f32 %v3406_v24, 0.0 }
 0x53a   :  { %3816 = vmatpush.bf16.msrb.mxu0 %v7053_v5 }
 0x53b   :  { %v3024_v45 = vunpack.c.l.b16 %v2980_v60  ;;  %v3507_v23 = vpack.c.bf16 %v3478_v13, %v3477_v50 }
 0x53c   :  { %3447 = vmatmul.bf16.gmra.mxu3 %v7035_v35 }
 0x53d   :  { %v3046_v43 = vsel %vm3045_vm5, %v3024_v45, %v3044_v46  ;;  %v7052_v46 = vld [vmem:[%s6352_s15] sm:$0xff]  ;;  %s7472_s15 = smov 33  }
 0x53e   :  { %v3054_v47 = vpack.c.b16 %v3053_v30, %v3046_v43  ;;  %v3408_v52 = vpop.f32.mrf.mxu3  ;;  %3817 = vmatpush.bf16.msrb.mxu0 %v7052_v46  ;;  %s9274_s18 = sld [smem:[%s10316_s0 + %s7472_s15]]  }
 0x53f   :  { %v3409_v38 = vadd.f32 %v8932_v57, %v3408_v52 }
 0x540   :  { %6623 = vmatmul.msk.bf16.vlgmr.msrb.gmra.mxu1 %vm608_vm0, %v3054_v47 }
 0x541   :  { %v3479_v6 = vmax.f32 %v3409_v38, 0.0 }
 0x546   :  { %v3410_v56 = vpop.f32.mrf.mxu3 }
 0x547   :  { %v3411_v18 = vadd.f32 %v8932_v57, %v3410_v56 }
 0x549   :  { %v3480_v36 = vmax.f32 %v3411_v18, 0.0 }
 0x54b   :  { %v3508_v59 = vpack.c.bf16 %v3480_v36, %v3479_v6 }
 0x54c   :  { %3452 = vmatmul.bf16.gmra.mxu3 %v7036_v22 }
 0x54e   :  { %v3413_v32 = vpop.f32.mrf.mxu3 }
 0x54f   :  { %v3414_v54 = vadd.f32 %v8932_v57, %v3413_v32 }
 0x550   :  { %6753 = vmatmul.msk.bf16.vlgmr.msra.gmra.mxu1 %vm608_vm0, %v3505_v21 }
 0x551   :  { %v3481_v12 = vmax.f32 %v3414_v54, 0.0 }
 0x556   :  { %v3415_v16 = vpop.f32.mrf.mxu3 }
 0x557   :  { %v3416_v58 = vadd.f32 %v8932_v57, %v3415_v16 }
 0x559   :  { %v3482_v41 = vmax.f32 %v3416_v58, 0.0 }
 0x55b   :  { %v3509_v19 = vpack.c.bf16 %v3482_v41, %v3481_v12 }
 0x55c   :  { %3457 = vmatmul.bf16.gmra.mxu3 %v7037_v11  ;;  %v9005_v11 = vld [vmem:[%s8942_s8] ss:$0 sm:$0xff]  ;;  %s7470_s8 = smov 5  }
 0x55d   :  { %s6330_s7 = sld [smem:[%s10316_s0 + %s7470_s8]]  }
 0x55e   :  { %v3418_v40 = vpop.f32.mrf.mxu3 }
 0x55f   :  { %v3419_v20 = vadd.f32 %v8932_v57, %v3418_v40 }
 0x560   :  { %6754 = vmatmul.msk.bf16.gmra.mxu1 %vm608_vm0, %v3506_v48 }
 0x561   :  { %v3483_v62 = vmax.f32 %v3419_v20, 0.0 }
 0x566   :  { %v3420_v53 = vpop.f32.mrf.mxu3 }
 0x567   :  { %v3421_v63 = vadd.f32 %v8932_v57, %v3420_v53 }
 0x569   :  { %v3484_v31 = vmax.f32 %v3421_v63, 0.0 }
 0x56b   :  { %v3510_v17 = vpack.c.bf16 %v3484_v31, %v3483_v62 }
 0x56c   :  { %3462 = vmatmul.bf16.gmra.mxu3 %v7038_v7 }
 0x56e   :  { %v3423_v51 = vpop.f32.mrf.mxu3 }
 0x56f   :  { %v3424_v1 = vadd.f32 %v8932_v57, %v3423_v51 }
 0x570   :  { %6755 = vmatmul.msk.bf16.gmra.mxu1 %vm608_vm0, %v3507_v23 }
 0x571   :  { %v3485_v25 = vmax.f32 %v3424_v1, 0.0 }
 0x576   :  { %v3425_v0 = vpop.f32.mrf.mxu3 }
 0x577   :  { %v3426_v60 = vadd.f32 %v8932_v57, %v3425_v0 }
 0x579   :  { %v3486_v10 = vmax.f32 %v3426_v60, 0.0 }
 0x57b   :  { %v3511_v45 = vpack.c.bf16 %v3486_v10, %v3485_v25 }
 0x57c   :  { %3467 = vmatmul.bf16.gmra.mxu3 %v7039_v2 }
 0x57e   :  { %v3428_v8 = vpop.f32.mrf.mxu3 }
 0x57f   :  { %v3429_v30 = vadd.f32 %v8932_v57, %v3428_v8 }
 0x580   :  { %6756 = vmatmul.msk.bf16.gmra.mxu1 %vm608_vm0, %v3508_v59 }
 0x581   :  { %v3487_v33 = vmax.f32 %v3429_v30, 0.0  ;;  %v7056_v30 = vld [vmem:[%s8993_s24 + $0x10] sm:$0xff] }
 0x586   :  { %v3430_v34 = vpop.f32.mrf.mxu3 }
 0x587   :  { %v3431_v47 = vadd.f32 %v8932_v57, %v3430_v34 }
 0x589   :  { %v3488_v42 = vmax.f32 %v3431_v47, 0.0 }
 0x58b   :  { %v3512_v37 = vpack.c.bf16 %v3488_v42, %v3487_v33 }
 0x58e   :  { %v3433_v9 = vpop.f32.mrf.mxu3 }
 0x58f   :  { %v3434_v15 = vadd.f32 %v8932_v57, %v3433_v9 }
 0x590   :  { %6757 = vmatmul.msk.bf16.gmra.mxu1 %vm608_vm0, %v3509_v19 }
 0x591   :  { %v3489_v32 = vmax.f32 %v3434_v15, 0.0 }
 0x596   :  { %v3435_v55 = vpop.f32.mrf.mxu3 }
 0x597   :  { %v3436_v3 = vadd.f32 %v8932_v57, %v3435_v55 }
 0x599   :  { %v3490_v48 = vmax.f32 %v3436_v3, 0.0 }
 0x59b   :  { %v3513_v28 = vpack.c.bf16 %v3490_v48, %v3489_v32 }
 0x59f   :  { %v3438_v43 = vpop.f32.mrf.mxu3 }
 0x5a0   :  { %6758 = vmatmul.msk.bf16.gmra.mxu1 %vm608_vm0, %v3510_v17  ;;  %v3439_v40 = vadd.f32 %v8932_v57, %v3438_v43  ;;  %v7060_v17 = vld [vmem:[%s8982_s19 + $0x10] sm:$0xff] }
 0x5a1   :  { %4290 = vmatpush.bf16.msra.mxu2 %v7060_v17 }
 0x5a2   :  { %v3491_v6 = vmax.f32 %v3439_v40, 0.0 }
 0x5a7   :  { %v3440_v4 = vpop.f32.mrf.mxu3 }
 0x5a8   :  { %v3441_v23 = vadd.f32 %v8932_v57, %v3440_v4 }
 0x5aa   :  { %v3492_v36 = vmax.f32 %v3441_v23, 0.0 }
 0x5ac   :  { %v3514_v39 = vpack.c.bf16 %v3492_v36, %v3491_v6 }
 0x5af   :  { %v3443_v56 = vpop.f32.mrf.mxu3 }
 0x5b0   :  { %6759 = vmatmul.msk.bf16.gmra.mxu1 %vm608_vm0, %v3511_v45  ;;  %v3444_v2 = vadd.f32 %v8932_v57, %v3443_v56 }
 0x5b2   :  { %v3493_v49 = vmax.f32 %v3444_v2, 0.0 }
 0x5b7   :  { %v3445_v24 = vpop.f32.mrf.mxu3 }
 0x5b8   :  { %v3446_v12 = vadd.f32 %v8932_v57, %v3445_v24 }
 0x5ba   :  { %v3494_v20 = vmax.f32 %v3446_v12, 0.0 }
 0x5bc   :  { %v3515_v31 = vpack.c.bf16 %v3494_v20, %v3493_v49 }
 0x5bd   :  { %v3091_v35 = vpop.f32.mrf.mxu1 }
 0x5be   :  { %v3092_v52 = vadd.f32 %v7162_v29, %v3091_v35 }
 0x5bf   :  { %v3448_v7 = vpop.f32.mrf.mxu3 }
 0x5c0   :  { %6760 = vmatmul.msk.bf16.gmra.mxu1 %vm608_vm0, %v3512_v37  ;;  %v3096_v22 = vmax.f32 %v3092_v52, 0.0  ;;  %v3449_v60 = vadd.f32 %v8932_v57, %v3448_v7 }
 0x5c2   :  { %v3495_v44 = vmax.f32 %v3449_v60, 0.0 }
 0x5c5   :  { %v3093_v21 = vpop.f32.mrf.mxu1 }
 0x5c6   :  { %v3094_v27 = vadd.f32 %v7162_v29, %v3093_v21 }
 0x5c7   :  { %v3450_v54 = vpop.f32.mrf.mxu3 }
 0x5c8   :  { %v3097_v61 = vmax.f32 %v3094_v27, 0.0  ;;  %v3451_v55 = vadd.f32 %v8932_v57, %v3450_v54 }
 0x5ca   :  { %v3098_v26 = vpack.c.bf16 %v3097_v61, %v3096_v22  ;;  %v3496_v46 = vmax.f32 %v3451_v55, 0.0 }
 0x5cc   :  { %6640 = vmatmul.msk.bf16.vlgmr.msra.gmra.mxu0 %vm608_vm0, %v3098_v26  ;;  %v3516_v33 = vpack.c.bf16 %v3496_v46, %v3495_v44  ;;  %v7058_v44 = vld [vmem:[%s8982_s19] sm:$0xff] }
 0x5cd   :  { %v3614_v16 = vpop.f32.mrf.mxu1  ;;  %3939 = vmatpush.bf16.msra.mxu0 %v7057_v14 }
 0x5ce   :  { %v3615_v50 = vadd.f32 %v9005_v11, %v3614_v16 }
 0x5cf   :  { %v3453_v62 = vpop.f32.mrf.mxu3 }
 0x5d0   :  { %6761 = vmatmul.msk.bf16.gmra.mxu1 %vm608_vm0, %v3513_v28  ;;  %v3694_v38 = vmax.f32 %v3615_v50, 0.0  ;;  %v3454_v37 = vadd.f32 %v8932_v57, %v3453_v62 }
 0x5d1   :  { %3940 = vmatpush.bf16.msra.mxu0 %v7056_v30 }
 0x5d2   :  { %v3497_v15 = vmax.f32 %v3454_v37, 0.0 }
 0x5d5   :  { %v3616_v13 = vpop.f32.mrf.mxu1 }
 0x5d6   :  { %v3617_v53 = vadd.f32 %v9005_v11, %v3616_v13 }
 0x5d7   :  { %v3455_v10 = vpop.f32.mrf.mxu3 }
 0x5d8   :  { %v3695_v18 = vmax.f32 %v3617_v53, 0.0  ;;  %v3456_v29 = vadd.f32 %v8932_v57, %v3455_v10  ;;  %v7055_v10 = vld [vmem:[%s8993_s24 + $0x8] sm:$0xff] }
 0x5d9   :  { %3941 = vmatpush.bf16.msra.mxu0 %v7055_v10 }
 0x5da   :  { %v3726_v59 = vpack.c.bf16 %v3695_v18, %v3694_v38  ;;  %v3498_v3 = vmax.f32 %v3456_v29, 0.0 }
 0x5dc   :  { %6777 = vmatmul.msk.bf16.vlgmr.msrb.gmra.mxu0 %vm814_vm1, %v3726_v59  ;;  %v3517_v14 = vpack.c.bf16 %v3498_v3, %v3497_v15 }
 0x5dd   :  { %v3619_v51 = vpop.f32.mrf.mxu1 }
 0x5de   :  { %v3620_v58 = vadd.f32 %v9005_v11, %v3619_v51 }
 0x5df   :  { %v3458_v42 = vpop.f32.mrf.mxu3 }
 0x5e0   :  { %6762 = vmatmul.msk.bf16.gmra.mxu1 %vm608_vm0, %v3514_v39  ;;  %v3696_v19 = vmax.f32 %v3620_v58, 0.0  ;;  %v3459_v16 = vadd.f32 %v8932_v57, %v3458_v42 }
 0x5e2   :  { %v3499_v40 = vmax.f32 %v3459_v16, 0.0 }
 0x5e5   :  { %v3621_v0 = vpop.f32.mrf.mxu1 }
 0x5e6   :  { %v3622_v41 = vadd.f32 %v9005_v11, %v3621_v0 }
 0x5e7   :  { %v3460_v22 = vpop.f32.mrf.mxu3 }
 0x5e8   :  { %v3697_v8 = vmax.f32 %v3622_v41, 0.0  ;;  %v3461_v28 = vadd.f32 %v8932_v57, %v3460_v22 }
 0x5ea   :  { %v3727_v63 = vpack.c.bf16 %v3697_v8, %v3696_v19  ;;  %v3500_v23 = vmax.f32 %v3461_v28, 0.0 }
 0x5ec   :  { %6778 = vmatmul.msk.bf16.gmra.mxu0 %vm814_vm1, %v3727_v63  ;;  %v3518_v18 = vpack.c.bf16 %v3500_v23, %v3499_v40  ;;  %v7059_v63 = vld [vmem:[%s8982_s19 + $0x8] sm:$0xff]  ;;  %s7473_s19 = smov 34  }
 0x5ed   :  { %v3624_v34 = vpop.f32.mrf.mxu1  ;;  %4291 = vmatpush.bf16.msra.mxu2 %v7059_v63  ;;  %s9282_s23 = sld [smem:[%s10316_s0 + %s7473_s19]]  }
 0x5ee   :  { %v3625_v9 = vadd.f32 %v9005_v11, %v3624_v34 }
 0x5ef   :  { %v3463_v26 = vpop.f32.mrf.mxu3 }
 0x5f0   :  { %6763 = vmatmul.msk.bf16.gmra.mxu1 %vm608_vm0, %v3515_v31  ;;  %v3698_v5 = vmax.f32 %v3625_v9, 0.0  ;;  %v3464_v59 = vadd.f32 %v8932_v57, %v3463_v26 }
 0x5f1   :  { %4292 = vmatpush.bf16.msra.mxu2 %v7058_v44 }
 0x5f2   :  { %v3501_v2 = vmax.f32 %v3464_v59, 0.0 }
 0x5f5   :  { %v3626_v1 = vpop.f32.mrf.mxu1 }
 0x5f6   :  { %v3627_v25 = vadd.f32 %v9005_v11, %v3626_v1 }
 0x5f7   :  { %v3465_v7 = vpop.f32.mrf.mxu3 }
 0x5f8   :  { %v3699_v45 = vmax.f32 %v3627_v25, 0.0  ;;  %v3466_v51 = vadd.f32 %v8932_v57, %v3465_v7 }
 0x5fa   :  { %v3728_v43 = vpack.c.bf16 %v3699_v45, %v3698_v5  ;;  %v3502_v12 = vmax.f32 %v3466_v51, 0.0 }
 0x5fc   :  { %6779 = vmatmul.msk.bf16.gmra.mxu0 %vm814_vm1, %v3728_v43  ;;  %v3519_v8 = vpack.c.bf16 %v3502_v12, %v3501_v2  ;;  %v7054_v2 = vld [vmem:[%s8993_s24] sm:$0xff]  ;;  %s7474_s24 = smov 35  }
 0x5fd   :  { %v3629_v47 = vpop.f32.mrf.mxu1  ;;  %3942 = vmatpush.bf16.msra.mxu0 %v7054_v2  ;;  %s6360_s27 = sld [smem:[%s10316_s0 + %s7474_s24]]   ;;  %s7482_s24 = smov 42  }
 0x5fe   :  { %v3630_v4 = vadd.f32 %v9005_v11, %v3629_v47 }
 0x5ff   :  { %v3468_v0 = vpop.f32.mrf.mxu3 }
 0x600   :  { %6764 = vmatmul.msk.bf16.gmra.mxu1 %vm608_vm0, %v3516_v33  ;;  %v3700_v21 = vmax.f32 %v3630_v4, 0.0  ;;  %v3469_v62 = vadd.f32 %v8932_v57, %v3468_v0  ;;  %v7065_v4 = vld [vmem:[%s9062_s6 + $0x18] sm:$0xff] }
 0x601   :  { %4546 = vmatpush.bf16.msrb.mxu1 %v7065_v4 }
 0x602   :  { %v3503_v60 = vmax.f32 %v3469_v62, 0.0 }
 0x605   :  { %v3631_v35 = vpop.f32.mrf.mxu1 }
 0x606   :  { %v3632_v52 = vadd.f32 %v9005_v11, %v3631_v35 }
 0x607   :  { %v3470_v49 = vpop.f32.mrf.mxu3 }
 0x608   :  { %v3701_v56 = vmax.f32 %v3632_v52, 0.0  ;;  %v3471_v31 = vadd.f32 %v8932_v57, %v3470_v49 }
 0x60a   :  { %v3729_v27 = vpack.c.bf16 %v3701_v56, %v3700_v21  ;;  %v3504_v55 = vmax.f32 %v3471_v31, 0.0 }
 0x60c   :  { %6780 = vmatmul.msk.bf16.gmra.mxu0 %vm814_vm1, %v3729_v27  ;;  %v3520_v45 = vpack.c.bf16 %v3504_v55, %v3503_v60 }
 0x60d   :  { %v3634_v61 = vpop.f32.mrf.mxu1 }
 0x60e   :  { %v3635_v32 = vadd.f32 %v9005_v11, %v3634_v61  ;;  %v9077_v61 = vld [vmem:[%s9015_s2] ss:$0 sm:$0xff]  ;;  %s9970_s2 = sld [smem:[%s10316_s0 + %s7475_s29]]   ;;  %s7483_s29 = smov 43  }
 0x610   :  { %6765 = vmatmul.msk.bf16.gmra.mxu1 %vm608_vm0, %v3517_v14  ;;  %v3702_v50 = vmax.f32 %v3635_v32, 0.0 }
 0x615   :  { %v3636_v48 = vpop.f32.mrf.mxu1 }
 0x616   :  { %v3637_v24 = vadd.f32 %v9005_v11, %v3636_v48 }
 0x618   :  { %v3703_v13 = vmax.f32 %v3637_v24, 0.0 }
 0x61a   :  { %v3730_v53 = vpack.c.bf16 %v3703_v13, %v3702_v50 }
 0x61c   :  { %6781 = vmatmul.msk.bf16.gmra.mxu0 %vm814_vm1, %v3730_v53 }
 0x61d   :  { %v3639_v38 = vpop.f32.mrf.mxu1 }
 0x61e   :  { %v3640_v6 = vadd.f32 %v9005_v11, %v3639_v38 }
 0x620   :  { %6766 = vmatmul.msk.bf16.gmra.mxu1 %vm608_vm0, %v3518_v18  ;;  %v3704_v54 = vmax.f32 %v3640_v6, 0.0 }
 0x625   :  { %v3641_v36 = vpop.f32.mrf.mxu1 }
 0x626   :  { %v3642_v39 = vadd.f32 %v9005_v11, %v3641_v36 }
 0x628   :  { %v3705_v58 = vmax.f32 %v3642_v39, 0.0 }
 0x62a   :  { %v3731_v41 = vpack.c.bf16 %v3705_v58, %v3704_v54 }
 0x62c   :  { %6782 = vmatmul.msk.bf16.gmra.mxu0 %vm814_vm1, %v3731_v41 }
 0x62d   :  { %v3644_v19 = vpop.f32.mrf.mxu1 }
 0x62e   :  { %v3645_v20 = vadd.f32 %v9005_v11, %v3644_v19 }
 0x630   :  { %6767 = vmatmul.msk.bf16.gmra.mxu1 %vm608_vm0, %v3519_v8  ;;  %v3706_v9 = vmax.f32 %v3645_v20, 0.0 }
 0x635   :  { %v3646_v34 = vpop.f32.mrf.mxu1 }
 0x636   :  { %v3647_v17 = vadd.f32 %v9005_v11, %v3646_v34 }
 0x638   :  { %v3707_v1 = vmax.f32 %v3647_v17, 0.0 }
 0x63a   :  { %v3732_v25 = vpack.c.bf16 %v3707_v1, %v3706_v9  ;;  %v7064_v1 = vld [vmem:[%s9062_s6 + $0x10] sm:$0xff] }
 0x63b   :  { %4547 = vmatpush.bf16.msrb.mxu1 %v7064_v1  ;;  %v3219_v1 = vld [vmem:[%s6330_s7 + $0x8] sm:$0xff] }
 0x63c   :  { %6783 = vmatmul.msk.bf16.gmra.mxu0 %vm814_vm1, %v3732_v25 }
 0x63d   :  { %v3649_v5 = vpop.f32.mrf.mxu1 }
 0x63e   :  { %v3650_v57 = vadd.f32 %v9005_v11, %v3649_v5 }
 0x640   :  { %6768 = vmatmul.msk.bf16.gmra.mxu1 %vm608_vm0, %v3520_v45  ;;  %v3708_v30 = vmax.f32 %v3650_v57, 0.0 }
 0x645   :  { %v3651_v46 = vpop.f32.mrf.mxu1 }
 0x646   :  { %v3652_v43 = vadd.f32 %v9005_v11, %v3651_v46 }
 0x648   :  { %v3709_v47 = vmax.f32 %v3652_v43, 0.0 }
 0x649   :  { %v9067_v33 = vpop.f32.mrf.mxu0 }
 0x64a   :  { %10403 = vst [vmem:[#allocation12_spill] sm:$0xff] %v9067_v33  ;;  %v3733_v42 = vpack.c.bf16 %v3709_v47, %v3708_v30 }
 0x64c   :  { %6784 = vmatmul.msk.bf16.gmra.mxu0 %vm814_vm1, %v3733_v42 }
 0x64d   :  { %v3654_v35 = vpop.f32.mrf.mxu1 }
 0x64e   :  { %v3655_v29 = vadd.f32 %v9005_v11, %v3654_v35 }
 0x650   :  { %v3710_v56 = vmax.f32 %v3655_v29, 0.0 }
 0x651   :  { %v9071_v37 = vpop.f32.mrf.mxu0 }
 0x652   :  { %10404 = vst [vmem:[#allocation5_spill] sm:$0xff] %v9071_v37 }
 0x655   :  { %v3656_v52 = vpop.f32.mrf.mxu1 }
 0x656   :  { %v3657_v21 = vadd.f32 %v9005_v11, %v3656_v52 }
 0x658   :  { %v3711_v15 = vmax.f32 %v3657_v21, 0.0 }
 0x659   :  { %v3819_v3 = vpop.f32.mrf.mxu0 }
 0x65a   :  { %v3734_v27 = vpack.c.bf16 %v3711_v15, %v3710_v56  ;;  %v9080_v32 = vadd.f32 %v9077_v61, %v3819_v3 }
 0x65c   :  { %6785 = vmatmul.msk.bf16.gmra.mxu0 %vm814_vm1, %v3734_v27 }
 0x65d   :  { %v3659_v22 = vpop.f32.mrf.mxu1 }
 0x65e   :  { %v3660_v26 = vadd.f32 %v9005_v11, %v3659_v22 }
 0x660   :  { %v3712_v50 = vmax.f32 %v3660_v26, 0.0 }
 0x661   :  { %v3821_v14 = vpop.f32.mrf.mxu0 }
 0x662   :  { %v9083_v48 = vadd.f32 %v9077_v61, %v3821_v14 }
 0x664   :  { %v4189_v16 = vpack.c.bf16 %v9083_v48, %v9080_v32 }
 0x665   :  { %v3661_v28 = vpop.f32.mrf.mxu1 }
 0x666   :  { %v3662_v24 = vadd.f32 %v9005_v11, %v3661_v28  ;;  %6826 = vmatmul.msk.bf16.vlgmr.msra.gmra.mxu2 %vm608_vm0, %v4189_v16 }
 0x668   :  { %v3713_v13 = vmax.f32 %v3662_v24, 0.0 }
 0x669   :  { %v3824_v40 = vpop.f32.mrf.mxu0 }
 0x66a   :  { %v3735_v23 = vpack.c.bf16 %v3713_v13, %v3712_v50  ;;  %v9092_v18 = vadd.f32 %v9077_v61, %v3824_v40 }
 0x66c   :  { %6786 = vmatmul.msk.bf16.gmra.mxu0 %vm814_vm1, %v3735_v23 }
 0x66d   :  { %v3664_v53 = vpop.f32.mrf.mxu1 }
 0x66e   :  { %v3665_v6 = vadd.f32 %v9005_v11, %v3664_v53 }
 0x670   :  { %v3714_v39 = vmax.f32 %v3665_v6, 0.0 }
 0x671   :  { %v3826_v38 = vpop.f32.mrf.mxu0 }
 0x672   :  { %v9095_v7 = vadd.f32 %v9077_v61, %v3826_v38 }
 0x674   :  { %v4190_v36 = vpack.c.bf16 %v9095_v7, %v9092_v18 }
 0x675   :  { %v3666_v59 = vpop.f32.mrf.mxu1 }
 0x676   :  { %v3667_v51 = vadd.f32 %v9005_v11, %v3666_v59  ;;  %6827 = vmatmul.msk.bf16.gmra.mxu2 %vm608_vm0, %v4190_v36 }
 0x678   :  { %v3715_v54 = vmax.f32 %v3667_v51, 0.0 }
 0x679   :  { %v3829_v58 = vpop.f32.mrf.mxu0 }
 0x67a   :  { %v3736_v0 = vpack.c.bf16 %v3715_v54, %v3714_v39  ;;  %v9105_v19 = vadd.f32 %v9077_v61, %v3829_v58 }
 0x67c   :  { %6787 = vmatmul.msk.bf16.gmra.mxu0 %vm814_vm1, %v3736_v0 }
 0x67d   :  { %v3669_v12 = vpop.f32.mrf.mxu1 }
 0x67e   :  { %v3670_v49 = vadd.f32 %v9005_v11, %v3669_v12 }
 0x680   :  { %v3716_v62 = vmax.f32 %v3670_v49, 0.0 }
 0x681   :  { %v3831_v41 = vpop.f32.mrf.mxu0 }
 0x682   :  { %v9108_v8 = vadd.f32 %v9077_v61, %v3831_v41  ;;  %v7063_v41 = vld [vmem:[%s9062_s6 + $0x8] sm:$0xff] }
 0x683   :  { %4548 = vmatpush.bf16.msrb.mxu1 %v7063_v41 }
 0x684   :  { %v4191_v20 = vpack.c.bf16 %v9108_v8, %v9105_v19 }
 0x685   :  { %v3671_v63 = vpop.f32.mrf.mxu1 }
 0x686   :  { %v3672_v34 = vadd.f32 %v9005_v11, %v3671_v63  ;;  %6828 = vmatmul.msk.bf16.gmra.mxu2 %vm608_vm0, %v4191_v20 }
 0x688   :  { %v3717_v31 = vmax.f32 %v3672_v34, 0.0 }
 0x689   :  { %v3834_v17 = vpop.f32.mrf.mxu0 }
 0x68a   :  { %v3737_v9 = vpack.c.bf16 %v3717_v31, %v3716_v62  ;;  %v9118_v25 = vadd.f32 %v9077_v61, %v3834_v17 }
 0x68c   :  { %6788 = vmatmul.msk.bf16.gmra.mxu0 %vm814_vm1, %v3737_v9  ;;  %v3218_v9 = vld [vmem:[%s6330_s7] sm:$0xff]  ;;  %s7478_s7 = smov 39  }
 0x68d   :  { %v3674_v60 = vpop.f32.mrf.mxu1  ;;  %s10254_s13 = sld [smem:[%s10316_s0 + %s7478_s7]]  }
 0x68e   :  { %v3675_v5 = vadd.f32 %v9005_v11, %v3674_v60  ;;  %v3899_v60 = vpack.c.bf16 %v3219_v1, %v3218_v9 }
 0x690   :  { %v3718_v46 = vmax.f32 %v3675_v5, 0.0 }
 0x691   :  { %v3836_v55 = vpop.f32.mrf.mxu0 }
 0x692   :  { %v9121_v10 = vadd.f32 %v9077_v61, %v3836_v55 }
 0x694   :  { %v4192_v45 = vpack.c.bf16 %v9121_v10, %v9118_v25 }
 0x695   :  { %v3676_v57 = vpop.f32.mrf.mxu1 }
 0x696   :  { %v3677_v44 = vadd.f32 %v9005_v11, %v3676_v57  ;;  %6829 = vmatmul.msk.bf16.gmra.mxu2 %vm608_vm0, %v4192_v45 }
 0x698   :  { %v3719_v43 = vmax.f32 %v3677_v44, 0.0 }
 0x699   :  { %v3839_v30 = vpop.f32.mrf.mxu0 }
 0x69a   :  { %v3738_v47 = vpack.c.bf16 %v3719_v43, %v3718_v46  ;;  %v9130_v35 = vadd.f32 %v9077_v61, %v3839_v30 }
 0x69c   :  { %6789 = vmatmul.msk.bf16.gmra.mxu0 %vm814_vm1, %v3738_v47 }
 0x69d   :  { %v3679_v42 = vpop.f32.mrf.mxu1 }
 0x69e   :  { %v3680_v52 = vadd.f32 %v9005_v11, %v3679_v42 }
 0x6a0   :  { %v3720_v3 = vmax.f32 %v3680_v52, 0.0 }
 0x6a1   :  { %v3841_v4 = vpop.f32.mrf.mxu0 }
 0x6a2   :  { %v9133_v29 = vadd.f32 %v9077_v61, %v3841_v4 }
 0x6a4   :  { %v4193_v21 = vpack.c.bf16 %v9133_v29, %v9130_v35 }
 0x6a5   :  { %v3681_v56 = vpop.f32.mrf.mxu1 }
 0x6a6   :  { %v3682_v15 = vadd.f32 %v9005_v11, %v3681_v56  ;;  %6830 = vmatmul.msk.bf16.gmra.mxu2 %vm608_vm0, %v4193_v21 }
 0x6a8   :  { %v3721_v27 = vmax.f32 %v3682_v15, 0.0 }
 0x6a9   :  { %v3844_v22 = vpop.f32.mrf.mxu0 }
 0x6aa   :  { %v3739_v14 = vpack.c.bf16 %v3721_v27, %v3720_v3  ;;  %v9142_v28 = vadd.f32 %v9077_v61, %v3844_v22  ;;  %v7062_v3 = vld [vmem:[%s9062_s6] sm:$0xff]  ;;  %s7477_s6 = smov 38  }
 0x6ab   :  { %4549 = vmatpush.bf16.msrb.mxu1 %v7062_v3  ;;  %s10226_s10 = sld [smem:[%s10316_s0 + %s7477_s6]]  }
 0x6ac   :  { %6790 = vmatmul.msk.bf16.gmra.mxu0 %vm814_vm1, %v3739_v14 }
 0x6ad   :  { %v3684_v26 = vpop.f32.mrf.mxu1 }
 0x6ae   :  { %v3685_v50 = vadd.f32 %v9005_v11, %v3684_v26 }
 0x6b0   :  { %v3722_v53 = vmax.f32 %v3685_v50, 0.0 }
 0x6b1   :  { %v3846_v16 = vpop.f32.mrf.mxu0 }
 0x6b2   :  { %v9145_v24 = vadd.f32 %v9077_v61, %v3846_v16 }
 0x6b4   :  { %v4194_v13 = vpack.c.bf16 %v9145_v24, %v9142_v28 }
 0x6b5   :  { %v3686_v40 = vpop.f32.mrf.mxu1 }
 0x6b6   :  { %v3687_v23 = vadd.f32 %v9005_v11, %v3686_v40  ;;  %6831 = vmatmul.msk.bf16.gmra.mxu2 %vm608_vm0, %v4194_v13 }
 0x6b8   :  { %v3723_v38 = vmax.f32 %v3687_v23, 0.0 }
 0x6b9   :  { %v3849_v6 = vpop.f32.mrf.mxu0 }
 0x6ba   :  { %v3740_v36 = vpack.c.bf16 %v3723_v38, %v3722_v53  ;;  %v9154_v39 = vadd.f32 %v9077_v61, %v3849_v6 }
 0x6bc   :  { %6791 = vmatmul.msk.bf16.gmra.mxu0 %vm814_vm1, %v3740_v36  ;;  %10405 = vst [vmem:[#allocation6_spill] sm:$0xff] %v9154_v39 }
 0x6bd   :  { %v3689_v59 = vpop.f32.mrf.mxu1 }
 0x6be   :  { %v3690_v58 = vadd.f32 %v9005_v11, %v3689_v59 }
 0x6c0   :  { %v3724_v49 = vmax.f32 %v3690_v58, 0.0 }
 0x6c1   :  { %v3851_v51 = vpop.f32.mrf.mxu0 }
 0x6c2   :  { %v9157_v54 = vadd.f32 %v9077_v61, %v3851_v51 }
 0x6c4   :  { %v4195_v0 = vpack.c.bf16 %v9157_v54, %v9154_v39 }
 0x6c5   :  { %v3691_v2 = vpop.f32.mrf.mxu1 }
 0x6c6   :  { %v3692_v12 = vadd.f32 %v9005_v11, %v3691_v2  ;;  %6832 = vmatmul.msk.bf16.gmra.mxu2 %vm608_vm0, %v4195_v0 }
 0x6c8   :  { %v3725_v20 = vmax.f32 %v3692_v12, 0.0 }
 0x6c9   :  { %v3854_v63 = vpop.f32.mrf.mxu0 }
 0x6ca   :  { %v3741_v34 = vpack.c.bf16 %v3725_v20, %v3724_v49  ;;  %v9170_v31 = vadd.f32 %v9077_v61, %v3854_v63 }
 0x6cc   :  { %6792 = vmatmul.msk.bf16.gmra.mxu0 %vm814_vm1, %v3741_v34  ;;  %10406 = vst [vmem:[#allocation13_spill] sm:$0xff] %v9170_v31 }
 0x6d1   :  { %v3856_v62 = vpop.f32.mrf.mxu0 }
 0x6d2   :  { %v9173_v11 = vadd.f32 %v9077_v61, %v3856_v62 }
 0x6d4   :  { %10407 = vst [vmem:[#allocation7_spill] sm:$0xff] %v9173_v11  ;;  %v4196_v17 = vpack.c.bf16 %v9173_v11, %v9170_v31 }
 0x6d6   :  { %6833 = vmatmul.msk.bf16.gmra.mxu2 %vm608_vm0, %v4196_v17 }
 0x6d9   :  { %v3859_v55 = vpop.f32.mrf.mxu0 }
 0x6da   :  { %v9185_v45 = vadd.f32 %v9077_v61, %v3859_v55 }
 0x6dc   :  { %6809 = vmatmul.msk.bf16.vlgmr.msra.gmra.mxu0 %vm608_vm0, %v3899_v60  ;;  %10408 = vst [vmem:[#allocation16_spill] sm:$0xff] %v9185_v45 }
 0x6e1   :  { %v3861_v5 = vpop.f32.mrf.mxu0 }
 0x6e2   :  { %v9188_v57 = vadd.f32 %v9077_v61, %v3861_v5 }
 0x6e4   :  { %10409 = vst [vmem:[#allocation14_spill] sm:$0xff] %v9188_v57  ;;  %v4197_v44 = vpack.c.bf16 %v9188_v57, %v9185_v45 }
 0x6e6   :  { %6834 = vmatmul.msk.bf16.gmra.mxu2 %vm608_vm0, %v4197_v44 }
 0x6e9   :  { %v3864_v46 = vpop.f32.mrf.mxu0  ;;  %v4294_v22 = vpop.f32.mrf.mxu2 }
 0x6ea   :  { %v9194_v30 = vadd.f32 %v9077_v61, %v3864_v46 }
 0x6ec   :  { %10410 = vst [vmem:[#allocation15_spill] sm:$0xff] %v9194_v30 }
 0x6f1   :  { %v3866_v43 = vpop.f32.mrf.mxu0  ;;  %v4296_v13 = vpop.f32.mrf.mxu2 }
 0x6f2   :  { %v9197_v47 = vadd.f32 %v9077_v61, %v3866_v43  ;;  %v3968_v43 = vpop.permute.xlu0 %3967 }
 0x6f4   :  { %v4198_v42 = vpack.c.bf16 %v9197_v47, %v9194_v30 }
 0x6f6   :  { %6835 = vmatmul.msk.bf16.gmra.mxu2 %vm608_vm0, %v4198_v42 }
 0x6f9   :  { %v3869_v4 = vpop.f32.mrf.mxu0  ;;  %v4299_v6 = vpop.f32.mrf.mxu2 }
 0x6fa   :  { %v9203_v21 = vadd.f32 %v9077_v61, %v3869_v4 }
 0x6fc   :  { %10411 = vst [vmem:[#allocation8_spill] sm:$0xff] %v9203_v21 }
 0x701   :  { %v3871_v52 = vpop.f32.mrf.mxu0  ;;  %v4301_v51 = vpop.f32.mrf.mxu2 }
 0x702   :  { %v9206_v56 = vadd.f32 %v9077_v61, %v3871_v52  ;;  %v3973_v52 = vpop.permute.xlu2 %3972 }
 0x704   :  { %10412 = vst [vmem:[#allocation9_spill] sm:$0xff] %v9206_v56  ;;  %v4199_v15 = vpack.c.bf16 %v9206_v56, %v9203_v21 }
 0x706   :  { %6836 = vmatmul.msk.bf16.gmra.mxu2 %vm608_vm0, %v4199_v15 }
 0x709   :  { %v3874_v27 = vpop.f32.mrf.mxu0  ;;  %v4304_v41 = vpop.f32.mrf.mxu2 }
 0x70a   :  { %v9213_v26 = vadd.f32 %v9077_v61, %v3874_v27  ;;  %v9263_v27 = vld [vmem:[%s9182_s14] ss:$0 sm:$0xff]  ;;  %s7479_s14 = smov 40  }
 0x70b   :  { %s10264_s17 = sld [smem:[%s10316_s0 + %s7479_s14]]  }
 0x70c   :  { %10413 = vst [vmem:[#allocation18_spill] sm:$0xff] %v9213_v26 }
 0x711   :  { %v3876_v14 = vpop.f32.mrf.mxu0  ;;  %v4306_v20 = vpop.f32.mrf.mxu2 }
 0x712   :  { %v9216_v16 = vadd.f32 %v9077_v61, %v3876_v14 }
 0x714   :  { %10414 = vst [vmem:[#allocation17_spill] sm:$0xff] %v9216_v16  ;;  %v4200_v50 = vpack.c.bf16 %v9216_v16, %v9213_v26 }
 0x716   :  { %6837 = vmatmul.msk.bf16.gmra.mxu2 %vm608_vm0, %v4200_v50 }
 0x719   :  { %v3879_v40 = vpop.f32.mrf.mxu0  ;;  %v9248_v1 = vpop.f32.mrf.mxu2 }
 0x71a   :  { %v9222_v53 = vadd.f32 %v9077_v61, %v3879_v40 }
 0x71c   :  { %10415 = vst [vmem:[#allocation20_spill] sm:$0xff] %v9222_v53 }
 0x721   :  { %v3881_v23 = vpop.f32.mrf.mxu0  ;;  %v4311_v46 = vpop.f32.mrf.mxu2 }
 0x722   :  { %v9225_v38 = vadd.f32 %v9077_v61, %v3881_v23 }
 0x724   :  { %10416 = vst [vmem:[#allocation19_spill] sm:$0xff] %v9225_v38  ;;  %v4201_v36 = vpack.c.bf16 %v9225_v38, %v9222_v53 }
 0x726   :  { %6838 = vmatmul.msk.bf16.gmra.mxu2 %vm608_vm0, %v4201_v36 }
 0x729   :  { %v3884_v59 = vpop.f32.mrf.mxu0  ;;  %v9266_v40 = vpop.f32.mrf.mxu2 }
 0x72a   :  { %v9231_v0 = vadd.f32 %v9077_v61, %v3884_v59 }
 0x72c   :  { %10417 = vst [vmem:[#allocation21_spill] sm:$0xff] %v9231_v0 }
 0x731   :  { %v3886_v58 = vpop.f32.mrf.mxu0 }
 0x732   :  { %v9234_v2 = vadd.f32 %v9077_v61, %v3886_v58 }
 0x734   :  { %10418 = vst [vmem:[#allocation10_spill] sm:$0xff] %v9234_v2  ;;  %v4202_v12 = vpack.c.bf16 %v9234_v2, %v9231_v0 }
 0x736   :  { %6839 = vmatmul.msk.bf16.gmra.mxu2 %vm608_vm0, %v4202_v12 }
 0x739   :  { %v3889_v49 = vpop.f32.mrf.mxu0 }
 0x73a   :  { %v9240_v34 = vadd.f32 %v9077_v61, %v3889_v49  ;;  %v3978_v49 = vpop.permute.xlu1 %3977 }
 0x73c   :  { %10419 = vst [vmem:[#allocation22_spill] sm:$0xff] %v9240_v34 }
 0x741   :  { %v3891_v63 = vpop.f32.mrf.mxu0 }
 0x742   :  { %v9243_v62 = vadd.f32 %v9077_v61, %v3891_v63  ;;  %v3983_v63 = vpop.permute.xlu0 %3982 }
 0x744   :  { %10420 = vst [vmem:[#allocation11_spill] sm:$0xff] %v9243_v62  ;;  %v4203_v17 = vpack.c.bf16 %v9243_v62, %v9240_v34 }
 0x746   :  { %6840 = vmatmul.msk.bf16.gmra.mxu2 %vm608_vm0, %v4203_v17 }
 0x749   :  { %v3894_v9 = vpop.f32.mrf.mxu0 }
 0x74a   :  { %v9251_v55 = vadd.f32 %v9077_v61, %v3894_v9 }
 0x74c   :  { %10421 = vst [vmem:[#allocation23_spill] sm:$0xff] %v9251_v55 }
 0x751   :  { %v3896_v60 = vpop.f32.mrf.mxu0 }
 0x752   :  { %v9254_v5 = vadd.f32 %v9077_v61, %v3896_v60 }
 0x754   :  { %10422 = vst [vmem:[#allocation24_spill] sm:$0xff] %v9254_v5  ;;  %v4204_v44 = vpack.c.bf16 %v9254_v5, %v9251_v55 }
 0x756   :  { %6841 = vmatmul.msk.bf16.gmra.mxu2 %vm608_vm0, %v4204_v44 }
 0x759   :  { %v9259_v42 = vpop.f32.mrf.mxu0 }
 0x75a   :  { %v4125_v4 = vperm.slane %v9259_v42, 0  ;;  %v3951_v14 = vrot.slane %v9259_v42, 1 }
 0x75c   :  { %v4157_v15 = vmul.f32 %v4125_v4, %v3968_v43  ;;  %v4158_v3 = vmul.f32 %v4125_v4, %v3973_v52  ;;  %v4126_v59 = vperm.slane %v3951_v14, 0  ;;  %v3952_v52 = vrot.slane %v9259_v42, 2  ;;  %v3993_v14 = vpop.permute.xlu1 %3992 }
 0x75e   :  { %v4295_v61 = vadd.f32 %v4294_v22, %v4157_v15  ;;  %v4297_v50 = vadd.f32 %v4296_v13, %v4158_v3  ;;  %v4159_v9 = vmul.f32 %v4126_v59, %v3978_v49  ;;  %v4160_v60 = vmul.f32 %v4126_v59, %v3983_v63  ;;  %v4316_v22 = vpop.f32.mrf.mxu2  ;;  %v3988_v3 = vpop.permute.xlu2 %3987 }
 0x75f   :  { %v4127_v15 = vperm.slane %v3952_v52, 0  ;;  %v3953_v63 = vrot.slane %v9259_v42, 3 }
 0x760   :  { %v4378_v23 = vadd.f32 %v9263_v27, %v4295_v61  ;;  %v4379_v36 = vadd.f32 %v9263_v27, %v4297_v50  ;;  %v4300_v44 = vadd.f32 %v4299_v6, %v4159_v9  ;;  %v4302_v43 = vadd.f32 %v4301_v51, %v4160_v60 }
 0x762   :  { %v4410_v58 = vmax.f32 %v4378_v23, 0.0  ;;  %v4411_v12 = vmax.f32 %v4379_v36, 0.0  ;;  %v4380_v13 = vadd.f32 %v9263_v27, %v4300_v44  ;;  %v4381_v4 = vadd.f32 %v9263_v27, %v4302_v43 }
 0x763   :  { %v4161_v23 = vmul.f32 %v4127_v15, %v3988_v3  ;;  %v4162_v36 = vmul.f32 %v4127_v15, %v3993_v14  ;;  %v4128_v44 = vperm.slane %v3953_v63, 0  ;;  %v3954_v14 = vrot.slane %v9259_v42, 4 }
 0x764   :  { %v4442_v17 = vpack.c.bf16 %v4411_v12, %v4410_v58  ;;  %v4412_v6 = vmax.f32 %v4380_v13, 0.0  ;;  %v4413_v51 = vmax.f32 %v4381_v4, 0.0  ;;  %v3998_v13 = vpop.permute.xlu0 %3997 }
 0x765   :  { %v4305_v59 = vadd.f32 %v4304_v41, %v4161_v23  ;;  %v4307_v58 = vadd.f32 %v4306_v20, %v4162_v36  ;;  %v4163_v52 = vmul.f32 %v4128_v44, %v3998_v13  ;;  %v4129_v36 = vperm.slane %v3954_v14, 0 }
 0x766   :  { %6858 = vmatmul.msk.bf16.vlgmr.msrb.gmra.mxu1 %vm608_vm0, %v4442_v17  ;;  %v4319_v61 = vpop.f32.mrf.mxu2  ;;  %v4443_v50 = vpack.c.bf16 %v4413_v51, %v4412_v6  ;;  %v4003_v43 = vpop.permute.xlu2 %4002  ;;  %v3955_v13 = vrot.slane %v9259_v42, 5 }
 0x767   :  { %v4382_v12 = vadd.f32 %v9263_v27, %v4305_v59  ;;  %v4383_v49 = vadd.f32 %v9263_v27, %v4307_v58  ;;  %v4164_v6 = vmul.f32 %v4128_v44, %v4003_v43  ;;  %v4310_v41 = vadd.f32 %v9248_v1, %v4163_v52  ;;  %v4008_v58 = vpop.permute.xlu1 %4007 }
 0x768   :  { %v4165_v63 = vmul.f32 %v4129_v36, %v4008_v58  ;;  %v3956_v58 = vrot.slane %v9259_v42, 6 }
 0x769   :  { %v4414_v9 = vmax.f32 %v4382_v12, 0.0  ;;  %v4415_v60 = vmax.f32 %v4383_v49, 0.0  ;;  %v4312_v20 = vadd.f32 %v4311_v46, %v4164_v6  ;;  %v4384_v15 = vadd.f32 %v9263_v27, %v4310_v41 }
 0x76a   :  { %v4315_v1 = vadd.f32 %v9266_v40, %v4165_v63  ;;  %v4130_v6 = vperm.slane %v3955_v13, 0 }
 0x76b   :  { %v4444_v4 = vpack.c.bf16 %v4415_v60, %v4414_v9  ;;  %v4385_v3 = vadd.f32 %v9263_v27, %v4312_v20 }
 0x76c   :  { %v4013_v12 = vpop.permute.xlu0 %4012  ;;  %v4386_v44 = vadd.f32 %v9263_v27, %v4315_v1 }
 0x76d   :  { %v4417_v23 = vmax.f32 %v4385_v3, 0.0  ;;  %v4166_v9 = vmul.f32 %v4129_v36, %v4013_v12 }
 0x76e   :  { %v4321_v17 = vpop.f32.mrf.mxu2  ;;  %v4018_v41 = vpop.permute.xlu2 %4017 }
 0x76f   :  { %v4317_v46 = vadd.f32 %v4316_v22, %v4166_v9  ;;  %v4023_v20 = vpop.permute.xlu1 %4022  ;;  %v4167_v3 = vmul.f32 %v4130_v6, %v4018_v41  ;;  %v4131_v9 = vperm.slane %v3956_v58, 0  ;;  %v3957_v41 = vrot.slane %v9259_v42, 7 }
 0x770   :  { %v4168_v14 = vmul.f32 %v4130_v6, %v4023_v20 }
 0x771   :  { %v4387_v43 = vadd.f32 %v9263_v27, %v4317_v46  ;;  %v4320_v40 = vadd.f32 %v4319_v61, %v4167_v3  ;;  %v4132_v3 = vperm.slane %v3957_v41, 0 }
 0x772   :  { %v4322_v22 = vadd.f32 %v4321_v17, %v4168_v14 }
 0x773   :  { %v4419_v52 = vmax.f32 %v4387_v43, 0.0 }
 0x774   :  { %v4389_v36 = vadd.f32 %v9263_v27, %v4322_v22  ;;  %v4028_v46 = vpop.permute.xlu0 %4027 }
 0x775   :  { %v4169_v43 = vmul.f32 %v4131_v9, %v4028_v46 }
 0x776   :  { %6859 = vmatmul.msk.bf16.gmra.mxu1 %vm608_vm0, %v4443_v50  ;;  %v4324_v51 = vpop.f32.mrf.mxu2  ;;  %v4416_v50 = vmax.f32 %v4384_v15, 0.0  ;;  %v4421_v63 = vmax.f32 %v4389_v36, 0.0  ;;  %v4033_v1 = vpop.permute.xlu2 %4032 }
 0x777   :  { %v4170_v13 = vmul.f32 %v4131_v9, %v4033_v1  ;;  %v4038_v22 = vpop.permute.xlu1 %4037  ;;  %v9309_v1 = vpop.f32.mrf.mxu0 }
 0x778   :  { %v4445_v49 = vpack.c.bf16 %v4417_v23, %v4416_v50  ;;  %v4388_v23 = vadd.f32 %v9263_v27, %v4320_v40  ;;  %v4171_v36 = vmul.f32 %v4132_v3, %v4038_v22 }
 0x77e   :  { %v4326_v59 = vpop.f32.mrf.mxu2 }
 0x77f   :  { %v4327_v61 = vadd.f32 %v4326_v59, %v4170_v13  ;;  %v4053_v13 = vpop.permute.xlu1 %4052 }
 0x781   :  { %v4391_v6 = vadd.f32 %v9263_v27, %v4327_v61  ;;  %v4048_v61 = vpop.permute.xlu2 %4047 }
 0x786   :  { %6860 = vmatmul.msk.bf16.gmra.mxu1 %vm608_vm0, %v4444_v4  ;;  %v4329_v60 = vpop.f32.mrf.mxu2  ;;  %v4418_v4 = vmax.f32 %v4386_v44, 0.0 }
 0x787   :  { %v4330_v59 = vadd.f32 %v4329_v60, %v4171_v36 }
 0x788   :  { %v4446_v15 = vpack.c.bf16 %v4419_v52, %v4418_v4  ;;  %v4325_v4 = vadd.f32 %v4324_v51, %v4169_v43 }
 0x789   :  { %v4392_v9 = vadd.f32 %v9263_v27, %v4330_v59 }
 0x78a   :  { %v4390_v52 = vadd.f32 %v9263_v27, %v4325_v4 }
 0x78b   :  { %v4424_v46 = vmax.f32 %v4392_v9, 0.0 }
 0x78c   :  { %v4422_v20 = vmax.f32 %v4390_v52, 0.0 }
 0x78e   :  { %v4331_v50 = vpop.f32.mrf.mxu2 }
 0x796   :  { %6861 = vmatmul.msk.bf16.gmra.mxu1 %vm608_vm0, %v4445_v49  ;;  %v4334_v12 = vpop.f32.mrf.mxu2  ;;  %v4420_v49 = vmax.f32 %v4388_v23, 0.0  ;;  %v4043_v23 = vpop.permute.xlu0 %4042 }
 0x797   :  { %v4172_v58 = vmul.f32 %v4132_v3, %v4043_v23 }
 0x798   :  { %v4447_v44 = vpack.c.bf16 %v4421_v63, %v4420_v49 }
 0x799   :  { %v4332_v51 = vadd.f32 %v4331_v50, %v4172_v58 }
 0x79b   :  { %v4393_v49 = vadd.f32 %v9263_v27, %v4332_v51 }
 0x79d   :  { %v4425_v42 = vmax.f32 %v4393_v49, 0.0  ;;  %v9321_v49 = vld [vmem:[%s9282_s23] ss:$0 sm:$0xff] }
 0x79e   :  { %v4336_v17 = vpop.f32.mrf.mxu2 }
 0x79f   :  { %v4449_v43 = vpack.c.bf16 %v4425_v42, %v4424_v46  ;;  %v4058_v42 = vpop.permute.xlu0 %4057 }
 0x7a6   :  { %6862 = vmatmul.msk.bf16.gmra.mxu1 %vm608_vm0, %v4446_v15  ;;  %v4423_v15 = vmax.f32 %v4391_v6, 0.0  ;;  %v4339_v14 = vpop.f32.mrf.mxu2 }
 0x7a8   :  { %v4448_v40 = vpack.c.bf16 %v4423_v15, %v4422_v20  ;;  %v3958_v15 = vrot.slane %v9309_v1, 1 }
 0x7aa   :  { %v4134_v36 = vperm.slane %v3958_v15, 0 }
 0x7ac   :  { %v4175_v46 = vmul.f32 %v4134_v36, %v4058_v42 }
 0x7ae   :  { %v4341_v63 = vpop.f32.mrf.mxu2 }
 0x7b6   :  { %6863 = vmatmul.msk.bf16.gmra.mxu1 %vm608_vm0, %v4447_v44  ;;  %v4133_v44 = vperm.slane %v9309_v1, 0  ;;  %v4344_v60 = vpop.f32.mrf.mxu2 }
 0x7b8   :  { %v4174_v4 = vmul.f32 %v4133_v44, %v4053_v13  ;;  %v4173_v50 = vmul.f32 %v4133_v44, %v4048_v61  ;;  %v4340_v13 = vadd.f32 %v4339_v14, %v4175_v46  ;;  %v4068_v46 = vpop.permute.xlu1 %4067 }
 0x7ba   :  { %v4337_v52 = vadd.f32 %v4336_v17, %v4174_v4  ;;  %v4335_v6 = vadd.f32 %v4334_v12, %v4173_v50  ;;  %v4063_v17 = vpop.permute.xlu2 %4062 }
 0x7bb   :  { %v4176_v12 = vmul.f32 %v4134_v36, %v4063_v17  ;;  %v4073_v17 = vpop.permute.xlu0 %4072 }
 0x7bc   :  { %v4395_v41 = vadd.f32 %v9263_v27, %v4337_v52  ;;  %v4394_v20 = vadd.f32 %v9263_v27, %v4335_v6 }
 0x7bd   :  { %v4342_v44 = vadd.f32 %v4341_v63, %v4176_v12 }
 0x7be   :  { %v4427_v3 = vmax.f32 %v4395_v41, 0.0  ;;  %v4346_v22 = vpop.f32.mrf.mxu2  ;;  %v4426_v23 = vmax.f32 %v4394_v20, 0.0  ;;  %v4396_v41 = vadd.f32 %v9263_v27, %v4340_v13  ;;  %v3959_v20 = vrot.slane %v9309_v1, 2 }
 0x7bf   :  { %v4397_v52 = vadd.f32 %v9263_v27, %v4342_v44 }
 0x7c0   :  { %v4450_v51 = vpack.c.bf16 %v4427_v3, %v4426_v23  ;;  %v4428_v23 = vmax.f32 %v4396_v41, 0.0  ;;  %v4135_v36 = vperm.slane %v3959_v20, 0 }
 0x7c1   :  { %v4429_v3 = vmax.f32 %v4397_v52, 0.0 }
 0x7c2   :  { %v4177_v44 = vmul.f32 %v4135_v36, %v4068_v46  ;;  %v4078_v46 = vpop.permute.xlu2 %4077 }
 0x7c6   :  { %6864 = vmatmul.msk.bf16.gmra.mxu1 %vm608_vm0, %v4448_v40  ;;  %v9317_v40 = vld [vmem:[%s9274_s18] ss:$0 sm:$0xff]  ;;  %v4349_v61 = vpop.f32.mrf.mxu2 }
 0x7ce   :  { %v4351_v12 = vpop.f32.mrf.mxu2 }
 0x7d6   :  { %6865 = vmatmul.msk.bf16.gmra.mxu1 %vm608_vm0, %v4449_v43 }
 0x7e3   :  { %v4551_v58 = vpop.f32.mrf.mxu1 }
 0x7e4   :  { %v4552_v59 = vadd.f32 %v9317_v40, %v4551_v58 }
 0x7e6   :  { %v4631_v9 = vmax.f32 %v4552_v59, 0.0  ;;  %6866 = vmatmul.msk.bf16.gmra.mxu1 %vm608_vm0, %v4450_v51  ;;  %v4451_v51 = vpack.c.bf16 %v4429_v3, %v4428_v23 }
 0x7e8   :  { %v4667_v43 = vmul.f32 %v9321_v49, %v4631_v9  ;;  %v4178_v9 = vmul.f32 %v4135_v36, %v4073_v17  ;;  %v4083_v17 = vpop.permute.xlu1 %4082 }
 0x7ea   :  { %v4699_v4 = vsel %vm814_vm1, %v4667_v43, 0.0  ;;  %v4347_v43 = vadd.f32 %v4346_v22, %v4178_v9 }
 0x7eb   :  { %v4553_v50 = vpop.f32.mrf.mxu1  ;;  %4700 = vadd.xlane.f32.xlu1 %v4699_v4  ;;  %v4345_v4 = vadd.f32 %v4344_v60, %v4177_v44 }
 0x7ec   :  { %v4554_v6 = vadd.f32 %v9317_v40, %v4553_v50 }
 0x7ed   :  { %v4398_v20 = vadd.f32 %v9263_v27, %v4345_v4 }
 0x7ee   :  { %v4632_v15 = vmax.f32 %v4554_v6, 0.0  ;;  %v4399_v6 = vadd.f32 %v9263_v27, %v4347_v43 }
 0x7ef   :  { %v4430_v36 = vmax.f32 %v4398_v20, 0.0 }
 0x7f0   :  { %v4668_v63 = vmul.f32 %v9321_v49, %v4632_v15  ;;  %v3960_v15 = vrot.slane %v9309_v1, 3  ;;  %v4431_v23 = vmax.f32 %v4399_v6, 0.0 }
 0x7f2   :  { %v4702_v14 = vsel %vm814_vm1, %v4668_v63, 0.0  ;;  %v4354_v63 = vpop.f32.mrf.mxu2 }
 0x7f3   :  { %v4556_v58 = vpop.f32.mrf.mxu1  ;;  %4703 = vadd.xlane.f32.xlu0 %v4702_v14  ;;  %v4136_v14 = vperm.slane %v3960_v15, 0 }
 0x7f4   :  { %v4557_v59 = vadd.f32 %v9317_v40, %v4556_v58 }
 0x7f5   :  { %v4180_v9 = vmul.f32 %v4136_v14, %v4083_v17  ;;  %v4179_v44 = vmul.f32 %v4136_v14, %v4078_v46  ;;  %v4093_v17 = vpop.permute.xlu2 %4092  ;;  %v4088_v46 = vpop.permute.xlu0 %4087 }
 0x7f6   :  { %v4633_v42 = vmax.f32 %v4557_v59, 0.0  ;;  %6867 = vmatmul.msk.bf16.gmra.mxu1 %vm608_vm0, %v4451_v51  ;;  %v4452_v51 = vpack.c.bf16 %v4431_v23, %v4430_v36 }
 0x7f7   :  { %v4352_v43 = vadd.f32 %v4351_v12, %v4180_v9 }
 0x7f8   :  { %v4669_v13 = vmul.f32 %v9321_v49, %v4633_v42 }
 0x7fa   :  { %v4705_v50 = vsel %vm814_vm1, %v4669_v13, 0.0  ;;  %v4356_v4 = vpop.f32.mrf.mxu2 }
 0x7fb   :  { %v4558_v52 = vpop.f32.mrf.mxu1  ;;  %4706 = vadd.xlane.f32.xlu2 %v4705_v50  ;;  %v4350_v50 = vadd.f32 %v4349_v61, %v4179_v44 }
 0x7fc   :  { %v4559_v41 = vadd.f32 %v9317_v40, %v4558_v52 }
 0x7fd   :  { %v4400_v15 = vadd.f32 %v9263_v27, %v4350_v50 }
 0x7fe   :  { %v4634_v3 = vmax.f32 %v4559_v41, 0.0  ;;  %v4401_v41 = vadd.f32 %v9263_v27, %v4352_v43 }
 0x7ff   :  { %v4432_v36 = vmax.f32 %v4400_v15, 0.0 }
 0x800   :  { %v4670_v22 = vmul.f32 %v9321_v49, %v4634_v3  ;;  %v3961_v3 = vrot.slane %v9309_v1, 4 }
 0x802   :  { %v4708_v60 = vsel %vm814_vm1, %v4670_v22, 0.0  ;;  %v4433_v22 = vmax.f32 %v4401_v41, 0.0  ;;  %v4137_v14 = vperm.slane %v3961_v3, 0 }
 0x803   :  { %4709 = vadd.xlane.f32.xlu1 %v4708_v60  ;;  %v4561_v58 = vpop.f32.mrf.mxu1  ;;  %v4359_v60 = vpop.f32.mrf.mxu2 }
 0x804   :  { %v4562_v59 = vadd.f32 %v9317_v40, %v4561_v58  ;;  %v4182_v9 = vmul.f32 %v4137_v14, %v4093_v17  ;;  %v4181_v44 = vmul.f32 %v4137_v14, %v4088_v46 }
 0x806   :  { %v4635_v42 = vmax.f32 %v4562_v59, 0.0  ;;  %6868 = vmatmul.msk.bf16.gmra.mxu1 %vm608_vm0, %v4452_v51  ;;  %v4453_v51 = vpack.c.bf16 %v4433_v22, %v4432_v36  ;;  %v4357_v43 = vadd.f32 %v4356_v4, %v4182_v9  ;;  %v4355_v50 = vadd.f32 %v4354_v63, %v4181_v44 }
 0x808   :  { %v4671_v13 = vmul.f32 %v9321_v49, %v4635_v42  ;;  %v4403_v41 = vadd.f32 %v9263_v27, %v4357_v43  ;;  %v4402_v3 = vadd.f32 %v9263_v27, %v4355_v50 }
 0x80a   :  { %v4711_v52 = vsel %vm814_vm1, %v4671_v13, 0.0  ;;  %v4434_v36 = vmax.f32 %v4402_v3, 0.0 }
 0x80b   :  { %v4563_v6 = vpop.f32.mrf.mxu1  ;;  %4712 = vadd.xlane.f32.xlu2 %v4711_v52  ;;  %v4361_v15 = vpop.f32.mrf.mxu2 }
 0x80c   :  { %v4564_v20 = vadd.f32 %v9317_v40, %v4563_v6 }
 0x80e   :  { %v4636_v23 = vmax.f32 %v4564_v20, 0.0 }
 0x810   :  { %v4672_v12 = vmul.f32 %v9321_v49, %v4636_v23  ;;  %v3962_v23 = vrot.slane %v9309_v1, 5 }
 0x812   :  { %v4714_v61 = vsel %vm814_vm1, %v4672_v12, 0.0  ;;  %v4435_v12 = vmax.f32 %v4403_v41, 0.0  ;;  %v4138_v14 = vperm.slane %v3962_v23, 0  ;;  %v3963_v23 = vrot.slane %v9309_v1, 6 }
 0x813   :  { %4715 = vadd.xlane.f32.xlu1 %v4714_v61  ;;  %v4566_v58 = vpop.f32.mrf.mxu1  ;;  %v4364_v46 = vpop.f32.mrf.mxu2 }
 0x814   :  { %v4567_v59 = vadd.f32 %v9317_v40, %v4566_v58  ;;  %v4454_v58 = vpack.c.bf16 %v4435_v12, %v4434_v36 }
 0x816   :  { %v4637_v42 = vmax.f32 %v4567_v59, 0.0  ;;  %6869 = vmatmul.msk.bf16.gmra.mxu1 %vm608_vm0, %v4453_v51  ;;  %v4103_v59 = vpop.permute.xlu0 %4102 }
 0x817   :  { %v4184_v17 = vmul.f32 %v4138_v14, %v4103_v59 }
 0x818   :  { %v4673_v13 = vmul.f32 %v9321_v49, %v4637_v42  ;;  %v4098_v42 = vpop.permute.xlu1 %4097 }
 0x819   :  { %v4183_v44 = vmul.f32 %v4138_v14, %v4098_v42  ;;  %v4362_v43 = vadd.f32 %v4361_v15, %v4184_v17  ;;  %v4139_v14 = vperm.slane %v3963_v23, 0  ;;  %v3964_v23 = vrot.slane %v9309_v1, 7 }
 0x81a   :  { %v4717_v52 = vsel %vm814_vm1, %v4673_v13, 0.0 }
 0x81b   :  { %v4568_v6 = vpop.f32.mrf.mxu1  ;;  %4718 = vadd.xlane.f32.xlu1 %v4717_v52  ;;  %v4360_v50 = vadd.f32 %v4359_v60, %v4183_v44  ;;  %v4405_v41 = vadd.f32 %v9263_v27, %v4362_v43  ;;  %v4366_v15 = vpop.f32.mrf.mxu2 }
 0x81c   :  { %v4569_v20 = vadd.f32 %v9317_v40, %v4568_v6 }
 0x81d   :  { %v4404_v3 = vadd.f32 %v9263_v27, %v4360_v50  ;;  %v4437_v12 = vmax.f32 %v4405_v41, 0.0 }
 0x81e   :  { %v4638_v22 = vmax.f32 %v4569_v20, 0.0  ;;  %v4118_v1 = vpop.permute.xlu0 %4117 }
 0x81f   :  { %v4436_v36 = vmax.f32 %v4404_v3, 0.0 }
 0x820   :  { %v4674_v4 = vmul.f32 %v9321_v49, %v4638_v22 }
 0x822   :  { %v4720_v63 = vsel %vm814_vm1, %v4674_v4, 0.0 }
 0x823   :  { %v4571_v61 = vpop.f32.mrf.mxu1  ;;  %4721 = vadd.xlane.f32.xlu0 %v4720_v63 }
 0x824   :  { %v4572_v51 = vadd.f32 %v9317_v40, %v4571_v61  ;;  %v4455_v61 = vpack.c.bf16 %v4437_v12, %v4436_v36  ;;  %v104_v12 = vstv %s6360_s27  ;;  %v4140_v36 = vperm.slane %v3964_v23, 0  ;;  %s6367_s27 = sld [smem:[%s10316_s0 + %s7482_s24]]  }
 0x825   :  { %105 = vst [vmem:[#allocation3] sm:$0x1] %v104_v12 }
 0x826   :  { %v4639_v9 = vmax.f32 %v4572_v51, 0.0  ;;  %6870 = vmatmul.msk.bf16.gmra.mxu1 %vm608_vm0, %v4454_v58  ;;  %v4113_v51 = vpop.permute.xlu1 %4112 }
 0x827   :  { %v4186_v59 = vmul.f32 %v4139_v14, %v4113_v51 }
 0x828   :  { %v4675_v13 = vmul.f32 %v9321_v49, %v4639_v9  ;;  %v4108_v9 = vpop.permute.xlu2 %4107 }
 0x829   :  { %v4185_v42 = vmul.f32 %v4139_v14, %v4108_v9  ;;  %v4367_v44 = vadd.f32 %v4366_v15, %v4186_v59  ;;  %v4187_v9 = vmul.f32 %v4140_v36, %v4118_v1 }
 0x82a   :  { %v4723_v52 = vsel %vm814_vm1, %v4675_v13, 0.0 }
 0x82b   :  { %v4573_v6 = vpop.f32.mrf.mxu1  ;;  %4724 = vadd.xlane.f32.xlu0 %v4723_v52  ;;  %v4365_v13 = vadd.f32 %v4364_v46, %v4185_v42  ;;  %v4369_v52 = vpop.f32.mrf.mxu2  ;;  %v4407_v41 = vadd.f32 %v9263_v27, %v4367_v44 }
 0x82c   :  { %v4574_v20 = vadd.f32 %v9317_v40, %v4573_v6 }
 0x82d   :  { %v4406_v3 = vadd.f32 %v9263_v27, %v4365_v13 }
 0x82e   :  { %v4640_v22 = vmax.f32 %v4574_v20, 0.0 }
 0x82f   :  { %v4438_v46 = vmax.f32 %v4406_v3, 0.0 }
 0x830   :  { %v4676_v4 = vmul.f32 %v9321_v49, %v4640_v22 }
 0x832   :  { %v4726_v60 = vsel %vm814_vm1, %v4676_v4, 0.0  ;;  %v4439_v4 = vmax.f32 %v4407_v41, 0.0 }
 0x833   :  { %4727 = vadd.xlane.f32.xlu2 %v4726_v60  ;;  %v4576_v63 = vpop.f32.mrf.mxu1  ;;  %v4371_v51 = vpop.f32.mrf.mxu2 }
 0x834   :  { %v4577_v58 = vadd.f32 %v9317_v40, %v4576_v63  ;;  %v4456_v63 = vpack.c.bf16 %v4439_v4, %v4438_v46 }
 0x836   :  { %v4641_v17 = vmax.f32 %v4577_v58, 0.0  ;;  %6871 = vmatmul.msk.bf16.gmra.mxu1 %vm608_vm0, %v4455_v61  ;;  %v4123_v58 = vpop.permute.xlu2 %4122 }
 0x837   :  { %v4188_v59 = vmul.f32 %v4140_v36, %v4123_v58  ;;  %v9399_v58 = vld [vmem:[#allocation3] ss:$0 sm:$0xff] }
 0x838   :  { %v4677_v43 = vmul.f32 %v9321_v49, %v4641_v17 }
 0x839   :  { %v4372_v42 = vadd.f32 %v4371_v51, %v4188_v59 }
 0x83a   :  { %v4729_v50 = vsel %vm814_vm1, %v4677_v43, 0.0  ;;  %v4370_v43 = vadd.f32 %v4369_v52, %v4187_v9 }
 0x83b   :  { %v4578_v6 = vpop.f32.mrf.mxu1  ;;  %4730 = vadd.xlane.f32.xlu2 %v4729_v50 }
 0x83c   :  { %v4579_v20 = vadd.f32 %v9317_v40, %v4578_v6  ;;  %v4409_v6 = vadd.f32 %v9263_v27, %v4372_v42  ;;  %v9405_v42 = vld [vmem:[%s8785_s21] sm:$0xff] }
 0x83d   :  { %vm4831_vm8 = vcmp.gt.f32.partialorder %v9405_v42, 0.0 }
 0x83e   :  { %v4642_v22 = vmax.f32 %v4579_v20, 0.0  ;;  %v4408_v20 = vadd.f32 %v9263_v27, %v4370_v43  ;;  %v4441_v23 = vmax.f32 %v4409_v6, 0.0 }
 0x840   :  { %v4678_v15 = vmul.f32 %v9321_v49, %v4642_v22  ;;  %v4440_v12 = vmax.f32 %v4408_v20, 0.0 }
 0x842   :  { %v4732_v14 = vsel %vm814_vm1, %v4678_v15, 0.0  ;;  %v4457_v52 = vpack.c.bf16 %v4441_v23, %v4440_v12 }
 0x843   :  { %4733 = vadd.xlane.f32.xlu1 %v4732_v14  ;;  %v4581_v60 = vpop.f32.mrf.mxu1 }
 0x844   :  { %v4582_v61 = vadd.f32 %v9317_v40, %v4581_v60 }
 0x846   :  { %v4643_v17 = vmax.f32 %v4582_v61, 0.0  ;;  %6872 = vmatmul.msk.bf16.gmra.mxu1 %vm608_vm0, %v4456_v63 }
 0x848   :  { %v4679_v44 = vmul.f32 %v9321_v49, %v4643_v17 }
 0x84a   :  { %v4735_v13 = vsel %vm814_vm1, %v4679_v44, 0.0 }
 0x84b   :  { %v4583_v50 = vpop.f32.mrf.mxu1  ;;  %4736 = vadd.xlane.f32.xlu1 %v4735_v13  ;;  %v9410_v13 = vld [vmem:[%s8785_s21 + $0x8] sm:$0xff] }
 0x84c   :  { %v4584_v41 = vadd.f32 %v9317_v40, %v4583_v50  ;;  %vm4832_vm9 = vcmp.gt.f32.partialorder %v9410_v13, 0.0 }
 0x84e   :  { %v4644_v3 = vmax.f32 %v4584_v41, 0.0 }
 0x850   :  { %v4680_v22 = vmul.f32 %v9321_v49, %v4644_v3 }
 0x852   :  { %v4738_v4 = vsel %vm814_vm1, %v4680_v22, 0.0 }
 0x853   :  { %v4586_v15 = vpop.f32.mrf.mxu1  ;;  %4739 = vadd.xlane.f32.xlu0 %v4738_v4 }
 0x854   :  { %v4587_v46 = vadd.f32 %v9317_v40, %v4586_v15 }
 0x856   :  { %v4645_v36 = vmax.f32 %v4587_v46, 0.0  ;;  %6873 = vmatmul.msk.bf16.gmra.mxu1 %vm608_vm0, %v4457_v52 }
 0x858   :  { %v4681_v14 = vmul.f32 %v9321_v49, %v4645_v36 }
 0x85a   :  { %v4741_v27 = vsel %vm814_vm1, %v4681_v14, 0.0 }
 0x85b   :  { %v4588_v60 = vpop.f32.mrf.mxu1  ;;  %4742 = vadd.xlane.f32.xlu0 %v4741_v27 }
 0x85c   :  { %v4589_v63 = vadd.f32 %v9317_v40, %v4588_v60 }
 0x85e   :  { %v4646_v61 = vmax.f32 %v4589_v63, 0.0  ;;  %v4701_v51 = vpop.xlane.xlu1 %4700 }
 0x85f   :  { %v4799_v1 = vadd.f32 %v9399_v58, %v4701_v51 }
 0x860   :  { %v4682_v59 = vmul.f32 %v9321_v49, %v4646_v61 }
 0x861   :  { %v4863_v6 = vsel %vm4831_vm8, %v4799_v1, -1e+30  ;;  %v9423_v1 = vld [vmem:[%s8785_s21 + $0x10] sm:$0xff] }
 0x862   :  { %v4744_v17 = vsel %vm814_vm1, %v4682_v59, 0.0  ;;  %v4895_v23 = vsel %vm1948_vm4, %v4863_v6, -inf  ;;  %vm4833_vm10 = vcmp.gt.f32.partialorder %v9423_v1, 0.0 }
 0x863   :  { %4745 = vadd.xlane.f32.xlu2 %v4744_v17  ;;  %v4591_v9 = vpop.f32.mrf.mxu1 }
 0x864   :  { %v4592_v44 = vadd.f32 %v9317_v40, %v4591_v9 }
 0x866   :  { %v4647_v43 = vmax.f32 %v4592_v44, 0.0  ;;  %v4704_v50 = vpop.xlane.xlu0 %4703 }
 0x867   :  { %v4800_v41 = vadd.f32 %v9399_v58, %v4704_v50  ;;  %v9428_v50 = vld [vmem:[%s8785_s21 + $0x18] sm:$0xff] }
 0x868   :  { %v4683_v20 = vmul.f32 %v9321_v49, %v4647_v43  ;;  %vm4834_vm11 = vcmp.gt.f32.partialorder %v9428_v50, 0.0 }
 0x869   :  { %v4864_v3 = vsel %vm4832_vm9, %v4800_v41, -1e+30 }
 0x86a   :  { %v4896_v22 = vsel %vm1948_vm4, %v4864_v3, -inf  ;;  %v4747_v12 = vsel %vm814_vm1, %v4683_v20, 0.0 }
 0x86b   :  { %v4897_v4 = vmax.f32 %v4895_v23, %v4896_v22  ;;  %v4593_v15 = vpop.f32.mrf.mxu1  ;;  %4748 = vadd.xlane.f32.xlu0 %v4747_v12 }
 0x86c   :  { %v4594_v52 = vadd.f32 %v9317_v40, %v4593_v15 }
 0x86d   :  { %v4898_v46 = vrot.slane %v4897_v4, 4 }
 0x86e   :  { %v4648_v36 = vmax.f32 %v4594_v52, 0.0  ;;  %v4707_v27 = vpop.xlane.xlu2 %4706 }
 0x86f   :  { %v4899_v14 = vmax.f32 %v4897_v4, %v4898_v46  ;;  %v4801_v59 = vadd.f32 %v9399_v58, %v4707_v27 }
 0x870   :  { %v4684_v60 = vmul.f32 %v9321_v49, %v4648_v36 }
 0x871   :  { %v4900_v63 = vrot.slane %v4899_v14, 2  ;;  %v4865_v23 = vsel %vm4833_vm10, %v4801_v59, -1e+30 }
 0x872   :  { %v4750_v61 = vsel %vm814_vm1, %v4684_v60, 0.0  ;;  %v4904_v46 = vsel %vm1948_vm4, %v4865_v23, -inf }
 0x873   :  { %v4901_v51 = vmax.f32 %v4899_v14, %v4900_v63  ;;  %4751 = vadd.xlane.f32.xlu2 %v4750_v61  ;;  %v4596_v17 = vpop.f32.mrf.mxu1 }
 0x874   :  { %v4597_v9 = vadd.f32 %v9317_v40, %v4596_v17 }
 0x875   :  { %v4902_v44 = vrot.slane %v4901_v51, 1 }
 0x876   :  { %v4649_v43 = vmax.f32 %v4597_v9, 0.0  ;;  %v4710_v41 = vpop.xlane.xlu1 %4709 }
 0x877   :  { %v4903_v20 = vmax.f32 %v4901_v51, %v4902_v44  ;;  %v4802_v22 = vadd.f32 %v9399_v58, %v4710_v41 }
 0x878   :  { %v4685_v12 = vmul.f32 %v9321_v49, %v4649_v43 }
 0x879   :  { %v5039_v4 = vsub.f32 %v4863_v6, %v4903_v20  ;;  %v5040_v15 = vsub.f32 %v4864_v3, %v4903_v20  ;;  %v4866_v52 = vsel %vm4834_vm11, %v4802_v22, -1e+30 }
 0x87a   :  { %v4905_v36 = vsel %vm1948_vm4, %v4866_v52, -inf  ;;  %v4753_v14 = vsel %vm814_vm1, %v4685_v12, 0.0 }
 0x87b   :  { %v5071_v27 = vmul.f32 1.442695, %v5039_v4  ;;  %v5073_v60 = vmul.f32 1.442695, %v5040_v15  ;;  %v4906_v63 = vmax.f32 %v4904_v46, %v4905_v36  ;;  %v4598_v61 = vpop.f32.mrf.mxu1  ;;  %4754 = vadd.xlane.f32.xlu1 %v4753_v14  ;;  %v9441_v15 = vld [vmem:[%s8785_s21 + $0x20] sm:$0xff] }
 0x87c   :  { %v4599_v51 = vadd.f32 %v9317_v40, %v4598_v61  ;;  %vm4835_vm12 = vcmp.gt.f32.partialorder %v9441_v15, 0.0 }
 0x87d   :  { %7273 = vpow2.f32 %v5071_v27  ;;  %v4907_v59 = vrot.slane %v4906_v63, 4 }
 0x87e   :  { %7275 = vpow2.f32 %v5073_v60  ;;  %v4650_v6 = vmax.f32 %v4599_v51, 0.0  ;;  %v4713_v9 = vpop.xlane.xlu2 %4712 }
 0x87f   :  { %v4908_v3 = vmax.f32 %v4906_v63, %v4907_v59  ;;  %v4803_v22 = vadd.f32 %v9399_v58, %v4713_v9  ;;  %v9452_v63 = vld [vmem:[%s8785_s21 + $0x28] sm:$0xff] }
 0x880   :  { %v4686_v17 = vmul.f32 %v9321_v49, %v4650_v6  ;;  %vm4836_vm13 = vcmp.gt.f32.partialorder %v9452_v63, 0.0 }
 0x881   :  { %v4909_v44 = vrot.slane %v4908_v3, 2  ;;  %v9457_v6 = vsel %vm4835_vm12, %v4803_v22, -1e+30 }
 0x882   :  { %v4756_v43 = vsel %vm814_vm1, %v4686_v17, 0.0 }
 0x883   :  { %v7274_v41 = vpop.eup %7273  ;;  %v4910_v20 = vmax.f32 %v4908_v3, %v4909_v44  ;;  %v4601_v12 = vpop.f32.mrf.mxu1  ;;  %4757 = vadd.xlane.f32.xlu0 %v4756_v43 }
 0x884   :  { %v7276_v4 = vpop.eup %7275  ;;  %v4602_v46 = vadd.f32 %v9317_v40, %v4601_v12  ;;  %v9446_v36 = vmul.f32 %v9405_v42, %v7274_v41  ;;  %v4913_v41 = vsel %vm1948_vm4, %v9457_v6, -inf }
 0x885   :  { %v9449_v14 = vmul.f32 %v9410_v13, %v7276_v4  ;;  %v4911_v27 = vrot.slane %v4910_v20, 1 }
 0x886   :  { %v4651_v60 = vmax.f32 %v4602_v46, 0.0  ;;  %v4716_v61 = vpop.xlane.xlu1 %4715  ;;  %v5167_v51 = vsel %vm1948_vm4, %v9446_v36, 0.0 }
 0x887   :  { %v4912_v59 = vmax.f32 %v4910_v20, %v4911_v27  ;;  %v4804_v3 = vadd.f32 %v9399_v58, %v4716_v61  ;;  %v5168_v42 = vsel %vm1948_vm4, %v9449_v14, 0.0 }
 0x888   :  { %v4687_v13 = vmul.f32 %v9321_v49, %v4651_v60  ;;  %v5169_v17 = vadd.f32 %v5168_v42, %v5167_v51 }
 0x889   :  { %v5041_v9 = vsub.f32 %v4865_v23, %v4912_v59  ;;  %v5042_v44 = vsub.f32 %v4866_v52, %v4912_v59  ;;  %v4868_v43 = vsel %vm4836_vm13, %v4804_v3, -1e+30 }
 0x88a   :  { %v4914_v12 = vsel %vm1948_vm4, %v4868_v43, -inf  ;;  %v4759_v20 = vsel %vm814_vm1, %v4687_v13, 0.0  ;;  %v5170_v22 = vrot.slane %v5169_v17, 4 }
 0x88b   :  { %v5075_v4 = vmul.f32 1.442695, %v5041_v9  ;;  %v5077_v46 = vmul.f32 1.442695, %v5042_v44  ;;  %v4915_v27 = vmax.f32 %v4913_v41, %v4914_v12  ;;  %v4603_v61 = vpop.f32.mrf.mxu1  ;;  %4760 = vadd.xlane.f32.xlu0 %v4759_v20  ;;  %v9472_v20 = vld [vmem:[%s8785_s21 + $0x30] sm:$0xff] }
 0x88c   :  { %v4604_v37 = vadd.f32 %v9317_v40, %v4603_v61  ;;  %v5171_v60 = vadd.f32 %v5170_v22, %v5169_v17  ;;  %vm4837_vm8 = vcmp.gt.f32.partialorder %v9472_v20, 0.0 }
 0x88d   :  { %7277 = vpow2.f32 %v5075_v4  ;;  %v4916_v23 = vrot.slane %v4915_v27, 4 }
 0x88e   :  { %7279 = vpow2.f32 %v5077_v46  ;;  %v4652_v52 = vmax.f32 %v4604_v37, 0.0  ;;  %v5172_v51 = vrot.slane %v5171_v60, 2  ;;  %v4719_v3 = vpop.xlane.xlu1 %4718 }
 0x88f   :  { %v4917_v59 = vmax.f32 %v4915_v27, %v4916_v23  ;;  %v4805_v9 = vadd.f32 %v9399_v58, %v4719_v3 }
 0x890   :  { %v4688_v42 = vmul.f32 %v9321_v49, %v4652_v52  ;;  %v5173_v13 = vadd.f32 %v5172_v51, %v5171_v60  ;;  %v9485_v52 = vld [vmem:[%s8785_s21 + $0x38] sm:$0xff] }
 0x891   :  { %v4918_v33 = vrot.slane %v4917_v59, 2  ;;  %v9482_v23 = vsel %vm4837_vm8, %v4805_v9, -1e+30  ;;  %vm4838_vm9 = vcmp.gt.f32.partialorder %v9485_v52, 0.0 }
 0x892   :  { %v4762_v44 = vsel %vm814_vm1, %v4688_v42, 0.0  ;;  %v5174_v41 = vrot.slane %v5173_v13, 1 }
 0x893   :  { %v7278_v12 = vpop.eup %7277  ;;  %v4919_v17 = vmax.f32 %v4917_v59, %v4918_v33  ;;  %4763 = vadd.xlane.f32.xlu2 %v4762_v44  ;;  %v4606_v37 = vpop.f32.mrf.mxu1 }
 0x894   :  { %v7280_v22 = vpop.eup %7279  ;;  %v4607_v4 = vadd.f32 %v9317_v40, %v4606_v37  ;;  %v5175_v46 = vadd.f32 %v5174_v41, %v5173_v13  ;;  %v9477_v27 = vmul.f32 %v9423_v1, %v7278_v12  ;;  %v4922_v12 = vsel %vm1948_vm4, %v9482_v23, -inf }
 0x895   :  { %v9480_v61 = vmul.f32 %v9428_v50, %v7280_v22  ;;  %v4920_v60 = vrot.slane %v4919_v17, 1 }
 0x896   :  { %v4653_v33 = vmax.f32 %v4607_v4, 0.0  ;;  %v4722_v51 = vpop.xlane.xlu0 %4721  ;;  %v9488_v59 = vadd.f32 1e-10, %v5175_v46  ;;  %v5176_v1 = vsel %vm1948_vm4, %v9477_v27, 0.0 }
 0x897   :  { %v4921_v3 = vmax.f32 %v4919_v17, %v4920_v60  ;;  %v4806_v42 = vadd.f32 %v9399_v58, %v4722_v51  ;;  %v5177_v50 = vsel %vm1948_vm4, %v9480_v61, 0.0 }
 0x898   :  { %v4689_v13 = vmul.f32 %v9321_v49, %v4653_v33  ;;  %7281 = vrcp.f32 %v9488_v59  ;;  %v5178_v22 = vadd.f32 %v5177_v50, %v5176_v1  ;;  %vm5332_vm13 = vweird.f32 %v9488_v59 }
 0x899   :  { %v5043_v9 = vsub.f32 %v9457_v6, %v4921_v3  ;;  %v5044_v44 = vsub.f32 %v4868_v43, %v4921_v3  ;;  %v9498_v41 = vsel %vm4838_vm9, %v4806_v42, -1e+30 }
 0x89a   :  { %v4923_v17 = vsel %vm1948_vm4, %v9498_v41, -inf  ;;  %v4765_v37 = vsel %vm814_vm1, %v4689_v13, 0.0  ;;  %v5179_v43 = vrot.slane %v5178_v22, 4 }
 0x89b   :  { %v5079_v4 = vmul.f32 1.442695, %v5043_v9  ;;  %v5081_v46 = vmul.f32 1.442695, %v5044_v44  ;;  %v4924_v60 = vmax.f32 %v4922_v12, %v4923_v17  ;;  %v4608_v33 = vpop.f32.mrf.mxu1  ;;  %4766 = vadd.xlane.f32.xlu2 %v4765_v37  ;;  %v9509_v9 = vld [vmem:[%s8785_s21 + $0x40] sm:$0xff]  ;;  %v5338_v37 = vand.u32 2147483648, %v9488_v59 }
 0x89c   :  { %v4609_v6 = vadd.f32 %v9317_v40, %v4608_v33  ;;  %v5180_v50 = vadd.f32 %v5179_v43, %v5178_v22  ;;  %vm4839_vm10 = vcmp.gt.f32.partialorder %v9509_v9, 0.0  ;;  %v5336_v22 = vand.u32 2147483647, %v9488_v59 }
 0x89d   :  { %7283 = vpow2.f32 %v5079_v4  ;;  %v4925_v51 = vrot.slane %v4924_v60, 4  ;;  %v5339_v31 = vor.u32 1.1754944e-38, %v5338_v37 }
 0x89e   :  { %v7282_v3 = vpop.eup %7281  ;;  %7285 = vpow2.f32 %v5081_v46  ;;  %v4654_v42 = vmax.f32 %v4609_v6, 0.0  ;;  %v4725_v55 = vpop.xlane.xlu0 %4724  ;;  %v5181_v4 = vrot.slane %v5180_v50, 2  ;;  %vm5337_vm9 = vcmp.eq.f32.partialorder %v5336_v22, 8.507059e+37 }
 0x89f   :  { %v4926_v5 = vmax.f32 %v4924_v60, %v4925_v51  ;;  %v5328_v11 = vmul.f32 %v7282_v3, %v9488_v59  ;;  %v4807_v12 = vadd.f32 %v9399_v58, %v4725_v55  ;;  %vm5333_vm11 = vweird.f32 %v7282_v3 }
 0x8a0   :  { %v4690_v1 = vmul.f32 %v9321_v49, %v4654_v42  ;;  %v9518_v42 = vld [vmem:[%s8785_s21 + $0x48] sm:$0xff]  ;;  %vm5334_vm8 = vmor %vm5332_vm13, %vm5333_vm11 }
 0x8a1   :  { %v4927_v13 = vrot.slane %v4926_v5, 2  ;;  %v5329_v44 = vsub.f32 1.0, %v5328_v11  ;;  %vm4840_vm12 = vcmp.gt.f32.partialorder %v9518_v42, 0.0  ;;  %v5182_v11 = vadd.f32 %v5181_v4, %v5180_v50 }
 0x8a2   :  { %v4768_v17 = vsel %vm814_vm1, %v4690_v1, 0.0 }
 0x8a3   :  { %v7284_v46 = vpop.eup %7283  ;;  %v4928_v60 = vmax.f32 %v4926_v5, %v4927_v13  ;;  %4769 = vadd.xlane.f32.xlu1 %v4768_v17  ;;  %v4611_v33 = vpop.f32.mrf.mxu1  ;;  %v5330_v6 = vmul.f32 %v7282_v3, %v5329_v44  ;;  %v9530_v44 = vsel %vm4839_vm10, %v4807_v12, -1e+30  ;;  %v5183_v34 = vrot.slane %v5182_v11, 1 }
 0x8a4   :  { %v7286_v43 = vpop.eup %7285  ;;  %v4612_v51 = vadd.f32 %v9317_v40, %v4611_v33  ;;  %v9526_v13 = vmul.f32 %v9441_v15, %v7284_v46  ;;  %v4931_v46 = vsel %vm1948_vm4, %v9530_v44, -inf }
 0x8a5   :  { %v9523_v55 = vmul.f32 %v9452_v63, %v7286_v43  ;;  %v4929_v5 = vrot.slane %v4928_v60, 1  ;;  %v5331_v1 = vadd.f32 %v7282_v3, %v5330_v6  ;;  %v5184_v15 = vadd.f32 %v5183_v34, %v5182_v11 }
 0x8a6   :  { %v4655_v17 = vmax.f32 %v4612_v51, 0.0  ;;  %v4728_v33 = vpop.xlane.xlu2 %4727  ;;  %v5185_v43 = vsel %vm1948_vm4, %v9526_v13, 0.0 }
 0x8a7   :  { %v4930_v59 = vmax.f32 %v4928_v60, %v4929_v5  ;;  %v4808_v50 = vadd.f32 %v9399_v58, %v4728_v33  ;;  %v5335_v63 = vsel %vm5334_vm8, %v7282_v3, %v5331_v1  ;;  %v5186_v37 = vsel %vm1948_vm4, %v9523_v55, 0.0 }
 0x8a8   :  { %v4691_v4 = vmul.f32 %v9321_v49, %v4655_v17  ;;  %v5340_v6 = vsel %vm5337_vm9, %v5339_v31, %v5335_v63  ;;  %v9545_v22 = vadd.f32 1e-10, %v5184_v15  ;;  %v5187_v33 = vadd.f32 %v5186_v37, %v5185_v43 }
 0x8a9   :  { %v4872_v12 = vsel %vm4840_vm12, %v4808_v50, -1e+30  ;;  %v9548_v31 = vmul.f32 %v5340_v6, %v9449_v14  ;;  %v5045_v34 = vsub.f32 %v9482_v23, %v4930_v59  ;;  %v5046_v5 = vsub.f32 %v9498_v41, %v4930_v59 }
 0x8aa   :  { %v4932_v60 = vsel %vm1948_vm4, %v4872_v12, -inf  ;;  %v4771_v3 = vsel %vm814_vm1, %v4691_v4, 0.0  ;;  %7287 = vrcp.f32 %v9545_v22  ;;  %vm5348_vm13 = vweird.f32 %v9545_v22 }
 0x8ab   :  { %v4933_v51 = vmax.f32 %v4931_v46, %v4932_v60  ;;  %v4613_v11 = vpop.f32.mrf.mxu1  ;;  %4772 = vadd.xlane.f32.xlu1 %v4771_v3  ;;  %v5083_v63 = vmul.f32 1.442695, %v5045_v34  ;;  %v5085_v15 = vmul.f32 1.442695, %v5046_v5  ;;  %v5341_v46 = vmul.f32 %v5340_v6, %v9446_v36  ;;  %v9561_v34 = vld [vmem:[%s8785_s21 + $0x50] sm:$0xff]  ;;  %v9566_v5 = vld [vmem:[%s8785_s21 + $0x58] sm:$0xff] }
 0x8ac   :  { %v4614_v1 = vadd.f32 %v9317_v40, %v4613_v11  ;;  %v5188_v60 = vrot.slane %v5187_v33, 4  ;;  %vm4841_vm10 = vcmp.gt.f32.partialorder %v9561_v34, 0.0  ;;  %vm4842_vm11 = vcmp.gt.f32.partialorder %v9566_v5, 0.0 }
 0x8ad   :  { %v4934_v17 = vrot.slane %v4933_v51, 4  ;;  %7289 = vpow2.f32 %v5083_v63 }
 0x8ae   :  { %v4656_v50 = vmax.f32 %v4614_v1, 0.0  ;;  %v4731_v62 = vpop.xlane.xlu2 %4730  ;;  %7291 = vpow2.f32 %v5085_v15 }
 0x8af   :  { %v4935_v4 = vmax.f32 %v4933_v51, %v4934_v17  ;;  %v4809_v43 = vadd.f32 %v9399_v58, %v4731_v62  ;;  %v5189_v51 = vadd.f32 %v5188_v60, %v5187_v33 }
 0x8b0   :  { %v4692_v14 = vmul.f32 %v9321_v49, %v4656_v50  ;;  %v9557_v59 = vpop.eup %7287 }
 0x8b1   :  { %v4936_v23 = vrot.slane %v4935_v4, 2  ;;  %v5344_v62 = vmul.f32 %v9557_v59, %v9545_v22  ;;  %v9571_v50 = vsel %vm4841_vm10, %v4809_v43, -1e+30  ;;  %vm5349_vm12 = vweird.f32 %v9557_v59 }
 0x8b2   :  { %v4774_v41 = vsel %vm814_vm1, %v4692_v14, 0.0  ;;  %v4940_v60 = vsel %vm1948_vm4, %v9571_v50, -inf  ;;  %vm9608_vm9 = vmor %vm5348_vm13, %vm5349_vm12 }
 0x8b3   :  { %v4937_v3 = vmax.f32 %v4935_v4, %v4936_v23  ;;  %5585 = vperm.xlu2 %7148, %v5341_v46   ;;  %v4616_v37 = vpop.f32.mrf.mxu1  ;;  %4775 = vadd.xlane.f32.xlu0 %v4774_v41  ;;  %v7290_v15 = vpop.eup %7289  ;;  %v5190_v23 = vrot.slane %v5189_v51, 2  ;;  %v5345_v43 = vsub.f32 1.0, %v5344_v62 }
 0x8b4   :  { %v4617_v36 = vadd.f32 %v9317_v40, %v4616_v37  ;;  %v7292_v46 = vpop.eup %7291 }
 0x8b5   :  { %v4938_v6 = vrot.slane %v4937_v3, 1 }
 0x8b6   :  { %v4657_v11 = vmax.f32 %v4617_v36, 0.0  ;;  %v4734_v1 = vpop.xlane.xlu1 %4733 }
 0x8b7   :  { %v4939_v17 = vmax.f32 %v4937_v3, %v4938_v6  ;;  %v4810_v63 = vadd.f32 %v9399_v58, %v4734_v1  ;;  %v5346_v1 = vmul.f32 %v9557_v59, %v5345_v43 }
 0x8b8   :  { %v4693_v4 = vmul.f32 %v9321_v49, %v4657_v11  ;;  %v9587_v11 = vmul.f32 %v9472_v20, %v7290_v15 }
 0x8b9   :  { %v5047_v40 = vsub.f32 %v9530_v44, %v4939_v17  ;;  %v5048_v33 = vsub.f32 %v4872_v12, %v4939_v17  ;;  %v9576_v14 = vsel %vm4842_vm11, %v4810_v63, -1e+30  ;;  %v9584_v44 = vmul.f32 %v9485_v52, %v7292_v46 }
 0x8ba   :  { %v4941_v41 = vsel %vm1948_vm4, %v9576_v14, -inf  ;;  %v4777_v3 = vsel %vm814_vm1, %v4693_v4, 0.0  ;;  %v5191_v17 = vadd.f32 %v5190_v23, %v5189_v51 }
 0x8bb   :  { %v5087_v37 = vmul.f32 1.442695, %v5047_v40  ;;  %v5089_v36 = vmul.f32 1.442695, %v5048_v33  ;;  %v4942_v49 = vmax.f32 %v4940_v60, %v4941_v41  ;;  %v4618_v6 = vpop.f32.mrf.mxu1  ;;  %4778 = vadd.xlane.f32.xlu0 %v4777_v3  ;;  %v5194_v40 = vsel %vm1948_vm4, %v9587_v11, 0.0  ;;  %v9601_v41 = vld [vmem:[%s8785_s21 + $0x60] sm:$0xff] }
 0x8bc   :  { %v5195_v52 = vsel %vm1948_vm4, %v9584_v44, 0.0  ;;  %v5347_v33 = vadd.f32 %v9557_v59, %v5346_v1  ;;  %v5192_v20 = vrot.slane %v5191_v17, 1  ;;  %vm4843_vm8 = vcmp.gt.f32.partialorder %v9601_v41, 0.0  ;;  %v9614_v1 = vld [vmem:[%s8785_s21 + $0x68] sm:$0xff] }
 0x8bd   :  { %7293 = vpow2.f32 %v5087_v37  ;;  %v4943_v12 = vrot.slane %v4942_v49, 4  ;;  %v5354_v3 = vand.u32 2147483648, %v9545_v22  ;;  %v5196_v37 = vadd.f32 %v5195_v52, %v5194_v40 }
 0x8be   :  { %7295 = vpow2.f32 %v5089_v36  ;;  %v4737_v62 = vpop.xlane.xlu1 %4736  ;;  %vm4844_vm10 = vcmp.gt.f32.partialorder %v9614_v1, 0.0 }
 0x8bf   :  { %v4944_v63 = vmax.f32 %v4942_v49, %v4943_v12  ;;  %v4811_v60 = vadd.f32 %v9399_v58, %v4737_v62  ;;  %v5352_v12 = vand.u32 2147483647, %v9545_v22  ;;  %v5351_v62 = vsel %vm9608_vm9, %v9557_v59, %v5347_v33 }
 0x8c0   :  { %v5355_v53 = vor.u32 1.1754944e-38, %v5354_v3  ;;  %v5197_v2 = vrot.slane %v5196_v37, 4 }
 0x8c1   :  { %v4945_v4 = vrot.slane %v4944_v63, 2  ;;  %v9623_v52 = vsel %vm4843_vm8, %v4811_v60, -1e+30  ;;  %vm5353_vm11 = vcmp.eq.f32.partialorder %v5352_v12, 8.507059e+37 }
 0x8c2   :  { %v4949_v33 = vsel %vm1948_vm4, %v9623_v52, -inf }
 0x8c3   :  { %v7294_v15 = vpop.eup %7293  ;;  %v4946_v46 = vmax.f32 %v4944_v63, %v4945_v4  ;;  %v9597_v51 = vpop.f32.mrf.mxu1  ;;  %v5193_v4 = vadd.f32 %v5192_v20, %v5191_v17 }
 0x8c4   :  { %v7296_v23 = vpop.eup %7295  ;;  %v9606_v43 = vmul.f32 %v9509_v9, %v7294_v15 }
 0x8c5   :  { %v4947_v36 = vrot.slane %v4946_v46, 1  ;;  %v9621_v9 = vmul.f32 %v9518_v42, %v7296_v23 }
 0x8c6   :  { %v4740_v63 = vpop.xlane.xlu0 %4739  ;;  %v5203_v22 = vsel %vm1948_vm4, %v9606_v43, 0.0 }
 0x8c7   :  { %v4948_v40 = vmax.f32 %v4946_v46, %v4947_v36  ;;  %v4812_v15 = vadd.f32 %v9399_v58, %v4740_v63  ;;  %v5204_v0 = vsel %vm1948_vm4, %v9621_v9, 0.0  ;;  %v9638_v46 = vsel %vm5353_vm11, %v5355_v53, %v5351_v62 }
 0x8c8   :  { %v5205_v60 = vadd.f32 %v5204_v0, %v5203_v22  ;;  %v9640_v63 = vadd.f32 1e-10, %v5193_v4  ;;  %v5357_v53 = vmul.f32 %v9638_v46, %v9477_v27 }
 0x8c9   :  { %v5049_v59 = vsub.f32 %v9571_v50, %v4948_v40  ;;  %v5050_v17 = vsub.f32 %v9576_v14, %v4948_v40  ;;  %v9632_v42 = vsel %vm4844_vm10, %v4812_v15, -1e+30  ;;  %v9643_v50 = vld [vmem:[%s9274_s18] ss:$0 sm:$0xff]  ;;  %v5198_v40 = vadd.f32 %v5197_v2, %v5196_v37  ;;  %s7480_s18 = smov 41  }
 0x8ca   :  { %v4950_v20 = vsel %vm1948_vm4, %v9632_v42, -inf  ;;  %v5206_v12 = vrot.slane %v5205_v60, 4  ;;  %v4619_v15 = vadd.f32 %v9643_v50, %v4618_v6  ;;  %vm5364_vm11 = vweird.f32 %v9640_v63  ;;  %s10277_s22 = sld [smem:[%s10316_s0 + %s7480_s18]]  }
 0x8cb   :  { %v5091_v23 = vmul.f32 1.442695, %v5049_v59  ;;  %v5093_v3 = vmul.f32 1.442695, %v5050_v17  ;;  %v4951_v36 = vmax.f32 %v4949_v33, %v4950_v20  ;;  %v4623_v49 = vpop.f32.mrf.mxu1  ;;  %v9651_v59 = vld [vmem:[%s9282_s23] ss:$0 sm:$0xff] }
 0x8cc   :  { %v4624_v14 = vadd.f32 %v9643_v50, %v4623_v49  ;;  %v5207_v62 = vadd.f32 %v5206_v12, %v5205_v60  ;;  %v5199_v17 = vrot.slane %v5198_v40, 2  ;;  %v4658_v6 = vmax.f32 %v4619_v15, 0.0  ;;  %s7481_s23 = smov 64  }
 0x8cd   :  { %7297 = vpow2.f32 %v5091_v23  ;;  %v4952_v16 = vrot.slane %v4951_v36, 4 }
 0x8ce   :  { %7299 = vpow2.f32 %v5093_v3  ;;  %v4660_v0 = vmax.f32 %v4624_v14, 0.0  ;;  %v4743_v22 = vpop.xlane.xlu0 %4742  ;;  %v5208_v37 = vrot.slane %v5207_v62, 2  ;;  %v5200_v12 = vadd.f32 %v5199_v17, %v5198_v40 }
 0x8cf   :  { %v4953_v4 = vmax.f32 %v4951_v36, %v4952_v16  ;;  %5595 = vperm.xlu0 %7146, %v5357_v53   ;;  %7301 = vrcp.f32 %v9640_v63  ;;  %v4813_v20 = vadd.f32 %v9399_v58, %v4743_v22  ;;  %v9657_v16 = vld [vmem:[%s8785_s21 + $0x70] sm:$0xff] }
 0x8d0   :  { %v4696_v2 = vmul.f32 %v9651_v59, %v4660_v0  ;;  %v5209_v23 = vadd.f32 %v5208_v37, %v5207_v62  ;;  %vm4845_vm12 = vcmp.gt.f32.partialorder %v9657_v16, 0.0  ;;  %v4694_v62 = vmul.f32 %v9651_v59, %v4658_v6 }
 0x8d1   :  { %v4954_v33 = vrot.slane %v4953_v4, 2 }
 0x8d2   :  { %v4786_v27 = vsel %vm814_vm1, %v4696_v2, 0.0  ;;  %v9672_v2 = vsel %vm4845_vm12, %v4813_v20, -1e+30  ;;  %v5210_v40 = vrot.slane %v5209_v23, 1 }
 0x8d3   :  { %v7298_v60 = vpop.eup %7297  ;;  %v4955_v3 = vmax.f32 %v4953_v4, %v4954_v33  ;;  %4787 = vadd.xlane.f32.xlu1 %v4786_v27  ;;  %v4626_v36 = vpop.f32.mrf.mxu1  ;;  %v4622_v4 = vadd.f32 %v9643_v50, %v9597_v51  ;;  %v9675_v33 = vld [vmem:[%s8785_s21 + $0x78] sm:$0xff]  ;;  %v4958_v38 = vsel %vm1948_vm4, %v9672_v2, -inf }
 0x8d4   :  { %v7300_v49 = vpop.eup %7299  ;;  %v4627_v14 = vadd.f32 %v9643_v50, %v4626_v36  ;;  %v9662_v15 = vmul.f32 %v9561_v34, %v7298_v60  ;;  %vm4846_vm13 = vcmp.gt.f32.partialorder %v9675_v33, 0.0  ;;  %v5201_v60 = vrot.slane %v5200_v12, 1 }
 0x8d5   :  { %v9664_v53 = vpop.eup %7301  ;;  %v9667_v0 = vmul.f32 %v9566_v5, %v7300_v49  ;;  %v4956_v22 = vrot.slane %v4955_v3, 1 }
 0x8d6   :  { %v4661_v37 = vmax.f32 %v4627_v14, 0.0  ;;  %v4746_v34 = vpop.xlane.xlu2 %4745  ;;  %v5212_v5 = vsel %vm1948_vm4, %v9662_v15, 0.0  ;;  %v5360_v20 = vmul.f32 %v9664_v53, %v9640_v63  ;;  %vm5365_vm9 = vweird.f32 %v9664_v53 }
 0x8d7   :  { %v4957_v17 = vmax.f32 %v4955_v3, %v4956_v22  ;;  %v4814_v27 = vadd.f32 %v9399_v58, %v4746_v34  ;;  %v5213_v6 = vsel %vm1948_vm4, %v9667_v0, 0.0  ;;  %v4780_v22 = vsel %vm814_vm1, %v4694_v62, 0.0 }
 0x8d8   :  { %v4697_v51 = vmul.f32 %v9651_v59, %v4661_v37  ;;  %v5214_v36 = vadd.f32 %v5213_v6, %v5212_v5  ;;  %v4659_v34 = vmax.f32 %v4622_v4, 0.0  ;;  %v5361_v62 = vsub.f32 1.0, %v5360_v20 }
 0x8d9   :  { %v5051_v49 = vsub.f32 %v9623_v52, %v4957_v17  ;;  %v5052_v14 = vsub.f32 %v9632_v42, %v4957_v17  ;;  %v9688_v3 = vsel %vm4846_vm13, %v4814_v27, -1e+30  ;;  %v5211_v52 = vadd.f32 %v5210_v40, %v5209_v23  ;;  %vm9754_vm13 = vmor %vm5364_vm11, %vm5365_vm9 }
 0x8da   :  { %v4959_v37 = vsel %vm1948_vm4, %v9688_v3, -inf  ;;  %v4789_v39 = vsel %vm814_vm1, %v4697_v51, 0.0  ;;  %v5202_v42 = vadd.f32 %v5201_v60, %v5200_v12  ;;  %v5215_v17 = vrot.slane %v5214_v36, 4  ;;  %v9706_v60 = vld [vmem:[%s8785_s21 + $0x80] sm:$0xff] }
 0x8db   :  { %v5095_v26 = vmul.f32 1.442695, %v5051_v49  ;;  %v5097_v45 = vmul.f32 1.442695, %v5052_v14  ;;  %v4960_v5 = vmax.f32 %v4958_v38, %v4959_v37  ;;  %4790 = vadd.xlane.f32.xlu1 %v4789_v39  ;;  %v4695_v4 = vmul.f32 %v9651_v59, %v4659_v34  ;;  %v9719_v37 = vld [vmem:[%s8785_s21 + $0x88] sm:$0xff] }
 0x8dc   :  { %4781 = vadd.xlane.f32.xlu2 %v4780_v22  ;;  %v9697_v57 = vadd.f32 1e-10, %v5211_v52  ;;  %v9699_v51 = vadd.f32 1e-10, %v5202_v42  ;;  %v5216_v49 = vadd.f32 %v5215_v17, %v5214_v36  ;;  %v5362_v39 = vmul.f32 %v9664_v53, %v5361_v62 }
 0x8dd   :  { %7303 = vpow2.f32 %v5095_v26  ;;  %v4961_v27 = vrot.slane %v4960_v5, 4  ;;  %v4783_v40 = vsel %vm814_vm1, %v4695_v4, 0.0  ;;  %vm4847_vm8 = vcmp.gt.f32.partialorder %v9706_v60, 0.0 }
 0x8de   :  { %7305 = vpow2.f32 %v5097_v45  ;;  %v4749_v30 = vpop.xlane.xlu0 %4748  ;;  %v5217_v23 = vrot.slane %v5216_v49, 2  ;;  %v5368_v34 = vand.u32 2147483647, %v9640_v63  ;;  %vm4848_vm10 = vcmp.gt.f32.partialorder %v9719_v37, 0.0 }
 0x8df   :  { %v4962_v6 = vmax.f32 %v4960_v5, %v4961_v27  ;;  %v4815_v45 = vadd.f32 %v9399_v58, %v4749_v30  ;;  %7307 = vrcp.f32 %v9697_v57  ;;  %v5363_v52 = vadd.f32 %v9664_v53, %v5362_v39 }
 0x8e0   :  { %7309 = vrcp.f32 %v9699_v51  ;;  %v5218_v36 = vadd.f32 %v5217_v23, %v5216_v49  ;;  %v5370_v4 = vand.u32 2147483648, %v9640_v63  ;;  %vm9742_vm12 = vcmp.eq.f32.partialorder %v5368_v34, 8.507059e+37 }
 0x8e1   :  { %v4963_v38 = vrot.slane %v4962_v6, 2 }
 0x8e2   :  { %v5219_v42 = vrot.slane %v5218_v36, 1 }
 0x8e3   :  { %v7304_v12 = vpop.eup %7303  ;;  %v4964_v26 = vmax.f32 %v4962_v6, %v4963_v38 }
 0x8e4   :  { %v7306_v20 = vpop.eup %7305  ;;  %4784 = vadd.xlane.f32.xlu2 %v4783_v40  ;;  %v9711_v14 = vmul.f32 %v9601_v41, %v7304_v12  ;;  %v5220_v6 = vadd.f32 %v5219_v42, %v5218_v36  ;;  %v4628_v12 = vpop.f32.mrf.mxu1  ;;  %v5367_v42 = vsel %vm9754_vm13, %v9664_v53, %v5363_v52  ;;  %vm5380_vm13 = vweird.f32 %v9699_v51 }
 0x8e5   :  { %v9714_v22 = vmul.f32 %v9614_v1, %v7306_v20  ;;  %v4965_v30 = vrot.slane %v4964_v26, 1  ;;  %v9727_v1 = vsel %vm4847_vm8, %v4815_v45, -1e+30  ;;  %v9734_v38 = vpop.eup %7307  ;;  %vm5396_vm8 = vweird.f32 %v9697_v57 }
 0x8e6   :  { %v4752_v5 = vpop.xlane.xlu2 %4751  ;;  %v5221_v41 = vsel %vm1948_vm4, %v9711_v14, 0.0  ;;  %v9746_v40 = vpop.eup %7309  ;;  %v4967_v63 = vsel %vm1948_vm4, %v9727_v1, -inf  ;;  %v5400_v45 = vand.u32 2147483647, %v9697_v57 }
 0x8e7   :  { %v4966_v17 = vmax.f32 %v4964_v26, %v4965_v30  ;;  %v4816_v27 = vadd.f32 %v9399_v58, %v4752_v5  ;;  %v5222_v62 = vsel %vm1948_vm4, %v9714_v22, 0.0  ;;  %vm5381_vm9 = vweird.f32 %v9746_v40 }
 0x8e8   :  { %v5223_v49 = vadd.f32 %v5222_v62, %v5221_v41  ;;  %v4629_v41 = vadd.f32 %v9643_v50, %v4628_v12  ;;  %v5358_v12 = vmul.f32 %v9638_v46, %v9480_v61 }
 0x8e9   :  { %v5053_v39 = vsub.f32 %v9672_v2, %v4966_v17  ;;  %v5054_v23 = vsub.f32 %v9688_v3, %v4966_v17  ;;  %v9740_v26 = vsel %vm4848_vm10, %v4816_v27, -1e+30  ;;  %v9758_v3 = vadd.f32 1e-10, %v5220_v6 }
 0x8ea   :  { %v4968_v20 = vsel %vm1948_vm4, %v9740_v26, -inf  ;;  %v5224_v36 = vrot.slane %v5223_v49, 4  ;;  %v5371_v17 = vor.u32 1.1754944e-38, %v5370_v4  ;;  %v5392_v27 = vmul.f32 %v9734_v38, %v9697_v57 }
 0x8eb   :  { %v5099_v30 = vmul.f32 1.442695, %v5053_v39  ;;  %v5101_v34 = vmul.f32 1.442695, %v5054_v23  ;;  %v4969_v5 = vmax.f32 %v4967_v63, %v4968_v20  ;;  %7311 = vrcp.f32 %v9758_v3 }
 0x8ec   :  { %v5376_v6 = vmul.f32 %v9746_v40, %v9699_v51  ;;  %v5225_v39 = vadd.f32 %v5224_v36, %v5223_v49  ;;  %v9771_v23 = vsel %vm9742_vm12, %v5371_v17, %v5367_v42  ;;  %v4662_v50 = vmax.f32 %v4629_v41, 0.0 }
 0x8ed   :  { %7313 = vpow2.f32 %v5099_v30  ;;  %v4970_v62 = vrot.slane %v4969_v5, 4  ;;  %v5393_v63 = vsub.f32 1.0, %v5392_v27  ;;  %v5373_v2 = vmul.f32 %v9771_v23, %v9526_v13  ;;  %v9788_v27 = vld [vmem:[%s8785_s21 + $0x90] sm:$0xff] }
 0x8ee   :  { %7315 = vpow2.f32 %v5101_v34  ;;  %v5226_v52 = vrot.slane %v5225_v39, 2  ;;  %v4755_v4 = vpop.xlane.xlu1 %4754  ;;  %v5377_v30 = vsub.f32 1.0, %v5376_v6  ;;  %v5402_v34 = vand.u32 2147483648, %v9697_v57 }
 0x8ef   :  { %v4971_v53 = vmax.f32 %v4969_v5, %v4970_v62  ;;  %v4817_v5 = vadd.f32 %v9399_v58, %v4755_v4  ;;  %v4698_v17 = vmul.f32 %v9651_v59, %v4662_v50  ;;  %vm4849_vm10 = vcmp.gt.f32.partialorder %v9788_v27, 0.0 }
 0x8f0   :  { %v5227_v49 = vadd.f32 %v5226_v52, %v5225_v39  ;;  %v5394_v62 = vmul.f32 %v9734_v38, %v5393_v63  ;;  %v9800_v52 = vld [vmem:[%s8785_s21 + $0x98] sm:$0xff]  ;;  %v5378_v59 = vmul.f32 %v9746_v40, %v5377_v30  ;;  %vm5397_vm12 = vweird.f32 %v9734_v38 }
 0x8f1   :  { %v4972_v20 = vrot.slane %v4971_v53, 2  ;;  %v9777_v36 = vpop.eup %7311  ;;  %vm4850_vm11 = vcmp.gt.f32.partialorder %v9800_v52, 0.0  ;;  %v5403_v57 = vor.u32 1.1754944e-38, %v5402_v34  ;;  %v5418_v34 = vand.u32 2147483648, %v9758_v3 }
 0x8f2   :  { %v5408_v13 = vmul.f32 %v9777_v36, %v9758_v3  ;;  %v5228_v42 = vrot.slane %v5227_v49, 1  ;;  %v5395_v30 = vadd.f32 %v9734_v38, %v5394_v62 }
 0x8f3   :  { %v7314_v61 = vpop.eup %7313  ;;  %v4973_v46 = vmax.f32 %v4971_v53, %v4972_v20  ;;  %v9807_v20 = vsel %vm4849_vm10, %v4817_v5, -1e+30  ;;  %vm5401_vm10 = vcmp.eq.f32.partialorder %v5400_v45, 8.507059e+37 }
 0x8f4   :  { %v7316_v41 = vpop.eup %7315  ;;  %5590 = vperm.xlu1 %7147, %v9548_v31   ;;  %v9794_v6 = vmul.f32 %v9657_v16, %v7314_v61  ;;  %v5409_v4 = vsub.f32 1.0, %v5408_v13  ;;  %v5229_v31 = vadd.f32 %v5228_v42, %v5227_v49  ;;  %v4976_v5 = vsel %vm1948_vm4, %v9807_v20, -inf }
 0x8f5   :  { %v9797_v39 = vmul.f32 %v9675_v33, %v7316_v41  ;;  %v4974_v53 = vrot.slane %v4973_v46, 1  ;;  %v4792_v41 = vsel %vm814_vm1, %v4698_v17, 0.0  ;;  %vm9833_vm1 = vmor %vm5396_vm8, %vm5397_vm12  ;;  %vm5412_vm12 = vweird.f32 %v9758_v3 }
 0x8f6   :  { %v4758_v50 = vpop.xlane.xlu0 %4757  ;;  %v5230_v63 = vsel %vm1948_vm4, %v9794_v6, 0.0  ;;  %v9814_v21 = vadd.f32 1e-10, %v5229_v31  ;;  %v5410_v17 = vmul.f32 %v9777_v36, %v5409_v4  ;;  %v5384_v4 = vand.u32 2147483647, %v9699_v51  ;;  %vm9845_vm8 = vmor %vm5380_vm13, %vm5381_vm9 }
 0x8f7   :  { %v4975_v16 = vmax.f32 %v4973_v46, %v4974_v53  ;;  %v4818_v33 = vadd.f32 %v9399_v58, %v4758_v50  ;;  %v5231_v61 = vsel %vm1948_vm4, %v9797_v39, 0.0  ;;  %v5379_v58 = vadd.f32 %v9746_v40, %v5378_v59 }
 0x8f8   :  { %v5232_v56 = vadd.f32 %v5231_v61, %v5230_v63  ;;  %7317 = vrcp.f32 %v9814_v21  ;;  %v5386_v59 = vand.u32 2147483648, %v9699_v51  ;;  %v5399_v50 = vsel %vm9833_vm1, %v9734_v38, %v5395_v30 }
 0x8f9   :  { %v5055_v49 = vsub.f32 %v9727_v1, %v4975_v16  ;;  %v5056_v13 = vsub.f32 %v9740_v26, %v4975_v16  ;;  %v9820_v46 = vsel %vm4850_vm11, %v4818_v33, -1e+30  ;;  %4793 = vadd.xlane.f32.xlu0 %v4792_v41  ;;  %v5383_v38 = vsel %vm9845_vm8, %v9746_v40, %v5379_v58  ;;  %v9891_v16 = vld [vmem:[%s8785_s21 + $0xa8] sm:$0xff] }
 0x8fa   :  { %v4977_v42 = vsel %vm1948_vm4, %v9820_v46, -inf  ;;  %v5233_v31 = vrot.slane %v5232_v56, 4  ;;  %vm5413_vm11 = vweird.f32 %v9777_v36  ;;  %v9854_v33 = vsel %vm5401_vm10, %v5403_v57, %v5399_v50 }
 0x8fb   :  { %v5103_v1 = vmul.f32 1.442695, %v5055_v49  ;;  %v5105_v62 = vmul.f32 1.442695, %v5056_v13  ;;  %v4978_v26 = vmax.f32 %v4976_v5, %v4977_v42  ;;  %v5387_v45 = vor.u32 1.1754944e-38, %v5386_v59  ;;  %vm9863_vm1 = vmor %vm5412_vm12, %vm5413_vm11 }
 0x8fc   :  { %5600 = vperm.xlu2 %7148, %v5358_v12   ;;  %5605 = vperm.xlu1 %7147, %v5373_v2   ;;  %v5411_v12 = vadd.f32 %v9777_v36, %v5410_v17  ;;  %vm5385_vm9 = vcmp.eq.f32.partialorder %v5384_v4, 8.507059e+37  ;;  %v5416_v41 = vand.u32 2147483647, %v9758_v3  ;;  %v5234_v40 = vadd.f32 %v5233_v31, %v5232_v56  ;;  %v9869_v42 = vld [vmem:[#allocation3] ss:$0 sm:$0xff] }
 0x8fd   :  { %7319 = vpow2.f32 %v5103_v1  ;;  %v4979_v63 = vrot.slane %v4978_v26, 4  ;;  %v5374_v49 = vmul.f32 %v9771_v23, %v9523_v55  ;;  %v5388_v13 = vsel %vm5385_vm9, %v5387_v45, %v5383_v38 }
 0x8fe   :  { %7321 = vpow2.f32 %v5105_v62  ;;  %v4761_v2 = vpop.xlane.xlu0 %4760  ;;  %v9857_v61 = vpop.eup %7317  ;;  %v5406_v3 = vmul.f32 %v9854_v33, %v9621_v9  ;;  %v5415_v56 = vsel %vm9863_vm1, %v9777_v36, %v5411_v12  ;;  %v5235_v55 = vrot.slane %v5234_v40, 2  ;;  %v9878_v62 = vld [vmem:[%s8785_s21 + $0xa0] sm:$0xff] }
 0x8ff   :  { %v4980_v51 = vmax.f32 %v4978_v26, %v4979_v63  ;;  %v5424_v5 = vmul.f32 %v9857_v61, %v9814_v21  ;;  %v4819_v17 = vadd.f32 %v9869_v42, %v4761_v2  ;;  %vm4851_vm13 = vcmp.gt.f32.partialorder %v9878_v62, 0.0 }
 0x900   :  { %v5419_v26 = vor.u32 1.1754944e-38, %v5418_v34  ;;  %vm5417_vm10 = vcmp.eq.f32.partialorder %v5416_v41, 8.507059e+37  ;;  %v5236_v50 = vadd.f32 %v5235_v55, %v5234_v40  ;;  %v5389_v36 = vmul.f32 %v5388_v13, %v9587_v11 }
 0x901   :  { %v4981_v30 = vrot.slane %v4980_v51, 2  ;;  %v5425_v53 = vsub.f32 1.0, %v5424_v5  ;;  %v9888_v57 = vsel %vm4851_vm13, %v4819_v17, -1e+30  ;;  %vm4852_vm8 = vcmp.gt.f32.partialorder %v9891_v16, 0.0 }
 0x902   :  { %v5420_v31 = vsel %vm5417_vm10, %v5419_v26, %v5415_v56  ;;  %v5237_v12 = vrot.slane %v5236_v50, 1  ;;  %v5390_v34 = vmul.f32 %v5388_v13, %v9584_v44  ;;  %vm5429_vm11 = vweird.f32 %v9857_v61 }
 0x903   :  { %v7320_v23 = vpop.eup %7319  ;;  %v4982_v1 = vmax.f32 %v4980_v51, %v4981_v30  ;;  %v5426_v11 = vmul.f32 %v9857_v61, %v5425_v53  ;;  %v5421_v45 = vmul.f32 %v5420_v31, %v9662_v15  ;;  %v4985_v5 = vsel %vm1948_vm4, %v9888_v57, -inf }
 0x904   :  { %v7322_v59 = vpop.eup %7321  ;;  %5610 = vperm.xlu2 %7148, %v5374_v49   ;;  %5630 = vperm.xlu1 %7147, %v5406_v3   ;;  %v9882_v9 = vmul.f32 %v9706_v60, %v7320_v23  ;;  %v5238_v41 = vadd.f32 %v5237_v12, %v5236_v50  ;;  %vm5428_vm9 = vweird.f32 %v9814_v21  ;;  %v5432_v23 = vand.u32 2147483647, %v9814_v21 }
 0x905   :  { %v4983_v4 = vrot.slane %v4982_v1, 1  ;;  %v9886_v63 = vmul.f32 %v9719_v37, %v7322_v59  ;;  %vm5430_vm12 = vmor %vm5428_vm9, %vm5429_vm11 }
 0x906   :  { %v4764_v38 = vpop.xlane.xlu2 %4763  ;;  %v5239_v51 = vsel %vm1948_vm4, %v9882_v9, 0.0  ;;  %v9911_v3 = vadd.f32 1e-10, %v5238_v41  ;;  %vm5433_vm1 = vcmp.eq.f32.partialorder %v5432_v23, 8.507059e+37  ;;  %v9927_v41 = vld [vmem:[%s8785_s21 + $0xb0] sm:$0xff] }
 0x907   :  { %v4984_v60 = vmax.f32 %v4982_v1, %v4983_v4  ;;  %v4820_v2 = vadd.f32 %v9869_v42, %v4764_v38  ;;  %v5240_v37 = vsel %vm1948_vm4, %v9886_v63, 0.0  ;;  %vm4853_vm13 = vcmp.gt.f32.partialorder %v9927_v41, 0.0 }
 0x908   :  { %v5241_v40 = vadd.f32 %v5240_v37, %v5239_v51  ;;  %7323 = vrcp.f32 %v9911_v3  ;;  %v5422_v51 = vmul.f32 %v5420_v31, %v9667_v0 }
 0x909   :  { %v5057_v30 = vsub.f32 %v9807_v20, %v4984_v60  ;;  %v5058_v49 = vsub.f32 %v9820_v46, %v4984_v60  ;;  %v9904_v58 = vsel %vm4852_vm8, %v4820_v2, -1e+30  ;;  %v5427_v20 = vadd.f32 %v9857_v61, %v5426_v11 }
 0x90a   :  { %v4986_v17 = vsel %vm1948_vm4, %v9904_v58, -inf  ;;  %v5242_v15 = vrot.slane %v5241_v40, 4  ;;  %v5434_v46 = vand.u32 2147483648, %v9814_v21  ;;  %v5405_v21 = vmul.f32 %v9854_v33, %v9606_v43 }
 0x90b   :  { %v5107_v44 = vmul.f32 1.442695, %v5057_v30  ;;  %v5109_v13 = vmul.f32 1.442695, %v5058_v49  ;;  %v4987_v56 = vmax.f32 %v4985_v5, %v4986_v17  ;;  %v5431_v53 = vsel %vm5430_vm12, %v9857_v61, %v5427_v20 }
 0x90c   :  { %5615 = vperm.xlu2 %7148, %v5389_v36   ;;  %5635 = vperm.xlu1 %7147, %v5421_v45   ;;  %v5243_v1 = vadd.f32 %v5242_v15, %v5241_v40  ;;  %v5435_v4 = vor.u32 1.1754944e-38, %v5434_v46  ;;  %v9931_v40 = vld [vmem:[%s8785_s21 + $0xb8] sm:$0xff]  ;;  %vm5444_vm8 = vweird.f32 %v9911_v3  ;;  %v5450_v15 = vand.u32 2147483648, %v9911_v3 }
 0x90d   :  { %7325 = vpow2.f32 %v5107_v44  ;;  %v4988_v55 = vrot.slane %v4987_v56, 4  ;;  %5620 = vperm.xlu0 %7146, %v5390_v34   ;;  %vm4854_vm10 = vcmp.gt.f32.partialorder %v9931_v40, 0.0 }
 0x90e   :  { %7327 = vpow2.f32 %v5109_v13  ;;  %v5244_v59 = vrot.slane %v5243_v1, 2  ;;  %v4767_v50 = vpop.xlane.xlu2 %4766  ;;  %v7324_v12 = vpop.eup %7323  ;;  %v5436_v60 = vsel %vm5433_vm1, %v5435_v4, %v5431_v53 }
 0x90f   :  { %v4989_v26 = vmax.f32 %v4987_v56, %v4988_v55  ;;  %v4821_v37 = vadd.f32 %v9869_v42, %v4767_v50  ;;  %v5440_v61 = vmul.f32 %v7324_v12, %v9911_v3  ;;  %v5437_v5 = vmul.f32 %v5436_v60, %v9711_v14 }
 0x910   :  { %v5245_v38 = vadd.f32 %v5244_v59, %v5243_v1  ;;  %v5438_v17 = vmul.f32 %v5436_v60, %v9714_v22  ;;  %vm5445_vm11 = vweird.f32 %v7324_v12  ;;  %v5448_v56 = vand.u32 2147483647, %v9911_v3 }
 0x911   :  { %v4990_v36 = vrot.slane %v4989_v26, 2  ;;  %v5441_v31 = vsub.f32 1.0, %v5440_v61  ;;  %vm5446_vm9 = vmor %vm5444_vm8, %vm5445_vm11  ;;  %v5451_v50 = vor.u32 1.1754944e-38, %v5450_v15 }
 0x912   :  { %v5246_v45 = vrot.slane %v5245_v38, 1  ;;  %vm5449_vm12 = vcmp.eq.f32.partialorder %v5448_v56, 8.507059e+37 }
 0x913   :  { %v7326_v2 = vpop.eup %7325  ;;  %v4991_v11 = vmax.f32 %v4989_v26, %v4990_v36  ;;  %v5442_v13 = vmul.f32 %v7324_v12, %v5441_v31  ;;  %v7069_v31 = vld [vmem:[%s9970_s2 + $0x18] sm:$0xff] }
 0x914   :  { %v7328_v34 = vpop.eup %7327  ;;  %5640 = vperm.xlu2 %7148, %v5422_v51   ;;  %v9935_v43 = vmul.f32 %v9788_v27, %v7326_v2  ;;  %v5247_v30 = vadd.f32 %v5246_v45, %v5245_v38  ;;  %v9946_v27 = vsel %vm4853_vm13, %v4821_v37, -1e+30  ;;  %6025 = vmatpush.bf16.msra.mxu3 %v7069_v31 }
 0x915   :  { %v9938_v0 = vmul.f32 %v9800_v52, %v7328_v34  ;;  %v4992_v33 = vrot.slane %v4991_v11, 1  ;;  %5625 = vperm.xlu0 %7146, %v5405_v21   ;;  %v4994_v1 = vsel %vm1948_vm4, %v9946_v27, -inf  ;;  %v5443_v53 = vadd.f32 %v7324_v12, %v5442_v13 }
 0x916   :  { %v4770_v49 = vpop.xlane.xlu1 %4769  ;;  %v9950_v20 = vadd.f32 1e-10, %v5247_v30  ;;  %v5248_v14 = vsel %vm1948_vm4, %v9935_v43, 0.0 }
 0x917   :  { %v4993_v44 = vmax.f32 %v4991_v11, %v4992_v33  ;;  %v4822_v52 = vadd.f32 %v9869_v42, %v4770_v49  ;;  %v5249_v23 = vsel %vm1948_vm4, %v9938_v0, 0.0  ;;  %v5447_v4 = vsel %vm5446_vm9, %v7324_v12, %v5443_v53  ;;  %v9980_v12 = vld [vmem:[%s8785_s21 + $0xc0] sm:$0xff] }
 0x918   :  { %7329 = vrcp.f32 %v9950_v20  ;;  %v5250_v36 = vadd.f32 %v5249_v23, %v5248_v14  ;;  %v5452_v51 = vsel %vm5449_vm12, %v5451_v50, %v5447_v4  ;;  %vm4855_vm1 = vcmp.gt.f32.partialorder %v9980_v12, 0.0 }
 0x919   :  { %v5059_v22 = vsub.f32 %v9888_v57, %v4993_v44  ;;  %v5060_v46 = vsub.f32 %v9904_v58, %v4993_v44  ;;  %v9958_v55 = vsel %vm4854_vm10, %v4822_v52, -1e+30  ;;  %v9976_v11 = vmul.f32 %v5452_v51, %v9797_v39  ;;  %v9988_v39 = vld [vmem:[%s8785_s21 + $0xc8] sm:$0xff] }
 0x91a   :  { %v4995_v26 = vsel %vm1948_vm4, %v9958_v55, -inf  ;;  %v5251_v2 = vrot.slane %v5250_v36, 4  ;;  %v5464_v34 = vand.u32 2147483647, %v9950_v20  ;;  %vm4856_vm13 = vcmp.gt.f32.partialorder %v9988_v39, 0.0 }
 0x91b   :  { %v5111_v57 = vmul.f32 1.442695, %v5059_v22  ;;  %v5113_v58 = vmul.f32 1.442695, %v5060_v46  ;;  %v4996_v59 = vmax.f32 %v4994_v1, %v4995_v26  ;;  %v5466_v52 = vand.u32 2147483648, %v9950_v20 }
 0x91c   :  { %5645 = vperm.xlu2 %7148, %v5437_v5   ;;  %v5252_v33 = vadd.f32 %v5251_v2, %v5250_v36  ;;  %v5453_v5 = vmul.f32 %v5452_v51, %v9794_v6  ;;  %vm5460_vm8 = vweird.f32 %v9950_v20  ;;  %vm10001_vm11 = vcmp.eq.f32.partialorder %v5464_v34, 8.507059e+37 }
 0x91d   :  { %7331 = vpow2.f32 %v5111_v57  ;;  %v4997_v38 = vrot.slane %v4996_v59, 4  ;;  %5650 = vperm.xlu0 %7146, %v5438_v17  }
 0x91e   :  { %7333 = vpow2.f32 %v5113_v58  ;;  %v4773_v21 = vpop.xlane.xlu1 %4772  ;;  %v7330_v3 = vpop.eup %7329  ;;  %v5253_v13 = vrot.slane %v5252_v33, 2 }
 0x91f   :  { %v4998_v60 = vmax.f32 %v4996_v59, %v4997_v38  ;;  %v4823_v37 = vadd.f32 %v9869_v42, %v4773_v21  ;;  %v5456_v45 = vmul.f32 %v7330_v3, %v9950_v20  ;;  %vm5461_vm10 = vweird.f32 %v7330_v3 }
 0x920   :  { %v5254_v1 = vadd.f32 %v5253_v13, %v5252_v33  ;;  %vm5462_vm9 = vmor %vm5460_vm8, %vm5461_vm10  ;;  %v5467_v20 = vor.u32 1.1754944e-38, %v5466_v52 }
 0x921   :  { %v4999_v61 = vrot.slane %v4998_v60, 2  ;;  %v5457_v17 = vsub.f32 1.0, %v5456_v45  ;;  %v9991_v44 = vsel %vm4855_vm1, %v4823_v37, -1e+30 }
 0x922   :  { %v5255_v59 = vrot.slane %v5254_v1, 1 }
 0x923   :  { %v7332_v30 = vpop.eup %7331  ;;  %v5000_v49 = vmax.f32 %v4998_v60, %v4999_v61  ;;  %v5458_v22 = vmul.f32 %v7330_v3, %v5457_v17 }
 0x924   :  { %v7334_v15 = vpop.eup %7333  ;;  %v9995_v56 = vmul.f32 %v9878_v62, %v7332_v30  ;;  %v5256_v2 = vadd.f32 %v5255_v59, %v5254_v1 }
 0x925   :  { %v5001_v14 = vrot.slane %v5000_v49, 1  ;;  %5655 = vperm.xlu0 %7146, %v5453_v5   ;;  %v9998_v6 = vmul.f32 %v9891_v16, %v7334_v15  ;;  %v5459_v57 = vadd.f32 %v7330_v3, %v5458_v22  ;;  %v5003_v16 = vsel %vm1948_vm4, %v9991_v44, -inf }
 0x926   :  { %v4776_v46 = vpop.xlane.xlu0 %4775  ;;  %v5257_v26 = vsel %vm1948_vm4, %v9995_v56, 0.0  ;;  %v5320_v31 = vadd.f32 1e-10, %v5256_v2 }
 0x927   :  { %v5002_v62 = vmax.f32 %v5000_v49, %v5001_v14  ;;  %v4824_v53 = vadd.f32 %v9869_v42, %v4776_v46  ;;  %v5258_v58 = vsel %vm1948_vm4, %v9998_v6, 0.0  ;;  %v5463_v51 = vsel %vm5462_vm9, %v7330_v3, %v5459_v57 }
 0x928   :  { %v5259_v50 = vadd.f32 %v5258_v58, %v5257_v26  ;;  %v5468_v60 = vsel %vm10001_vm11, %v5467_v20, %v5463_v51  ;;  %v5482_v59 = vand.u32 2147483648, %v5320_v31  ;;  %vm5476_vm1 = vweird.f32 %v5320_v31 }
 0x929   :  { %v5061_v4 = vsub.f32 %v9946_v27, %v5002_v62  ;;  %v5062_v36 = vsub.f32 %v9958_v55, %v5002_v62  ;;  %v4888_v38 = vsel %vm4856_vm13, %v4824_v53, -1e+30  ;;  %v5470_v33 = vmul.f32 %v5468_v60, %v9886_v63 }
 0x92a   :  { %v5004_v21 = vsel %vm1948_vm4, %v4888_v38, -inf  ;;  %v5260_v37 = vrot.slane %v5259_v50, 4  ;;  %v5469_v27 = vmul.f32 %v5468_v60, %v9882_v9  ;;  %v5483_v2 = vor.u32 1.1754944e-38, %v5482_v59 }
 0x92b   :  { %v5115_v61 = vmul.f32 1.442695, %v5061_v4  ;;  %v5117_v45 = vmul.f32 1.442695, %v5062_v36  ;;  %v5005_v34 = vmax.f32 %v5003_v16, %v5004_v21  ;;  %5670 = vperm.xlu1 %7147, %v5470_v33  }
 0x92c   :  { %v5261_v55 = vadd.f32 %v5260_v37, %v5259_v50 }
 0x92d   :  { %7335 = vpow2.f32 %v5115_v61  ;;  %v5006_v30 = vrot.slane %v5005_v34, 4  ;;  %5665 = vperm.xlu0 %7146, %v5469_v27  }
 0x92e   :  { %7337 = vpow2.f32 %v5117_v45  ;;  %v5262_v49 = vrot.slane %v5261_v55, 2 }
 0x92f   :  { %v5007_v3 = vmax.f32 %v5005_v34, %v5006_v30  ;;  %7339 = vrcp.f32 %v5320_v31 }
 0x930   :  { %v5263_v17 = vadd.f32 %v5262_v49, %v5261_v55 }
 0x931   :  { %v5008_v5 = vrot.slane %v5007_v3, 2 }
 0x932   :  { %v5264_v13 = vrot.slane %v5263_v17, 1 }
 0x933   :  { %v7336_v15 = vpop.eup %7335  ;;  %v5009_v52 = vmax.f32 %v5007_v3, %v5008_v5 }
 0x934   :  { %v7338_v14 = vpop.eup %7337  ;;  %v10022_v63 = vmul.f32 %v9927_v41, %v7336_v15  ;;  %v5265_v46 = vadd.f32 %v5264_v13, %v5263_v17 }
 0x935   :  { %v7340_v9 = vpop.eup %7339  ;;  %v5010_v22 = vrot.slane %v5009_v52, 1  ;;  %v10025_v23 = vmul.f32 %v9931_v40, %v7338_v14  ;;  %v5480_v40 = vand.u32 2147483647, %v5320_v31  ;;  %v10042_v14 = vpop.permute.xlu2 %5585 }
 0x936   :  { %v5472_v1 = vmul.f32 %v7340_v9, %v5320_v31  ;;  %v5266_v26 = vsel %vm1948_vm4, %v10022_v63, 0.0  ;;  %v5321_v53 = vadd.f32 1e-10, %v5265_v46  ;;  %vm5477_vm12 = vweird.f32 %v7340_v9 }
 0x937   :  { %v5011_v62 = vmax.f32 %v5009_v52, %v5010_v22  ;;  %v5267_v57 = vsel %vm1948_vm4, %v10025_v23, 0.0  ;;  %vm5478_vm13 = vmor %vm5476_vm1, %vm5477_vm12  ;;  %vm5481_vm10 = vcmp.eq.f32.partialorder %v5480_v40, 8.507059e+37 }
 0x938   :  { %v5473_v58 = vsub.f32 1.0, %v5472_v1  ;;  %v5268_v16 = vadd.f32 %v5267_v57, %v5266_v26  ;;  %7341 = vrcp.f32 %v5321_v53  ;;  %v5498_v30 = vand.u32 2147483648, %v5321_v53 }
 0x939   :  { %v5063_v41 = vsub.f32 %v9991_v44, %v5011_v62  ;;  %v5064_v20 = vsub.f32 %v4888_v38, %v5011_v62  ;;  %v5496_v17 = vand.u32 2147483647, %v5321_v53  ;;  %vm5492_vm11 = vweird.f32 %v5321_v53 }
 0x93a   :  { %v5474_v50 = vmul.f32 %v7340_v9, %v5473_v58  ;;  %v5269_v4 = vrot.slane %v5268_v16, 4 }
 0x93b   :  { %v5119_v36 = vmul.f32 1.442695, %v5063_v41  ;;  %v5121_v51 = vmul.f32 1.442695, %v5064_v20  ;;  %vm5497_vm12 = vcmp.eq.f32.partialorder %v5496_v17, 8.507059e+37 }
 0x93c   :  { %v5475_v21 = vadd.f32 %v7340_v9, %v5474_v50  ;;  %v5270_v60 = vadd.f32 %v5269_v4, %v5268_v16  ;;  %v10050_v16 = vld [vmem:[%s8785_s21 + $0xd0] sm:$0xff]  ;;  %v10056_v50 = vld [vmem:[%s8785_s21 + $0xd8] sm:$0xff] }
 0x93d   :  { %7343 = vpow2.f32 %v5119_v36  ;;  %vm4857_vm1 = vcmp.gt.f32.partialorder %v10050_v16, 0.0 }
 0x93e   :  { %7345 = vpow2.f32 %v5121_v51  ;;  %v5479_v37 = vsel %vm5478_vm13, %v7340_v9, %v5475_v21  ;;  %v5271_v61 = vrot.slane %v5270_v60, 2  ;;  %v7342_v44 = vpop.eup %7341  ;;  %v5499_v9 = vor.u32 1.1754944e-38, %v5498_v30 }
 0x93f   :  { %v5484_v38 = vsel %vm5481_vm10, %v5483_v2, %v5479_v37  ;;  %v5488_v33 = vmul.f32 %v7342_v44, %v5321_v53  ;;  %vm5493_vm8 = vweird.f32 %v7342_v44  ;;  %vm4858_vm13 = vcmp.gt.f32.partialorder %v10056_v50, 0.0 }
 0x940   :  { %v5485_v45 = vmul.f32 %v5484_v38, %v9935_v43  ;;  %v5486_v34 = vmul.f32 %v5484_v38, %v9938_v0  ;;  %v5272_v27 = vadd.f32 %v5271_v61, %v5270_v60  ;;  %vm5494_vm9 = vmor %vm5492_vm11, %vm5493_vm8  ;;  %v10063_v60 = vld [vmem:[%s8785_s21 + $0xe8] sm:$0xff] }
 0x941   :  { %v5489_v55 = vsub.f32 1.0, %v5488_v33  ;;  %vm4860_vm10 = vcmp.gt.f32.partialorder %v10063_v60, 0.0 }
 0x942   :  { %5675 = vperm.xlu2 %7148, %v5485_v45   ;;  %5680 = vperm.xlu0 %7146, %v5486_v34   ;;  %v5273_v3 = vrot.slane %v5272_v27, 1 }
 0x943   :  { %v7344_v31 = vpop.eup %7343  ;;  %v5490_v5 = vmul.f32 %v7342_v44, %v5489_v55 }
 0x944   :  { %v7346_v49 = vpop.eup %7345  ;;  %v10035_v15 = vmul.f32 %v9980_v12, %v7344_v31  ;;  %v5274_v52 = vadd.f32 %v5273_v3, %v5272_v27  ;;  %v4779_v12 = vpop.xlane.xlu0 %4778 }
 0x945   :  { %v10038_v43 = vmul.f32 %v9988_v39, %v7346_v49  ;;  %v5491_v0 = vadd.f32 %v7342_v44, %v5490_v5  ;;  %v4825_v57 = vadd.f32 %v9869_v42, %v4779_v12  ;;  %v10071_v49 = vld [vmem:[%s8785_s21 + $0xe0] sm:$0xff] }
 0x946   :  { %v5275_v13 = vsel %vm1948_vm4, %v10035_v15, 0.0  ;;  %v5322_v22 = vadd.f32 1e-10, %v5274_v52  ;;  %v4788_v40 = vpop.xlane.xlu1 %4787 }
 0x947   :  { %v5276_v46 = vsel %vm1948_vm4, %v10038_v43, 0.0  ;;  %v5495_v1 = vsel %vm5494_vm9, %v7342_v44, %v5491_v0  ;;  %v10053_v59 = vsel %vm4857_vm1, %v4825_v57, -1e+30  ;;  %v4828_v61 = vadd.f32 %v9869_v42, %v4788_v40 }
 0x948   :  { %v5277_v39 = vadd.f32 %v5276_v46, %v5275_v13  ;;  %v5500_v26 = vsel %vm5497_vm12, %v5499_v9, %v5495_v1  ;;  %7347 = vrcp.f32 %v5322_v22  ;;  %v5012_v21 = vsel %vm1948_vm4, %v10053_v59, -inf }
 0x949   :  { %v5502_v62 = vmul.f32 %v5500_v26, %v9998_v6  ;;  %v5501_v53 = vmul.f32 %v5500_v26, %v9995_v56  ;;  %v5514_v38 = vand.u32 2147483648, %v5322_v22  ;;  %v5512_v27 = vand.u32 2147483647, %v5322_v22 }
 0x94a   :  { %v5278_v58 = vrot.slane %v5277_v39, 4  ;;  %vm5508_vm11 = vweird.f32 %v5322_v22  ;;  %v10068_v3 = vsel %vm4860_vm10, %v4828_v61, -1e+30  ;;  %vm4859_vm9 = vcmp.gt.f32.partialorder %v10071_v49, 0.0 }
 0x94b   :  { %5690 = vperm.xlu1 %7147, %v5502_v62   ;;  %5685 = vperm.xlu0 %7146, %v5501_v53   ;;  %v5515_v17 = vor.u32 1.1754944e-38, %v5514_v38  ;;  %vm5513_vm1 = vcmp.eq.f32.partialorder %v5512_v27, 8.507059e+37  ;;  %v5022_v62 = vsel %vm1948_vm4, %v10068_v3, -inf  ;;  %v5743_v38 = vmul.f32 %v10042_v14, %v9080_v32 }
 0x94c   :  { %v5279_v41 = vadd.f32 %v5278_v58, %v5277_v39 }
 0x94e   :  { %v7348_v20 = vpop.eup %7347  ;;  %v5280_v56 = vrot.slane %v5279_v41, 2 }
 0x94f   :  { %v4782_v6 = vpop.xlane.xlu2 %4781  ;;  %v5504_v36 = vmul.f32 %v7348_v20, %v5322_v22  ;;  %vm5509_vm8 = vweird.f32 %v7348_v20  ;;  %v5596_v22 = vpop.permute.xlu0 %5595 }
 0x950   :  { %v4826_v4 = vadd.f32 %v9869_v42, %v4782_v6  ;;  %v5281_v51 = vadd.f32 %v5280_v56, %v5279_v41  ;;  %vm5510_vm12 = vmor %vm5508_vm11, %vm5509_vm8  ;;  %v5745_v41 = vmul.f32 %v5596_v22, %v9092_v18 }
 0x951   :  { %v5505_v37 = vsub.f32 1.0, %v5504_v36 }
 0x952   :  { %v4890_v2 = vsel %vm4858_vm13, %v4826_v4, -1e+30  ;;  %v5282_v45 = vrot.slane %v5281_v51, 1 }
 0x953   :  { %v5013_v44 = vsel %vm1948_vm4, %v4890_v2, -inf  ;;  %v5506_v33 = vmul.f32 %v7348_v20, %v5505_v37 }
 0x954   :  { %v5014_v34 = vmax.f32 %v5012_v21, %v5013_v44  ;;  %v5283_v55 = vadd.f32 %v5282_v45, %v5281_v51  ;;  %v5784_v21 = vsel %vm608_vm0, %v5745_v41, 0.0 }
 0x955   :  { %v5507_v30 = vadd.f32 %v7348_v20, %v5506_v33 }
 0x956   :  { %v5015_v31 = vrot.slane %v5014_v34, 4  ;;  %v10074_v52 = vadd.f32 1e-10, %v5283_v55 }
 0x957   :  { %v4785_v5 = vpop.xlane.xlu2 %4784  ;;  %v5511_v9 = vsel %vm5510_vm12, %v7348_v20, %v5507_v30  ;;  %v4791_v20 = vpop.xlane.xlu1 %4790 }
 0x958   :  { %v5016_v0 = vmax.f32 %v5014_v34, %v5015_v31  ;;  %v4827_v13 = vadd.f32 %v9869_v42, %v4785_v5  ;;  %v5516_v46 = vsel %vm5513_vm1, %v5515_v17, %v5511_v9  ;;  %7349 = vrcp.f32 %v10074_v52  ;;  %v7068_v31 = vld [vmem:[%s9970_s2 + $0x10] sm:$0xff] }
 0x959   :  { %v5518_v39 = vmul.f32 %v5516_v46, %v10025_v23  ;;  %v5517_v26 = vmul.f32 %v5516_v46, %v10022_v63  ;;  %v4829_v33 = vadd.f32 %v9869_v42, %v4791_v20  ;;  %vm5524_vm10 = vweird.f32 %v10074_v52  ;;  %6026 = vmatpush.bf16.msra.mxu3 %v7068_v31  ;;  %v10102_v46 = vld [vmem:[%s8785_s21 + $0xf0] sm:$0xff] }
 0x95a   :  { %v5017_v12 = vrot.slane %v5016_v0, 2  ;;  %v10078_v1 = vsel %vm4859_vm9, %v4827_v13, -1e+30  ;;  %v5528_v32 = vand.u32 2147483647, %v10074_v52  ;;  %v5775_v9 = vsel %vm608_vm0, %v5743_v38, 0.0 }
 0x95b   :  { %v5021_v53 = vsel %vm1948_vm4, %v10078_v1, -inf  ;;  %5700 = vperm.xlu2 %7148, %v5518_v39   ;;  %5695 = vperm.xlu1 %7147, %v5517_v26   ;;  %vm4861_vm8 = vcmp.gt.f32.partialorder %v10102_v46, 0.0 }
 0x95c   :  { %v5018_v57 = vmax.f32 %v5016_v0, %v5017_v12  ;;  %v5023_v58 = vmax.f32 %v5021_v53, %v5022_v62  ;;  %vm5529_vm9 = vcmp.eq.f32.partialorder %v5528_v32, 8.507059e+37 }
 0x95e   :  { %v5019_v6 = vrot.slane %v5018_v57, 1  ;;  %v5024_v56 = vrot.slane %v5023_v58, 4  ;;  %v7350_v40 = vpop.eup %7349 }
 0x95f   :  { %v5601_v4 = vpop.permute.xlu2 %5600  ;;  %v5520_v51 = vmul.f32 %v7350_v40, %v10074_v52  ;;  %vm5525_vm13 = vweird.f32 %v7350_v40 }
 0x960   :  { %v5020_v23 = vmax.f32 %v5018_v57, %v5019_v6  ;;  %v5025_v63 = vmax.f32 %v5023_v58, %v5024_v56  ;;  %v5746_v36 = vmul.f32 %v5601_v4, %v9095_v7  ;;  %vm5526_vm11 = vmor %vm5524_vm10, %vm5525_vm13  ;;  %v10109_v58 = vsel %vm4861_vm8, %v4829_v33, -1e+30  ;;  %v10112_v6 = vld [vmem:[%s8785_s21 + $0xf8] sm:$0xff]  ;;  %s7476_s21 = smov 37  }
 0x961   :  { %v5521_v34 = vsub.f32 1.0, %v5520_v51  ;;  %vm4862_vm12 = vcmp.gt.f32.partialorder %v10112_v6, 0.0  ;;  %s10178_s5 = sld [smem:[%s10316_s0 + %s7476_s21]]  }
 0x962   :  { %v5065_v37 = vsub.f32 %v10053_v59, %v5020_v23  ;;  %v5066_v61 = vsub.f32 %v4890_v2, %v5020_v23  ;;  %v5026_v44 = vrot.slane %v5025_v63, 2  ;;  %v5785_v18 = vsel %vm608_vm0, %v5746_v36, 0.0 }
 0x963   :  { %v5786_v45 = vadd.f32 %v5785_v18, %v5784_v21  ;;  %v5522_v5 = vmul.f32 %v7350_v40, %v5521_v34  ;;  %v5530_v59 = vand.u32 2147483648, %v10074_v52 }
 0x964   :  { %v5123_v27 = vmul.f32 1.442695, %v5065_v37  ;;  %v5125_v55 = vmul.f32 1.442695, %v5066_v61  ;;  %v5027_v7 = vmax.f32 %v5025_v63, %v5026_v44 }
 0x965   :  { %v5787_v30 = vrot.slane %v5786_v45, 4  ;;  %v5523_v13 = vadd.f32 %v7350_v40, %v5522_v5  ;;  %v5531_v26 = vor.u32 1.1754944e-38, %v5530_v59 }
 0x966   :  { %7351 = vpow2.f32 %v5123_v27  ;;  %v5028_v2 = vrot.slane %v5027_v7, 1  ;;  %v5591_v17 = vpop.permute.xlu1 %5590 }
 0x967   :  { %7353 = vpow2.f32 %v5125_v55  ;;  %v5788_v14 = vadd.f32 %v5787_v30, %v5786_v45  ;;  %v5744_v0 = vmul.f32 %v5591_v17, %v9083_v48  ;;  %v5527_v52 = vsel %vm5526_vm11, %v7350_v40, %v5523_v13  ;;  %v5611_v57 = vpop.permute.xlu2 %5610 }
 0x968   :  { %v5029_v22 = vmax.f32 %v5027_v7, %v5028_v2  ;;  %v5532_v20 = vsel %vm5529_vm9, %v5531_v26, %v5527_v52 }
 0x969   :  { %v5789_v12 = vrot.slane %v5788_v14, 2  ;;  %v5776_v39 = vsel %vm608_vm0, %v5744_v0, 0.0  ;;  %v5534_v63 = vmul.f32 %v5532_v20, %v10038_v43  ;;  %v5533_v51 = vmul.f32 %v5532_v20, %v10035_v15 }
 0x96a   :  { %v5067_v62 = vsub.f32 %v10078_v1, %v5029_v22  ;;  %v5068_v48 = vsub.f32 %v10068_v3, %v5029_v22  ;;  %v5777_v53 = vadd.f32 %v5776_v39, %v5775_v9  ;;  %v5748_v3 = vmul.f32 %v5611_v57, %v9108_v8 }
 0x96b   :  { %v5790_v41 = vadd.f32 %v5789_v12, %v5788_v14  ;;  %5710 = vperm.xlu0 %7146, %v5534_v63   ;;  %5705 = vperm.xlu2 %7148, %v5533_v51  }
 0x96c   :  { %v7352_v56 = vpop.eup %7351  ;;  %v5127_v4 = vmul.f32 1.442695, %v5067_v62  ;;  %v5129_v23 = vmul.f32 1.442695, %v5068_v48  ;;  %v5778_v40 = vrot.slane %v5777_v53, 4  ;;  %v4794_v1 = vpop.xlane.xlu0 %4793  ;;  %v5794_v34 = vsel %vm608_vm0, %v5748_v3, 0.0 }
 0x96d   :  { %v7354_v36 = vpop.eup %7353  ;;  %v4830_v21 = vadd.f32 %v9869_v42, %v4794_v1  ;;  %v10120_v37 = vmul.f32 %v10050_v16, %v7352_v56  ;;  %v5791_v61 = vrot.slane %v5790_v41, 1  ;;  %v5030_v42 = vsel %vm1948_vm4, %v10109_v58, -inf }
 0x96e   :  { %7355 = vpow2.f32 %v5127_v4  ;;  %v5779_v44 = vadd.f32 %v5778_v40, %v5777_v53  ;;  %v5606_v18 = vpop.permute.xlu1 %5605  ;;  %v10123_v38 = vmul.f32 %v10056_v50, %v7354_v36 }
 0x96f   :  { %7357 = vpow2.f32 %v5129_v23  ;;  %v4894_v8 = vsel %vm4862_vm12, %v4830_v21, -1e+30  ;;  %v5747_v15 = vmul.f32 %v5606_v18, %v9105_v19  ;;  %v5284_v45 = vsel %vm1948_vm4, %v10120_v37, 0.0  ;;  %v5616_v4 = vpop.permute.xlu2 %5615 }
 0x970   :  { %v5780_v43 = vrot.slane %v5779_v44, 2  ;;  %v5031_v16 = vsel %vm1948_vm4, %v4894_v8, -inf  ;;  %v5285_v27 = vsel %vm1948_vm4, %v10123_v38, 0.0  ;;  %v5792_v55 = vadd.f32 %v5791_v61, %v5790_v41 }
 0x971   :  { %v5032_v50 = vmax.f32 %v5030_v42, %v5031_v16  ;;  %v5793_v33 = vsel %vm608_vm0, %v5747_v15, 0.0  ;;  %v5286_v31 = vadd.f32 %v5285_v27, %v5284_v45  ;;  %v5749_v3 = vmul.f32 %v5616_v4, %v9118_v25 }
 0x972   :  { %v5781_v7 = vadd.f32 %v5780_v43, %v5779_v44  ;;  %v5795_v19 = vadd.f32 %v5794_v34, %v5793_v33  ;;  %v5920_v13 = vpack.c.bf16 %v5792_v55, %v5792_v55 }
 0x973   :  { %v5033_v30 = vrot.slane %v5032_v50, 4  ;;  %v5287_v17 = vrot.slane %v5286_v31, 4 }
 0x974   :  { %v7356_v5 = vpop.eup %7355  ;;  %v5782_v59 = vrot.slane %v5781_v7, 1  ;;  %v5796_v2 = vrot.slane %v5795_v19, 4 }
 0x975   :  { %v7358_v32 = vpop.eup %7357  ;;  %v10138_v14 = vmul.f32 %v10071_v49, %v7356_v5  ;;  %v5034_v0 = vmax.f32 %v5032_v50, %v5033_v30  ;;  %v5288_v22 = vadd.f32 %v5287_v17, %v5286_v31  ;;  %v5964_v49 = vunpack.c.l.b16 %v5920_v13 }
 0x976   :  { %v5783_v9 = vadd.f32 %v5782_v59, %v5781_v7  ;;  %v10141_v12 = vmul.f32 %v10063_v60, %v7358_v32  ;;  %v5797_v26 = vadd.f32 %v5796_v2, %v5795_v19  ;;  %v5802_v50 = vsel %vm608_vm0, %v5749_v3, 0.0 }
 0x977   :  { %v5035_v39 = vrot.slane %v5034_v0, 2  ;;  %v5289_v62 = vrot.slane %v5288_v22, 2  ;;  %v5293_v48 = vsel %vm1948_vm4, %v10138_v14, 0.0 }
 0x978   :  { %v5919_v52 = vpack.c.bf16 %v5783_v9, %v5783_v9  ;;  %v5294_v57 = vsel %vm1948_vm4, %v10141_v12, 0.0  ;;  %v5798_v40 = vrot.slane %v5797_v26, 2 }
 0x979   :  { %v5036_v53 = vmax.f32 %v5034_v0, %v5035_v39  ;;  %v5290_v20 = vadd.f32 %v5289_v62, %v5288_v22  ;;  %v5295_v23 = vadd.f32 %v5294_v57, %v5293_v48 }
 0x97a   :  { %v5963_v41 = vunpack.c.l.b16 %v5919_v52  ;;  %v5799_v15 = vadd.f32 %v5798_v40, %v5797_v26 }
 0x97b   :  { %v5037_v56 = vrot.slane %v5036_v53, 1  ;;  %v5291_v63 = vrot.slane %v5290_v20, 1  ;;  %v5296_v36 = vrot.slane %v5295_v23, 4 }
 0x97c   :  { %v5979_v60 = vsel %vm3033_vm14, %v5964_v49, %v5963_v41  ;;  %v5800_v25 = vrot.slane %v5799_v15, 1 }
 0x97d   :  { %v5038_v1 = vmax.f32 %v5036_v53, %v5037_v56  ;;  %v5292_v51 = vadd.f32 %v5291_v63, %v5290_v20  ;;  %v5297_v18 = vadd.f32 %v5296_v36, %v5295_v23 }
 0x97e   :  { %v5801_v19 = vadd.f32 %v5800_v25, %v5799_v15 }
 0x97f   :  { %v5069_v21 = vsub.f32 %v10109_v58, %v5038_v1  ;;  %v5070_v61 = vsub.f32 %v4894_v8, %v5038_v1  ;;  %v5621_v44 = vpop.permute.xlu0 %5620  ;;  %v5324_v43 = vadd.f32 1e-10, %v5292_v51  ;;  %v5298_v34 = vrot.slane %v5297_v18, 2 }
 0x980   :  { %v5750_v42 = vmul.f32 %v5621_v44, %v9121_v10  ;;  %v5921_v13 = vpack.c.bf16 %v5801_v19, %v5801_v19 }
 0x981   :  { %v5131_v16 = vmul.f32 1.442695, %v5069_v21  ;;  %v5133_v45 = vmul.f32 1.442695, %v5070_v61  ;;  %v5299_v58 = vadd.f32 %v5298_v34, %v5297_v18  ;;  %v5546_v62 = vand.u32 2147483648, %v5324_v43 }
 0x982   :  { %v5803_v33 = vsel %vm608_vm0, %v5750_v42, 0.0  ;;  %v5965_v48 = vunpack.c.l.b16 %v5921_v13  ;;  %v5544_v57 = vand.u32 2147483647, %v5324_v43  ;;  %vm5540_vm13 = vweird.f32 %v5324_v43  ;;  %v7066_v13 = vld [vmem:[%s9970_s2] sm:$0xff] }
 0x983   :  { %7359 = vpow2.f32 %v5131_v16  ;;  %v5804_v27 = vadd.f32 %v5803_v33, %v5802_v50  ;;  %v5300_v7 = vrot.slane %v5299_v58, 1  ;;  %v5547_v4 = vor.u32 1.1754944e-38, %v5546_v62 }
 0x984   :  { %7361 = vpow2.f32 %v5133_v45  ;;  %v5980_v40 = vsel %vm3035_vm6, %v5965_v48, %v5979_v60  ;;  %vm5545_vm8 = vcmp.eq.f32.partialorder %v5544_v57, 8.507059e+37 }
 0x985   :  { %v5805_v55 = vrot.slane %v5804_v27, 4  ;;  %7363 = vrcp.f32 %v5324_v43  ;;  %v5301_v30 = vadd.f32 %v5300_v7, %v5299_v58 }
 0x987   :  { %v5806_v8 = vadd.f32 %v5805_v55, %v5804_v27  ;;  %v5325_v32 = vadd.f32 1e-10, %v5301_v30 }
 0x989   :  { %v7360_v31 = vpop.eup %7359  ;;  %v5807_v10 = vrot.slane %v5806_v8, 2  ;;  %7365 = vrcp.f32 %v5325_v32  ;;  %v5562_v18 = vand.u32 2147483648, %v5325_v32  ;;  %v5560_v42 = vand.u32 2147483647, %v5325_v32 }
 0x98a   :  { %v7362_v5 = vpop.eup %7361  ;;  %v10154_v59 = vmul.f32 %v10102_v46, %v7360_v31  ;;  %vm5556_vm9 = vweird.f32 %v5325_v32 }
 0x98b   :  { %v7364_v2 = vpop.eup %7363  ;;  %v5808_v17 = vadd.f32 %v5807_v10, %v5806_v8  ;;  %v10157_v0 = vmul.f32 %v10112_v6, %v7362_v5  ;;  %v5563_v45 = vor.u32 1.1754944e-38, %v5562_v18  ;;  %v7067_v8 = vld [vmem:[%s9970_s2 + $0x8] sm:$0xff]  ;;  %s7484_s2 = smov 44  }
 0x98c   :  { %v5536_v9 = vmul.f32 %v7364_v2, %v5324_v43  ;;  %v5302_v52 = vsel %vm1948_vm4, %v10154_v59, 0.0  ;;  %vm5541_vm1 = vweird.f32 %v7364_v2  ;;  %6027 = vmatpush.bf16.msra.mxu3 %v7067_v8  ;;  %s6369_s4 = sld [smem:[%s10316_s0 + %s7484_s2]]  }
 0x98d   :  { %v5809_v22 = vrot.slane %v5808_v17, 1  ;;  %v5303_v46 = vsel %vm1948_vm4, %v10157_v0, 0.0  ;;  %vm5542_vm10 = vmor %vm5540_vm13, %vm5541_vm1  ;;  %vm5561_vm1 = vcmp.eq.f32.partialorder %v5560_v42, 8.507059e+37  ;;  %v10440_v42 = vld [vmem:[#allocation14_spill] sm:$0xff] }
 0x98e   :  { %v5537_v39 = vsub.f32 1.0, %v5536_v9  ;;  %v5304_v6 = vadd.f32 %v5303_v46, %v5302_v52  ;;  %v5631_v9 = vpop.permute.xlu1 %5630 }
 0x98f   :  { %v5810_v26 = vadd.f32 %v5809_v22, %v5808_v17  ;;  %v7366_v20 = vpop.eup %7365  ;;  %v5626_v17 = vpop.permute.xlu0 %5625 }
 0x990   :  { %v5538_v53 = vmul.f32 %v7364_v2, %v5537_v39  ;;  %v5305_v23 = vrot.slane %v5304_v6, 4  ;;  %v5552_v1 = vmul.f32 %v7366_v20, %v5325_v32  ;;  %vm5557_vm11 = vweird.f32 %v7366_v20  ;;  %6028 = vmatpush.bf16.msra.mxu3 %v7066_v13  ;;  %v5641_v39 = vpop.permute.xlu2 %5640 }
 0x991   :  { %v5922_v49 = vpack.c.bf16 %v5810_v26, %v5810_v26  ;;  %vm5558_vm12 = vmor %vm5556_vm9, %vm5557_vm11 }
 0x992   :  { %v5539_v41 = vadd.f32 %v7364_v2, %v5538_v53  ;;  %v5553_v61 = vsub.f32 1.0, %v5552_v1  ;;  %v5306_v44 = vadd.f32 %v5305_v23, %v5304_v6 }
 0x993   :  { %v5966_v56 = vunpack.c.l.b16 %v5922_v49 }
 0x994   :  { %v5543_v63 = vsel %vm5542_vm10, %v7364_v2, %v5539_v41  ;;  %v5554_v15 = vmul.f32 %v7366_v20, %v5553_v61  ;;  %v5307_v60 = vrot.slane %v5306_v44, 2  ;;  %v5752_v41 = vmul.f32 %v5631_v9, %v9133_v29  ;;  %v10437_v61 = vld [vmem:[#allocation9_spill] sm:$0xff] }
 0x995   :  { %v10165_v36 = vsel %vm3037_vm7, %v5966_v56, %v5980_v40  ;;  %v5548_v3 = vsel %vm5545_vm8, %v5547_v4, %v5543_v63  ;;  %v5754_v4 = vmul.f32 %v5641_v39, %v9145_v24  ;;  %v10449_v39 = vld [vmem:[#allocation11_spill] sm:$0xff] }
 0x996   :  { %v5550_v51 = vmul.f32 %v5548_v3, %v10123_v38  ;;  %v5549_v21 = vmul.f32 %v5548_v3, %v10120_v37  ;;  %v5555_v43 = vadd.f32 %v7366_v20, %v5554_v15  ;;  %v5308_v16 = vadd.f32 %v5307_v60, %v5306_v44  ;;  %v5636_v52 = vpop.permute.xlu1 %5635  ;;  %v10438_v44 = vld [vmem:[#allocation8_spill] sm:$0xff]  ;;  %v10439_v15 = vld [vmem:[#allocation15_spill] sm:$0xff] }
 0x997   :  { %v5651_v32 = vpop.permute.xlu0 %5650  ;;  %v5753_v40 = vmul.f32 %v5636_v52, %v9142_v28  ;;  %v5812_v63 = vsel %vm608_vm0, %v5752_v41, 0.0  ;;  %v10441_v28 = vld [vmem:[#allocation16_spill] sm:$0xff] }
 0x998   :  { %5720 = vperm.xlu1 %7147, %v5550_v51   ;;  %5715 = vperm.xlu0 %7146, %v5549_v21   ;;  %v5559_v34 = vsel %vm5558_vm12, %v7366_v20, %v5555_v43  ;;  %v5309_v38 = vrot.slane %v5308_v16, 1  ;;  %v5646_v26 = vpop.permute.xlu2 %5645  ;;  %v5751_v20 = vmul.f32 %v5626_v17, %v9130_v35  ;;  %v5821_v51 = vsel %vm608_vm0, %v5754_v4, 0.0 }
 0x999   :  { %v5564_v50 = vsel %vm5561_vm1, %v5563_v45, %v5559_v34  ;;  %v5756_v21 = vmul.f32 %v5651_v32, %v9157_v54  ;;  %v5820_v34 = vsel %vm608_vm0, %v5753_v40, 0.0 }
 0x99a   :  { %v5566_v37 = vmul.f32 %v5564_v50, %v10141_v12  ;;  %v5565_v33 = vmul.f32 %v5564_v50, %v10138_v14  ;;  %v5310_v27 = vadd.f32 %v5309_v38, %v5308_v16  ;;  %v5811_v1 = vsel %vm608_vm0, %v5751_v20, 0.0  ;;  %v10442_v16 = vld [vmem:[#allocation18_spill] sm:$0xff] }
 0x99b   :  { %v5813_v50 = vadd.f32 %v5812_v63, %v5811_v1  ;;  %v5822_v41 = vadd.f32 %v5821_v51, %v5820_v34 }
 0x99c   :  { %5730 = vperm.xlu2 %7148, %v5566_v37   ;;  %v5326_v25 = vadd.f32 1e-10, %v5310_v27  ;;  %v10444_v37 = vld [vmem:[#allocation19_spill] sm:$0xff]  ;;  %v10445_v27 = vld [vmem:[#allocation17_spill] sm:$0xff] }
 0x99d   :  { %v5814_v4 = vrot.slane %v5813_v50, 4 }
 0x99e   :  { %7367 = vrcp.f32 %v5326_v25  ;;  %v5578_v19 = vand.u32 2147483648, %v5326_v25  ;;  %v5576_v10 = vand.u32 2147483647, %v5326_v25  ;;  %vm5572_vm10 = vweird.f32 %v5326_v25 }
 0x99f   :  { %v10181_v22 = vpop.permute.xlu0 %5655 }
 0x9a0   :  { %5725 = vperm.xlu1 %7147, %v5565_v33   ;;  %v5579_v14 = vor.u32 1.1754944e-38, %v5578_v19  ;;  %vm5577_vm11 = vcmp.eq.f32.partialorder %v5576_v10, 8.507059e+37  ;;  %v5676_v46 = vpop.permute.xlu2 %5675 }
 0x9a1   :  { %v5761_v24 = vmul.f32 %v5676_v46, %v10439_v15 }
 0x9a4   :  { %v7368_v55 = vpop.eup %7367 }
 0x9a5   :  { %v5568_v58 = vmul.f32 %v7368_v55, %v5326_v25  ;;  %vm5573_vm13 = vweird.f32 %v7368_v55 }
 0x9a6   :  { %vm5574_vm8 = vmor %vm5572_vm10, %vm5573_vm13 }
 0x9a7   :  { %v5569_v7 = vsub.f32 1.0, %v5568_v58  ;;  %v10446_v58 = vld [vmem:[#allocation10_spill] sm:$0xff] }
 0x9a8   :  { %5660 = vperm.xlu1 %7147, %v9976_v11  }
 0x9a9   :  { %v5570_v31 = vmul.f32 %v7368_v55, %v5569_v7  ;;  %v10447_v7 = vld [vmem:[#allocation21_spill] sm:$0xff] }
 0x9ab   :  { %v5571_v12 = vadd.f32 %v7368_v55, %v5570_v31  ;;  %v5830_v31 = vsel %vm608_vm0, %v5756_v21, 0.0 }
 0x9ad   :  { %v5575_v30 = vsel %vm5574_vm8, %v7368_v55, %v5571_v12 }
 0x9ae   :  { %v5580_v5 = vsel %vm5577_vm11, %v5579_v14, %v5575_v30  ;;  %v10448_v14 = vld [vmem:[#allocation20_spill] sm:$0xff] }
 0x9af   :  { %v5582_v2 = vmul.f32 %v5580_v5, %v10157_v0  ;;  %v5581_v11 = vmul.f32 %v5580_v5, %v10154_v59  ;;  %v5666_v0 = vpop.permute.xlu0 %5665  ;;  %v5671_v59 = vpop.permute.xlu1 %5670  ;;  %v5856_v5 = vsel %vm608_vm0, %v5761_v24, 0.0  ;;  %v5815_v24 = vadd.f32 %v5814_v4, %v5813_v50  ;;  %v10454_v4 = vld [vmem:[#allocation24_spill] sm:$0xff] }
 0x9b0   :  { %v5760_v60 = vmul.f32 %v5671_v59, %v10440_v42  ;;  %v5759_v43 = vmul.f32 %v5666_v0, %v10441_v28  ;;  %v10450_v0 = vld [vmem:[#allocation22_spill] sm:$0xff]  ;;  %v10452_v28 = vld [vmem:[#allocation7_spill] sm:$0xff] }
 0x9b1   :  { %5740 = vperm.xlu0 %7146, %v5582_v2   ;;  %5735 = vperm.xlu2 %7148, %v5581_v11  }
 0x9b2   :  { %v5848_v2 = vsel %vm608_vm0, %v5760_v60, 0.0  ;;  %v5847_v11 = vsel %vm608_vm0, %v5759_v43, 0.0 }
 0x9b5   :  { %v5701_v57 = vpop.permute.xlu2 %5700 }
 0x9b6   :  { %v5766_v25 = vmul.f32 %v5701_v57, %v10445_v27 }
 0x9b7   :  { %v5681_v62 = vpop.permute.xlu0 %5680 }
 0x9b8   :  { %v5762_v3 = vmul.f32 %v5681_v62, %v9197_v47  ;;  %v10443_v47 = vld [vmem:[#allocation6_spill] sm:$0xff]  ;;  %v5875_v59 = vsel %vm608_vm0, %v5766_v25, 0.0  ;;  %v5816_v25 = vrot.slane %v5815_v24, 2 }
 0x9b9   :  { %v5755_v38 = vmul.f32 %v5646_v26, %v10443_v47 }
 0x9ba   :  { %v5857_v33 = vsel %vm608_vm0, %v5762_v3, 0.0 }
 0x9bb   :  { %v5858_v13 = vadd.f32 %v5857_v33, %v5856_v5  ;;  %v5829_v20 = vsel %vm608_vm0, %v5755_v38, 0.0 }
 0x9bc   :  { %v5831_v1 = vadd.f32 %v5830_v31, %v5829_v20  ;;  %v7073_v31 = vld [vmem:[%s10226_s10 + $0x18] sm:$0xff] }
 0x9bd   :  { %v5691_v48 = vpop.permute.xlu1 %5690  ;;  %6081 = vmatpush.bf16.msrb.mxu0 %v7073_v31 }
 0x9be   :  { %v5764_v29 = vmul.f32 %v5691_v48, %v10437_v61  ;;  %v10451_v61 = vld [vmem:[#allocation13_spill] sm:$0xff] }
 0x9bf   :  { %v5686_v53 = vpop.permute.xlu0 %5685  ;;  %v5757_v51 = vmul.f32 %v10181_v22, %v10451_v61 }
 0x9c0   :  { %v5763_v35 = vmul.f32 %v5686_v53, %v10438_v44  ;;  %v5866_v10 = vsel %vm608_vm0, %v5764_v29, 0.0  ;;  %v5849_v53 = vadd.f32 %v5848_v2, %v5847_v11  ;;  %v5817_v2 = vadd.f32 %v5816_v25, %v5815_v24 }
 0x9c1   :  { %v5838_v47 = vsel %vm608_vm0, %v5757_v51, 0.0 }
 0x9c2   :  { %v5865_v12 = vsel %vm608_vm0, %v5763_v35, 0.0  ;;  %v5850_v29 = vrot.slane %v5849_v53, 4  ;;  %v5823_v35 = vrot.slane %v5822_v41, 4 }
 0x9c3   :  { %v5867_v62 = vadd.f32 %v5866_v10, %v5865_v12 }
 0x9c4   :  { %v5851_v38 = vadd.f32 %v5850_v29, %v5849_v53  ;;  %v5824_v27 = vadd.f32 %v5823_v35, %v5822_v41  ;;  %v5818_v53 = vrot.slane %v5817_v2, 1 }
 0x9c5   :  { %v5706_v56 = vpop.permute.xlu2 %5705  ;;  %v5868_v3 = vrot.slane %v5867_v62, 4 }
 0x9c6   :  { %v5767_v30 = vmul.f32 %v5706_v56, %v10448_v14  ;;  %v5852_v10 = vrot.slane %v5851_v38, 2  ;;  %v5825_v5 = vrot.slane %v5824_v27, 2 }
 0x9c8   :  { %v5883_v57 = vsel %vm608_vm0, %v5767_v30, 0.0 }
 0x9cd   :  { %v5696_v49 = vpop.permute.xlu1 %5695 }
 0x9ce   :  { %v5765_v45 = vmul.f32 %v5696_v49, %v10442_v16  ;;  %v5832_v16 = vrot.slane %v5831_v1, 4 }
 0x9d0   :  { %v5874_v17 = vsel %vm608_vm0, %v5765_v45, 0.0  ;;  %v5869_v45 = vadd.f32 %v5868_v3, %v5867_v62  ;;  %v10453_v62 = vld [vmem:[#allocation23_spill] sm:$0xff] }
 0x9d1   :  { %v5876_v49 = vadd.f32 %v5875_v59, %v5874_v17 }
 0x9d3   :  { %v5877_v44 = vrot.slane %v5876_v49, 4 }
 0x9dd   :  { %v5711_v6 = vpop.permute.xlu0 %5710 }
 0x9de   :  { %v5768_v54 = vmul.f32 %v5711_v6, %v10444_v37  ;;  %v5878_v37 = vadd.f32 %v5877_v44, %v5876_v49 }
 0x9e0   :  { %v5884_v9 = vsel %vm608_vm0, %v5768_v54, 0.0  ;;  %v5879_v12 = vrot.slane %v5878_v37, 2 }
 0x9e1   :  { %v5885_v56 = vadd.f32 %v5884_v9, %v5883_v57 }
 0x9f6   :  { %v5731_v55 = vpop.permute.xlu2 %5730 }
 0x9f7   :  { %v5772_v52 = vmul.f32 %v5731_v55, %v10449_v39 }
 0x9f9   :  { %v5902_v40 = vsel %vm608_vm0, %v5772_v52, 0.0  ;;  %v5853_v52 = vadd.f32 %v5852_v10, %v5851_v38 }
 0xa0a   :  { %v5721_v23 = vpop.permute.xlu1 %5720  ;;  %v5716_v18 = vpop.permute.xlu0 %5715 }
 0xa0b   :  { %v5770_v8 = vmul.f32 %v5721_v23, %v10446_v58  ;;  %v5769_v19 = vmul.f32 %v5716_v18, %v10447_v7  ;;  %v5859_v23 = vrot.slane %v5858_v13, 4  ;;  %v5886_v18 = vrot.slane %v5885_v56, 4 }
 0xa0c   :  { %v5833_v58 = vadd.f32 %v5832_v16, %v5831_v1 }
 0xa0d   :  { %v5893_v46 = vsel %vm608_vm0, %v5770_v8, 0.0  ;;  %v5892_v48 = vsel %vm608_vm0, %v5769_v19, 0.0  ;;  %v5860_v42 = vadd.f32 %v5859_v23, %v5858_v13  ;;  %v5887_v54 = vadd.f32 %v5886_v18, %v5885_v56 }
 0xa0e   :  { %v5894_v63 = vadd.f32 %v5893_v46, %v5892_v48  ;;  %v5870_v8 = vrot.slane %v5869_v45, 2  ;;  %v5834_v13 = vrot.slane %v5833_v58, 2  ;;  %v5826_v48 = vadd.f32 %v5825_v5, %v5824_v27 }
 0xa0f   :  { %v5861_v55 = vrot.slane %v5860_v42, 2  ;;  %v5888_v14 = vrot.slane %v5887_v54, 2  ;;  %v5819_v18 = vadd.f32 %v5818_v53, %v5817_v2 }
 0xa10   :  { %v5895_v60 = vrot.slane %v5894_v63, 4  ;;  %v5871_v9 = vadd.f32 %v5870_v8, %v5869_v45  ;;  %v5835_v41 = vadd.f32 %v5834_v13, %v5833_v58  ;;  %v5827_v51 = vrot.slane %v5826_v48, 1 }
 0xa11   :  { %v5862_v11 = vadd.f32 %v5861_v55, %v5860_v42  ;;  %v5889_v59 = vadd.f32 %v5888_v14, %v5887_v54 }
 0xa12   :  { %v5726_v32 = vpop.permute.xlu1 %5725  ;;  %v5896_v50 = vadd.f32 %v5895_v60, %v5894_v63  ;;  %v5872_v20 = vrot.slane %v5871_v9, 1 }
 0xa13   :  { %v5771_v26 = vmul.f32 %v5726_v32, %v10450_v0  ;;  %v5736_v32 = vpop.permute.xlu2 %5735  ;;  %v5880_v0 = vadd.f32 %v5879_v12, %v5878_v37  ;;  %v5863_v57 = vrot.slane %v5862_v11, 1  ;;  %v5890_v3 = vrot.slane %v5889_v59, 1 }
 0xa14   :  { %v5897_v17 = vrot.slane %v5896_v50, 2  ;;  %v5773_v46 = vmul.f32 %v5736_v32, %v10453_v62  ;;  %v5873_v24 = vadd.f32 %v5872_v20, %v5871_v9 }
 0xa15   :  { %v5901_v6 = vsel %vm608_vm0, %v5771_v26, 0.0  ;;  %v5881_v63 = vrot.slane %v5880_v0, 1  ;;  %v5864_v29 = vadd.f32 %v5863_v57, %v5862_v11  ;;  %v5891_v45 = vadd.f32 %v5890_v3, %v5889_v59  ;;  %v7070_v3 = vld [vmem:[%s10226_s10] sm:$0xff] }
 0xa16   :  { %v5903_v21 = vadd.f32 %v5902_v40, %v5901_v6  ;;  %v5898_v49 = vadd.f32 %v5897_v17, %v5896_v50  ;;  %v5854_v40 = vrot.slane %v5853_v52, 1 }
 0xa17   :  { %v5931_v8 = vpack.c.bf16 %v5891_v45, %v5891_v45  ;;  %v7076_v45 = vld [vmem:[%s10264_s17 + $0x10] sm:$0xff] }
 0xa18   :  { %v5904_v34 = vrot.slane %v5903_v21, 4  ;;  %v5899_v44 = vrot.slane %v5898_v49, 1  ;;  %v5855_v60 = vadd.f32 %v5854_v40, %v5853_v52 }
 0xa19   :  { %v5975_v13 = vunpack.c.l.b16 %v5931_v8 }
 0xa1a   :  { %v5661_v15 = vpop.permute.xlu1 %5660  ;;  %v5905_v7 = vadd.f32 %v5904_v34, %v5903_v21  ;;  %v5910_v21 = vsel %vm608_vm0, %v5773_v46, 0.0  ;;  %v5828_v34 = vadd.f32 %v5827_v51, %v5826_v48  ;;  %v5900_v38 = vadd.f32 %v5899_v44, %v5898_v49 }
 0xa1b   :  { %v5758_v43 = vmul.f32 %v5661_v15, %v10452_v28  ;;  %v5836_v15 = vrot.slane %v5835_v41, 1  ;;  %v5882_v28 = vadd.f32 %v5881_v63, %v5880_v0  ;;  %v5927_v25 = vpack.c.bf16 %v5855_v60, %v5855_v60  ;;  %v7072_v63 = vld [vmem:[%s10226_s10 + $0x10] sm:$0xff]  ;;  %v7079_v60 = vld [vmem:[%s10264_s17 + $0x28] sm:$0xff] }
 0xa1c   :  { %v5906_v39 = vrot.slane %v5905_v7, 2  ;;  %v5932_v31 = vpack.c.bf16 %v5900_v38, %v5900_v38  ;;  %6082 = vmatpush.bf16.msrb.mxu0 %v7072_v63 }
 0xa1d   :  { %v5839_v22 = vsel %vm608_vm0, %v5758_v43, 0.0  ;;  %v5837_v54 = vadd.f32 %v5836_v15, %v5835_v41  ;;  %v5930_v55 = vpack.c.bf16 %v5882_v28, %v5882_v28  ;;  %v5971_v2 = vunpack.c.l.b16 %v5927_v25  ;;  %v7078_v28 = vld [vmem:[%s10264_s17 + $0x20] sm:$0xff] }
 0xa1e   :  { %v5840_v33 = vadd.f32 %v5839_v22, %v5838_v47  ;;  %v5907_v56 = vadd.f32 %v5906_v39, %v5905_v7  ;;  %v5928_v47 = vpack.c.bf16 %v5864_v29, %v5864_v29  ;;  %v5923_v22 = vpack.c.bf16 %v5819_v18, %v5819_v18  ;;  %v7074_v25 = vld [vmem:[%s10264_s17] sm:$0xff] }
 0xa1f   :  { %v5924_v7 = vpack.c.bf16 %v5828_v34, %v5828_v34  ;;  %v5925_v14 = vpack.c.bf16 %v5837_v54, %v5837_v54  ;;  %v5974_v11 = vunpack.c.l.b16 %v5930_v55  ;;  %v5976_v39 = vunpack.c.l.b16 %v5932_v31  ;;  %v7171_v34 = vld [vmem:[%s10254_s13] ss:$0 sm:$0xff]  ;;  %v7085_v55 = vld [vmem:[%s6367_s27 + $0x18] sm:$0xff]  ;;  %s7487_s13 = smov 47  }
 0xa20   :  { %v5841_v19 = vrot.slane %v5840_v33, 4  ;;  %v5908_v42 = vrot.slane %v5907_v56, 1  ;;  %v5967_v12 = vunpack.c.l.b16 %v5923_v22  ;;  %s6372_s16 = sld [smem:[%s10316_s0 + %s7487_s13]]  }
 0xa21   :  { %v5968_v46 = vunpack.c.l.b16 %v5924_v7  ;;  %v10456_v7 = vld [vmem:[#allocation5_spill] sm:$0xff] }
 0xa22   :  { %v5842_v30 = vadd.f32 %v5841_v19, %v5840_v33  ;;  %v5929_v33 = vpack.c.bf16 %v5873_v24, %v5873_v24  ;;  %v5909_v27 = vadd.f32 %v5908_v42, %v5907_v56  ;;  %v5972_v19 = vunpack.c.l.b16 %v5928_v47  ;;  %v7081_v24 = vld [vmem:[%s10264_s17 + $0x38] sm:$0xff]  ;;  %v7080_v42 = vld [vmem:[%s10264_s17 + $0x30] sm:$0xff]  ;;  %v7075_v47 = vld [vmem:[%s10264_s17 + $0x8] sm:$0xff] }
 0xa23   :  { %v5741_v6 = vpop.permute.xlu0 %5740  ;;  %v5982_v0 = vsel %vm3039_vm15, %v5967_v12, %v10165_v36  ;;  %6172 = vmatpush.bf16.msrb.mxu3 %v7081_v24 }
 0xa24   :  { %v5843_v26 = vrot.slane %v5842_v30, 2  ;;  %v5774_v23 = vmul.f32 %v5741_v6, %v10454_v4  ;;  %v5933_v5 = vpack.c.bf16 %v5909_v27, %v5909_v27  ;;  %v5986_v9 = vsel %vm3033_vm14, %v5972_v19, %v5971_v2 }
 0xa25   :  { %v5983_v6 = vsel %vm3041_vm2, %v5968_v46, %v5982_v0 }
 0xa26   :  { %v5844_v1 = vadd.f32 %v5843_v26, %v5842_v30  ;;  %v5911_v61 = vsel %vm608_vm0, %v5774_v23, 0.0  ;;  %v5973_v30 = vunpack.c.l.b16 %v5929_v33  ;;  %v5969_v26 = vunpack.c.l.b16 %v5925_v14 }
 0xa27   :  { %v5912_v35 = vadd.f32 %v5911_v61, %v5910_v21  ;;  %v5977_v62 = vunpack.c.l.b16 %v5933_v5  ;;  %v7170_v61 = vld [vmem:[%s10178_s5] ss:$0 sm:$0xff]  ;;  %6173 = vmatpush.bf16.msrb.mxu3 %v7080_v42  ;;  %s7485_s5 = smov 45   ;;  %v106_v63 = vstv %s6372_s16 }
 0xa28   :  { %v5845_v43 = vrot.slane %v5844_v1, 1  ;;  %v5987_v59 = vsel %vm3035_vm6, %v5973_v30, %v5986_v9  ;;  %v5984_v36 = vsel %vm3043_vm3, %v5969_v26, %v5983_v6  ;;  %v7089_v9 = vld [vmem:[%s6369_s4 + $0x18] sm:$0xff]  ;;  %s6370_s9 = sld [smem:[%s10316_s0 + %s7485_s5]]   ;;  %107 = vst [vmem:[#allocation4] sm:$0x1] %v106_v63 }
 0xa29   :  { %v5913_v16 = vrot.slane %v5912_v35, 4  ;;  %v5988_v48 = vsel %vm3037_vm7, %v5974_v11, %v5987_v59 }
 0xa2a   :  { %v5846_v50 = vadd.f32 %v5845_v43, %v5844_v1  ;;  %v5989_v49 = vsel %vm3039_vm15, %v5975_v13, %v5988_v48  ;;  %v7071_v1 = vld [vmem:[%s10226_s10 + $0x8] sm:$0xff]  ;;  %v7077_v43 = vld [vmem:[%s10264_s17 + $0x18] sm:$0xff]  ;;  %v7082_v13 = vld [vmem:[%s6367_s27] sm:$0xff]  ;;  %s7486_s10 = smov 46   ;;  %s7488_s17 = smov 48  }
 0xa2b   :  { %v5914_v37 = vadd.f32 %v5913_v16, %v5912_v35  ;;  %v5990_v41 = vsel %vm3041_vm2, %v5976_v39, %v5989_v49  ;;  %6083 = vmatpush.bf16.msrb.mxu0 %v7071_v1  ;;  %6174 = vmatpush.bf16.msrb.mxu3 %v7079_v60  ;;  %s6371_s12 = sld [smem:[%s10316_s0 + %s7486_s10]]   ;;  %v7086_v49 = vld [vmem:[%s6369_s4] sm:$0xff] }
 0xa2c   :  { %v5926_v17 = vpack.c.bf16 %v5846_v50, %v5846_v50  ;;  %v5991_v56 = vsel %vm3043_vm3, %v5977_v62, %v5990_v41  ;;  %v7164_v50 = vld [vmem:[%s9000_s28] ss:$0 sm:$0xff]  ;;  %s10291_s28 = sld [smem:[%s10316_s0 + %s7483_s29]]  }
 0xa2d   :  { %v5915_v58 = vrot.slane %v5914_v37, 2  ;;  %v3150_v19 = vadd.f32 %v7164_v50, %v10456_v7  ;;  %s6373_s20 = sld [smem:[%s10316_s0 + %s7488_s17]]  }
 0xa2e   :  { %v5970_v53 = vunpack.c.l.b16 %v5926_v17  ;;  %v7084_v17 = vld [vmem:[%s6367_s27 + $0x10] sm:$0xff]  ;;  %v7174_v1 = vld [vmem:[%s6370_s9] ss:$0 sm:$0xff] }
 0xa2f   :  { %v5916_v10 = vadd.f32 %v5915_v58, %v5914_v37  ;;  %6084 = vmatpush.bf16.msrb.mxu0 %v7070_v3  ;;  %6175 = vmatpush.bf16.msrb.mxu3 %v7078_v28  ;;  %v10455_v58 = vld [vmem:[#allocation12_spill] sm:$0xff]  ;;  %v3153_v12 = vmax.f32 %v3150_v19, 0.0 }
 0xa30   :  { %v5985_v4 = vsel %vm3045_vm5, %v5970_v53, %v5984_v36  ;;  %v3148_v8 = vadd.f32 %v7164_v50, %v10455_v58  ;;  %v7088_v53 = vld [vmem:[%s6369_s4 + $0x10] sm:$0xff]  ;;  %v7176_v60 = vld [vmem:[#allocation4] ss:$0 sm:$0xff] }
 0xa31   :  { %v5917_v32 = vrot.slane %v5916_v10, 1 }
 0xa32   :  { %v7173_v41 = vld [vmem:[%s10291_s28] ss:$0 sm:$0xff] }
 0xa33   :  { %v5918_v52 = vadd.f32 %v5917_v32, %v5916_v10  ;;  %6176 = vmatpush.bf16.msrb.mxu3 %v7077_v43  ;;  %6232 = vmatpush.bf16.msra.mxu0 %v7085_v55  ;;  %v3152_v10 = vmax.f32 %v3148_v8, 0.0  ;;  %v7083_v32 = vld [vmem:[%s6367_s27 + $0x8] sm:$0xff] }
 0xa35   :  { %v5934_v57 = vpack.c.bf16 %v5918_v52, %v5918_v52  ;;  %v7172_v52 = vld [vmem:[%s10277_s22] ss:$0 sm:$0xff] }
 0xa37   :  { %v5978_v20 = vunpack.c.l.b16 %v5934_v57  ;;  %6177 = vmatpush.bf16.msrb.mxu3 %v7076_v45  ;;  %6233 = vmatpush.bf16.msra.mxu0 %v7084_v17  ;;  %v7087_v57 = vld [vmem:[%s6369_s4 + $0x8] sm:$0xff] }
 0xa39   :  { %v5992_v23 = vsel %vm3045_vm5, %v5978_v20, %v5991_v56 }
 0xa3a   :  { %v5993_v40 = vpack.c.b16 %v5992_v23, %v5985_v4 }
 0xa3b   :  { %6178 = vmatpush.bf16.msrb.mxu3 %v7075_v47  ;;  %6234 = vmatpush.bf16.msra.mxu0 %v7083_v32 }
 0xa3c   :  { %6890 = vmatmul.msk.bf16.vlgmr.msra.gmra.mxu3 %vm608_vm0, %v5993_v40 }
 0xa3f   :  { %6179 = vmatpush.bf16.msrb.mxu3 %v7074_v25  ;;  %6235 = vmatpush.bf16.msra.mxu0 %v7082_v13 }
 0xabf   :  { %v6030_v21 = vpop.f32.mrf.mxu3 }
 0xac0   :  { %v6031_v51 = vadd.f32 %v7170_v61, %v6030_v21 }
 0xac2   :  { %v6035_v35 = vmax.f32 %v6031_v51, 0.0 }
 0xac7   :  { %v6032_v29 = vpop.f32.mrf.mxu3 }
 0xac8   :  { %v6033_v44 = vadd.f32 %v7170_v61, %v6032_v29  ;;  %v7175_v61 = vld [vmem:[%s6371_s12] ss:$0 sm:$0xff] }
 0xaca   :  { %v6036_v18 = vmax.f32 %v6033_v44, 0.0 }
 0xacc   :  { %v6037_v15 = vpack.c.bf16 %v6036_v18, %v6035_v35 }
 0xace   :  { %6907 = vmatmul.msk.bf16.vlgmr.msrb.gmra.mxu0 %vm608_vm0, %v6037_v15 }
 0xacf   :  { %6288 = vmatpush.bf16.msrb.mxu0 %v7089_v9 }
 0xad3   :  { %6289 = vmatpush.bf16.msrb.mxu0 %v7088_v53 }
 0xad7   :  { %6290 = vmatpush.bf16.msrb.mxu0 %v7087_v57 }
 0xadb   :  { %6291 = vmatpush.bf16.msrb.mxu0 %v7086_v49 }
 0xb4b   :  { %v6086_v16 = vpop.f32.mrf.mxu0 }
 0xb4c   :  { %v6087_v38 = vadd.f32 %v7171_v34, %v6086_v16 }
 0xb4e   :  { %v6091_v54 = vmax.f32 %v6087_v38, 0.0 }
 0xb53   :  { %v6088_v37 = vpop.f32.mrf.mxu0 }
 0xb54   :  { %v6089_v22 = vadd.f32 %v7171_v34, %v6088_v37 }
 0xb56   :  { %v6092_v33 = vmax.f32 %v6089_v22, 0.0 }
 0xb58   :  { %v7149_v27 = vpack.i.bf16 %v6092_v33, %v6091_v54 }
 0xb5a   :  { %7150 = vrot.lane.b32.xlu1 %v7149_v27, %s7481_s23 }
 0xbcc   :  { %v7151_v31 = vpop.permute.xlu1 %7150 }
 0xbcd   :  { %v7153_v14 = vunpack.i.h.bf16 %v7151_v31  ;;  %v7152_v30 = vunpack.i.l.bf16 %v7151_v31 }
 0xbcf   :  { %v6102_v5 = vsel %vm608_vm0, %v3153_v12, %v7153_v14  ;;  %v6101_v2 = vsel %vm608_vm0, %v3152_v10, %v7152_v30 }
 0xbd0   :  { %v6103_v11 = vpack.c.bf16 %v6102_v5, %v6101_v2 }
 0xbd2   :  { %6180 = vmatmul.bf16.vlgmr.msrb.gmra.mxu3 %v6103_v11 }
 0xc55   :  { %v6181_v39 = vpop.f32.mrf.mxu3 }
 0xc56   :  { %v6182_v0 = vadd.f32 %v7172_v52, %v6181_v39 }
 0xc58   :  { %v6186_v62 = vmax.f32 %v6182_v0, 0.0 }
 0xc5d   :  { %v6183_v26 = vpop.f32.mrf.mxu3 }
 0xc5e   :  { %v6184_v59 = vadd.f32 %v7172_v52, %v6183_v26 }
 0xc60   :  { %v6187_v46 = vmax.f32 %v6184_v59, 0.0 }
 0xc62   :  { %v6188_v48 = vpack.c.bf16 %v6187_v46, %v6186_v62 }
 0xc64   :  { %6956 = vmatmul.msk.bf16.vlgmr.msra.gmra.mxu0 %vm608_vm0, %v6188_v48 }
 0xce1   :  { %v6237_v6 = vpop.f32.mrf.mxu0 }
 0xce2   :  { %v6238_v20 = vadd.f32 %v7173_v41, %v6237_v6 }
 0xce4   :  { %v6242_v4 = vmax.f32 %v6238_v20, 0.0 }
 0xce9   :  { %v6239_v36 = vpop.f32.mrf.mxu0 }
 0xcea   :  { %v6240_v56 = vadd.f32 %v7173_v41, %v6239_v36 }
 0xcec   :  { %v6243_v23 = vmax.f32 %v6240_v56, 0.0 }
 0xcee   :  { %v6244_v40 = vpack.c.bf16 %v6243_v23, %v6242_v4 }
 0xcf0   :  { %6973 = vmatmul.msk.bf16.vlgmr.msrb.gmra.mxu0 %vm608_vm0, %v6244_v40 }
 0xd6d   :  { %v6293_v3 = vpop.f32.mrf.mxu0 }
 0xd6e   :  { %v6294_v21 = vadd.f32 %v7174_v1, %v6293_v3 }
 0xd70   :  { %v6298_v51 = vmax.f32 %v6294_v21, 0.0 }
 0xd72   :  { %v6304_v29 = vmul.f32 %v7175_v61, %v6298_v51 }
 0xd74   :  { %v6306_v44 = vsel %vm608_vm0, %v6304_v29, 0.0 }
 0xd75   :  { %v6295_v35 = vpop.f32.mrf.mxu0  ;;  %6307 = vadd.xlane.f32.xlu2 %v6306_v44 }
 0xd76   :  { %v6296_v18 = vadd.f32 %v7174_v1, %v6295_v35 }
 0xd78   :  { %v6299_v15 = vmax.f32 %v6296_v18, 0.0 }
 0xd7a   :  { %v6305_v24 = vmul.f32 %v7175_v61, %v6299_v15 }
 0xd7c   :  { %v6309_v42 = vsel %vm608_vm0, %v6305_v24, 0.0 }
 0xd7d   :  { %6310 = vadd.xlane.f32.xlu0 %v6309_v42 }
 0xde8   :  { %v6308_v28 = vpop.xlane.xlu2 %6307 }
 0xde9   :  { %v6316_v43 = vadd.f32 %v7176_v60, %v6308_v28 }
 0xdeb   :  { %v6318_v16 = vmax.f32 %v6316_v43, 0.0 }
 0xded   :  { %6320 = vst.msk [vmem:[%s6373_s20] sm:$0xff] %vm1948_vm4, %v6318_v16 }
 0xdf0   :  { %v6311_v45 = vpop.xlane.xlu0 %6310 }
 0xdf1   :  { %v6317_v34 = vadd.f32 %v7176_v60, %v6311_v45 }
 0xdf3   :  { %v6319_v47 = vmax.f32 %v6317_v34, 0.0 }
 0xdf5   :  { %6321 = vst.msk [vmem:[%s6373_s20 + $0x8] sm:$0xff] %vm1948_vm4, %v6319_v47 }

</bundles_post_ra>
